<compile_context>
chip_gen: v5e
topology: v5e:2x2
jax: 0.10.0
libtpu: 0.0.40
codegen_flags: <defaults>
</compile_context>

<pallas_src>
import functools

import numpy as np
import jax
import jax.numpy as jnp
from jax.experimental import pallas as pl
from jax.experimental.pallas import tpu as pltpu

DIM = 32                 # dim_primary == dim_secondary
NUM_HEADS = 4
HEAD_DIM = DIM // NUM_HEADS
MLP_HIDDEN = 4 * DIM
DEPTH = 4
NUM_CLASSES = 10
LANE_PAD = 128           # lane-dense output width (sliced back in wrapper)
EPS = 1e-6               # matches partial(nn.LayerNorm, eps=1e-06)
SCALE = HEAD_DIM ** -0.5
NEG_INF = -1e30

_ATTN_KEYS = ("ln_g", "ln_b", "ln_o_g", "ln_o_b", "wqkv", "bqkv", "wo", "bo")
_MLP_KEYS = ("ln_g", "ln_b", "w1", "b1", "w2", "b2")


# ---------------------------------------------------------------------------
# fused kernel: one grid step == BT batch elements, whole model in VMEM
# ---------------------------------------------------------------------------
def _fused_kernel(bt, n_p, n_s, *refs):
    (xp_ref, xs_ref,
     pa_lg, pa_lb, pa_olg, pa_olb,
     sa_lg, sa_lb, sa_olg, sa_olb,
     wqkv, bqkv, wo_p, bo_p, wo_s, bo_s,
     pm_lg, pm_lb, pm_w1, pm_b1, pm_w2, pm_b2,
     sm_lg, sm_lb, sm_w1, sm_b1, sm_w2, sm_b2,
     h_lg, h_lb, h_w, h_b,
     hmask_p_ref, hmask_s_ref, bmask_p_ref, bmask_s_ref,
     yp_ref, ys_ref) = refs

    npt = bt * n_p                 # primary tokens per step (batch folded)
    nst = bt * n_s                 # secondary tokens per step
    nk = npt + nst                 # attention context length (self || cross)
    f32, bf16 = jnp.float32, jnp.bfloat16

    def norm_core(x):              # LayerNorm without affine (f32)
        mu = jnp.mean(x, axis=-1, keepdims=True)
        var = jnp.mean((x - mu) ** 2, axis=-1, keepdims=True)
        return (x - mu) * jax.lax.rsqrt(var + EPS)

    def mha(q, k, v, hmask, bmask, nq, wo, bo, resid):
        """Head-batched MHA: scores laid out (H*nq, nk); one Wo matmul."""
        # block-diagonal Q: row h*nq + i keeps only head-h feature lanes
        qbd = jnp.concatenate([q] * NUM_HEADS, axis=0) * hmask     # (H*nq, D)
        s = jax.lax.dot_general(qbd.astype(bf16), k.astype(bf16),
                                (((1,), (1,)), ((), ())),
                                preferred_element_type=f32)        # (H*nq, nk)
        s = s + bmask                                              # block-diag batch mask
        m = jnp.max(s, axis=-1, keepdims=True)
        e = jnp.exp(s - m)
        inv = pl.reciprocal(jnp.sum(e, axis=-1, keepdims=True), approx=True)
        p = (e * inv).astype(bf16)
        o = jnp.dot(p, v.astype(bf16), preferred_element_type=f32)  # (H*nq, D)
        o = o * hmask                                # keep head-h lanes per row group
        oc = o[0:nq]                                 # fold head groups -> (nq, D) concat
        for h in range(1, NUM_HEADS):
            oc = oc + o[h * nq:(h + 1) * nq]
        proj = jnp.dot(oc.astype(bf16), wo, preferred_element_type=f32)
        return resid + proj + bo

    def mlp(x, g, b, w1, b1, w2, b2):
        h = (norm_core(x) * g + b).astype(bf16)
        h = jnp.dot(h, w1, preferred_element_type=f32) + b1
        # TODO(synk): tanh-approx GELU; PyTorch nn.GELU defaults to exact erf.
        h = jax.nn.gelu(h)
        h = jnp.dot(h.astype(bf16), w2, preferred_element_type=f32) + b2
        return x + h

    # hoist the static masks out of the depth loop (loaded once)
    hmask_p = hmask_p_ref[...]
    hmask_s = hmask_s_ref[...]
    bmask_p = bmask_p_ref[...]
    bmask_s = bmask_s_ref[...]

    xp = xp_ref[...].reshape(npt, DIM)               # (BT*Np, D) f32
    xs = xs_ref[...].reshape(nst, DIM)               # (BT*Ns, D) f32

    for d in range(DEPTH):                           # static unrolled layers
        # conjoined 'o<->o': both updates read the same pre-layer states.
        # LayerNorm stats are computed once per stream and re-used for the
        # query-side and cross-side affine params.
        xp_hat = norm_core(xp)
        xs_hat = norm_core(xs)
        stacked = jnp.concatenate(
            [xp_hat * pa_lg[d] + pa_lb[d],           # A: primary   q / self-kv
             xs_hat * pa_olg[d] + pa_olb[d],         # B: primary   cross-kv
             xs_hat * sa_lg[d] + sa_lb[d],           # C: secondary q / self-kv
             xp_hat * sa_olg[d] + sa_olb[d]],        # D: secondary cross-kv
            axis=0).astype(bf16)                     # (2*nk, D)
        # ONE fused QKV matmul for both streams & both kv sources per layer
        qkv = jnp.dot(stacked, wqkv[d], preferred_element_type=f32) + bqkv[d]

        new_p = mha(qkv[:npt, 0:DIM],                # Q  (scale folded in weights)
                    qkv[:nk, DIM:2 * DIM],           # K  (self || cross), contiguous
                    qkv[:nk, 2 * DIM:3 * DIM],       # V
                    hmask_p, bmask_p, npt, wo_p[d], bo_p[d], xp)
        new_s = mha(qkv[nk:nk + nst, 3 * DIM:4 * DIM],
                    qkv[nk:, 4 * DIM:5 * DIM],
                    qkv[nk:, 5 * DIM:6 * DIM],
                    hmask_s, bmask_s, nst, wo_s[d], bo_s[d], xs)

        xp = mlp(new_p, pm_lg[d], pm_lb[d], pm_w1[d], pm_b1[d],
                 pm_w2[d], pm_b2[d])
        xs = mlp(new_s, sm_lg[d], sm_lb[d], sm_w1[d], sm_b1[d],
                 sm_w2[d], sm_b2[d])

    # primary output head (lane-dense); secondary output = Identity (padded)
    hp = (norm_core(xp) * h_lg[...] + h_lb[...]).astype(bf16)
    yp = jnp.dot(hp, h_w[...], preferred_element_type=f32) + h_b[...]
    yp_ref[...] = yp.reshape(bt, n_p, LANE_PAD)
    ys = jnp.concatenate(
        [xs, jnp.zeros((nst, LANE_PAD - DIM), f32)], axis=-1)
    ys_ref[...] = ys.reshape(bt, n_s, LANE_PAD)


# ---------------------------------------------------------------------------
# static mask construction (built once in the wrapper, constant-folded)
# ---------------------------------------------------------------------------
def _head_block_mask(nq):
    m = np.zeros((NUM_HEADS * nq, DIM), np.float32)
    for h in range(NUM_HEADS):
        m[h * nq:(h + 1) * nq, h * HEAD_DIM:(h + 1) * HEAD_DIM] = 1.0
    return jnp.asarray(m)


def _batch_attend_mask(bt, n_q, n_other):
    """Additive mask: query of batch b may only attend keys of batch b."""
    q_b = np.repeat(np.arange(bt), n_q)
    k_b = np.concatenate([np.repeat(np.arange(bt), n_q),
                          np.repeat(np.arange(bt), n_other)])
    m = np.where(q_b[:, None] == k_b[None, :], 0.0, NEG_INF).astype(np.float32)
    return jnp.asarray(np.tile(m, (NUM_HEADS, 1)))


def _const_spec(arr):
    idx = (0,) * arr.ndim
    return pl.BlockSpec(arr.shape, lambda s, _i=idx: _i)


# ---------------------------------------------------------------------------
# pallas_call wrapper
# ---------------------------------------------------------------------------
def two_stream_forward(params, x_primary, x_secondary,
                       x_primary_pe=None, x_secondary_pe=None):
    # apply_pos_emb_all_layers=False: add PE once, then drop PEs.
    if x_primary_pe is not None:
        x_primary = x_primary + x_primary_pe
    if x_secondary_pe is not None:
        x_secondary = x_secondary + x_secondary_pe

    B, n_p, d = x_primary.shape
    n_s = x_secondary.shape[1]
    assert d == DIM

    # Batch folding: fold several batch elements per grid step (block-diagonal
    # attend mask) to amortize per-step overhead on v5e/v6e, but keep >= 2
    # grid steps so both v7x TensorCores get work.
    bt = 1 if B <= 1 else max(1, min(4, B // 2))
    steps = -(-B // bt)
    b_pad = steps * bt
    if b_pad != B:
        x_primary = jnp.concatenate(
            [x_primary, jnp.zeros((b_pad - B, n_p, d), x_primary.dtype)], 0)
        x_secondary = jnp.concatenate(
            [x_secondary, jnp.zeros((b_pad - B, n_s, d), x_secondary.dtype)], 0)

    pa, sa = params["p_attn"], params["s_attn"]
    pm, sm = params["p_mlp"], params["s_mlp"]
    hd = params["head"]
    bf = jnp.bfloat16

    # Fused QKV weight [primary | secondary] along output lanes; attention
    # scale folded into the Q columns (constant-folded under jit).
    q_scale = jnp.concatenate(
        [jnp.full((1, DIM), SCALE, jnp.float32),
         jnp.ones((1, 2 * DIM), jnp.float32)], axis=-1)
    wqkv_cat = jnp.concatenate([pa["wqkv"] * q_scale,
                                sa["wqkv"] * q_scale], axis=-1).astype(bf)
    bqkv_cat = jnp.concatenate([pa["bqkv"] * q_scale,
                                sa["bqkv"] * q_scale], axis=-1)

    # lane-dense head weights (10 -> 128 output lanes; sliced back below)
    wh_pad = jnp.pad(hd["wh"], ((0, 0), (0, LANE_PAD - NUM_CLASSES))).astype(bf)
    bh_pad = jnp.pad(hd["bh"], ((0, 0), (0, LANE_PAD - NUM_CLASSES)))

    # static masks (hoisted: built here once, loaded once in-kernel)
    hmask_p = _head_block_mask(bt * n_p)
    hmask_s = _head_block_mask(bt * n_s)
    bmask_p = _batch_attend_mask(bt, n_p, n_s)
    bmask_s = _batch_attend_mask(bt, n_s, n_p)

    weight_list = [
        pa["ln_g"], pa["ln_b"], pa["ln_o_g"], pa["ln_o_b"],
        sa["ln_g"], sa["ln_b"], sa["ln_o_g"], sa["ln_o_b"],
        wqkv_cat, bqkv_cat,
        pa["wo"].astype(bf), pa["bo"], sa["wo"].astype(bf), sa["bo"],
        pm["ln_g"], pm["ln_b"], pm["w1"].astype(bf), pm["b1"],
        pm["w2"].astype(bf), pm["b2"],
        sm["ln_g"], sm["ln_b"], sm["w1"].astype(bf), sm["b1"],
        sm["w2"].astype(bf), sm["b2"],
        hd["ln_g"], hd["ln_b"], wh_pad, bh_pad,
        hmask_p, hmask_s, bmask_p, bmask_s,
    ]

    kernel = functools.partial(_fused_kernel, bt, n_p, n_s)

    yp_pad, ys_pad = pl.pallas_call(
        kernel,
        out_shape=(jax.ShapeDtypeStruct((b_pad, n_p, LANE_PAD), jnp.float32),
                   jax.ShapeDtypeStruct((b_pad, n_s, LANE_PAD), jnp.float32)),
        grid=(steps,),
        in_specs=[pl.BlockSpec((bt, n_p, DIM), lambda s: (s, 0, 0)),
                  pl.BlockSpec((bt, n_s, DIM), lambda s: (s, 0, 0))]
                 + [_const_spec(w) for w in weight_list],
        out_specs=(pl.BlockSpec((bt, n_p, LANE_PAD), lambda s: (s, 0, 0)),
                   pl.BlockSpec((bt, n_s, LANE_PAD), lambda s: (s, 0, 0))),
        compiler_params=pltpu.CompilerParams(
            dimension_semantics=("parallel",)),
    )(x_primary, x_secondary, *weight_list)

    return yp_pad[:B, :, :NUM_CLASSES], ys_pad[:B, :, :DIM]


# ---------------------------------------------------------------------------
# deterministic parameter init (mirrors _init_weights: normal(0.02) weights,
# LN gamma=1 / beta=0, biases=0); all per-layer tensors stacked over DEPTH.
# ---------------------------------------------------------------------------
def init_params(key):
    keys = iter(jax.random.split(key, 16))

    def nrm(shape):
        return jax.random.normal(next(keys), shape, jnp.float32) * 0.02

    def attn_params():
        return dict(
            ln_g=jnp.ones((DEPTH, 1, DIM), jnp.float32),
            ln_b=jnp.zeros((DEPTH, 1, DIM), jnp.float32),
            ln_o_g=jnp.ones((DEPTH, 1, DIM), jnp.float32),
            ln_o_b=jnp.zeros((DEPTH, 1, DIM), jnp.float32),
            wqkv=nrm((DEPTH, DIM, 3 * DIM)),
            bqkv=jnp.zeros((DEPTH, 1, 3 * DIM), jnp.float32),
            wo=nrm((DEPTH, DIM, DIM)),
            bo=jnp.zeros((DEPTH, 1, DIM), jnp.float32))

    def mlp_params():
        return dict(
            ln_g=jnp.ones((DEPTH, 1, DIM), jnp.float32),
            ln_b=jnp.zeros((DEPTH, 1, DIM), jnp.float32),
            w1=nrm((DEPTH, DIM, MLP_HIDDEN)),
            b1=jnp.zeros((DEPTH, 1, MLP_HIDDEN), jnp.float32),
            w2=nrm((DEPTH, MLP_HIDDEN, DIM)),
            b2=jnp.zeros((DEPTH, 1, DIM), jnp.float32))

    head = dict(ln_g=jnp.ones((1, DIM), jnp.float32),
                ln_b=jnp.zeros((1, DIM), jnp.float32),
                wh=nrm((DIM, NUM_CLASSES)),
                bh=jnp.zeros((1, NUM_CLASSES), jnp.float32))

    return dict(p_attn=attn_params(), s_attn=attn_params(),
                p_mlp=mlp_params(), s_mlp=mlp_params(), head=head)


# ---------------------------------------------------------------------------
if __name__ == "__main__":
    key = jax.random.PRNGKey(0)
    k1, k2, k3, k4, kp = jax.random.split(key, 5)

    B, N_P, N_S = 2, 8, 16
    x_p = jax.random.normal(k1, (B, N_P, DIM), jnp.float32)
    x_s = jax.random.normal(k2, (B, N_S, DIM), jnp.float32)
    pe_p = jax.random.normal(k3, (B, N_P, DIM), jnp.float32) * 0.1
    pe_s = jax.random.normal(k4, (B, N_S, DIM), jnp.float32) * 0.1

    params = init_params(kp)

    fwd = jax.jit(functools.partial(two_stream_forward, params))
    y_p, y_s = fwd(x_p, x_s, pe_p, pe_s)
    jax.block_until_ready((y_p, y_s))

    assert y_p.shape == (B, N_P, NUM_CLASSES), y_p.shape
    assert y_s.shape == (B, N_S, DIM), y_s.shape
    assert jnp.all(jnp.isfinite(y_p)) and jnp.all(jnp.isfinite(y_s))
    print("KERNEL_OK")
</pallas_src>

<mosaic_0001>
module attributes {stable_mosaic.version = 11 : i64} {
  func.func @_fused_kernel(%arg0: i32, %arg1: memref<1x8x32xf32, #tpu.memory_space<vmem>>, %arg2: memref<1x16x32xf32, #tpu.memory_space<vmem>>, %arg3: memref<4x1x32xf32, #tpu.memory_space<vmem>>, %arg4: memref<4x1x32xf32, #tpu.memory_space<vmem>>, %arg5: memref<4x1x32xf32, #tpu.memory_space<vmem>>, %arg6: memref<4x1x32xf32, #tpu.memory_space<vmem>>, %arg7: memref<4x1x32xf32, #tpu.memory_space<vmem>>, %arg8: memref<4x1x32xf32, #tpu.memory_space<vmem>>, %arg9: memref<4x1x32xf32, #tpu.memory_space<vmem>>, %arg10: memref<4x1x32xf32, #tpu.memory_space<vmem>>, %arg11: memref<4x32x192xbf16, #tpu.memory_space<vmem>>, %arg12: memref<4x1x192xf32, #tpu.memory_space<vmem>>, %arg13: memref<4x32x32xbf16, #tpu.memory_space<vmem>>, %arg14: memref<4x1x32xf32, #tpu.memory_space<vmem>>, %arg15: memref<4x32x32xbf16, #tpu.memory_space<vmem>>, %arg16: memref<4x1x32xf32, #tpu.memory_space<vmem>>, %arg17: memref<4x1x32xf32, #tpu.memory_space<vmem>>, %arg18: memref<4x1x32xf32, #tpu.memory_space<vmem>>, %arg19: memref<4x32x128xbf16, #tpu.memory_space<vmem>>, %arg20: memref<4x1x128xf32, #tpu.memory_space<vmem>>, %arg21: memref<4x128x32xbf16, #tpu.memory_space<vmem>>, %arg22: memref<4x1x32xf32, #tpu.memory_space<vmem>>, %arg23: memref<4x1x32xf32, #tpu.memory_space<vmem>>, %arg24: memref<4x1x32xf32, #tpu.memory_space<vmem>>, %arg25: memref<4x32x128xbf16, #tpu.memory_space<vmem>>, %arg26: memref<4x1x128xf32, #tpu.memory_space<vmem>>, %arg27: memref<4x128x32xbf16, #tpu.memory_space<vmem>>, %arg28: memref<4x1x32xf32, #tpu.memory_space<vmem>>, %arg29: memref<1x32xf32, #tpu.memory_space<vmem>>, %arg30: memref<1x32xf32, #tpu.memory_space<vmem>>, %arg31: memref<32x128xbf16, #tpu.memory_space<vmem>>, %arg32: memref<1x128xf32, #tpu.memory_space<vmem>>, %arg33: memref<32x32xf32, #tpu.memory_space<vmem>>, %arg34: memref<64x32xf32, #tpu.memory_space<vmem>>, %arg35: memref<32x24xf32, #tpu.memory_space<vmem>>, %arg36: memref<64x24xf32, #tpu.memory_space<vmem>>, %arg37: memref<1x8x128xf32, #tpu.memory_space<vmem>>, %arg38: memref<1x16x128xf32, #tpu.memory_space<vmem>>) attributes {dimension_semantics = [#tpu.dimension_semantics<parallel>], iteration_bounds = array<i64: 2>, scalar_prefetch = 0 : i64, scratch_operands = 0 : i64, tpu.core_type = #tpu.core_type<tc>, window_params = [{transform_indices = @transform_0, window_bounds = array<i64: 1, 8, 32>}, {transform_indices = @transform_1, window_bounds = array<i64: 1, 16, 32>}, {pipeline_mode = #tpu.pipeline_mode<synchronous>, transform_indices = @transform_2, window_bounds = array<i64: 4, 1, 32>}, {pipeline_mode = #tpu.pipeline_mode<synchronous>, transform_indices = @transform_3, window_bounds = array<i64: 4, 1, 32>}, {pipeline_mode = #tpu.pipeline_mode<synchronous>, transform_indices = @transform_4, window_bounds = array<i64: 4, 1, 32>}, {pipeline_mode = #tpu.pipeline_mode<synchronous>, transform_indices = @transform_5, window_bounds = array<i64: 4, 1, 32>}, {pipeline_mode = #tpu.pipeline_mode<synchronous>, transform_indices = @transform_6, window_bounds = array<i64: 4, 1, 32>}, {pipeline_mode = #tpu.pipeline_mode<synchronous>, transform_indices = @transform_7, window_bounds = array<i64: 4, 1, 32>}, {pipeline_mode = #tpu.pipeline_mode<synchronous>, transform_indices = @transform_8, window_bounds = array<i64: 4, 1, 32>}, {pipeline_mode = #tpu.pipeline_mode<synchronous>, transform_indices = @transform_9, window_bounds = array<i64: 4, 1, 32>}, {pipeline_mode = #tpu.pipeline_mode<synchronous>, transform_indices = @transform_10, window_bounds = array<i64: 4, 32, 192>}, {pipeline_mode = #tpu.pipeline_mode<synchronous>, transform_indices = @transform_11, window_bounds = array<i64: 4, 1, 192>}, {pipeline_mode = #tpu.pipeline_mode<synchronous>, transform_indices = @transform_12, window_bounds = array<i64: 4, 32, 32>}, {pipeline_mode = #tpu.pipeline_mode<synchronous>, transform_indices = @transform_13, window_bounds = array<i64: 4, 1, 32>}, {pipeline_mode = #tpu.pipeline_mode<synchronous>, transform_indices = @transform_14, window_bounds = array<i64: 4, 32, 32>}, {pipeline_mode = #tpu.pipeline_mode<synchronous>, transform_indices = @transform_15, window_bounds = array<i64: 4, 1, 32>}, {pipeline_mode = #tpu.pipeline_mode<synchronous>, transform_indices = @transform_16, window_bounds = array<i64: 4, 1, 32>}, {pipeline_mode = #tpu.pipeline_mode<synchronous>, transform_indices = @transform_17, window_bounds = array<i64: 4, 1, 32>}, {pipeline_mode = #tpu.pipeline_mode<synchronous>, transform_indices = @transform_18, window_bounds = array<i64: 4, 32, 128>}, {pipeline_mode = #tpu.pipeline_mode<synchronous>, transform_indices = @transform_19, window_bounds = array<i64: 4, 1, 128>}, {pipeline_mode = #tpu.pipeline_mode<synchronous>, transform_indices = @transform_20, window_bounds = array<i64: 4, 128, 32>}, {pipeline_mode = #tpu.pipeline_mode<synchronous>, transform_indices = @transform_21, window_bounds = array<i64: 4, 1, 32>}, {pipeline_mode = #tpu.pipeline_mode<synchronous>, transform_indices = @transform_22, window_bounds = array<i64: 4, 1, 32>}, {pipeline_mode = #tpu.pipeline_mode<synchronous>, transform_indices = @transform_23, window_bounds = array<i64: 4, 1, 32>}, {pipeline_mode = #tpu.pipeline_mode<synchronous>, transform_indices = @transform_24, window_bounds = array<i64: 4, 32, 128>}, {pipeline_mode = #tpu.pipeline_mode<synchronous>, transform_indices = @transform_25, window_bounds = array<i64: 4, 1, 128>}, {pipeline_mode = #tpu.pipeline_mode<synchronous>, transform_indices = @transform_26, window_bounds = array<i64: 4, 128, 32>}, {pipeline_mode = #tpu.pipeline_mode<synchronous>, transform_indices = @transform_27, window_bounds = array<i64: 4, 1, 32>}, {pipeline_mode = #tpu.pipeline_mode<synchronous>, transform_indices = @transform_28, window_bounds = array<i64: 1, 32>}, {pipeline_mode = #tpu.pipeline_mode<synchronous>, transform_indices = @transform_29, window_bounds = array<i64: 1, 32>}, {pipeline_mode = #tpu.pipeline_mode<synchronous>, transform_indices = @transform_30, window_bounds = array<i64: 32, 128>}, {pipeline_mode = #tpu.pipeline_mode<synchronous>, transform_indices = @transform_31, window_bounds = array<i64: 1, 128>}, {pipeline_mode = #tpu.pipeline_mode<synchronous>, transform_indices = @transform_32, window_bounds = array<i64: 32, 32>}, {pipeline_mode = #tpu.pipeline_mode<synchronous>, transform_indices = @transform_33, window_bounds = array<i64: 64, 32>}, {pipeline_mode = #tpu.pipeline_mode<synchronous>, transform_indices = @transform_34, window_bounds = array<i64: 32, 24>}, {pipeline_mode = #tpu.pipeline_mode<synchronous>, transform_indices = @transform_35, window_bounds = array<i64: 64, 24>}, {transform_indices = @transform_36, window_bounds = array<i64: 1, 8, 128>}, {transform_indices = @transform_37, window_bounds = array<i64: 1, 16, 128>}]} {
    %c0 = arith.constant 0 : index
    %c0_0 = arith.constant 0 : index
    %0 = vector.load %arg33[%c0, %c0_0] : memref<32x32xf32, #tpu.memory_space<vmem>>, vector<32x32xf32>
    %c0_1 = arith.constant 0 : index
    %c0_2 = arith.constant 0 : index
    %1 = vector.load %arg34[%c0_1, %c0_2] : memref<64x32xf32, #tpu.memory_space<vmem>>, vector<64x32xf32>
    %c0_3 = arith.constant 0 : index
    %c0_4 = arith.constant 0 : index
    %2 = vector.load %arg35[%c0_3, %c0_4] : memref<32x24xf32, #tpu.memory_space<vmem>>, vector<32x24xf32>
    %c0_5 = arith.constant 0 : index
    %c0_6 = arith.constant 0 : index
    %3 = vector.load %arg36[%c0_5, %c0_6] : memref<64x24xf32, #tpu.memory_space<vmem>>, vector<64x24xf32>
    %c0_7 = arith.constant 0 : index
    %c0_8 = arith.constant 0 : index
    %c0_9 = arith.constant 0 : index
    %4 = vector.load %arg1[%c0_7, %c0_8, %c0_9] : memref<1x8x32xf32, #tpu.memory_space<vmem>>, vector<1x8x32xf32>
    %5 = vector.shape_cast %4 : vector<1x8x32xf32> to vector<8x32xf32>
    %c0_10 = arith.constant 0 : index
    %c0_11 = arith.constant 0 : index
    %c0_12 = arith.constant 0 : index
    %6 = vector.load %arg2[%c0_10, %c0_11, %c0_12] : memref<1x16x32xf32, #tpu.memory_space<vmem>>, vector<1x16x32xf32>
    %7 = vector.shape_cast %6 : vector<1x16x32xf32> to vector<16x32xf32>
    %cst = arith.constant dense<0.000000e+00> : vector<8xf32>
    %8 = vector.multi_reduction <add>, %5, %cst [1] : vector<8x32xf32> to vector<8xf32>
    %9 = vector.shape_cast %8 : vector<8xf32> to vector<8x1xf32>
    %cst_13 = arith.constant 3.200000e+01 : f32
    %10 = vector.broadcast %cst_13 : f32 to vector<8x1xf32>
    %11 = arith.divf %9, %10 : vector<8x1xf32>
    %12 = vector.broadcast %11 : vector<8x1xf32> to vector<8x32xf32>
    %13 = arith.subf %5, %12 : vector<8x32xf32>
    %14 = arith.mulf %13, %13 : vector<8x32xf32>
    %cst_14 = arith.constant dense<0.000000e+00> : vector<8xf32>
    %15 = vector.multi_reduction <add>, %14, %cst_14 [1] : vector<8x32xf32> to vector<8xf32>
    %16 = vector.shape_cast %15 : vector<8xf32> to vector<8x1xf32>
    %cst_15 = arith.constant 3.200000e+01 : f32
    %17 = vector.broadcast %cst_15 : f32 to vector<8x1xf32>
    %18 = arith.divf %16, %17 : vector<8x1xf32>
    %19 = vector.broadcast %11 : vector<8x1xf32> to vector<8x32xf32>
    %20 = arith.subf %5, %19 : vector<8x32xf32>
    %cst_16 = arith.constant 9.99999997E-7 : f32
    %21 = vector.broadcast %cst_16 : f32 to vector<8x1xf32>
    %22 = arith.addf %18, %21 : vector<8x1xf32>
    %23 = math.rsqrt %22 : vector<8x1xf32>
    %24 = vector.broadcast %23 : vector<8x1xf32> to vector<8x32xf32>
    %25 = arith.mulf %20, %24 : vector<8x32xf32>
    %cst_17 = arith.constant dense<0.000000e+00> : vector<16xf32>
    %26 = vector.multi_reduction <add>, %7, %cst_17 [1] : vector<16x32xf32> to vector<16xf32>
    %27 = vector.shape_cast %26 : vector<16xf32> to vector<16x1xf32>
    %cst_18 = arith.constant 3.200000e+01 : f32
    %28 = vector.broadcast %cst_18 : f32 to vector<16x1xf32>
    %29 = arith.divf %27, %28 : vector<16x1xf32>
    %30 = vector.broadcast %29 : vector<16x1xf32> to vector<16x32xf32>
    %31 = arith.subf %7, %30 : vector<16x32xf32>
    %32 = arith.mulf %31, %31 : vector<16x32xf32>
    %cst_19 = arith.constant dense<0.000000e+00> : vector<16xf32>
    %33 = vector.multi_reduction <add>, %32, %cst_19 [1] : vector<16x32xf32> to vector<16xf32>
    %34 = vector.shape_cast %33 : vector<16xf32> to vector<16x1xf32>
    %cst_20 = arith.constant 3.200000e+01 : f32
    %35 = vector.broadcast %cst_20 : f32 to vector<16x1xf32>
    %36 = arith.divf %34, %35 : vector<16x1xf32>
    %37 = vector.broadcast %29 : vector<16x1xf32> to vector<16x32xf32>
    %38 = arith.subf %7, %37 : vector<16x32xf32>
    %cst_21 = arith.constant 9.99999997E-7 : f32
    %39 = vector.broadcast %cst_21 : f32 to vector<16x1xf32>
    %40 = arith.addf %36, %39 : vector<16x1xf32>
    %41 = math.rsqrt %40 : vector<16x1xf32>
    %42 = vector.broadcast %41 : vector<16x1xf32> to vector<16x32xf32>
    %43 = arith.mulf %38, %42 : vector<16x32xf32>
    %c0_22 = arith.constant 0 : index
    %c0_23 = arith.constant 0 : index
    %c0_24 = arith.constant 0 : index
    %44 = vector.load %arg3[%c0_22, %c0_23, %c0_24] : memref<4x1x32xf32, #tpu.memory_space<vmem>>, vector<1x1x32xf32>
    %45 = vector.shape_cast %44 : vector<1x1x32xf32> to vector<1x32xf32>
    %46 = vector.broadcast %45 : vector<1x32xf32> to vector<8x32xf32>
    %47 = arith.mulf %25, %46 : vector<8x32xf32>
    %c0_25 = arith.constant 0 : index
    %c0_26 = arith.constant 0 : index
    %c0_27 = arith.constant 0 : index
    %48 = vector.load %arg4[%c0_25, %c0_26, %c0_27] : memref<4x1x32xf32, #tpu.memory_space<vmem>>, vector<1x1x32xf32>
    %49 = vector.shape_cast %48 : vector<1x1x32xf32> to vector<1x32xf32>
    %50 = vector.broadcast %49 : vector<1x32xf32> to vector<8x32xf32>
    %51 = arith.addf %47, %50 : vector<8x32xf32>
    %c0_28 = arith.constant 0 : index
    %c0_29 = arith.constant 0 : index
    %c0_30 = arith.constant 0 : index
    %52 = vector.load %arg5[%c0_28, %c0_29, %c0_30] : memref<4x1x32xf32, #tpu.memory_space<vmem>>, vector<1x1x32xf32>
    %53 = vector.shape_cast %52 : vector<1x1x32xf32> to vector<1x32xf32>
    %54 = vector.broadcast %53 : vector<1x32xf32> to vector<16x32xf32>
    %55 = arith.mulf %43, %54 : vector<16x32xf32>
    %c0_31 = arith.constant 0 : index
    %c0_32 = arith.constant 0 : index
    %c0_33 = arith.constant 0 : index
    %56 = vector.load %arg6[%c0_31, %c0_32, %c0_33] : memref<4x1x32xf32, #tpu.memory_space<vmem>>, vector<1x1x32xf32>
    %57 = vector.shape_cast %56 : vector<1x1x32xf32> to vector<1x32xf32>
    %58 = vector.broadcast %57 : vector<1x32xf32> to vector<16x32xf32>
    %59 = arith.addf %55, %58 : vector<16x32xf32>
    %c0_34 = arith.constant 0 : index
    %c0_35 = arith.constant 0 : index
    %c0_36 = arith.constant 0 : index
    %60 = vector.load %arg7[%c0_34, %c0_35, %c0_36] : memref<4x1x32xf32, #tpu.memory_space<vmem>>, vector<1x1x32xf32>
    %61 = vector.shape_cast %60 : vector<1x1x32xf32> to vector<1x32xf32>
    %62 = vector.broadcast %61 : vector<1x32xf32> to vector<16x32xf32>
    %63 = arith.mulf %43, %62 : vector<16x32xf32>
    %c0_37 = arith.constant 0 : index
    %c0_38 = arith.constant 0 : index
    %c0_39 = arith.constant 0 : index
    %64 = vector.load %arg8[%c0_37, %c0_38, %c0_39] : memref<4x1x32xf32, #tpu.memory_space<vmem>>, vector<1x1x32xf32>
    %65 = vector.shape_cast %64 : vector<1x1x32xf32> to vector<1x32xf32>
    %66 = vector.broadcast %65 : vector<1x32xf32> to vector<16x32xf32>
    %67 = arith.addf %63, %66 : vector<16x32xf32>
    %c0_40 = arith.constant 0 : index
    %c0_41 = arith.constant 0 : index
    %c0_42 = arith.constant 0 : index
    %68 = vector.load %arg9[%c0_40, %c0_41, %c0_42] : memref<4x1x32xf32, #tpu.memory_space<vmem>>, vector<1x1x32xf32>
    %69 = vector.shape_cast %68 : vector<1x1x32xf32> to vector<1x32xf32>
    %70 = vector.broadcast %69 : vector<1x32xf32> to vector<8x32xf32>
    %71 = arith.mulf %25, %70 : vector<8x32xf32>
    %c0_43 = arith.constant 0 : index
    %c0_44 = arith.constant 0 : index
    %c0_45 = arith.constant 0 : index
    %72 = vector.load %arg10[%c0_43, %c0_44, %c0_45] : memref<4x1x32xf32, #tpu.memory_space<vmem>>, vector<1x1x32xf32>
    %73 = vector.shape_cast %72 : vector<1x1x32xf32> to vector<1x32xf32>
    %74 = vector.broadcast %73 : vector<1x32xf32> to vector<8x32xf32>
    %75 = arith.addf %71, %74 : vector<8x32xf32>
    %76 = tpu.concatenate %51, %59, %67, %75 in 0 : vector<8x32xf32>, vector<16x32xf32>, vector<16x32xf32>, vector<8x32xf32> -> vector<48x32xf32>
    %77 = arith.truncf %76 : vector<48x32xf32> to vector<48x32xbf16>
    %c0_46 = arith.constant 0 : index
    %c0_47 = arith.constant 0 : index
    %c0_48 = arith.constant 0 : index
    %78 = vector.load %arg11[%c0_46, %c0_47, %c0_48] : memref<4x32x192xbf16, #tpu.memory_space<vmem>>, vector<1x32x192xbf16>
    %79 = vector.shape_cast %78 : vector<1x32x192xbf16> to vector<32x192xbf16>
    %cst_49 = arith.constant dense<0.000000e+00> : vector<48x192xf32>
    %80 = tpu.matmul %77, %79, %cst_49 {dimension_numbers = #tpu.dot_dimension_numbers<[1], [0], [0], [1], [0, 0, 1, 1], [], []>} : vector<48x32xbf16>, vector<32x192xbf16>, vector<48x192xf32> -> vector<48x192xf32>
    %c0_50 = arith.constant 0 : index
    %c0_51 = arith.constant 0 : index
    %c0_52 = arith.constant 0 : index
    %81 = vector.load %arg12[%c0_50, %c0_51, %c0_52] : memref<4x1x192xf32, #tpu.memory_space<vmem>>, vector<1x1x192xf32>
    %82 = vector.shape_cast %81 : vector<1x1x192xf32> to vector<1x192xf32>
    %83 = vector.broadcast %82 : vector<1x192xf32> to vector<48x192xf32>
    %84 = arith.addf %80, %83 : vector<48x192xf32>
    %85 = vector.extract_strided_slice %84 {offsets = [0, 0], sizes = [8, 32], strides = [1, 1]} : vector<48x192xf32> to vector<8x32xf32>
    %86 = vector.extract_strided_slice %84 {offsets = [0, 32], sizes = [24, 32], strides = [1, 1]} : vector<48x192xf32> to vector<24x32xf32>
    %87 = vector.extract_strided_slice %84 {offsets = [0, 64], sizes = [24, 32], strides = [1, 1]} : vector<48x192xf32> to vector<24x32xf32>
    %c0_53 = arith.constant 0 : index
    %c0_54 = arith.constant 0 : index
    %c0_55 = arith.constant 0 : index
    %88 = vector.load %arg13[%c0_53, %c0_54, %c0_55] : memref<4x32x32xbf16, #tpu.memory_space<vmem>>, vector<1x32x32xbf16>
    %89 = vector.shape_cast %88 : vector<1x32x32xbf16> to vector<32x32xbf16>
    %c0_56 = arith.constant 0 : index
    %c0_57 = arith.constant 0 : index
    %c0_58 = arith.constant 0 : index
    %90 = vector.load %arg14[%c0_56, %c0_57, %c0_58] : memref<4x1x32xf32, #tpu.memory_space<vmem>>, vector<1x1x32xf32>
    %91 = vector.shape_cast %90 : vector<1x1x32xf32> to vector<1x32xf32>
    %92 = tpu.concatenate %85, %85, %85, %85 in 0 : vector<8x32xf32>, vector<8x32xf32>, vector<8x32xf32>, vector<8x32xf32> -> vector<32x32xf32>
    %93 = arith.mulf %92, %0 : vector<32x32xf32>
    %94 = arith.truncf %93 : vector<32x32xf32> to vector<32x32xbf16>
    %95 = arith.truncf %86 : vector<24x32xf32> to vector<24x32xbf16>
    %cst_59 = arith.constant dense<0.000000e+00> : vector<32x24xf32>
    %96 = tpu.matmul %94, %95, %cst_59 {dimension_numbers = #tpu.dot_dimension_numbers<[1], [1], [0], [0], [0, 0, 1, 0], [], []>} : vector<32x32xbf16>, vector<24x32xbf16>, vector<32x24xf32> -> vector<32x24xf32>
    %97 = arith.addf %96, %2 : vector<32x24xf32>
    %cst_60 = arith.constant dense<0xFF800000> : vector<32xf32>
    %98 = vector.multi_reduction <maximumf>, %97, %cst_60 [1] : vector<32x24xf32> to vector<32xf32>
    %99 = vector.shape_cast %98 : vector<32xf32> to vector<32x1xf32>
    %100 = vector.broadcast %99 : vector<32x1xf32> to vector<32x24xf32>
    %101 = arith.subf %97, %100 : vector<32x24xf32>
    %102 = math.exp %101 : vector<32x24xf32>
    %cst_61 = arith.constant dense<0.000000e+00> : vector<32xf32>
    %103 = vector.multi_reduction <add>, %102, %cst_61 [1] : vector<32x24xf32> to vector<32xf32>
    %104 = vector.shape_cast %103 : vector<32xf32> to vector<32x1xf32>
    %105 = tpu.reciprocal %104 {approx = true} : vector<32x1xf32> -> vector<32x1xf32>
    %106 = vector.broadcast %105 : vector<32x1xf32> to vector<32x24xf32>
    %107 = arith.mulf %102, %106 : vector<32x24xf32>
    %108 = arith.truncf %107 : vector<32x24xf32> to vector<32x24xbf16>
    %109 = arith.truncf %87 : vector<24x32xf32> to vector<24x32xbf16>
    %cst_62 = arith.constant dense<0.000000e+00> : vector<32x32xf32>
    %110 = tpu.matmul %108, %109, %cst_62 {dimension_numbers = #tpu.dot_dimension_numbers<[1], [0], [0], [1], [0, 0, 1, 1], [], []>} : vector<32x24xbf16>, vector<24x32xbf16>, vector<32x32xf32> -> vector<32x32xf32>
    %111 = arith.mulf %110, %0 : vector<32x32xf32>
    %112 = vector.extract_strided_slice %111 {offsets = [0, 0], sizes = [8, 32], strides = [1, 1]} : vector<32x32xf32> to vector<8x32xf32>
    %113 = vector.extract_strided_slice %111 {offsets = [8, 0], sizes = [8, 32], strides = [1, 1]} : vector<32x32xf32> to vector<8x32xf32>
    %114 = arith.addf %112, %113 : vector<8x32xf32>
    %115 = vector.extract_strided_slice %111 {offsets = [16, 0], sizes = [8, 32], strides = [1, 1]} : vector<32x32xf32> to vector<8x32xf32>
    %116 = arith.addf %114, %115 : vector<8x32xf32>
    %117 = vector.extract_strided_slice %111 {offsets = [24, 0], sizes = [8, 32], strides = [1, 1]} : vector<32x32xf32> to vector<8x32xf32>
    %118 = arith.addf %116, %117 : vector<8x32xf32>
    %119 = arith.truncf %118 : vector<8x32xf32> to vector<8x32xbf16>
    %cst_63 = arith.constant dense<0.000000e+00> : vector<8x32xf32>
    %120 = tpu.matmul %119, %89, %cst_63 {dimension_numbers = #tpu.dot_dimension_numbers<[1], [0], [0], [1], [0, 0, 1, 1], [], []>} : vector<8x32xbf16>, vector<32x32xbf16>, vector<8x32xf32> -> vector<8x32xf32>
    %121 = arith.addf %5, %120 : vector<8x32xf32>
    %122 = vector.broadcast %91 : vector<1x32xf32> to vector<8x32xf32>
    %123 = arith.addf %121, %122 : vector<8x32xf32>
    %124 = vector.extract_strided_slice %84 {offsets = [24, 96], sizes = [16, 32], strides = [1, 1]} : vector<48x192xf32> to vector<16x32xf32>
    %125 = vector.extract_strided_slice %84 {offsets = [24, 128], sizes = [24, 32], strides = [1, 1]} : vector<48x192xf32> to vector<24x32xf32>
    %126 = vector.extract_strided_slice %84 {offsets = [24, 160], sizes = [24, 32], strides = [1, 1]} : vector<48x192xf32> to vector<24x32xf32>
    %c0_64 = arith.constant 0 : index
    %c0_65 = arith.constant 0 : index
    %c0_66 = arith.constant 0 : index
    %127 = vector.load %arg15[%c0_64, %c0_65, %c0_66] : memref<4x32x32xbf16, #tpu.memory_space<vmem>>, vector<1x32x32xbf16>
    %128 = vector.shape_cast %127 : vector<1x32x32xbf16> to vector<32x32xbf16>
    %c0_67 = arith.constant 0 : index
    %c0_68 = arith.constant 0 : index
    %c0_69 = arith.constant 0 : index
    %129 = vector.load %arg16[%c0_67, %c0_68, %c0_69] : memref<4x1x32xf32, #tpu.memory_space<vmem>>, vector<1x1x32xf32>
    %130 = vector.shape_cast %129 : vector<1x1x32xf32> to vector<1x32xf32>
    %131 = tpu.concatenate %124, %124, %124, %124 in 0 : vector<16x32xf32>, vector<16x32xf32>, vector<16x32xf32>, vector<16x32xf32> -> vector<64x32xf32>
    %132 = arith.mulf %131, %1 : vector<64x32xf32>
    %133 = arith.truncf %132 : vector<64x32xf32> to vector<64x32xbf16>
    %134 = arith.truncf %125 : vector<24x32xf32> to vector<24x32xbf16>
    %cst_70 = arith.constant dense<0.000000e+00> : vector<64x24xf32>
    %135 = tpu.matmul %133, %134, %cst_70 {dimension_numbers = #tpu.dot_dimension_numbers<[1], [1], [0], [0], [0, 0, 1, 0], [], []>} : vector<64x32xbf16>, vector<24x32xbf16>, vector<64x24xf32> -> vector<64x24xf32>
    %136 = arith.addf %135, %3 : vector<64x24xf32>
    %cst_71 = arith.constant dense<0xFF800000> : vector<64xf32>
    %137 = vector.multi_reduction <maximumf>, %136, %cst_71 [1] : vector<64x24xf32> to vector<64xf32>
    %138 = vector.shape_cast %137 : vector<64xf32> to vector<64x1xf32>
    %139 = vector.broadcast %138 : vector<64x1xf32> to vector<64x24xf32>
    %140 = arith.subf %136, %139 : vector<64x24xf32>
    %141 = math.exp %140 : vector<64x24xf32>
    %cst_72 = arith.constant dense<0.000000e+00> : vector<64xf32>
    %142 = vector.multi_reduction <add>, %141, %cst_72 [1] : vector<64x24xf32> to vector<64xf32>
    %143 = vector.shape_cast %142 : vector<64xf32> to vector<64x1xf32>
    %144 = tpu.reciprocal %143 {approx = true} : vector<64x1xf32> -> vector<64x1xf32>
    %145 = vector.broadcast %144 : vector<64x1xf32> to vector<64x24xf32>
    %146 = arith.mulf %141, %145 : vector<64x24xf32>
    %147 = arith.truncf %146 : vector<64x24xf32> to vector<64x24xbf16>
    %148 = arith.truncf %126 : vector<24x32xf32> to vector<24x32xbf16>
    %cst_73 = arith.constant dense<0.000000e+00> : vector<64x32xf32>
    %149 = tpu.matmul %147, %148, %cst_73 {dimension_numbers = #tpu.dot_dimension_numbers<[1], [0], [0], [1], [0, 0, 1, 1], [], []>} : vector<64x24xbf16>, vector<24x32xbf16>, vector<64x32xf32> -> vector<64x32xf32>
    %150 = arith.mulf %149, %1 : vector<64x32xf32>
    %151 = vector.extract_strided_slice %150 {offsets = [0, 0], sizes = [16, 32], strides = [1, 1]} : vector<64x32xf32> to vector<16x32xf32>
    %152 = vector.extract_strided_slice %150 {offsets = [16, 0], sizes = [16, 32], strides = [1, 1]} : vector<64x32xf32> to vector<16x32xf32>
    %153 = arith.addf %151, %152 : vector<16x32xf32>
    %154 = vector.extract_strided_slice %150 {offsets = [32, 0], sizes = [16, 32], strides = [1, 1]} : vector<64x32xf32> to vector<16x32xf32>
    %155 = arith.addf %153, %154 : vector<16x32xf32>
    %156 = vector.extract_strided_slice %150 {offsets = [48, 0], sizes = [16, 32], strides = [1, 1]} : vector<64x32xf32> to vector<16x32xf32>
    %157 = arith.addf %155, %156 : vector<16x32xf32>
    %158 = arith.truncf %157 : vector<16x32xf32> to vector<16x32xbf16>
    %cst_74 = arith.constant dense<0.000000e+00> : vector<16x32xf32>
    %159 = tpu.matmul %158, %128, %cst_74 {dimension_numbers = #tpu.dot_dimension_numbers<[1], [0], [0], [1], [0, 0, 1, 1], [], []>} : vector<16x32xbf16>, vector<32x32xbf16>, vector<16x32xf32> -> vector<16x32xf32>
    %160 = arith.addf %7, %159 : vector<16x32xf32>
    %161 = vector.broadcast %130 : vector<1x32xf32> to vector<16x32xf32>
    %162 = arith.addf %160, %161 : vector<16x32xf32>
    %c0_75 = arith.constant 0 : index
    %c0_76 = arith.constant 0 : index
    %c0_77 = arith.constant 0 : index
    %163 = vector.load %arg17[%c0_75, %c0_76, %c0_77] : memref<4x1x32xf32, #tpu.memory_space<vmem>>, vector<1x1x32xf32>
    %164 = vector.shape_cast %163 : vector<1x1x32xf32> to vector<1x32xf32>
    %c0_78 = arith.constant 0 : index
    %c0_79 = arith.constant 0 : index
    %c0_80 = arith.constant 0 : index
    %165 = vector.load %arg18[%c0_78, %c0_79, %c0_80] : memref<4x1x32xf32, #tpu.memory_space<vmem>>, vector<1x1x32xf32>
    %166 = vector.shape_cast %165 : vector<1x1x32xf32> to vector<1x32xf32>
    %c0_81 = arith.constant 0 : index
    %c0_82 = arith.constant 0 : index
    %c0_83 = arith.constant 0 : index
    %167 = vector.load %arg19[%c0_81, %c0_82, %c0_83] : memref<4x32x128xbf16, #tpu.memory_space<vmem>>, vector<1x32x128xbf16>
    %168 = vector.shape_cast %167 : vector<1x32x128xbf16> to vector<32x128xbf16>
    %c0_84 = arith.constant 0 : index
    %c0_85 = arith.constant 0 : index
    %c0_86 = arith.constant 0 : index
    %169 = vector.load %arg20[%c0_84, %c0_85, %c0_86] : memref<4x1x128xf32, #tpu.memory_space<vmem>>, vector<1x1x128xf32>
    %170 = vector.shape_cast %169 : vector<1x1x128xf32> to vector<1x128xf32>
    %c0_87 = arith.constant 0 : index
    %c0_88 = arith.constant 0 : index
    %c0_89 = arith.constant 0 : index
    %171 = vector.load %arg21[%c0_87, %c0_88, %c0_89] : memref<4x128x32xbf16, #tpu.memory_space<vmem>>, vector<1x128x32xbf16>
    %172 = vector.shape_cast %171 : vector<1x128x32xbf16> to vector<128x32xbf16>
    %c0_90 = arith.constant 0 : index
    %c0_91 = arith.constant 0 : index
    %c0_92 = arith.constant 0 : index
    %173 = vector.load %arg22[%c0_90, %c0_91, %c0_92] : memref<4x1x32xf32, #tpu.memory_space<vmem>>, vector<1x1x32xf32>
    %174 = vector.shape_cast %173 : vector<1x1x32xf32> to vector<1x32xf32>
    %cst_93 = arith.constant dense<0.000000e+00> : vector<8xf32>
    %175 = vector.multi_reduction <add>, %123, %cst_93 [1] : vector<8x32xf32> to vector<8xf32>
    %176 = vector.shape_cast %175 : vector<8xf32> to vector<8x1xf32>
    %cst_94 = arith.constant 3.200000e+01 : f32
    %177 = vector.broadcast %cst_94 : f32 to vector<8x1xf32>
    %178 = arith.divf %176, %177 : vector<8x1xf32>
    %179 = vector.broadcast %178 : vector<8x1xf32> to vector<8x32xf32>
    %180 = arith.subf %123, %179 : vector<8x32xf32>
    %181 = arith.mulf %180, %180 : vector<8x32xf32>
    %cst_95 = arith.constant dense<0.000000e+00> : vector<8xf32>
    %182 = vector.multi_reduction <add>, %181, %cst_95 [1] : vector<8x32xf32> to vector<8xf32>
    %183 = vector.shape_cast %182 : vector<8xf32> to vector<8x1xf32>
    %cst_96 = arith.constant 3.200000e+01 : f32
    %184 = vector.broadcast %cst_96 : f32 to vector<8x1xf32>
    %185 = arith.divf %183, %184 : vector<8x1xf32>
    %186 = vector.broadcast %178 : vector<8x1xf32> to vector<8x32xf32>
    %187 = arith.subf %123, %186 : vector<8x32xf32>
    %cst_97 = arith.constant 9.99999997E-7 : f32
    %188 = vector.broadcast %cst_97 : f32 to vector<8x1xf32>
    %189 = arith.addf %185, %188 : vector<8x1xf32>
    %190 = math.rsqrt %189 : vector<8x1xf32>
    %191 = vector.broadcast %190 : vector<8x1xf32> to vector<8x32xf32>
    %192 = arith.mulf %187, %191 : vector<8x32xf32>
    %193 = vector.broadcast %164 : vector<1x32xf32> to vector<8x32xf32>
    %194 = arith.mulf %192, %193 : vector<8x32xf32>
    %195 = vector.broadcast %166 : vector<1x32xf32> to vector<8x32xf32>
    %196 = arith.addf %194, %195 : vector<8x32xf32>
    %197 = arith.truncf %196 : vector<8x32xf32> to vector<8x32xbf16>
    %cst_98 = arith.constant dense<0.000000e+00> : vector<8x128xf32>
    %198 = tpu.matmul %197, %168, %cst_98 {dimension_numbers = #tpu.dot_dimension_numbers<[1], [0], [0], [1], [0, 0, 1, 1], [], []>} : vector<8x32xbf16>, vector<32x128xbf16>, vector<8x128xf32> -> vector<8x128xf32>
    %199 = vector.broadcast %170 : vector<1x128xf32> to vector<8x128xf32>
    %200 = arith.addf %198, %199 : vector<8x128xf32>
    %201 = arith.mulf %200, %200 : vector<8x128xf32>
    %202 = arith.mulf %200, %201 : vector<8x128xf32>
    %cst_99 = arith.constant 4.471500e-02 : f32
    %203 = vector.broadcast %cst_99 : f32 to vector<8x128xf32>
    %204 = arith.mulf %203, %202 : vector<8x128xf32>
    %205 = arith.addf %200, %204 : vector<8x128xf32>
    %cst_100 = arith.constant 0.797884583 : f32
    %206 = vector.broadcast %cst_100 : f32 to vector<8x128xf32>
    %207 = arith.mulf %206, %205 : vector<8x128xf32>
    %208 = math.tanh %207 : vector<8x128xf32>
    %cst_101 = arith.constant 1.000000e+00 : f32
    %209 = vector.broadcast %cst_101 : f32 to vector<8x128xf32>
    %210 = arith.addf %209, %208 : vector<8x128xf32>
    %cst_102 = arith.constant 5.000000e-01 : f32
    %211 = vector.broadcast %cst_102 : f32 to vector<8x128xf32>
    %212 = arith.mulf %211, %210 : vector<8x128xf32>
    %213 = arith.mulf %200, %212 : vector<8x128xf32>
    %214 = arith.truncf %213 : vector<8x128xf32> to vector<8x128xbf16>
    %cst_103 = arith.constant dense<0.000000e+00> : vector<8x32xf32>
    %215 = tpu.matmul %214, %172, %cst_103 {dimension_numbers = #tpu.dot_dimension_numbers<[1], [0], [0], [1], [0, 0, 1, 1], [], []>} : vector<8x128xbf16>, vector<128x32xbf16>, vector<8x32xf32> -> vector<8x32xf32>
    %216 = vector.broadcast %174 : vector<1x32xf32> to vector<8x32xf32>
    %217 = arith.addf %215, %216 : vector<8x32xf32>
    %218 = arith.addf %123, %217 : vector<8x32xf32>
    %c0_104 = arith.constant 0 : index
    %c0_105 = arith.constant 0 : index
    %c0_106 = arith.constant 0 : index
    %219 = vector.load %arg23[%c0_104, %c0_105, %c0_106] : memref<4x1x32xf32, #tpu.memory_space<vmem>>, vector<1x1x32xf32>
    %220 = vector.shape_cast %219 : vector<1x1x32xf32> to vector<1x32xf32>
    %c0_107 = arith.constant 0 : index
    %c0_108 = arith.constant 0 : index
    %c0_109 = arith.constant 0 : index
    %221 = vector.load %arg24[%c0_107, %c0_108, %c0_109] : memref<4x1x32xf32, #tpu.memory_space<vmem>>, vector<1x1x32xf32>
    %222 = vector.shape_cast %221 : vector<1x1x32xf32> to vector<1x32xf32>
    %c0_110 = arith.constant 0 : index
    %c0_111 = arith.constant 0 : index
    %c0_112 = arith.constant 0 : index
    %223 = vector.load %arg25[%c0_110, %c0_111, %c0_112] : memref<4x32x128xbf16, #tpu.memory_space<vmem>>, vector<1x32x128xbf16>
    %224 = vector.shape_cast %223 : vector<1x32x128xbf16> to vector<32x128xbf16>
    %c0_113 = arith.constant 0 : index
    %c0_114 = arith.constant 0 : index
    %c0_115 = arith.constant 0 : index
    %225 = vector.load %arg26[%c0_113, %c0_114, %c0_115] : memref<4x1x128xf32, #tpu.memory_space<vmem>>, vector<1x1x128xf32>
    %226 = vector.shape_cast %225 : vector<1x1x128xf32> to vector<1x128xf32>
    %c0_116 = arith.constant 0 : index
    %c0_117 = arith.constant 0 : index
    %c0_118 = arith.constant 0 : index
    %227 = vector.load %arg27[%c0_116, %c0_117, %c0_118] : memref<4x128x32xbf16, #tpu.memory_space<vmem>>, vector<1x128x32xbf16>
    %228 = vector.shape_cast %227 : vector<1x128x32xbf16> to vector<128x32xbf16>
    %c0_119 = arith.constant 0 : index
    %c0_120 = arith.constant 0 : index
    %c0_121 = arith.constant 0 : index
    %229 = vector.load %arg28[%c0_119, %c0_120, %c0_121] : memref<4x1x32xf32, #tpu.memory_space<vmem>>, vector<1x1x32xf32>
    %230 = vector.shape_cast %229 : vector<1x1x32xf32> to vector<1x32xf32>
    %cst_122 = arith.constant dense<0.000000e+00> : vector<16xf32>
    %231 = vector.multi_reduction <add>, %162, %cst_122 [1] : vector<16x32xf32> to vector<16xf32>
    %232 = vector.shape_cast %231 : vector<16xf32> to vector<16x1xf32>
    %cst_123 = arith.constant 3.200000e+01 : f32
    %233 = vector.broadcast %cst_123 : f32 to vector<16x1xf32>
    %234 = arith.divf %232, %233 : vector<16x1xf32>
    %235 = vector.broadcast %234 : vector<16x1xf32> to vector<16x32xf32>
    %236 = arith.subf %162, %235 : vector<16x32xf32>
    %237 = arith.mulf %236, %236 : vector<16x32xf32>
    %cst_124 = arith.constant dense<0.000000e+00> : vector<16xf32>
    %238 = vector.multi_reduction <add>, %237, %cst_124 [1] : vector<16x32xf32> to vector<16xf32>
    %239 = vector.shape_cast %238 : vector<16xf32> to vector<16x1xf32>
    %cst_125 = arith.constant 3.200000e+01 : f32
    %240 = vector.broadcast %cst_125 : f32 to vector<16x1xf32>
    %241 = arith.divf %239, %240 : vector<16x1xf32>
    %242 = vector.broadcast %234 : vector<16x1xf32> to vector<16x32xf32>
    %243 = arith.subf %162, %242 : vector<16x32xf32>
    %cst_126 = arith.constant 9.99999997E-7 : f32
    %244 = vector.broadcast %cst_126 : f32 to vector<16x1xf32>
    %245 = arith.addf %241, %244 : vector<16x1xf32>
    %246 = math.rsqrt %245 : vector<16x1xf32>
    %247 = vector.broadcast %246 : vector<16x1xf32> to vector<16x32xf32>
    %248 = arith.mulf %243, %247 : vector<16x32xf32>
    %249 = vector.broadcast %220 : vector<1x32xf32> to vector<16x32xf32>
    %250 = arith.mulf %248, %249 : vector<16x32xf32>
    %251 = vector.broadcast %222 : vector<1x32xf32> to vector<16x32xf32>
    %252 = arith.addf %250, %251 : vector<16x32xf32>
    %253 = arith.truncf %252 : vector<16x32xf32> to vector<16x32xbf16>
    %cst_127 = arith.constant dense<0.000000e+00> : vector<16x128xf32>
    %254 = tpu.matmul %253, %224, %cst_127 {dimension_numbers = #tpu.dot_dimension_numbers<[1], [0], [0], [1], [0, 0, 1, 1], [], []>} : vector<16x32xbf16>, vector<32x128xbf16>, vector<16x128xf32> -> vector<16x128xf32>
    %255 = vector.broadcast %226 : vector<1x128xf32> to vector<16x128xf32>
    %256 = arith.addf %254, %255 : vector<16x128xf32>
    %257 = arith.mulf %256, %256 : vector<16x128xf32>
    %258 = arith.mulf %256, %257 : vector<16x128xf32>
    %cst_128 = arith.constant 4.471500e-02 : f32
    %259 = vector.broadcast %cst_128 : f32 to vector<16x128xf32>
    %260 = arith.mulf %259, %258 : vector<16x128xf32>
    %261 = arith.addf %256, %260 : vector<16x128xf32>
    %cst_129 = arith.constant 0.797884583 : f32
    %262 = vector.broadcast %cst_129 : f32 to vector<16x128xf32>
    %263 = arith.mulf %262, %261 : vector<16x128xf32>
    %264 = math.tanh %263 : vector<16x128xf32>
    %cst_130 = arith.constant 1.000000e+00 : f32
    %265 = vector.broadcast %cst_130 : f32 to vector<16x128xf32>
    %266 = arith.addf %265, %264 : vector<16x128xf32>
    %cst_131 = arith.constant 5.000000e-01 : f32
    %267 = vector.broadcast %cst_131 : f32 to vector<16x128xf32>
    %268 = arith.mulf %267, %266 : vector<16x128xf32>
    %269 = arith.mulf %256, %268 : vector<16x128xf32>
    %270 = arith.truncf %269 : vector<16x128xf32> to vector<16x128xbf16>
    %cst_132 = arith.constant dense<0.000000e+00> : vector<16x32xf32>
    %271 = tpu.matmul %270, %228, %cst_132 {dimension_numbers = #tpu.dot_dimension_numbers<[1], [0], [0], [1], [0, 0, 1, 1], [], []>} : vector<16x128xbf16>, vector<128x32xbf16>, vector<16x32xf32> -> vector<16x32xf32>
    %272 = vector.broadcast %230 : vector<1x32xf32> to vector<16x32xf32>
    %273 = arith.addf %271, %272 : vector<16x32xf32>
    %274 = arith.addf %162, %273 : vector<16x32xf32>
    %cst_133 = arith.constant dense<0.000000e+00> : vector<8xf32>
    %275 = vector.multi_reduction <add>, %218, %cst_133 [1] : vector<8x32xf32> to vector<8xf32>
    %276 = vector.shape_cast %275 : vector<8xf32> to vector<8x1xf32>
    %cst_134 = arith.constant 3.200000e+01 : f32
    %277 = vector.broadcast %cst_134 : f32 to vector<8x1xf32>
    %278 = arith.divf %276, %277 : vector<8x1xf32>
    %279 = vector.broadcast %278 : vector<8x1xf32> to vector<8x32xf32>
    %280 = arith.subf %218, %279 : vector<8x32xf32>
    %281 = arith.mulf %280, %280 : vector<8x32xf32>
    %cst_135 = arith.constant dense<0.000000e+00> : vector<8xf32>
    %282 = vector.multi_reduction <add>, %281, %cst_135 [1] : vector<8x32xf32> to vector<8xf32>
    %283 = vector.shape_cast %282 : vector<8xf32> to vector<8x1xf32>
    %cst_136 = arith.constant 3.200000e+01 : f32
    %284 = vector.broadcast %cst_136 : f32 to vector<8x1xf32>
    %285 = arith.divf %283, %284 : vector<8x1xf32>
    %286 = vector.broadcast %278 : vector<8x1xf32> to vector<8x32xf32>
    %287 = arith.subf %218, %286 : vector<8x32xf32>
    %cst_137 = arith.constant 9.99999997E-7 : f32
    %288 = vector.broadcast %cst_137 : f32 to vector<8x1xf32>
    %289 = arith.addf %285, %288 : vector<8x1xf32>
    %290 = math.rsqrt %289 : vector<8x1xf32>
    %291 = vector.broadcast %290 : vector<8x1xf32> to vector<8x32xf32>
    %292 = arith.mulf %287, %291 : vector<8x32xf32>
    %cst_138 = arith.constant dense<0.000000e+00> : vector<16xf32>
    %293 = vector.multi_reduction <add>, %274, %cst_138 [1] : vector<16x32xf32> to vector<16xf32>
    %294 = vector.shape_cast %293 : vector<16xf32> to vector<16x1xf32>
    %cst_139 = arith.constant 3.200000e+01 : f32
    %295 = vector.broadcast %cst_139 : f32 to vector<16x1xf32>
    %296 = arith.divf %294, %295 : vector<16x1xf32>
    %297 = vector.broadcast %296 : vector<16x1xf32> to vector<16x32xf32>
    %298 = arith.subf %274, %297 : vector<16x32xf32>
    %299 = arith.mulf %298, %298 : vector<16x32xf32>
    %cst_140 = arith.constant dense<0.000000e+00> : vector<16xf32>
    %300 = vector.multi_reduction <add>, %299, %cst_140 [1] : vector<16x32xf32> to vector<16xf32>
    %301 = vector.shape_cast %300 : vector<16xf32> to vector<16x1xf32>
    %cst_141 = arith.constant 3.200000e+01 : f32
    %302 = vector.broadcast %cst_141 : f32 to vector<16x1xf32>
    %303 = arith.divf %301, %302 : vector<16x1xf32>
    %304 = vector.broadcast %296 : vector<16x1xf32> to vector<16x32xf32>
    %305 = arith.subf %274, %304 : vector<16x32xf32>
    %cst_142 = arith.constant 9.99999997E-7 : f32
    %306 = vector.broadcast %cst_142 : f32 to vector<16x1xf32>
    %307 = arith.addf %303, %306 : vector<16x1xf32>
    %308 = math.rsqrt %307 : vector<16x1xf32>
    %309 = vector.broadcast %308 : vector<16x1xf32> to vector<16x32xf32>
    %310 = arith.mulf %305, %309 : vector<16x32xf32>
    %c1 = arith.constant 1 : index
    %c0_143 = arith.constant 0 : index
    %c0_144 = arith.constant 0 : index
    %311 = vector.load %arg3[%c1, %c0_143, %c0_144] : memref<4x1x32xf32, #tpu.memory_space<vmem>>, vector<1x1x32xf32>
    %312 = vector.shape_cast %311 : vector<1x1x32xf32> to vector<1x32xf32>
    %313 = vector.broadcast %312 : vector<1x32xf32> to vector<8x32xf32>
    %314 = arith.mulf %292, %313 : vector<8x32xf32>
    %c1_145 = arith.constant 1 : index
    %c0_146 = arith.constant 0 : index
    %c0_147 = arith.constant 0 : index
    %315 = vector.load %arg4[%c1_145, %c0_146, %c0_147] : memref<4x1x32xf32, #tpu.memory_space<vmem>>, vector<1x1x32xf32>
    %316 = vector.shape_cast %315 : vector<1x1x32xf32> to vector<1x32xf32>
    %317 = vector.broadcast %316 : vector<1x32xf32> to vector<8x32xf32>
    %318 = arith.addf %314, %317 : vector<8x32xf32>
    %c1_148 = arith.constant 1 : index
    %c0_149 = arith.constant 0 : index
    %c0_150 = arith.constant 0 : index
    %319 = vector.load %arg5[%c1_148, %c0_149, %c0_150] : memref<4x1x32xf32, #tpu.memory_space<vmem>>, vector<1x1x32xf32>
    %320 = vector.shape_cast %319 : vector<1x1x32xf32> to vector<1x32xf32>
    %321 = vector.broadcast %320 : vector<1x32xf32> to vector<16x32xf32>
    %322 = arith.mulf %310, %321 : vector<16x32xf32>
    %c1_151 = arith.constant 1 : index
    %c0_152 = arith.constant 0 : index
    %c0_153 = arith.constant 0 : index
    %323 = vector.load %arg6[%c1_151, %c0_152, %c0_153] : memref<4x1x32xf32, #tpu.memory_space<vmem>>, vector<1x1x32xf32>
    %324 = vector.shape_cast %323 : vector<1x1x32xf32> to vector<1x32xf32>
    %325 = vector.broadcast %324 : vector<1x32xf32> to vector<16x32xf32>
    %326 = arith.addf %322, %325 : vector<16x32xf32>
    %c1_154 = arith.constant 1 : index
    %c0_155 = arith.constant 0 : index
    %c0_156 = arith.constant 0 : index
    %327 = vector.load %arg7[%c1_154, %c0_155, %c0_156] : memref<4x1x32xf32, #tpu.memory_space<vmem>>, vector<1x1x32xf32>
    %328 = vector.shape_cast %327 : vector<1x1x32xf32> to vector<1x32xf32>
    %329 = vector.broadcast %328 : vector<1x32xf32> to vector<16x32xf32>
    %330 = arith.mulf %310, %329 : vector<16x32xf32>
    %c1_157 = arith.constant 1 : index
    %c0_158 = arith.constant 0 : index
    %c0_159 = arith.constant 0 : index
    %331 = vector.load %arg8[%c1_157, %c0_158, %c0_159] : memref<4x1x32xf32, #tpu.memory_space<vmem>>, vector<1x1x32xf32>
    %332 = vector.shape_cast %331 : vector<1x1x32xf32> to vector<1x32xf32>
    %333 = vector.broadcast %332 : vector<1x32xf32> to vector<16x32xf32>
    %334 = arith.addf %330, %333 : vector<16x32xf32>
    %c1_160 = arith.constant 1 : index
    %c0_161 = arith.constant 0 : index
    %c0_162 = arith.constant 0 : index
    %335 = vector.load %arg9[%c1_160, %c0_161, %c0_162] : memref<4x1x32xf32, #tpu.memory_space<vmem>>, vector<1x1x32xf32>
    %336 = vector.shape_cast %335 : vector<1x1x32xf32> to vector<1x32xf32>
    %337 = vector.broadcast %336 : vector<1x32xf32> to vector<8x32xf32>
    %338 = arith.mulf %292, %337 : vector<8x32xf32>
    %c1_163 = arith.constant 1 : index
    %c0_164 = arith.constant 0 : index
    %c0_165 = arith.constant 0 : index
    %339 = vector.load %arg10[%c1_163, %c0_164, %c0_165] : memref<4x1x32xf32, #tpu.memory_space<vmem>>, vector<1x1x32xf32>
    %340 = vector.shape_cast %339 : vector<1x1x32xf32> to vector<1x32xf32>
    %341 = vector.broadcast %340 : vector<1x32xf32> to vector<8x32xf32>
    %342 = arith.addf %338, %341 : vector<8x32xf32>
    %343 = tpu.concatenate %318, %326, %334, %342 in 0 : vector<8x32xf32>, vector<16x32xf32>, vector<16x32xf32>, vector<8x32xf32> -> vector<48x32xf32>
    %344 = arith.truncf %343 : vector<48x32xf32> to vector<48x32xbf16>
    %c1_166 = arith.constant 1 : index
    %c0_167 = arith.constant 0 : index
    %c0_168 = arith.constant 0 : index
    %345 = vector.load %arg11[%c1_166, %c0_167, %c0_168] : memref<4x32x192xbf16, #tpu.memory_space<vmem>>, vector<1x32x192xbf16>
    %346 = vector.shape_cast %345 : vector<1x32x192xbf16> to vector<32x192xbf16>
    %cst_169 = arith.constant dense<0.000000e+00> : vector<48x192xf32>
    %347 = tpu.matmul %344, %346, %cst_169 {dimension_numbers = #tpu.dot_dimension_numbers<[1], [0], [0], [1], [0, 0, 1, 1], [], []>} : vector<48x32xbf16>, vector<32x192xbf16>, vector<48x192xf32> -> vector<48x192xf32>
    %c1_170 = arith.constant 1 : index
    %c0_171 = arith.constant 0 : index
    %c0_172 = arith.constant 0 : index
    %348 = vector.load %arg12[%c1_170, %c0_171, %c0_172] : memref<4x1x192xf32, #tpu.memory_space<vmem>>, vector<1x1x192xf32>
    %349 = vector.shape_cast %348 : vector<1x1x192xf32> to vector<1x192xf32>
    %350 = vector.broadcast %349 : vector<1x192xf32> to vector<48x192xf32>
    %351 = arith.addf %347, %350 : vector<48x192xf32>
    %352 = vector.extract_strided_slice %351 {offsets = [0, 0], sizes = [8, 32], strides = [1, 1]} : vector<48x192xf32> to vector<8x32xf32>
    %353 = vector.extract_strided_slice %351 {offsets = [0, 32], sizes = [24, 32], strides = [1, 1]} : vector<48x192xf32> to vector<24x32xf32>
    %354 = vector.extract_strided_slice %351 {offsets = [0, 64], sizes = [24, 32], strides = [1, 1]} : vector<48x192xf32> to vector<24x32xf32>
    %c1_173 = arith.constant 1 : index
    %c0_174 = arith.constant 0 : index
    %c0_175 = arith.constant 0 : index
    %355 = vector.load %arg13[%c1_173, %c0_174, %c0_175] : memref<4x32x32xbf16, #tpu.memory_space<vmem>>, vector<1x32x32xbf16>
    %356 = vector.shape_cast %355 : vector<1x32x32xbf16> to vector<32x32xbf16>
    %c1_176 = arith.constant 1 : index
    %c0_177 = arith.constant 0 : index
    %c0_178 = arith.constant 0 : index
    %357 = vector.load %arg14[%c1_176, %c0_177, %c0_178] : memref<4x1x32xf32, #tpu.memory_space<vmem>>, vector<1x1x32xf32>
    %358 = vector.shape_cast %357 : vector<1x1x32xf32> to vector<1x32xf32>
    %359 = tpu.concatenate %352, %352, %352, %352 in 0 : vector<8x32xf32>, vector<8x32xf32>, vector<8x32xf32>, vector<8x32xf32> -> vector<32x32xf32>
    %360 = arith.mulf %359, %0 : vector<32x32xf32>
    %361 = arith.truncf %360 : vector<32x32xf32> to vector<32x32xbf16>
    %362 = arith.truncf %353 : vector<24x32xf32> to vector<24x32xbf16>
    %cst_179 = arith.constant dense<0.000000e+00> : vector<32x24xf32>
    %363 = tpu.matmul %361, %362, %cst_179 {dimension_numbers = #tpu.dot_dimension_numbers<[1], [1], [0], [0], [0, 0, 1, 0], [], []>} : vector<32x32xbf16>, vector<24x32xbf16>, vector<32x24xf32> -> vector<32x24xf32>
    %364 = arith.addf %363, %2 : vector<32x24xf32>
    %cst_180 = arith.constant dense<0xFF800000> : vector<32xf32>
    %365 = vector.multi_reduction <maximumf>, %364, %cst_180 [1] : vector<32x24xf32> to vector<32xf32>
    %366 = vector.shape_cast %365 : vector<32xf32> to vector<32x1xf32>
    %367 = vector.broadcast %366 : vector<32x1xf32> to vector<32x24xf32>
    %368 = arith.subf %364, %367 : vector<32x24xf32>
    %369 = math.exp %368 : vector<32x24xf32>
    %cst_181 = arith.constant dense<0.000000e+00> : vector<32xf32>
    %370 = vector.multi_reduction <add>, %369, %cst_181 [1] : vector<32x24xf32> to vector<32xf32>
    %371 = vector.shape_cast %370 : vector<32xf32> to vector<32x1xf32>
    %372 = tpu.reciprocal %371 {approx = true} : vector<32x1xf32> -> vector<32x1xf32>
    %373 = vector.broadcast %372 : vector<32x1xf32> to vector<32x24xf32>
    %374 = arith.mulf %369, %373 : vector<32x24xf32>
    %375 = arith.truncf %374 : vector<32x24xf32> to vector<32x24xbf16>
    %376 = arith.truncf %354 : vector<24x32xf32> to vector<24x32xbf16>
    %cst_182 = arith.constant dense<0.000000e+00> : vector<32x32xf32>
    %377 = tpu.matmul %375, %376, %cst_182 {dimension_numbers = #tpu.dot_dimension_numbers<[1], [0], [0], [1], [0, 0, 1, 1], [], []>} : vector<32x24xbf16>, vector<24x32xbf16>, vector<32x32xf32> -> vector<32x32xf32>
    %378 = arith.mulf %377, %0 : vector<32x32xf32>
    %379 = vector.extract_strided_slice %378 {offsets = [0, 0], sizes = [8, 32], strides = [1, 1]} : vector<32x32xf32> to vector<8x32xf32>
    %380 = vector.extract_strided_slice %378 {offsets = [8, 0], sizes = [8, 32], strides = [1, 1]} : vector<32x32xf32> to vector<8x32xf32>
    %381 = arith.addf %379, %380 : vector<8x32xf32>
    %382 = vector.extract_strided_slice %378 {offsets = [16, 0], sizes = [8, 32], strides = [1, 1]} : vector<32x32xf32> to vector<8x32xf32>
    %383 = arith.addf %381, %382 : vector<8x32xf32>
    %384 = vector.extract_strided_slice %378 {offsets = [24, 0], sizes = [8, 32], strides = [1, 1]} : vector<32x32xf32> to vector<8x32xf32>
    %385 = arith.addf %383, %384 : vector<8x32xf32>
    %386 = arith.truncf %385 : vector<8x32xf32> to vector<8x32xbf16>
    %cst_183 = arith.constant dense<0.000000e+00> : vector<8x32xf32>
    %387 = tpu.matmul %386, %356, %cst_183 {dimension_numbers = #tpu.dot_dimension_numbers<[1], [0], [0], [1], [0, 0, 1, 1], [], []>} : vector<8x32xbf16>, vector<32x32xbf16>, vector<8x32xf32> -> vector<8x32xf32>
    %388 = arith.addf %218, %387 : vector<8x32xf32>
    %389 = vector.broadcast %358 : vector<1x32xf32> to vector<8x32xf32>
    %390 = arith.addf %388, %389 : vector<8x32xf32>
    %391 = vector.extract_strided_slice %351 {offsets = [24, 96], sizes = [16, 32], strides = [1, 1]} : vector<48x192xf32> to vector<16x32xf32>
    %392 = vector.extract_strided_slice %351 {offsets = [24, 128], sizes = [24, 32], strides = [1, 1]} : vector<48x192xf32> to vector<24x32xf32>
    %393 = vector.extract_strided_slice %351 {offsets = [24, 160], sizes = [24, 32], strides = [1, 1]} : vector<48x192xf32> to vector<24x32xf32>
    %c1_184 = arith.constant 1 : index
    %c0_185 = arith.constant 0 : index
    %c0_186 = arith.constant 0 : index
    %394 = vector.load %arg15[%c1_184, %c0_185, %c0_186] : memref<4x32x32xbf16, #tpu.memory_space<vmem>>, vector<1x32x32xbf16>
    %395 = vector.shape_cast %394 : vector<1x32x32xbf16> to vector<32x32xbf16>
    %c1_187 = arith.constant 1 : index
    %c0_188 = arith.constant 0 : index
    %c0_189 = arith.constant 0 : index
    %396 = vector.load %arg16[%c1_187, %c0_188, %c0_189] : memref<4x1x32xf32, #tpu.memory_space<vmem>>, vector<1x1x32xf32>
    %397 = vector.shape_cast %396 : vector<1x1x32xf32> to vector<1x32xf32>
    %398 = tpu.concatenate %391, %391, %391, %391 in 0 : vector<16x32xf32>, vector<16x32xf32>, vector<16x32xf32>, vector<16x32xf32> -> vector<64x32xf32>
    %399 = arith.mulf %398, %1 : vector<64x32xf32>
    %400 = arith.truncf %399 : vector<64x32xf32> to vector<64x32xbf16>
    %401 = arith.truncf %392 : vector<24x32xf32> to vector<24x32xbf16>
    %cst_190 = arith.constant dense<0.000000e+00> : vector<64x24xf32>
    %402 = tpu.matmul %400, %401, %cst_190 {dimension_numbers = #tpu.dot_dimension_numbers<[1], [1], [0], [0], [0, 0, 1, 0], [], []>} : vector<64x32xbf16>, vector<24x32xbf16>, vector<64x24xf32> -> vector<64x24xf32>
    %403 = arith.addf %402, %3 : vector<64x24xf32>
    %cst_191 = arith.constant dense<0xFF800000> : vector<64xf32>
    %404 = vector.multi_reduction <maximumf>, %403, %cst_191 [1] : vector<64x24xf32> to vector<64xf32>
    %405 = vector.shape_cast %404 : vector<64xf32> to vector<64x1xf32>
    %406 = vector.broadcast %405 : vector<64x1xf32> to vector<64x24xf32>
    %407 = arith.subf %403, %406 : vector<64x24xf32>
    %408 = math.exp %407 : vector<64x24xf32>
    %cst_192 = arith.constant dense<0.000000e+00> : vector<64xf32>
    %409 = vector.multi_reduction <add>, %408, %cst_192 [1] : vector<64x24xf32> to vector<64xf32>
    %410 = vector.shape_cast %409 : vector<64xf32> to vector<64x1xf32>
    %411 = tpu.reciprocal %410 {approx = true} : vector<64x1xf32> -> vector<64x1xf32>
    %412 = vector.broadcast %411 : vector<64x1xf32> to vector<64x24xf32>
    %413 = arith.mulf %408, %412 : vector<64x24xf32>
    %414 = arith.truncf %413 : vector<64x24xf32> to vector<64x24xbf16>
    %415 = arith.truncf %393 : vector<24x32xf32> to vector<24x32xbf16>
    %cst_193 = arith.constant dense<0.000000e+00> : vector<64x32xf32>
    %416 = tpu.matmul %414, %415, %cst_193 {dimension_numbers = #tpu.dot_dimension_numbers<[1], [0], [0], [1], [0, 0, 1, 1], [], []>} : vector<64x24xbf16>, vector<24x32xbf16>, vector<64x32xf32> -> vector<64x32xf32>
    %417 = arith.mulf %416, %1 : vector<64x32xf32>
    %418 = vector.extract_strided_slice %417 {offsets = [0, 0], sizes = [16, 32], strides = [1, 1]} : vector<64x32xf32> to vector<16x32xf32>
    %419 = vector.extract_strided_slice %417 {offsets = [16, 0], sizes = [16, 32], strides = [1, 1]} : vector<64x32xf32> to vector<16x32xf32>
    %420 = arith.addf %418, %419 : vector<16x32xf32>
    %421 = vector.extract_strided_slice %417 {offsets = [32, 0], sizes = [16, 32], strides = [1, 1]} : vector<64x32xf32> to vector<16x32xf32>
    %422 = arith.addf %420, %421 : vector<16x32xf32>
    %423 = vector.extract_strided_slice %417 {offsets = [48, 0], sizes = [16, 32], strides = [1, 1]} : vector<64x32xf32> to vector<16x32xf32>
    %424 = arith.addf %422, %423 : vector<16x32xf32>
    %425 = arith.truncf %424 : vector<16x32xf32> to vector<16x32xbf16>
    %cst_194 = arith.constant dense<0.000000e+00> : vector<16x32xf32>
    %426 = tpu.matmul %425, %395, %cst_194 {dimension_numbers = #tpu.dot_dimension_numbers<[1], [0], [0], [1], [0, 0, 1, 1], [], []>} : vector<16x32xbf16>, vector<32x32xbf16>, vector<16x32xf32> -> vector<16x32xf32>
    %427 = arith.addf %274, %426 : vector<16x32xf32>
    %428 = vector.broadcast %397 : vector<1x32xf32> to vector<16x32xf32>
    %429 = arith.addf %427, %428 : vector<16x32xf32>
    %c1_195 = arith.constant 1 : index
    %c0_196 = arith.constant 0 : index
    %c0_197 = arith.constant 0 : index
    %430 = vector.load %arg17[%c1_195, %c0_196, %c0_197] : memref<4x1x32xf32, #tpu.memory_space<vmem>>, vector<1x1x32xf32>
    %431 = vector.shape_cast %430 : vector<1x1x32xf32> to vector<1x32xf32>
    %c1_198 = arith.constant 1 : index
    %c0_199 = arith.constant 0 : index
    %c0_200 = arith.constant 0 : index
    %432 = vector.load %arg18[%c1_198, %c0_199, %c0_200] : memref<4x1x32xf32, #tpu.memory_space<vmem>>, vector<1x1x32xf32>
    %433 = vector.shape_cast %432 : vector<1x1x32xf32> to vector<1x32xf32>
    %c1_201 = arith.constant 1 : index
    %c0_202 = arith.constant 0 : index
    %c0_203 = arith.constant 0 : index
    %434 = vector.load %arg19[%c1_201, %c0_202, %c0_203] : memref<4x32x128xbf16, #tpu.memory_space<vmem>>, vector<1x32x128xbf16>
    %435 = vector.shape_cast %434 : vector<1x32x128xbf16> to vector<32x128xbf16>
    %c1_204 = arith.constant 1 : index
    %c0_205 = arith.constant 0 : index
    %c0_206 = arith.constant 0 : index
    %436 = vector.load %arg20[%c1_204, %c0_205, %c0_206] : memref<4x1x128xf32, #tpu.memory_space<vmem>>, vector<1x1x128xf32>
    %437 = vector.shape_cast %436 : vector<1x1x128xf32> to vector<1x128xf32>
    %c1_207 = arith.constant 1 : index
    %c0_208 = arith.constant 0 : index
    %c0_209 = arith.constant 0 : index
    %438 = vector.load %arg21[%c1_207, %c0_208, %c0_209] : memref<4x128x32xbf16, #tpu.memory_space<vmem>>, vector<1x128x32xbf16>
    %439 = vector.shape_cast %438 : vector<1x128x32xbf16> to vector<128x32xbf16>
    %c1_210 = arith.constant 1 : index
    %c0_211 = arith.constant 0 : index
    %c0_212 = arith.constant 0 : index
    %440 = vector.load %arg22[%c1_210, %c0_211, %c0_212] : memref<4x1x32xf32, #tpu.memory_space<vmem>>, vector<1x1x32xf32>
    %441 = vector.shape_cast %440 : vector<1x1x32xf32> to vector<1x32xf32>
    %cst_213 = arith.constant dense<0.000000e+00> : vector<8xf32>
    %442 = vector.multi_reduction <add>, %390, %cst_213 [1] : vector<8x32xf32> to vector<8xf32>
    %443 = vector.shape_cast %442 : vector<8xf32> to vector<8x1xf32>
    %cst_214 = arith.constant 3.200000e+01 : f32
    %444 = vector.broadcast %cst_214 : f32 to vector<8x1xf32>
    %445 = arith.divf %443, %444 : vector<8x1xf32>
    %446 = vector.broadcast %445 : vector<8x1xf32> to vector<8x32xf32>
    %447 = arith.subf %390, %446 : vector<8x32xf32>
    %448 = arith.mulf %447, %447 : vector<8x32xf32>
    %cst_215 = arith.constant dense<0.000000e+00> : vector<8xf32>
    %449 = vector.multi_reduction <add>, %448, %cst_215 [1] : vector<8x32xf32> to vector<8xf32>
    %450 = vector.shape_cast %449 : vector<8xf32> to vector<8x1xf32>
    %cst_216 = arith.constant 3.200000e+01 : f32
    %451 = vector.broadcast %cst_216 : f32 to vector<8x1xf32>
    %452 = arith.divf %450, %451 : vector<8x1xf32>
    %453 = vector.broadcast %445 : vector<8x1xf32> to vector<8x32xf32>
    %454 = arith.subf %390, %453 : vector<8x32xf32>
    %cst_217 = arith.constant 9.99999997E-7 : f32
    %455 = vector.broadcast %cst_217 : f32 to vector<8x1xf32>
    %456 = arith.addf %452, %455 : vector<8x1xf32>
    %457 = math.rsqrt %456 : vector<8x1xf32>
    %458 = vector.broadcast %457 : vector<8x1xf32> to vector<8x32xf32>
    %459 = arith.mulf %454, %458 : vector<8x32xf32>
    %460 = vector.broadcast %431 : vector<1x32xf32> to vector<8x32xf32>
    %461 = arith.mulf %459, %460 : vector<8x32xf32>
    %462 = vector.broadcast %433 : vector<1x32xf32> to vector<8x32xf32>
    %463 = arith.addf %461, %462 : vector<8x32xf32>
    %464 = arith.truncf %463 : vector<8x32xf32> to vector<8x32xbf16>
    %cst_218 = arith.constant dense<0.000000e+00> : vector<8x128xf32>
    %465 = tpu.matmul %464, %435, %cst_218 {dimension_numbers = #tpu.dot_dimension_numbers<[1], [0], [0], [1], [0, 0, 1, 1], [], []>} : vector<8x32xbf16>, vector<32x128xbf16>, vector<8x128xf32> -> vector<8x128xf32>
    %466 = vector.broadcast %437 : vector<1x128xf32> to vector<8x128xf32>
    %467 = arith.addf %465, %466 : vector<8x128xf32>
    %468 = arith.mulf %467, %467 : vector<8x128xf32>
    %469 = arith.mulf %467, %468 : vector<8x128xf32>
    %cst_219 = arith.constant 4.471500e-02 : f32
    %470 = vector.broadcast %cst_219 : f32 to vector<8x128xf32>
    %471 = arith.mulf %470, %469 : vector<8x128xf32>
    %472 = arith.addf %467, %471 : vector<8x128xf32>
    %cst_220 = arith.constant 0.797884583 : f32
    %473 = vector.broadcast %cst_220 : f32 to vector<8x128xf32>
    %474 = arith.mulf %473, %472 : vector<8x128xf32>
    %475 = math.tanh %474 : vector<8x128xf32>
    %cst_221 = arith.constant 1.000000e+00 : f32
    %476 = vector.broadcast %cst_221 : f32 to vector<8x128xf32>
    %477 = arith.addf %476, %475 : vector<8x128xf32>
    %cst_222 = arith.constant 5.000000e-01 : f32
    %478 = vector.broadcast %cst_222 : f32 to vector<8x128xf32>
    %479 = arith.mulf %478, %477 : vector<8x128xf32>
    %480 = arith.mulf %467, %479 : vector<8x128xf32>
    %481 = arith.truncf %480 : vector<8x128xf32> to vector<8x128xbf16>
    %cst_223 = arith.constant dense<0.000000e+00> : vector<8x32xf32>
    %482 = tpu.matmul %481, %439, %cst_223 {dimension_numbers = #tpu.dot_dimension_numbers<[1], [0], [0], [1], [0, 0, 1, 1], [], []>} : vector<8x128xbf16>, vector<128x32xbf16>, vector<8x32xf32> -> vector<8x32xf32>
    %483 = vector.broadcast %441 : vector<1x32xf32> to vector<8x32xf32>
    %484 = arith.addf %482, %483 : vector<8x32xf32>
    %485 = arith.addf %390, %484 : vector<8x32xf32>
    %c1_224 = arith.constant 1 : index
    %c0_225 = arith.constant 0 : index
    %c0_226 = arith.constant 0 : index
    %486 = vector.load %arg23[%c1_224, %c0_225, %c0_226] : memref<4x1x32xf32, #tpu.memory_space<vmem>>, vector<1x1x32xf32>
    %487 = vector.shape_cast %486 : vector<1x1x32xf32> to vector<1x32xf32>
    %c1_227 = arith.constant 1 : index
    %c0_228 = arith.constant 0 : index
    %c0_229 = arith.constant 0 : index
    %488 = vector.load %arg24[%c1_227, %c0_228, %c0_229] : memref<4x1x32xf32, #tpu.memory_space<vmem>>, vector<1x1x32xf32>
    %489 = vector.shape_cast %488 : vector<1x1x32xf32> to vector<1x32xf32>
    %c1_230 = arith.constant 1 : index
    %c0_231 = arith.constant 0 : index
    %c0_232 = arith.constant 0 : index
    %490 = vector.load %arg25[%c1_230, %c0_231, %c0_232] : memref<4x32x128xbf16, #tpu.memory_space<vmem>>, vector<1x32x128xbf16>
    %491 = vector.shape_cast %490 : vector<1x32x128xbf16> to vector<32x128xbf16>
    %c1_233 = arith.constant 1 : index
    %c0_234 = arith.constant 0 : index
    %c0_235 = arith.constant 0 : index
    %492 = vector.load %arg26[%c1_233, %c0_234, %c0_235] : memref<4x1x128xf32, #tpu.memory_space<vmem>>, vector<1x1x128xf32>
    %493 = vector.shape_cast %492 : vector<1x1x128xf32> to vector<1x128xf32>
    %c1_236 = arith.constant 1 : index
    %c0_237 = arith.constant 0 : index
    %c0_238 = arith.constant 0 : index
    %494 = vector.load %arg27[%c1_236, %c0_237, %c0_238] : memref<4x128x32xbf16, #tpu.memory_space<vmem>>, vector<1x128x32xbf16>
    %495 = vector.shape_cast %494 : vector<1x128x32xbf16> to vector<128x32xbf16>
    %c1_239 = arith.constant 1 : index
    %c0_240 = arith.constant 0 : index
    %c0_241 = arith.constant 0 : index
    %496 = vector.load %arg28[%c1_239, %c0_240, %c0_241] : memref<4x1x32xf32, #tpu.memory_space<vmem>>, vector<1x1x32xf32>
    %497 = vector.shape_cast %496 : vector<1x1x32xf32> to vector<1x32xf32>
    %cst_242 = arith.constant dense<0.000000e+00> : vector<16xf32>
    %498 = vector.multi_reduction <add>, %429, %cst_242 [1] : vector<16x32xf32> to vector<16xf32>
    %499 = vector.shape_cast %498 : vector<16xf32> to vector<16x1xf32>
    %cst_243 = arith.constant 3.200000e+01 : f32
    %500 = vector.broadcast %cst_243 : f32 to vector<16x1xf32>
    %501 = arith.divf %499, %500 : vector<16x1xf32>
    %502 = vector.broadcast %501 : vector<16x1xf32> to vector<16x32xf32>
    %503 = arith.subf %429, %502 : vector<16x32xf32>
    %504 = arith.mulf %503, %503 : vector<16x32xf32>
    %cst_244 = arith.constant dense<0.000000e+00> : vector<16xf32>
    %505 = vector.multi_reduction <add>, %504, %cst_244 [1] : vector<16x32xf32> to vector<16xf32>
    %506 = vector.shape_cast %505 : vector<16xf32> to vector<16x1xf32>
    %cst_245 = arith.constant 3.200000e+01 : f32
    %507 = vector.broadcast %cst_245 : f32 to vector<16x1xf32>
    %508 = arith.divf %506, %507 : vector<16x1xf32>
    %509 = vector.broadcast %501 : vector<16x1xf32> to vector<16x32xf32>
    %510 = arith.subf %429, %509 : vector<16x32xf32>
    %cst_246 = arith.constant 9.99999997E-7 : f32
    %511 = vector.broadcast %cst_246 : f32 to vector<16x1xf32>
    %512 = arith.addf %508, %511 : vector<16x1xf32>
    %513 = math.rsqrt %512 : vector<16x1xf32>
    %514 = vector.broadcast %513 : vector<16x1xf32> to vector<16x32xf32>
    %515 = arith.mulf %510, %514 : vector<16x32xf32>
    %516 = vector.broadcast %487 : vector<1x32xf32> to vector<16x32xf32>
    %517 = arith.mulf %515, %516 : vector<16x32xf32>
    %518 = vector.broadcast %489 : vector<1x32xf32> to vector<16x32xf32>
    %519 = arith.addf %517, %518 : vector<16x32xf32>
    %520 = arith.truncf %519 : vector<16x32xf32> to vector<16x32xbf16>
    %cst_247 = arith.constant dense<0.000000e+00> : vector<16x128xf32>
    %521 = tpu.matmul %520, %491, %cst_247 {dimension_numbers = #tpu.dot_dimension_numbers<[1], [0], [0], [1], [0, 0, 1, 1], [], []>} : vector<16x32xbf16>, vector<32x128xbf16>, vector<16x128xf32> -> vector<16x128xf32>
    %522 = vector.broadcast %493 : vector<1x128xf32> to vector<16x128xf32>
    %523 = arith.addf %521, %522 : vector<16x128xf32>
    %524 = arith.mulf %523, %523 : vector<16x128xf32>
    %525 = arith.mulf %523, %524 : vector<16x128xf32>
    %cst_248 = arith.constant 4.471500e-02 : f32
    %526 = vector.broadcast %cst_248 : f32 to vector<16x128xf32>
    %527 = arith.mulf %526, %525 : vector<16x128xf32>
    %528 = arith.addf %523, %527 : vector<16x128xf32>
    %cst_249 = arith.constant 0.797884583 : f32
    %529 = vector.broadcast %cst_249 : f32 to vector<16x128xf32>
    %530 = arith.mulf %529, %528 : vector<16x128xf32>
    %531 = math.tanh %530 : vector<16x128xf32>
    %cst_250 = arith.constant 1.000000e+00 : f32
    %532 = vector.broadcast %cst_250 : f32 to vector<16x128xf32>
    %533 = arith.addf %532, %531 : vector<16x128xf32>
    %cst_251 = arith.constant 5.000000e-01 : f32
    %534 = vector.broadcast %cst_251 : f32 to vector<16x128xf32>
    %535 = arith.mulf %534, %533 : vector<16x128xf32>
    %536 = arith.mulf %523, %535 : vector<16x128xf32>
    %537 = arith.truncf %536 : vector<16x128xf32> to vector<16x128xbf16>
    %cst_252 = arith.constant dense<0.000000e+00> : vector<16x32xf32>
    %538 = tpu.matmul %537, %495, %cst_252 {dimension_numbers = #tpu.dot_dimension_numbers<[1], [0], [0], [1], [0, 0, 1, 1], [], []>} : vector<16x128xbf16>, vector<128x32xbf16>, vector<16x32xf32> -> vector<16x32xf32>
    %539 = vector.broadcast %497 : vector<1x32xf32> to vector<16x32xf32>
    %540 = arith.addf %538, %539 : vector<16x32xf32>
    %541 = arith.addf %429, %540 : vector<16x32xf32>
    %cst_253 = arith.constant dense<0.000000e+00> : vector<8xf32>
    %542 = vector.multi_reduction <add>, %485, %cst_253 [1] : vector<8x32xf32> to vector<8xf32>
    %543 = vector.shape_cast %542 : vector<8xf32> to vector<8x1xf32>
    %cst_254 = arith.constant 3.200000e+01 : f32
    %544 = vector.broadcast %cst_254 : f32 to vector<8x1xf32>
    %545 = arith.divf %543, %544 : vector<8x1xf32>
    %546 = vector.broadcast %545 : vector<8x1xf32> to vector<8x32xf32>
    %547 = arith.subf %485, %546 : vector<8x32xf32>
    %548 = arith.mulf %547, %547 : vector<8x32xf32>
    %cst_255 = arith.constant dense<0.000000e+00> : vector<8xf32>
    %549 = vector.multi_reduction <add>, %548, %cst_255 [1] : vector<8x32xf32> to vector<8xf32>
    %550 = vector.shape_cast %549 : vector<8xf32> to vector<8x1xf32>
    %cst_256 = arith.constant 3.200000e+01 : f32
    %551 = vector.broadcast %cst_256 : f32 to vector<8x1xf32>
    %552 = arith.divf %550, %551 : vector<8x1xf32>
    %553 = vector.broadcast %545 : vector<8x1xf32> to vector<8x32xf32>
    %554 = arith.subf %485, %553 : vector<8x32xf32>
    %cst_257 = arith.constant 9.99999997E-7 : f32
    %555 = vector.broadcast %cst_257 : f32 to vector<8x1xf32>
    %556 = arith.addf %552, %555 : vector<8x1xf32>
    %557 = math.rsqrt %556 : vector<8x1xf32>
    %558 = vector.broadcast %557 : vector<8x1xf32> to vector<8x32xf32>
    %559 = arith.mulf %554, %558 : vector<8x32xf32>
    %cst_258 = arith.constant dense<0.000000e+00> : vector<16xf32>
    %560 = vector.multi_reduction <add>, %541, %cst_258 [1] : vector<16x32xf32> to vector<16xf32>
    %561 = vector.shape_cast %560 : vector<16xf32> to vector<16x1xf32>
    %cst_259 = arith.constant 3.200000e+01 : f32
    %562 = vector.broadcast %cst_259 : f32 to vector<16x1xf32>
    %563 = arith.divf %561, %562 : vector<16x1xf32>
    %564 = vector.broadcast %563 : vector<16x1xf32> to vector<16x32xf32>
    %565 = arith.subf %541, %564 : vector<16x32xf32>
    %566 = arith.mulf %565, %565 : vector<16x32xf32>
    %cst_260 = arith.constant dense<0.000000e+00> : vector<16xf32>
    %567 = vector.multi_reduction <add>, %566, %cst_260 [1] : vector<16x32xf32> to vector<16xf32>
    %568 = vector.shape_cast %567 : vector<16xf32> to vector<16x1xf32>
    %cst_261 = arith.constant 3.200000e+01 : f32
    %569 = vector.broadcast %cst_261 : f32 to vector<16x1xf32>
    %570 = arith.divf %568, %569 : vector<16x1xf32>
    %571 = vector.broadcast %563 : vector<16x1xf32> to vector<16x32xf32>
    %572 = arith.subf %541, %571 : vector<16x32xf32>
    %cst_262 = arith.constant 9.99999997E-7 : f32
    %573 = vector.broadcast %cst_262 : f32 to vector<16x1xf32>
    %574 = arith.addf %570, %573 : vector<16x1xf32>
    %575 = math.rsqrt %574 : vector<16x1xf32>
    %576 = vector.broadcast %575 : vector<16x1xf32> to vector<16x32xf32>
    %577 = arith.mulf %572, %576 : vector<16x32xf32>
    %c2 = arith.constant 2 : index
    %c0_263 = arith.constant 0 : index
    %c0_264 = arith.constant 0 : index
    %578 = vector.load %arg3[%c2, %c0_263, %c0_264] : memref<4x1x32xf32, #tpu.memory_space<vmem>>, vector<1x1x32xf32>
    %579 = vector.shape_cast %578 : vector<1x1x32xf32> to vector<1x32xf32>
    %580 = vector.broadcast %579 : vector<1x32xf32> to vector<8x32xf32>
    %581 = arith.mulf %559, %580 : vector<8x32xf32>
    %c2_265 = arith.constant 2 : index
    %c0_266 = arith.constant 0 : index
    %c0_267 = arith.constant 0 : index
    %582 = vector.load %arg4[%c2_265, %c0_266, %c0_267] : memref<4x1x32xf32, #tpu.memory_space<vmem>>, vector<1x1x32xf32>
    %583 = vector.shape_cast %582 : vector<1x1x32xf32> to vector<1x32xf32>
    %584 = vector.broadcast %583 : vector<1x32xf32> to vector<8x32xf32>
    %585 = arith.addf %581, %584 : vector<8x32xf32>
    %c2_268 = arith.constant 2 : index
    %c0_269 = arith.constant 0 : index
    %c0_270 = arith.constant 0 : index
    %586 = vector.load %arg5[%c2_268, %c0_269, %c0_270] : memref<4x1x32xf32, #tpu.memory_space<vmem>>, vector<1x1x32xf32>
    %587 = vector.shape_cast %586 : vector<1x1x32xf32> to vector<1x32xf32>
    %588 = vector.broadcast %587 : vector<1x32xf32> to vector<16x32xf32>
    %589 = arith.mulf %577, %588 : vector<16x32xf32>
    %c2_271 = arith.constant 2 : index
    %c0_272 = arith.constant 0 : index
    %c0_273 = arith.constant 0 : index
    %590 = vector.load %arg6[%c2_271, %c0_272, %c0_273] : memref<4x1x32xf32, #tpu.memory_space<vmem>>, vector<1x1x32xf32>
    %591 = vector.shape_cast %590 : vector<1x1x32xf32> to vector<1x32xf32>
    %592 = vector.broadcast %591 : vector<1x32xf32> to vector<16x32xf32>
    %593 = arith.addf %589, %592 : vector<16x32xf32>
    %c2_274 = arith.constant 2 : index
    %c0_275 = arith.constant 0 : index
    %c0_276 = arith.constant 0 : index
    %594 = vector.load %arg7[%c2_274, %c0_275, %c0_276] : memref<4x1x32xf32, #tpu.memory_space<vmem>>, vector<1x1x32xf32>
    %595 = vector.shape_cast %594 : vector<1x1x32xf32> to vector<1x32xf32>
    %596 = vector.broadcast %595 : vector<1x32xf32> to vector<16x32xf32>
    %597 = arith.mulf %577, %596 : vector<16x32xf32>
    %c2_277 = arith.constant 2 : index
    %c0_278 = arith.constant 0 : index
    %c0_279 = arith.constant 0 : index
    %598 = vector.load %arg8[%c2_277, %c0_278, %c0_279] : memref<4x1x32xf32, #tpu.memory_space<vmem>>, vector<1x1x32xf32>
    %599 = vector.shape_cast %598 : vector<1x1x32xf32> to vector<1x32xf32>
    %600 = vector.broadcast %599 : vector<1x32xf32> to vector<16x32xf32>
    %601 = arith.addf %597, %600 : vector<16x32xf32>
    %c2_280 = arith.constant 2 : index
    %c0_281 = arith.constant 0 : index
    %c0_282 = arith.constant 0 : index
    %602 = vector.load %arg9[%c2_280, %c0_281, %c0_282] : memref<4x1x32xf32, #tpu.memory_space<vmem>>, vector<1x1x32xf32>
    %603 = vector.shape_cast %602 : vector<1x1x32xf32> to vector<1x32xf32>
    %604 = vector.broadcast %603 : vector<1x32xf32> to vector<8x32xf32>
    %605 = arith.mulf %559, %604 : vector<8x32xf32>
    %c2_283 = arith.constant 2 : index
    %c0_284 = arith.constant 0 : index
    %c0_285 = arith.constant 0 : index
    %606 = vector.load %arg10[%c2_283, %c0_284, %c0_285] : memref<4x1x32xf32, #tpu.memory_space<vmem>>, vector<1x1x32xf32>
    %607 = vector.shape_cast %606 : vector<1x1x32xf32> to vector<1x32xf32>
    %608 = vector.broadcast %607 : vector<1x32xf32> to vector<8x32xf32>
    %609 = arith.addf %605, %608 : vector<8x32xf32>
    %610 = tpu.concatenate %585, %593, %601, %609 in 0 : vector<8x32xf32>, vector<16x32xf32>, vector<16x32xf32>, vector<8x32xf32> -> vector<48x32xf32>
    %611 = arith.truncf %610 : vector<48x32xf32> to vector<48x32xbf16>
    %c2_286 = arith.constant 2 : index
    %c0_287 = arith.constant 0 : index
    %c0_288 = arith.constant 0 : index
    %612 = vector.load %arg11[%c2_286, %c0_287, %c0_288] : memref<4x32x192xbf16, #tpu.memory_space<vmem>>, vector<1x32x192xbf16>
    %613 = vector.shape_cast %612 : vector<1x32x192xbf16> to vector<32x192xbf16>
    %cst_289 = arith.constant dense<0.000000e+00> : vector<48x192xf32>
    %614 = tpu.matmul %611, %613, %cst_289 {dimension_numbers = #tpu.dot_dimension_numbers<[1], [0], [0], [1], [0, 0, 1, 1], [], []>} : vector<48x32xbf16>, vector<32x192xbf16>, vector<48x192xf32> -> vector<48x192xf32>
    %c2_290 = arith.constant 2 : index
    %c0_291 = arith.constant 0 : index
    %c0_292 = arith.constant 0 : index
    %615 = vector.load %arg12[%c2_290, %c0_291, %c0_292] : memref<4x1x192xf32, #tpu.memory_space<vmem>>, vector<1x1x192xf32>
    %616 = vector.shape_cast %615 : vector<1x1x192xf32> to vector<1x192xf32>
    %617 = vector.broadcast %616 : vector<1x192xf32> to vector<48x192xf32>
    %618 = arith.addf %614, %617 : vector<48x192xf32>
    %619 = vector.extract_strided_slice %618 {offsets = [0, 0], sizes = [8, 32], strides = [1, 1]} : vector<48x192xf32> to vector<8x32xf32>
    %620 = vector.extract_strided_slice %618 {offsets = [0, 32], sizes = [24, 32], strides = [1, 1]} : vector<48x192xf32> to vector<24x32xf32>
    %621 = vector.extract_strided_slice %618 {offsets = [0, 64], sizes = [24, 32], strides = [1, 1]} : vector<48x192xf32> to vector<24x32xf32>
    %c2_293 = arith.constant 2 : index
    %c0_294 = arith.constant 0 : index
    %c0_295 = arith.constant 0 : index
    %622 = vector.load %arg13[%c2_293, %c0_294, %c0_295] : memref<4x32x32xbf16, #tpu.memory_space<vmem>>, vector<1x32x32xbf16>
    %623 = vector.shape_cast %622 : vector<1x32x32xbf16> to vector<32x32xbf16>
    %c2_296 = arith.constant 2 : index
    %c0_297 = arith.constant 0 : index
    %c0_298 = arith.constant 0 : index
    %624 = vector.load %arg14[%c2_296, %c0_297, %c0_298] : memref<4x1x32xf32, #tpu.memory_space<vmem>>, vector<1x1x32xf32>
    %625 = vector.shape_cast %624 : vector<1x1x32xf32> to vector<1x32xf32>
    %626 = tpu.concatenate %619, %619, %619, %619 in 0 : vector<8x32xf32>, vector<8x32xf32>, vector<8x32xf32>, vector<8x32xf32> -> vector<32x32xf32>
    %627 = arith.mulf %626, %0 : vector<32x32xf32>
    %628 = arith.truncf %627 : vector<32x32xf32> to vector<32x32xbf16>
    %629 = arith.truncf %620 : vector<24x32xf32> to vector<24x32xbf16>
    %cst_299 = arith.constant dense<0.000000e+00> : vector<32x24xf32>
    %630 = tpu.matmul %628, %629, %cst_299 {dimension_numbers = #tpu.dot_dimension_numbers<[1], [1], [0], [0], [0, 0, 1, 0], [], []>} : vector<32x32xbf16>, vector<24x32xbf16>, vector<32x24xf32> -> vector<32x24xf32>
    %631 = arith.addf %630, %2 : vector<32x24xf32>
    %cst_300 = arith.constant dense<0xFF800000> : vector<32xf32>
    %632 = vector.multi_reduction <maximumf>, %631, %cst_300 [1] : vector<32x24xf32> to vector<32xf32>
    %633 = vector.shape_cast %632 : vector<32xf32> to vector<32x1xf32>
    %634 = vector.broadcast %633 : vector<32x1xf32> to vector<32x24xf32>
    %635 = arith.subf %631, %634 : vector<32x24xf32>
    %636 = math.exp %635 : vector<32x24xf32>
    %cst_301 = arith.constant dense<0.000000e+00> : vector<32xf32>
    %637 = vector.multi_reduction <add>, %636, %cst_301 [1] : vector<32x24xf32> to vector<32xf32>
    %638 = vector.shape_cast %637 : vector<32xf32> to vector<32x1xf32>
    %639 = tpu.reciprocal %638 {approx = true} : vector<32x1xf32> -> vector<32x1xf32>
    %640 = vector.broadcast %639 : vector<32x1xf32> to vector<32x24xf32>
    %641 = arith.mulf %636, %640 : vector<32x24xf32>
    %642 = arith.truncf %641 : vector<32x24xf32> to vector<32x24xbf16>
    %643 = arith.truncf %621 : vector<24x32xf32> to vector<24x32xbf16>
    %cst_302 = arith.constant dense<0.000000e+00> : vector<32x32xf32>
    %644 = tpu.matmul %642, %643, %cst_302 {dimension_numbers = #tpu.dot_dimension_numbers<[1], [0], [0], [1], [0, 0, 1, 1], [], []>} : vector<32x24xbf16>, vector<24x32xbf16>, vector<32x32xf32> -> vector<32x32xf32>
    %645 = arith.mulf %644, %0 : vector<32x32xf32>
    %646 = vector.extract_strided_slice %645 {offsets = [0, 0], sizes = [8, 32], strides = [1, 1]} : vector<32x32xf32> to vector<8x32xf32>
    %647 = vector.extract_strided_slice %645 {offsets = [8, 0], sizes = [8, 32], strides = [1, 1]} : vector<32x32xf32> to vector<8x32xf32>
    %648 = arith.addf %646, %647 : vector<8x32xf32>
    %649 = vector.extract_strided_slice %645 {offsets = [16, 0], sizes = [8, 32], strides = [1, 1]} : vector<32x32xf32> to vector<8x32xf32>
    %650 = arith.addf %648, %649 : vector<8x32xf32>
    %651 = vector.extract_strided_slice %645 {offsets = [24, 0], sizes = [8, 32], strides = [1, 1]} : vector<32x32xf32> to vector<8x32xf32>
    %652 = arith.addf %650, %651 : vector<8x32xf32>
    %653 = arith.truncf %652 : vector<8x32xf32> to vector<8x32xbf16>
    %cst_303 = arith.constant dense<0.000000e+00> : vector<8x32xf32>
    %654 = tpu.matmul %653, %623, %cst_303 {dimension_numbers = #tpu.dot_dimension_numbers<[1], [0], [0], [1], [0, 0, 1, 1], [], []>} : vector<8x32xbf16>, vector<32x32xbf16>, vector<8x32xf32> -> vector<8x32xf32>
    %655 = arith.addf %485, %654 : vector<8x32xf32>
    %656 = vector.broadcast %625 : vector<1x32xf32> to vector<8x32xf32>
    %657 = arith.addf %655, %656 : vector<8x32xf32>
    %658 = vector.extract_strided_slice %618 {offsets = [24, 96], sizes = [16, 32], strides = [1, 1]} : vector<48x192xf32> to vector<16x32xf32>
    %659 = vector.extract_strided_slice %618 {offsets = [24, 128], sizes = [24, 32], strides = [1, 1]} : vector<48x192xf32> to vector<24x32xf32>
    %660 = vector.extract_strided_slice %618 {offsets = [24, 160], sizes = [24, 32], strides = [1, 1]} : vector<48x192xf32> to vector<24x32xf32>
    %c2_304 = arith.constant 2 : index
    %c0_305 = arith.constant 0 : index
    %c0_306 = arith.constant 0 : index
    %661 = vector.load %arg15[%c2_304, %c0_305, %c0_306] : memref<4x32x32xbf16, #tpu.memory_space<vmem>>, vector<1x32x32xbf16>
    %662 = vector.shape_cast %661 : vector<1x32x32xbf16> to vector<32x32xbf16>
    %c2_307 = arith.constant 2 : index
    %c0_308 = arith.constant 0 : index
    %c0_309 = arith.constant 0 : index
    %663 = vector.load %arg16[%c2_307, %c0_308, %c0_309] : memref<4x1x32xf32, #tpu.memory_space<vmem>>, vector<1x1x32xf32>
    %664 = vector.shape_cast %663 : vector<1x1x32xf32> to vector<1x32xf32>
    %665 = tpu.concatenate %658, %658, %658, %658 in 0 : vector<16x32xf32>, vector<16x32xf32>, vector<16x32xf32>, vector<16x32xf32> -> vector<64x32xf32>
    %666 = arith.mulf %665, %1 : vector<64x32xf32>
    %667 = arith.truncf %666 : vector<64x32xf32> to vector<64x32xbf16>
    %668 = arith.truncf %659 : vector<24x32xf32> to vector<24x32xbf16>
    %cst_310 = arith.constant dense<0.000000e+00> : vector<64x24xf32>
    %669 = tpu.matmul %667, %668, %cst_310 {dimension_numbers = #tpu.dot_dimension_numbers<[1], [1], [0], [0], [0, 0, 1, 0], [], []>} : vector<64x32xbf16>, vector<24x32xbf16>, vector<64x24xf32> -> vector<64x24xf32>
    %670 = arith.addf %669, %3 : vector<64x24xf32>
    %cst_311 = arith.constant dense<0xFF800000> : vector<64xf32>
    %671 = vector.multi_reduction <maximumf>, %670, %cst_311 [1] : vector<64x24xf32> to vector<64xf32>
    %672 = vector.shape_cast %671 : vector<64xf32> to vector<64x1xf32>
    %673 = vector.broadcast %672 : vector<64x1xf32> to vector<64x24xf32>
    %674 = arith.subf %670, %673 : vector<64x24xf32>
    %675 = math.exp %674 : vector<64x24xf32>
    %cst_312 = arith.constant dense<0.000000e+00> : vector<64xf32>
    %676 = vector.multi_reduction <add>, %675, %cst_312 [1] : vector<64x24xf32> to vector<64xf32>
    %677 = vector.shape_cast %676 : vector<64xf32> to vector<64x1xf32>
    %678 = tpu.reciprocal %677 {approx = true} : vector<64x1xf32> -> vector<64x1xf32>
    %679 = vector.broadcast %678 : vector<64x1xf32> to vector<64x24xf32>
    %680 = arith.mulf %675, %679 : vector<64x24xf32>
    %681 = arith.truncf %680 : vector<64x24xf32> to vector<64x24xbf16>
    %682 = arith.truncf %660 : vector<24x32xf32> to vector<24x32xbf16>
    %cst_313 = arith.constant dense<0.000000e+00> : vector<64x32xf32>
    %683 = tpu.matmul %681, %682, %cst_313 {dimension_numbers = #tpu.dot_dimension_numbers<[1], [0], [0], [1], [0, 0, 1, 1], [], []>} : vector<64x24xbf16>, vector<24x32xbf16>, vector<64x32xf32> -> vector<64x32xf32>
    %684 = arith.mulf %683, %1 : vector<64x32xf32>
    %685 = vector.extract_strided_slice %684 {offsets = [0, 0], sizes = [16, 32], strides = [1, 1]} : vector<64x32xf32> to vector<16x32xf32>
    %686 = vector.extract_strided_slice %684 {offsets = [16, 0], sizes = [16, 32], strides = [1, 1]} : vector<64x32xf32> to vector<16x32xf32>
    %687 = arith.addf %685, %686 : vector<16x32xf32>
    %688 = vector.extract_strided_slice %684 {offsets = [32, 0], sizes = [16, 32], strides = [1, 1]} : vector<64x32xf32> to vector<16x32xf32>
    %689 = arith.addf %687, %688 : vector<16x32xf32>
    %690 = vector.extract_strided_slice %684 {offsets = [48, 0], sizes = [16, 32], strides = [1, 1]} : vector<64x32xf32> to vector<16x32xf32>
    %691 = arith.addf %689, %690 : vector<16x32xf32>
    %692 = arith.truncf %691 : vector<16x32xf32> to vector<16x32xbf16>
    %cst_314 = arith.constant dense<0.000000e+00> : vector<16x32xf32>
    %693 = tpu.matmul %692, %662, %cst_314 {dimension_numbers = #tpu.dot_dimension_numbers<[1], [0], [0], [1], [0, 0, 1, 1], [], []>} : vector<16x32xbf16>, vector<32x32xbf16>, vector<16x32xf32> -> vector<16x32xf32>
    %694 = arith.addf %541, %693 : vector<16x32xf32>
    %695 = vector.broadcast %664 : vector<1x32xf32> to vector<16x32xf32>
    %696 = arith.addf %694, %695 : vector<16x32xf32>
    %c2_315 = arith.constant 2 : index
    %c0_316 = arith.constant 0 : index
    %c0_317 = arith.constant 0 : index
    %697 = vector.load %arg17[%c2_315, %c0_316, %c0_317] : memref<4x1x32xf32, #tpu.memory_space<vmem>>, vector<1x1x32xf32>
    %698 = vector.shape_cast %697 : vector<1x1x32xf32> to vector<1x32xf32>
    %c2_318 = arith.constant 2 : index
    %c0_319 = arith.constant 0 : index
    %c0_320 = arith.constant 0 : index
    %699 = vector.load %arg18[%c2_318, %c0_319, %c0_320] : memref<4x1x32xf32, #tpu.memory_space<vmem>>, vector<1x1x32xf32>
    %700 = vector.shape_cast %699 : vector<1x1x32xf32> to vector<1x32xf32>
    %c2_321 = arith.constant 2 : index
    %c0_322 = arith.constant 0 : index
    %c0_323 = arith.constant 0 : index
    %701 = vector.load %arg19[%c2_321, %c0_322, %c0_323] : memref<4x32x128xbf16, #tpu.memory_space<vmem>>, vector<1x32x128xbf16>
    %702 = vector.shape_cast %701 : vector<1x32x128xbf16> to vector<32x128xbf16>
    %c2_324 = arith.constant 2 : index
    %c0_325 = arith.constant 0 : index
    %c0_326 = arith.constant 0 : index
    %703 = vector.load %arg20[%c2_324, %c0_325, %c0_326] : memref<4x1x128xf32, #tpu.memory_space<vmem>>, vector<1x1x128xf32>
    %704 = vector.shape_cast %703 : vector<1x1x128xf32> to vector<1x128xf32>
    %c2_327 = arith.constant 2 : index
    %c0_328 = arith.constant 0 : index
    %c0_329 = arith.constant 0 : index
    %705 = vector.load %arg21[%c2_327, %c0_328, %c0_329] : memref<4x128x32xbf16, #tpu.memory_space<vmem>>, vector<1x128x32xbf16>
    %706 = vector.shape_cast %705 : vector<1x128x32xbf16> to vector<128x32xbf16>
    %c2_330 = arith.constant 2 : index
    %c0_331 = arith.constant 0 : index
    %c0_332 = arith.constant 0 : index
    %707 = vector.load %arg22[%c2_330, %c0_331, %c0_332] : memref<4x1x32xf32, #tpu.memory_space<vmem>>, vector<1x1x32xf32>
    %708 = vector.shape_cast %707 : vector<1x1x32xf32> to vector<1x32xf32>
    %cst_333 = arith.constant dense<0.000000e+00> : vector<8xf32>
    %709 = vector.multi_reduction <add>, %657, %cst_333 [1] : vector<8x32xf32> to vector<8xf32>
    %710 = vector.shape_cast %709 : vector<8xf32> to vector<8x1xf32>
    %cst_334 = arith.constant 3.200000e+01 : f32
    %711 = vector.broadcast %cst_334 : f32 to vector<8x1xf32>
    %712 = arith.divf %710, %711 : vector<8x1xf32>
    %713 = vector.broadcast %712 : vector<8x1xf32> to vector<8x32xf32>
    %714 = arith.subf %657, %713 : vector<8x32xf32>
    %715 = arith.mulf %714, %714 : vector<8x32xf32>
    %cst_335 = arith.constant dense<0.000000e+00> : vector<8xf32>
    %716 = vector.multi_reduction <add>, %715, %cst_335 [1] : vector<8x32xf32> to vector<8xf32>
    %717 = vector.shape_cast %716 : vector<8xf32> to vector<8x1xf32>
    %cst_336 = arith.constant 3.200000e+01 : f32
    %718 = vector.broadcast %cst_336 : f32 to vector<8x1xf32>
    %719 = arith.divf %717, %718 : vector<8x1xf32>
    %720 = vector.broadcast %712 : vector<8x1xf32> to vector<8x32xf32>
    %721 = arith.subf %657, %720 : vector<8x32xf32>
    %cst_337 = arith.constant 9.99999997E-7 : f32
    %722 = vector.broadcast %cst_337 : f32 to vector<8x1xf32>
    %723 = arith.addf %719, %722 : vector<8x1xf32>
    %724 = math.rsqrt %723 : vector<8x1xf32>
    %725 = vector.broadcast %724 : vector<8x1xf32> to vector<8x32xf32>
    %726 = arith.mulf %721, %725 : vector<8x32xf32>
    %727 = vector.broadcast %698 : vector<1x32xf32> to vector<8x32xf32>
    %728 = arith.mulf %726, %727 : vector<8x32xf32>
    %729 = vector.broadcast %700 : vector<1x32xf32> to vector<8x32xf32>
    %730 = arith.addf %728, %729 : vector<8x32xf32>
    %731 = arith.truncf %730 : vector<8x32xf32> to vector<8x32xbf16>
    %cst_338 = arith.constant dense<0.000000e+00> : vector<8x128xf32>
    %732 = tpu.matmul %731, %702, %cst_338 {dimension_numbers = #tpu.dot_dimension_numbers<[1], [0], [0], [1], [0, 0, 1, 1], [], []>} : vector<8x32xbf16>, vector<32x128xbf16>, vector<8x128xf32> -> vector<8x128xf32>
    %733 = vector.broadcast %704 : vector<1x128xf32> to vector<8x128xf32>
    %734 = arith.addf %732, %733 : vector<8x128xf32>
    %735 = arith.mulf %734, %734 : vector<8x128xf32>
    %736 = arith.mulf %734, %735 : vector<8x128xf32>
    %cst_339 = arith.constant 4.471500e-02 : f32
    %737 = vector.broadcast %cst_339 : f32 to vector<8x128xf32>
    %738 = arith.mulf %737, %736 : vector<8x128xf32>
    %739 = arith.addf %734, %738 : vector<8x128xf32>
    %cst_340 = arith.constant 0.797884583 : f32
    %740 = vector.broadcast %cst_340 : f32 to vector<8x128xf32>
    %741 = arith.mulf %740, %739 : vector<8x128xf32>
    %742 = math.tanh %741 : vector<8x128xf32>
    %cst_341 = arith.constant 1.000000e+00 : f32
    %743 = vector.broadcast %cst_341 : f32 to vector<8x128xf32>
    %744 = arith.addf %743, %742 : vector<8x128xf32>
    %cst_342 = arith.constant 5.000000e-01 : f32
    %745 = vector.broadcast %cst_342 : f32 to vector<8x128xf32>
    %746 = arith.mulf %745, %744 : vector<8x128xf32>
    %747 = arith.mulf %734, %746 : vector<8x128xf32>
    %748 = arith.truncf %747 : vector<8x128xf32> to vector<8x128xbf16>
    %cst_343 = arith.constant dense<0.000000e+00> : vector<8x32xf32>
    %749 = tpu.matmul %748, %706, %cst_343 {dimension_numbers = #tpu.dot_dimension_numbers<[1], [0], [0], [1], [0, 0, 1, 1], [], []>} : vector<8x128xbf16>, vector<128x32xbf16>, vector<8x32xf32> -> vector<8x32xf32>
    %750 = vector.broadcast %708 : vector<1x32xf32> to vector<8x32xf32>
    %751 = arith.addf %749, %750 : vector<8x32xf32>
    %752 = arith.addf %657, %751 : vector<8x32xf32>
    %c2_344 = arith.constant 2 : index
    %c0_345 = arith.constant 0 : index
    %c0_346 = arith.constant 0 : index
    %753 = vector.load %arg23[%c2_344, %c0_345, %c0_346] : memref<4x1x32xf32, #tpu.memory_space<vmem>>, vector<1x1x32xf32>
    %754 = vector.shape_cast %753 : vector<1x1x32xf32> to vector<1x32xf32>
    %c2_347 = arith.constant 2 : index
    %c0_348 = arith.constant 0 : index
    %c0_349 = arith.constant 0 : index
    %755 = vector.load %arg24[%c2_347, %c0_348, %c0_349] : memref<4x1x32xf32, #tpu.memory_space<vmem>>, vector<1x1x32xf32>
    %756 = vector.shape_cast %755 : vector<1x1x32xf32> to vector<1x32xf32>
    %c2_350 = arith.constant 2 : index
    %c0_351 = arith.constant 0 : index
    %c0_352 = arith.constant 0 : index
    %757 = vector.load %arg25[%c2_350, %c0_351, %c0_352] : memref<4x32x128xbf16, #tpu.memory_space<vmem>>, vector<1x32x128xbf16>
    %758 = vector.shape_cast %757 : vector<1x32x128xbf16> to vector<32x128xbf16>
    %c2_353 = arith.constant 2 : index
    %c0_354 = arith.constant 0 : index
    %c0_355 = arith.constant 0 : index
    %759 = vector.load %arg26[%c2_353, %c0_354, %c0_355] : memref<4x1x128xf32, #tpu.memory_space<vmem>>, vector<1x1x128xf32>
    %760 = vector.shape_cast %759 : vector<1x1x128xf32> to vector<1x128xf32>
    %c2_356 = arith.constant 2 : index
    %c0_357 = arith.constant 0 : index
    %c0_358 = arith.constant 0 : index
    %761 = vector.load %arg27[%c2_356, %c0_357, %c0_358] : memref<4x128x32xbf16, #tpu.memory_space<vmem>>, vector<1x128x32xbf16>
    %762 = vector.shape_cast %761 : vector<1x128x32xbf16> to vector<128x32xbf16>
    %c2_359 = arith.constant 2 : index
    %c0_360 = arith.constant 0 : index
    %c0_361 = arith.constant 0 : index
    %763 = vector.load %arg28[%c2_359, %c0_360, %c0_361] : memref<4x1x32xf32, #tpu.memory_space<vmem>>, vector<1x1x32xf32>
    %764 = vector.shape_cast %763 : vector<1x1x32xf32> to vector<1x32xf32>
    %cst_362 = arith.constant dense<0.000000e+00> : vector<16xf32>
    %765 = vector.multi_reduction <add>, %696, %cst_362 [1] : vector<16x32xf32> to vector<16xf32>
    %766 = vector.shape_cast %765 : vector<16xf32> to vector<16x1xf32>
    %cst_363 = arith.constant 3.200000e+01 : f32
    %767 = vector.broadcast %cst_363 : f32 to vector<16x1xf32>
    %768 = arith.divf %766, %767 : vector<16x1xf32>
    %769 = vector.broadcast %768 : vector<16x1xf32> to vector<16x32xf32>
    %770 = arith.subf %696, %769 : vector<16x32xf32>
    %771 = arith.mulf %770, %770 : vector<16x32xf32>
    %cst_364 = arith.constant dense<0.000000e+00> : vector<16xf32>
    %772 = vector.multi_reduction <add>, %771, %cst_364 [1] : vector<16x32xf32> to vector<16xf32>
    %773 = vector.shape_cast %772 : vector<16xf32> to vector<16x1xf32>
    %cst_365 = arith.constant 3.200000e+01 : f32
    %774 = vector.broadcast %cst_365 : f32 to vector<16x1xf32>
    %775 = arith.divf %773, %774 : vector<16x1xf32>
    %776 = vector.broadcast %768 : vector<16x1xf32> to vector<16x32xf32>
    %777 = arith.subf %696, %776 : vector<16x32xf32>
    %cst_366 = arith.constant 9.99999997E-7 : f32
    %778 = vector.broadcast %cst_366 : f32 to vector<16x1xf32>
    %779 = arith.addf %775, %778 : vector<16x1xf32>
    %780 = math.rsqrt %779 : vector<16x1xf32>
    %781 = vector.broadcast %780 : vector<16x1xf32> to vector<16x32xf32>
    %782 = arith.mulf %777, %781 : vector<16x32xf32>
    %783 = vector.broadcast %754 : vector<1x32xf32> to vector<16x32xf32>
    %784 = arith.mulf %782, %783 : vector<16x32xf32>
    %785 = vector.broadcast %756 : vector<1x32xf32> to vector<16x32xf32>
    %786 = arith.addf %784, %785 : vector<16x32xf32>
    %787 = arith.truncf %786 : vector<16x32xf32> to vector<16x32xbf16>
    %cst_367 = arith.constant dense<0.000000e+00> : vector<16x128xf32>
    %788 = tpu.matmul %787, %758, %cst_367 {dimension_numbers = #tpu.dot_dimension_numbers<[1], [0], [0], [1], [0, 0, 1, 1], [], []>} : vector<16x32xbf16>, vector<32x128xbf16>, vector<16x128xf32> -> vector<16x128xf32>
    %789 = vector.broadcast %760 : vector<1x128xf32> to vector<16x128xf32>
    %790 = arith.addf %788, %789 : vector<16x128xf32>
    %791 = arith.mulf %790, %790 : vector<16x128xf32>
    %792 = arith.mulf %790, %791 : vector<16x128xf32>
    %cst_368 = arith.constant 4.471500e-02 : f32
    %793 = vector.broadcast %cst_368 : f32 to vector<16x128xf32>
    %794 = arith.mulf %793, %792 : vector<16x128xf32>
    %795 = arith.addf %790, %794 : vector<16x128xf32>
    %cst_369 = arith.constant 0.797884583 : f32
    %796 = vector.broadcast %cst_369 : f32 to vector<16x128xf32>
    %797 = arith.mulf %796, %795 : vector<16x128xf32>
    %798 = math.tanh %797 : vector<16x128xf32>
    %cst_370 = arith.constant 1.000000e+00 : f32
    %799 = vector.broadcast %cst_370 : f32 to vector<16x128xf32>
    %800 = arith.addf %799, %798 : vector<16x128xf32>
    %cst_371 = arith.constant 5.000000e-01 : f32
    %801 = vector.broadcast %cst_371 : f32 to vector<16x128xf32>
    %802 = arith.mulf %801, %800 : vector<16x128xf32>
    %803 = arith.mulf %790, %802 : vector<16x128xf32>
    %804 = arith.truncf %803 : vector<16x128xf32> to vector<16x128xbf16>
    %cst_372 = arith.constant dense<0.000000e+00> : vector<16x32xf32>
    %805 = tpu.matmul %804, %762, %cst_372 {dimension_numbers = #tpu.dot_dimension_numbers<[1], [0], [0], [1], [0, 0, 1, 1], [], []>} : vector<16x128xbf16>, vector<128x32xbf16>, vector<16x32xf32> -> vector<16x32xf32>
    %806 = vector.broadcast %764 : vector<1x32xf32> to vector<16x32xf32>
    %807 = arith.addf %805, %806 : vector<16x32xf32>
    %808 = arith.addf %696, %807 : vector<16x32xf32>
    %cst_373 = arith.constant dense<0.000000e+00> : vector<8xf32>
    %809 = vector.multi_reduction <add>, %752, %cst_373 [1] : vector<8x32xf32> to vector<8xf32>
    %810 = vector.shape_cast %809 : vector<8xf32> to vector<8x1xf32>
    %cst_374 = arith.constant 3.200000e+01 : f32
    %811 = vector.broadcast %cst_374 : f32 to vector<8x1xf32>
    %812 = arith.divf %810, %811 : vector<8x1xf32>
    %813 = vector.broadcast %812 : vector<8x1xf32> to vector<8x32xf32>
    %814 = arith.subf %752, %813 : vector<8x32xf32>
    %815 = arith.mulf %814, %814 : vector<8x32xf32>
    %cst_375 = arith.constant dense<0.000000e+00> : vector<8xf32>
    %816 = vector.multi_reduction <add>, %815, %cst_375 [1] : vector<8x32xf32> to vector<8xf32>
    %817 = vector.shape_cast %816 : vector<8xf32> to vector<8x1xf32>
    %cst_376 = arith.constant 3.200000e+01 : f32
    %818 = vector.broadcast %cst_376 : f32 to vector<8x1xf32>
    %819 = arith.divf %817, %818 : vector<8x1xf32>
    %820 = vector.broadcast %812 : vector<8x1xf32> to vector<8x32xf32>
    %821 = arith.subf %752, %820 : vector<8x32xf32>
    %cst_377 = arith.constant 9.99999997E-7 : f32
    %822 = vector.broadcast %cst_377 : f32 to vector<8x1xf32>
    %823 = arith.addf %819, %822 : vector<8x1xf32>
    %824 = math.rsqrt %823 : vector<8x1xf32>
    %825 = vector.broadcast %824 : vector<8x1xf32> to vector<8x32xf32>
    %826 = arith.mulf %821, %825 : vector<8x32xf32>
    %cst_378 = arith.constant dense<0.000000e+00> : vector<16xf32>
    %827 = vector.multi_reduction <add>, %808, %cst_378 [1] : vector<16x32xf32> to vector<16xf32>
    %828 = vector.shape_cast %827 : vector<16xf32> to vector<16x1xf32>
    %cst_379 = arith.constant 3.200000e+01 : f32
    %829 = vector.broadcast %cst_379 : f32 to vector<16x1xf32>
    %830 = arith.divf %828, %829 : vector<16x1xf32>
    %831 = vector.broadcast %830 : vector<16x1xf32> to vector<16x32xf32>
    %832 = arith.subf %808, %831 : vector<16x32xf32>
    %833 = arith.mulf %832, %832 : vector<16x32xf32>
    %cst_380 = arith.constant dense<0.000000e+00> : vector<16xf32>
    %834 = vector.multi_reduction <add>, %833, %cst_380 [1] : vector<16x32xf32> to vector<16xf32>
    %835 = vector.shape_cast %834 : vector<16xf32> to vector<16x1xf32>
    %cst_381 = arith.constant 3.200000e+01 : f32
    %836 = vector.broadcast %cst_381 : f32 to vector<16x1xf32>
    %837 = arith.divf %835, %836 : vector<16x1xf32>
    %838 = vector.broadcast %830 : vector<16x1xf32> to vector<16x32xf32>
    %839 = arith.subf %808, %838 : vector<16x32xf32>
    %cst_382 = arith.constant 9.99999997E-7 : f32
    %840 = vector.broadcast %cst_382 : f32 to vector<16x1xf32>
    %841 = arith.addf %837, %840 : vector<16x1xf32>
    %842 = math.rsqrt %841 : vector<16x1xf32>
    %843 = vector.broadcast %842 : vector<16x1xf32> to vector<16x32xf32>
    %844 = arith.mulf %839, %843 : vector<16x32xf32>
    %c3 = arith.constant 3 : index
    %c0_383 = arith.constant 0 : index
    %c0_384 = arith.constant 0 : index
    %845 = vector.load %arg3[%c3, %c0_383, %c0_384] : memref<4x1x32xf32, #tpu.memory_space<vmem>>, vector<1x1x32xf32>
    %846 = vector.shape_cast %845 : vector<1x1x32xf32> to vector<1x32xf32>
    %847 = vector.broadcast %846 : vector<1x32xf32> to vector<8x32xf32>
    %848 = arith.mulf %826, %847 : vector<8x32xf32>
    %c3_385 = arith.constant 3 : index
    %c0_386 = arith.constant 0 : index
    %c0_387 = arith.constant 0 : index
    %849 = vector.load %arg4[%c3_385, %c0_386, %c0_387] : memref<4x1x32xf32, #tpu.memory_space<vmem>>, vector<1x1x32xf32>
    %850 = vector.shape_cast %849 : vector<1x1x32xf32> to vector<1x32xf32>
    %851 = vector.broadcast %850 : vector<1x32xf32> to vector<8x32xf32>
    %852 = arith.addf %848, %851 : vector<8x32xf32>
    %c3_388 = arith.constant 3 : index
    %c0_389 = arith.constant 0 : index
    %c0_390 = arith.constant 0 : index
    %853 = vector.load %arg5[%c3_388, %c0_389, %c0_390] : memref<4x1x32xf32, #tpu.memory_space<vmem>>, vector<1x1x32xf32>
    %854 = vector.shape_cast %853 : vector<1x1x32xf32> to vector<1x32xf32>
    %855 = vector.broadcast %854 : vector<1x32xf32> to vector<16x32xf32>
    %856 = arith.mulf %844, %855 : vector<16x32xf32>
    %c3_391 = arith.constant 3 : index
    %c0_392 = arith.constant 0 : index
    %c0_393 = arith.constant 0 : index
    %857 = vector.load %arg6[%c3_391, %c0_392, %c0_393] : memref<4x1x32xf32, #tpu.memory_space<vmem>>, vector<1x1x32xf32>
    %858 = vector.shape_cast %857 : vector<1x1x32xf32> to vector<1x32xf32>
    %859 = vector.broadcast %858 : vector<1x32xf32> to vector<16x32xf32>
    %860 = arith.addf %856, %859 : vector<16x32xf32>
    %c3_394 = arith.constant 3 : index
    %c0_395 = arith.constant 0 : index
    %c0_396 = arith.constant 0 : index
    %861 = vector.load %arg7[%c3_394, %c0_395, %c0_396] : memref<4x1x32xf32, #tpu.memory_space<vmem>>, vector<1x1x32xf32>
    %862 = vector.shape_cast %861 : vector<1x1x32xf32> to vector<1x32xf32>
    %863 = vector.broadcast %862 : vector<1x32xf32> to vector<16x32xf32>
    %864 = arith.mulf %844, %863 : vector<16x32xf32>
    %c3_397 = arith.constant 3 : index
    %c0_398 = arith.constant 0 : index
    %c0_399 = arith.constant 0 : index
    %865 = vector.load %arg8[%c3_397, %c0_398, %c0_399] : memref<4x1x32xf32, #tpu.memory_space<vmem>>, vector<1x1x32xf32>
    %866 = vector.shape_cast %865 : vector<1x1x32xf32> to vector<1x32xf32>
    %867 = vector.broadcast %866 : vector<1x32xf32> to vector<16x32xf32>
    %868 = arith.addf %864, %867 : vector<16x32xf32>
    %c3_400 = arith.constant 3 : index
    %c0_401 = arith.constant 0 : index
    %c0_402 = arith.constant 0 : index
    %869 = vector.load %arg9[%c3_400, %c0_401, %c0_402] : memref<4x1x32xf32, #tpu.memory_space<vmem>>, vector<1x1x32xf32>
    %870 = vector.shape_cast %869 : vector<1x1x32xf32> to vector<1x32xf32>
    %871 = vector.broadcast %870 : vector<1x32xf32> to vector<8x32xf32>
    %872 = arith.mulf %826, %871 : vector<8x32xf32>
    %c3_403 = arith.constant 3 : index
    %c0_404 = arith.constant 0 : index
    %c0_405 = arith.constant 0 : index
    %873 = vector.load %arg10[%c3_403, %c0_404, %c0_405] : memref<4x1x32xf32, #tpu.memory_space<vmem>>, vector<1x1x32xf32>
    %874 = vector.shape_cast %873 : vector<1x1x32xf32> to vector<1x32xf32>
    %875 = vector.broadcast %874 : vector<1x32xf32> to vector<8x32xf32>
    %876 = arith.addf %872, %875 : vector<8x32xf32>
    %877 = tpu.concatenate %852, %860, %868, %876 in 0 : vector<8x32xf32>, vector<16x32xf32>, vector<16x32xf32>, vector<8x32xf32> -> vector<48x32xf32>
    %878 = arith.truncf %877 : vector<48x32xf32> to vector<48x32xbf16>
    %c3_406 = arith.constant 3 : index
    %c0_407 = arith.constant 0 : index
    %c0_408 = arith.constant 0 : index
    %879 = vector.load %arg11[%c3_406, %c0_407, %c0_408] : memref<4x32x192xbf16, #tpu.memory_space<vmem>>, vector<1x32x192xbf16>
    %880 = vector.shape_cast %879 : vector<1x32x192xbf16> to vector<32x192xbf16>
    %cst_409 = arith.constant dense<0.000000e+00> : vector<48x192xf32>
    %881 = tpu.matmul %878, %880, %cst_409 {dimension_numbers = #tpu.dot_dimension_numbers<[1], [0], [0], [1], [0, 0, 1, 1], [], []>} : vector<48x32xbf16>, vector<32x192xbf16>, vector<48x192xf32> -> vector<48x192xf32>
    %c3_410 = arith.constant 3 : index
    %c0_411 = arith.constant 0 : index
    %c0_412 = arith.constant 0 : index
    %882 = vector.load %arg12[%c3_410, %c0_411, %c0_412] : memref<4x1x192xf32, #tpu.memory_space<vmem>>, vector<1x1x192xf32>
    %883 = vector.shape_cast %882 : vector<1x1x192xf32> to vector<1x192xf32>
    %884 = vector.broadcast %883 : vector<1x192xf32> to vector<48x192xf32>
    %885 = arith.addf %881, %884 : vector<48x192xf32>
    %886 = vector.extract_strided_slice %885 {offsets = [0, 0], sizes = [8, 32], strides = [1, 1]} : vector<48x192xf32> to vector<8x32xf32>
    %887 = vector.extract_strided_slice %885 {offsets = [0, 32], sizes = [24, 32], strides = [1, 1]} : vector<48x192xf32> to vector<24x32xf32>
    %888 = vector.extract_strided_slice %885 {offsets = [0, 64], sizes = [24, 32], strides = [1, 1]} : vector<48x192xf32> to vector<24x32xf32>
    %c3_413 = arith.constant 3 : index
    %c0_414 = arith.constant 0 : index
    %c0_415 = arith.constant 0 : index
    %889 = vector.load %arg13[%c3_413, %c0_414, %c0_415] : memref<4x32x32xbf16, #tpu.memory_space<vmem>>, vector<1x32x32xbf16>
    %890 = vector.shape_cast %889 : vector<1x32x32xbf16> to vector<32x32xbf16>
    %c3_416 = arith.constant 3 : index
    %c0_417 = arith.constant 0 : index
    %c0_418 = arith.constant 0 : index
    %891 = vector.load %arg14[%c3_416, %c0_417, %c0_418] : memref<4x1x32xf32, #tpu.memory_space<vmem>>, vector<1x1x32xf32>
    %892 = vector.shape_cast %891 : vector<1x1x32xf32> to vector<1x32xf32>
    %893 = tpu.concatenate %886, %886, %886, %886 in 0 : vector<8x32xf32>, vector<8x32xf32>, vector<8x32xf32>, vector<8x32xf32> -> vector<32x32xf32>
    %894 = arith.mulf %893, %0 : vector<32x32xf32>
    %895 = arith.truncf %894 : vector<32x32xf32> to vector<32x32xbf16>
    %896 = arith.truncf %887 : vector<24x32xf32> to vector<24x32xbf16>
    %cst_419 = arith.constant dense<0.000000e+00> : vector<32x24xf32>
    %897 = tpu.matmul %895, %896, %cst_419 {dimension_numbers = #tpu.dot_dimension_numbers<[1], [1], [0], [0], [0, 0, 1, 0], [], []>} : vector<32x32xbf16>, vector<24x32xbf16>, vector<32x24xf32> -> vector<32x24xf32>
    %898 = arith.addf %897, %2 : vector<32x24xf32>
    %cst_420 = arith.constant dense<0xFF800000> : vector<32xf32>
    %899 = vector.multi_reduction <maximumf>, %898, %cst_420 [1] : vector<32x24xf32> to vector<32xf32>
    %900 = vector.shape_cast %899 : vector<32xf32> to vector<32x1xf32>
    %901 = vector.broadcast %900 : vector<32x1xf32> to vector<32x24xf32>
    %902 = arith.subf %898, %901 : vector<32x24xf32>
    %903 = math.exp %902 : vector<32x24xf32>
    %cst_421 = arith.constant dense<0.000000e+00> : vector<32xf32>
    %904 = vector.multi_reduction <add>, %903, %cst_421 [1] : vector<32x24xf32> to vector<32xf32>
    %905 = vector.shape_cast %904 : vector<32xf32> to vector<32x1xf32>
    %906 = tpu.reciprocal %905 {approx = true} : vector<32x1xf32> -> vector<32x1xf32>
    %907 = vector.broadcast %906 : vector<32x1xf32> to vector<32x24xf32>
    %908 = arith.mulf %903, %907 : vector<32x24xf32>
    %909 = arith.truncf %908 : vector<32x24xf32> to vector<32x24xbf16>
    %910 = arith.truncf %888 : vector<24x32xf32> to vector<24x32xbf16>
    %cst_422 = arith.constant dense<0.000000e+00> : vector<32x32xf32>
    %911 = tpu.matmul %909, %910, %cst_422 {dimension_numbers = #tpu.dot_dimension_numbers<[1], [0], [0], [1], [0, 0, 1, 1], [], []>} : vector<32x24xbf16>, vector<24x32xbf16>, vector<32x32xf32> -> vector<32x32xf32>
    %912 = arith.mulf %911, %0 : vector<32x32xf32>
    %913 = vector.extract_strided_slice %912 {offsets = [0, 0], sizes = [8, 32], strides = [1, 1]} : vector<32x32xf32> to vector<8x32xf32>
    %914 = vector.extract_strided_slice %912 {offsets = [8, 0], sizes = [8, 32], strides = [1, 1]} : vector<32x32xf32> to vector<8x32xf32>
    %915 = arith.addf %913, %914 : vector<8x32xf32>
    %916 = vector.extract_strided_slice %912 {offsets = [16, 0], sizes = [8, 32], strides = [1, 1]} : vector<32x32xf32> to vector<8x32xf32>
    %917 = arith.addf %915, %916 : vector<8x32xf32>
    %918 = vector.extract_strided_slice %912 {offsets = [24, 0], sizes = [8, 32], strides = [1, 1]} : vector<32x32xf32> to vector<8x32xf32>
    %919 = arith.addf %917, %918 : vector<8x32xf32>
    %920 = arith.truncf %919 : vector<8x32xf32> to vector<8x32xbf16>
    %cst_423 = arith.constant dense<0.000000e+00> : vector<8x32xf32>
    %921 = tpu.matmul %920, %890, %cst_423 {dimension_numbers = #tpu.dot_dimension_numbers<[1], [0], [0], [1], [0, 0, 1, 1], [], []>} : vector<8x32xbf16>, vector<32x32xbf16>, vector<8x32xf32> -> vector<8x32xf32>
    %922 = arith.addf %752, %921 : vector<8x32xf32>
    %923 = vector.broadcast %892 : vector<1x32xf32> to vector<8x32xf32>
    %924 = arith.addf %922, %923 : vector<8x32xf32>
    %925 = vector.extract_strided_slice %885 {offsets = [24, 96], sizes = [16, 32], strides = [1, 1]} : vector<48x192xf32> to vector<16x32xf32>
    %926 = vector.extract_strided_slice %885 {offsets = [24, 128], sizes = [24, 32], strides = [1, 1]} : vector<48x192xf32> to vector<24x32xf32>
    %927 = vector.extract_strided_slice %885 {offsets = [24, 160], sizes = [24, 32], strides = [1, 1]} : vector<48x192xf32> to vector<24x32xf32>
    %c3_424 = arith.constant 3 : index
    %c0_425 = arith.constant 0 : index
    %c0_426 = arith.constant 0 : index
    %928 = vector.load %arg15[%c3_424, %c0_425, %c0_426] : memref<4x32x32xbf16, #tpu.memory_space<vmem>>, vector<1x32x32xbf16>
    %929 = vector.shape_cast %928 : vector<1x32x32xbf16> to vector<32x32xbf16>
    %c3_427 = arith.constant 3 : index
    %c0_428 = arith.constant 0 : index
    %c0_429 = arith.constant 0 : index
    %930 = vector.load %arg16[%c3_427, %c0_428, %c0_429] : memref<4x1x32xf32, #tpu.memory_space<vmem>>, vector<1x1x32xf32>
    %931 = vector.shape_cast %930 : vector<1x1x32xf32> to vector<1x32xf32>
    %932 = tpu.concatenate %925, %925, %925, %925 in 0 : vector<16x32xf32>, vector<16x32xf32>, vector<16x32xf32>, vector<16x32xf32> -> vector<64x32xf32>
    %933 = arith.mulf %932, %1 : vector<64x32xf32>
    %934 = arith.truncf %933 : vector<64x32xf32> to vector<64x32xbf16>
    %935 = arith.truncf %926 : vector<24x32xf32> to vector<24x32xbf16>
    %cst_430 = arith.constant dense<0.000000e+00> : vector<64x24xf32>
    %936 = tpu.matmul %934, %935, %cst_430 {dimension_numbers = #tpu.dot_dimension_numbers<[1], [1], [0], [0], [0, 0, 1, 0], [], []>} : vector<64x32xbf16>, vector<24x32xbf16>, vector<64x24xf32> -> vector<64x24xf32>
    %937 = arith.addf %936, %3 : vector<64x24xf32>
    %cst_431 = arith.constant dense<0xFF800000> : vector<64xf32>
    %938 = vector.multi_reduction <maximumf>, %937, %cst_431 [1] : vector<64x24xf32> to vector<64xf32>
    %939 = vector.shape_cast %938 : vector<64xf32> to vector<64x1xf32>
    %940 = vector.broadcast %939 : vector<64x1xf32> to vector<64x24xf32>
    %941 = arith.subf %937, %940 : vector<64x24xf32>
    %942 = math.exp %941 : vector<64x24xf32>
    %cst_432 = arith.constant dense<0.000000e+00> : vector<64xf32>
    %943 = vector.multi_reduction <add>, %942, %cst_432 [1] : vector<64x24xf32> to vector<64xf32>
    %944 = vector.shape_cast %943 : vector<64xf32> to vector<64x1xf32>
    %945 = tpu.reciprocal %944 {approx = true} : vector<64x1xf32> -> vector<64x1xf32>
    %946 = vector.broadcast %945 : vector<64x1xf32> to vector<64x24xf32>
    %947 = arith.mulf %942, %946 : vector<64x24xf32>
    %948 = arith.truncf %947 : vector<64x24xf32> to vector<64x24xbf16>
    %949 = arith.truncf %927 : vector<24x32xf32> to vector<24x32xbf16>
    %cst_433 = arith.constant dense<0.000000e+00> : vector<64x32xf32>
    %950 = tpu.matmul %948, %949, %cst_433 {dimension_numbers = #tpu.dot_dimension_numbers<[1], [0], [0], [1], [0, 0, 1, 1], [], []>} : vector<64x24xbf16>, vector<24x32xbf16>, vector<64x32xf32> -> vector<64x32xf32>
    %951 = arith.mulf %950, %1 : vector<64x32xf32>
    %952 = vector.extract_strided_slice %951 {offsets = [0, 0], sizes = [16, 32], strides = [1, 1]} : vector<64x32xf32> to vector<16x32xf32>
    %953 = vector.extract_strided_slice %951 {offsets = [16, 0], sizes = [16, 32], strides = [1, 1]} : vector<64x32xf32> to vector<16x32xf32>
    %954 = arith.addf %952, %953 : vector<16x32xf32>
    %955 = vector.extract_strided_slice %951 {offsets = [32, 0], sizes = [16, 32], strides = [1, 1]} : vector<64x32xf32> to vector<16x32xf32>
    %956 = arith.addf %954, %955 : vector<16x32xf32>
    %957 = vector.extract_strided_slice %951 {offsets = [48, 0], sizes = [16, 32], strides = [1, 1]} : vector<64x32xf32> to vector<16x32xf32>
    %958 = arith.addf %956, %957 : vector<16x32xf32>
    %959 = arith.truncf %958 : vector<16x32xf32> to vector<16x32xbf16>
    %cst_434 = arith.constant dense<0.000000e+00> : vector<16x32xf32>
    %960 = tpu.matmul %959, %929, %cst_434 {dimension_numbers = #tpu.dot_dimension_numbers<[1], [0], [0], [1], [0, 0, 1, 1], [], []>} : vector<16x32xbf16>, vector<32x32xbf16>, vector<16x32xf32> -> vector<16x32xf32>
    %961 = arith.addf %808, %960 : vector<16x32xf32>
    %962 = vector.broadcast %931 : vector<1x32xf32> to vector<16x32xf32>
    %963 = arith.addf %961, %962 : vector<16x32xf32>
    %c3_435 = arith.constant 3 : index
    %c0_436 = arith.constant 0 : index
    %c0_437 = arith.constant 0 : index
    %964 = vector.load %arg17[%c3_435, %c0_436, %c0_437] : memref<4x1x32xf32, #tpu.memory_space<vmem>>, vector<1x1x32xf32>
    %965 = vector.shape_cast %964 : vector<1x1x32xf32> to vector<1x32xf32>
    %c3_438 = arith.constant 3 : index
    %c0_439 = arith.constant 0 : index
    %c0_440 = arith.constant 0 : index
    %966 = vector.load %arg18[%c3_438, %c0_439, %c0_440] : memref<4x1x32xf32, #tpu.memory_space<vmem>>, vector<1x1x32xf32>
    %967 = vector.shape_cast %966 : vector<1x1x32xf32> to vector<1x32xf32>
    %c3_441 = arith.constant 3 : index
    %c0_442 = arith.constant 0 : index
    %c0_443 = arith.constant 0 : index
    %968 = vector.load %arg19[%c3_441, %c0_442, %c0_443] : memref<4x32x128xbf16, #tpu.memory_space<vmem>>, vector<1x32x128xbf16>
    %969 = vector.shape_cast %968 : vector<1x32x128xbf16> to vector<32x128xbf16>
    %c3_444 = arith.constant 3 : index
    %c0_445 = arith.constant 0 : index
    %c0_446 = arith.constant 0 : index
    %970 = vector.load %arg20[%c3_444, %c0_445, %c0_446] : memref<4x1x128xf32, #tpu.memory_space<vmem>>, vector<1x1x128xf32>
    %971 = vector.shape_cast %970 : vector<1x1x128xf32> to vector<1x128xf32>
    %c3_447 = arith.constant 3 : index
    %c0_448 = arith.constant 0 : index
    %c0_449 = arith.constant 0 : index
    %972 = vector.load %arg21[%c3_447, %c0_448, %c0_449] : memref<4x128x32xbf16, #tpu.memory_space<vmem>>, vector<1x128x32xbf16>
    %973 = vector.shape_cast %972 : vector<1x128x32xbf16> to vector<128x32xbf16>
    %c3_450 = arith.constant 3 : index
    %c0_451 = arith.constant 0 : index
    %c0_452 = arith.constant 0 : index
    %974 = vector.load %arg22[%c3_450, %c0_451, %c0_452] : memref<4x1x32xf32, #tpu.memory_space<vmem>>, vector<1x1x32xf32>
    %975 = vector.shape_cast %974 : vector<1x1x32xf32> to vector<1x32xf32>
    %cst_453 = arith.constant dense<0.000000e+00> : vector<8xf32>
    %976 = vector.multi_reduction <add>, %924, %cst_453 [1] : vector<8x32xf32> to vector<8xf32>
    %977 = vector.shape_cast %976 : vector<8xf32> to vector<8x1xf32>
    %cst_454 = arith.constant 3.200000e+01 : f32
    %978 = vector.broadcast %cst_454 : f32 to vector<8x1xf32>
    %979 = arith.divf %977, %978 : vector<8x1xf32>
    %980 = vector.broadcast %979 : vector<8x1xf32> to vector<8x32xf32>
    %981 = arith.subf %924, %980 : vector<8x32xf32>
    %982 = arith.mulf %981, %981 : vector<8x32xf32>
    %cst_455 = arith.constant dense<0.000000e+00> : vector<8xf32>
    %983 = vector.multi_reduction <add>, %982, %cst_455 [1] : vector<8x32xf32> to vector<8xf32>
    %984 = vector.shape_cast %983 : vector<8xf32> to vector<8x1xf32>
    %cst_456 = arith.constant 3.200000e+01 : f32
    %985 = vector.broadcast %cst_456 : f32 to vector<8x1xf32>
    %986 = arith.divf %984, %985 : vector<8x1xf32>
    %987 = vector.broadcast %979 : vector<8x1xf32> to vector<8x32xf32>
    %988 = arith.subf %924, %987 : vector<8x32xf32>
    %cst_457 = arith.constant 9.99999997E-7 : f32
    %989 = vector.broadcast %cst_457 : f32 to vector<8x1xf32>
    %990 = arith.addf %986, %989 : vector<8x1xf32>
    %991 = math.rsqrt %990 : vector<8x1xf32>
    %992 = vector.broadcast %991 : vector<8x1xf32> to vector<8x32xf32>
    %993 = arith.mulf %988, %992 : vector<8x32xf32>
    %994 = vector.broadcast %965 : vector<1x32xf32> to vector<8x32xf32>
    %995 = arith.mulf %993, %994 : vector<8x32xf32>
    %996 = vector.broadcast %967 : vector<1x32xf32> to vector<8x32xf32>
    %997 = arith.addf %995, %996 : vector<8x32xf32>
    %998 = arith.truncf %997 : vector<8x32xf32> to vector<8x32xbf16>
    %cst_458 = arith.constant dense<0.000000e+00> : vector<8x128xf32>
    %999 = tpu.matmul %998, %969, %cst_458 {dimension_numbers = #tpu.dot_dimension_numbers<[1], [0], [0], [1], [0, 0, 1, 1], [], []>} : vector<8x32xbf16>, vector<32x128xbf16>, vector<8x128xf32> -> vector<8x128xf32>
    %1000 = vector.broadcast %971 : vector<1x128xf32> to vector<8x128xf32>
    %1001 = arith.addf %999, %1000 : vector<8x128xf32>
    %1002 = arith.mulf %1001, %1001 : vector<8x128xf32>
    %1003 = arith.mulf %1001, %1002 : vector<8x128xf32>
    %cst_459 = arith.constant 4.471500e-02 : f32
    %1004 = vector.broadcast %cst_459 : f32 to vector<8x128xf32>
    %1005 = arith.mulf %1004, %1003 : vector<8x128xf32>
    %1006 = arith.addf %1001, %1005 : vector<8x128xf32>
    %cst_460 = arith.constant 0.797884583 : f32
    %1007 = vector.broadcast %cst_460 : f32 to vector<8x128xf32>
    %1008 = arith.mulf %1007, %1006 : vector<8x128xf32>
    %1009 = math.tanh %1008 : vector<8x128xf32>
    %cst_461 = arith.constant 1.000000e+00 : f32
    %1010 = vector.broadcast %cst_461 : f32 to vector<8x128xf32>
    %1011 = arith.addf %1010, %1009 : vector<8x128xf32>
    %cst_462 = arith.constant 5.000000e-01 : f32
    %1012 = vector.broadcast %cst_462 : f32 to vector<8x128xf32>
    %1013 = arith.mulf %1012, %1011 : vector<8x128xf32>
    %1014 = arith.mulf %1001, %1013 : vector<8x128xf32>
    %1015 = arith.truncf %1014 : vector<8x128xf32> to vector<8x128xbf16>
    %cst_463 = arith.constant dense<0.000000e+00> : vector<8x32xf32>
    %1016 = tpu.matmul %1015, %973, %cst_463 {dimension_numbers = #tpu.dot_dimension_numbers<[1], [0], [0], [1], [0, 0, 1, 1], [], []>} : vector<8x128xbf16>, vector<128x32xbf16>, vector<8x32xf32> -> vector<8x32xf32>
    %1017 = vector.broadcast %975 : vector<1x32xf32> to vector<8x32xf32>
    %1018 = arith.addf %1016, %1017 : vector<8x32xf32>
    %1019 = arith.addf %924, %1018 : vector<8x32xf32>
    %c3_464 = arith.constant 3 : index
    %c0_465 = arith.constant 0 : index
    %c0_466 = arith.constant 0 : index
    %1020 = vector.load %arg23[%c3_464, %c0_465, %c0_466] : memref<4x1x32xf32, #tpu.memory_space<vmem>>, vector<1x1x32xf32>
    %1021 = vector.shape_cast %1020 : vector<1x1x32xf32> to vector<1x32xf32>
    %c3_467 = arith.constant 3 : index
    %c0_468 = arith.constant 0 : index
    %c0_469 = arith.constant 0 : index
    %1022 = vector.load %arg24[%c3_467, %c0_468, %c0_469] : memref<4x1x32xf32, #tpu.memory_space<vmem>>, vector<1x1x32xf32>
    %1023 = vector.shape_cast %1022 : vector<1x1x32xf32> to vector<1x32xf32>
    %c3_470 = arith.constant 3 : index
    %c0_471 = arith.constant 0 : index
    %c0_472 = arith.constant 0 : index
    %1024 = vector.load %arg25[%c3_470, %c0_471, %c0_472] : memref<4x32x128xbf16, #tpu.memory_space<vmem>>, vector<1x32x128xbf16>
    %1025 = vector.shape_cast %1024 : vector<1x32x128xbf16> to vector<32x128xbf16>
    %c3_473 = arith.constant 3 : index
    %c0_474 = arith.constant 0 : index
    %c0_475 = arith.constant 0 : index
    %1026 = vector.load %arg26[%c3_473, %c0_474, %c0_475] : memref<4x1x128xf32, #tpu.memory_space<vmem>>, vector<1x1x128xf32>
    %1027 = vector.shape_cast %1026 : vector<1x1x128xf32> to vector<1x128xf32>
    %c3_476 = arith.constant 3 : index
    %c0_477 = arith.constant 0 : index
    %c0_478 = arith.constant 0 : index
    %1028 = vector.load %arg27[%c3_476, %c0_477, %c0_478] : memref<4x128x32xbf16, #tpu.memory_space<vmem>>, vector<1x128x32xbf16>
    %1029 = vector.shape_cast %1028 : vector<1x128x32xbf16> to vector<128x32xbf16>
    %c3_479 = arith.constant 3 : index
    %c0_480 = arith.constant 0 : index
    %c0_481 = arith.constant 0 : index
    %1030 = vector.load %arg28[%c3_479, %c0_480, %c0_481] : memref<4x1x32xf32, #tpu.memory_space<vmem>>, vector<1x1x32xf32>
    %1031 = vector.shape_cast %1030 : vector<1x1x32xf32> to vector<1x32xf32>
    %cst_482 = arith.constant dense<0.000000e+00> : vector<16xf32>
    %1032 = vector.multi_reduction <add>, %963, %cst_482 [1] : vector<16x32xf32> to vector<16xf32>
    %1033 = vector.shape_cast %1032 : vector<16xf32> to vector<16x1xf32>
    %cst_483 = arith.constant 3.200000e+01 : f32
    %1034 = vector.broadcast %cst_483 : f32 to vector<16x1xf32>
    %1035 = arith.divf %1033, %1034 : vector<16x1xf32>
    %1036 = vector.broadcast %1035 : vector<16x1xf32> to vector<16x32xf32>
    %1037 = arith.subf %963, %1036 : vector<16x32xf32>
    %1038 = arith.mulf %1037, %1037 : vector<16x32xf32>
    %cst_484 = arith.constant dense<0.000000e+00> : vector<16xf32>
    %1039 = vector.multi_reduction <add>, %1038, %cst_484 [1] : vector<16x32xf32> to vector<16xf32>
    %1040 = vector.shape_cast %1039 : vector<16xf32> to vector<16x1xf32>
    %cst_485 = arith.constant 3.200000e+01 : f32
    %1041 = vector.broadcast %cst_485 : f32 to vector<16x1xf32>
    %1042 = arith.divf %1040, %1041 : vector<16x1xf32>
    %1043 = vector.broadcast %1035 : vector<16x1xf32> to vector<16x32xf32>
    %1044 = arith.subf %963, %1043 : vector<16x32xf32>
    %cst_486 = arith.constant 9.99999997E-7 : f32
    %1045 = vector.broadcast %cst_486 : f32 to vector<16x1xf32>
    %1046 = arith.addf %1042, %1045 : vector<16x1xf32>
    %1047 = math.rsqrt %1046 : vector<16x1xf32>
    %1048 = vector.broadcast %1047 : vector<16x1xf32> to vector<16x32xf32>
    %1049 = arith.mulf %1044, %1048 : vector<16x32xf32>
    %1050 = vector.broadcast %1021 : vector<1x32xf32> to vector<16x32xf32>
    %1051 = arith.mulf %1049, %1050 : vector<16x32xf32>
    %1052 = vector.broadcast %1023 : vector<1x32xf32> to vector<16x32xf32>
    %1053 = arith.addf %1051, %1052 : vector<16x32xf32>
    %1054 = arith.truncf %1053 : vector<16x32xf32> to vector<16x32xbf16>
    %cst_487 = arith.constant dense<0.000000e+00> : vector<16x128xf32>
    %1055 = tpu.matmul %1054, %1025, %cst_487 {dimension_numbers = #tpu.dot_dimension_numbers<[1], [0], [0], [1], [0, 0, 1, 1], [], []>} : vector<16x32xbf16>, vector<32x128xbf16>, vector<16x128xf32> -> vector<16x128xf32>
    %1056 = vector.broadcast %1027 : vector<1x128xf32> to vector<16x128xf32>
    %1057 = arith.addf %1055, %1056 : vector<16x128xf32>
    %1058 = arith.mulf %1057, %1057 : vector<16x128xf32>
    %1059 = arith.mulf %1057, %1058 : vector<16x128xf32>
    %cst_488 = arith.constant 4.471500e-02 : f32
    %1060 = vector.broadcast %cst_488 : f32 to vector<16x128xf32>
    %1061 = arith.mulf %1060, %1059 : vector<16x128xf32>
    %1062 = arith.addf %1057, %1061 : vector<16x128xf32>
    %cst_489 = arith.constant 0.797884583 : f32
    %1063 = vector.broadcast %cst_489 : f32 to vector<16x128xf32>
    %1064 = arith.mulf %1063, %1062 : vector<16x128xf32>
    %1065 = math.tanh %1064 : vector<16x128xf32>
    %cst_490 = arith.constant 1.000000e+00 : f32
    %1066 = vector.broadcast %cst_490 : f32 to vector<16x128xf32>
    %1067 = arith.addf %1066, %1065 : vector<16x128xf32>
    %cst_491 = arith.constant 5.000000e-01 : f32
    %1068 = vector.broadcast %cst_491 : f32 to vector<16x128xf32>
    %1069 = arith.mulf %1068, %1067 : vector<16x128xf32>
    %1070 = arith.mulf %1057, %1069 : vector<16x128xf32>
    %1071 = arith.truncf %1070 : vector<16x128xf32> to vector<16x128xbf16>
    %cst_492 = arith.constant dense<0.000000e+00> : vector<16x32xf32>
    %1072 = tpu.matmul %1071, %1029, %cst_492 {dimension_numbers = #tpu.dot_dimension_numbers<[1], [0], [0], [1], [0, 0, 1, 1], [], []>} : vector<16x128xbf16>, vector<128x32xbf16>, vector<16x32xf32> -> vector<16x32xf32>
    %1073 = vector.broadcast %1031 : vector<1x32xf32> to vector<16x32xf32>
    %1074 = arith.addf %1072, %1073 : vector<16x32xf32>
    %1075 = arith.addf %963, %1074 : vector<16x32xf32>
    %cst_493 = arith.constant dense<0.000000e+00> : vector<8xf32>
    %1076 = vector.multi_reduction <add>, %1019, %cst_493 [1] : vector<8x32xf32> to vector<8xf32>
    %1077 = vector.shape_cast %1076 : vector<8xf32> to vector<8x1xf32>
    %cst_494 = arith.constant 3.200000e+01 : f32
    %1078 = vector.broadcast %cst_494 : f32 to vector<8x1xf32>
    %1079 = arith.divf %1077, %1078 : vector<8x1xf32>
    %1080 = vector.broadcast %1079 : vector<8x1xf32> to vector<8x32xf32>
    %1081 = arith.subf %1019, %1080 : vector<8x32xf32>
    %1082 = arith.mulf %1081, %1081 : vector<8x32xf32>
    %cst_495 = arith.constant dense<0.000000e+00> : vector<8xf32>
    %1083 = vector.multi_reduction <add>, %1082, %cst_495 [1] : vector<8x32xf32> to vector<8xf32>
    %1084 = vector.shape_cast %1083 : vector<8xf32> to vector<8x1xf32>
    %cst_496 = arith.constant 3.200000e+01 : f32
    %1085 = vector.broadcast %cst_496 : f32 to vector<8x1xf32>
    %1086 = arith.divf %1084, %1085 : vector<8x1xf32>
    %1087 = vector.broadcast %1079 : vector<8x1xf32> to vector<8x32xf32>
    %1088 = arith.subf %1019, %1087 : vector<8x32xf32>
    %cst_497 = arith.constant 9.99999997E-7 : f32
    %1089 = vector.broadcast %cst_497 : f32 to vector<8x1xf32>
    %1090 = arith.addf %1086, %1089 : vector<8x1xf32>
    %1091 = math.rsqrt %1090 : vector<8x1xf32>
    %1092 = vector.broadcast %1091 : vector<8x1xf32> to vector<8x32xf32>
    %1093 = arith.mulf %1088, %1092 : vector<8x32xf32>
    %c0_498 = arith.constant 0 : index
    %c0_499 = arith.constant 0 : index
    %1094 = vector.load %arg29[%c0_498, %c0_499] : memref<1x32xf32, #tpu.memory_space<vmem>>, vector<1x32xf32>
    %1095 = vector.broadcast %1094 : vector<1x32xf32> to vector<8x32xf32>
    %1096 = arith.mulf %1093, %1095 : vector<8x32xf32>
    %c0_500 = arith.constant 0 : index
    %c0_501 = arith.constant 0 : index
    %1097 = vector.load %arg30[%c0_500, %c0_501] : memref<1x32xf32, #tpu.memory_space<vmem>>, vector<1x32xf32>
    %1098 = vector.broadcast %1097 : vector<1x32xf32> to vector<8x32xf32>
    %1099 = arith.addf %1096, %1098 : vector<8x32xf32>
    %1100 = arith.truncf %1099 : vector<8x32xf32> to vector<8x32xbf16>
    %c0_502 = arith.constant 0 : index
    %c0_503 = arith.constant 0 : index
    %1101 = vector.load %arg31[%c0_502, %c0_503] : memref<32x128xbf16, #tpu.memory_space<vmem>>, vector<32x128xbf16>
    %cst_504 = arith.constant dense<0.000000e+00> : vector<8x128xf32>
    %1102 = tpu.matmul %1100, %1101, %cst_504 {dimension_numbers = #tpu.dot_dimension_numbers<[1], [0], [0], [1], [0, 0, 1, 1], [], []>} : vector<8x32xbf16>, vector<32x128xbf16>, vector<8x128xf32> -> vector<8x128xf32>
    %c0_505 = arith.constant 0 : index
    %c0_506 = arith.constant 0 : index
    %1103 = vector.load %arg32[%c0_505, %c0_506] : memref<1x128xf32, #tpu.memory_space<vmem>>, vector<1x128xf32>
    %1104 = vector.broadcast %1103 : vector<1x128xf32> to vector<8x128xf32>
    %1105 = arith.addf %1102, %1104 : vector<8x128xf32>
    %1106 = vector.shape_cast %1105 : vector<8x128xf32> to vector<1x8x128xf32>
    %c0_507 = arith.constant 0 : index
    %c0_508 = arith.constant 0 : index
    %c0_509 = arith.constant 0 : index
    %1107 = vector.load %arg37[%c0_507, %c0_508, %c0_509] : memref<1x8x128xf32, #tpu.memory_space<vmem>>, vector<1x8x128xf32>
    tpu.vector_store %arg37[%c0_507, %c0_508, %c0_509], %1106 {strides = array<i32>} : memref<1x8x128xf32, #tpu.memory_space<vmem>>, vector<1x8x128xf32>,
    %cst_510 = arith.constant 0.000000e+00 : f32
    %1108 = vector.broadcast %cst_510 : f32 to vector<16x96xf32>
    %1109 = tpu.concatenate %1075, %1108 in 1 : vector<16x32xf32>, vector<16x96xf32> -> vector<16x128xf32>
    %1110 = vector.shape_cast %1109 : vector<16x128xf32> to vector<1x16x128xf32>
    %c0_511 = arith.constant 0 : index
    %c0_512 = arith.constant 0 : index
    %c0_513 = arith.constant 0 : index
    %1111 = vector.load %arg38[%c0_511, %c0_512, %c0_513] : memref<1x16x128xf32, #tpu.memory_space<vmem>>, vector<1x16x128xf32>
    tpu.vector_store %arg38[%c0_511, %c0_512, %c0_513], %1110 {strides = array<i32>} : memref<1x16x128xf32, #tpu.memory_space<vmem>>, vector<1x16x128xf32>,
    return
  }
  func.func @transform_0(%arg0: i32) -> (i32, i32, i32) {
    %c0_i32 = arith.constant 0 : i32
    %c0_i32_0 = arith.constant 0 : i32
    %c0_i32_1 = arith.constant 0 : i32
    return %arg0, %c0_i32, %c0_i32_0 : i32, i32, i32
  }
  func.func @transform_1(%arg0: i32) -> (i32, i32, i32) {
    %c0_i32 = arith.constant 0 : i32
    %c0_i32_0 = arith.constant 0 : i32
    %c0_i32_1 = arith.constant 0 : i32
    return %arg0, %c0_i32, %c0_i32_0 : i32, i32, i32
  }
  func.func @transform_2(%arg0: i32) -> (i32, i32, i32) {
    %c0_i32 = arith.constant 0 : i32
    %c0_i32_0 = arith.constant 0 : i32
    %c0_i32_1 = arith.constant 0 : i32
    %c0_i32_2 = arith.constant 0 : i32
    return %c0_i32, %c0_i32_0, %c0_i32_1 : i32, i32, i32
  }
  func.func @transform_3(%arg0: i32) -> (i32, i32, i32) {
    %c0_i32 = arith.constant 0 : i32
    %c0_i32_0 = arith.constant 0 : i32
    %c0_i32_1 = arith.constant 0 : i32
    %c0_i32_2 = arith.constant 0 : i32
    return %c0_i32, %c0_i32_0, %c0_i32_1 : i32, i32, i32
  }
  func.func @transform_4(%arg0: i32) -> (i32, i32, i32) {
    %c0_i32 = arith.constant 0 : i32
    %c0_i32_0 = arith.constant 0 : i32
    %c0_i32_1 = arith.constant 0 : i32
    %c0_i32_2 = arith.constant 0 : i32
    return %c0_i32, %c0_i32_0, %c0_i32_1 : i32, i32, i32
  }
  func.func @transform_5(%arg0: i32) -> (i32, i32, i32) {
    %c0_i32 = arith.constant 0 : i32
    %c0_i32_0 = arith.constant 0 : i32
    %c0_i32_1 = arith.constant 0 : i32
    %c0_i32_2 = arith.constant 0 : i32
    return %c0_i32, %c0_i32_0, %c0_i32_1 : i32, i32, i32
  }
  func.func @transform_6(%arg0: i32) -> (i32, i32, i32) {
    %c0_i32 = arith.constant 0 : i32
    %c0_i32_0 = arith.constant 0 : i32
    %c0_i32_1 = arith.constant 0 : i32
    %c0_i32_2 = arith.constant 0 : i32
    return %c0_i32, %c0_i32_0, %c0_i32_1 : i32, i32, i32
  }
  func.func @transform_7(%arg0: i32) -> (i32, i32, i32) {
    %c0_i32 = arith.constant 0 : i32
    %c0_i32_0 = arith.constant 0 : i32
    %c0_i32_1 = arith.constant 0 : i32
    %c0_i32_2 = arith.constant 0 : i32
    return %c0_i32, %c0_i32_0, %c0_i32_1 : i32, i32, i32
  }
  func.func @transform_8(%arg0: i32) -> (i32, i32, i32) {
    %c0_i32 = arith.constant 0 : i32
    %c0_i32_0 = arith.constant 0 : i32
    %c0_i32_1 = arith.constant 0 : i32
    %c0_i32_2 = arith.constant 0 : i32
    return %c0_i32, %c0_i32_0, %c0_i32_1 : i32, i32, i32
  }
  func.func @transform_9(%arg0: i32) -> (i32, i32, i32) {
    %c0_i32 = arith.constant 0 : i32
    %c0_i32_0 = arith.constant 0 : i32
    %c0_i32_1 = arith.constant 0 : i32
    %c0_i32_2 = arith.constant 0 : i32
    return %c0_i32, %c0_i32_0, %c0_i32_1 : i32, i32, i32
  }
  func.func @transform_10(%arg0: i32) -> (i32, i32, i32) {
    %c0_i32 = arith.constant 0 : i32
    %c0_i32_0 = arith.constant 0 : i32
    %c0_i32_1 = arith.constant 0 : i32
    %c0_i32_2 = arith.constant 0 : i32
    return %c0_i32, %c0_i32_0, %c0_i32_1 : i32, i32, i32
  }
  func.func @transform_11(%arg0: i32) -> (i32, i32, i32) {
    %c0_i32 = arith.constant 0 : i32
    %c0_i32_0 = arith.constant 0 : i32
    %c0_i32_1 = arith.constant 0 : i32
    %c0_i32_2 = arith.constant 0 : i32
    return %c0_i32, %c0_i32_0, %c0_i32_1 : i32, i32, i32
  }
  func.func @transform_12(%arg0: i32) -> (i32, i32, i32) {
    %c0_i32 = arith.constant 0 : i32
    %c0_i32_0 = arith.constant 0 : i32
    %c0_i32_1 = arith.constant 0 : i32
    %c0_i32_2 = arith.constant 0 : i32
    return %c0_i32, %c0_i32_0, %c0_i32_1 : i32, i32, i32
  }
  func.func @transform_13(%arg0: i32) -> (i32, i32, i32) {
    %c0_i32 = arith.constant 0 : i32
    %c0_i32_0 = arith.constant 0 : i32
    %c0_i32_1 = arith.constant 0 : i32
    %c0_i32_2 = arith.constant 0 : i32
    return %c0_i32, %c0_i32_0, %c0_i32_1 : i32, i32, i32
  }
  func.func @transform_14(%arg0: i32) -> (i32, i32, i32) {
    %c0_i32 = arith.constant 0 : i32
    %c0_i32_0 = arith.constant 0 : i32
    %c0_i32_1 = arith.constant 0 : i32
    %c0_i32_2 = arith.constant 0 : i32
    return %c0_i32, %c0_i32_0, %c0_i32_1 : i32, i32, i32
  }
  func.func @transform_15(%arg0: i32) -> (i32, i32, i32) {
    %c0_i32 = arith.constant 0 : i32
    %c0_i32_0 = arith.constant 0 : i32
    %c0_i32_1 = arith.constant 0 : i32
    %c0_i32_2 = arith.constant 0 : i32
    return %c0_i32, %c0_i32_0, %c0_i32_1 : i32, i32, i32
  }
  func.func @transform_16(%arg0: i32) -> (i32, i32, i32) {
    %c0_i32 = arith.constant 0 : i32
    %c0_i32_0 = arith.constant 0 : i32
    %c0_i32_1 = arith.constant 0 : i32
    %c0_i32_2 = arith.constant 0 : i32
    return %c0_i32, %c0_i32_0, %c0_i32_1 : i32, i32, i32
  }
  func.func @transform_17(%arg0: i32) -> (i32, i32, i32) {
    %c0_i32 = arith.constant 0 : i32
    %c0_i32_0 = arith.constant 0 : i32
    %c0_i32_1 = arith.constant 0 : i32
    %c0_i32_2 = arith.constant 0 : i32
    return %c0_i32, %c0_i32_0, %c0_i32_1 : i32, i32, i32
  }
  func.func @transform_18(%arg0: i32) -> (i32, i32, i32) {
    %c0_i32 = arith.constant 0 : i32
    %c0_i32_0 = arith.constant 0 : i32
    %c0_i32_1 = arith.constant 0 : i32
    %c0_i32_2 = arith.constant 0 : i32
    return %c0_i32, %c0_i32_0, %c0_i32_1 : i32, i32, i32
  }
  func.func @transform_19(%arg0: i32) -> (i32, i32, i32) {
    %c0_i32 = arith.constant 0 : i32
    %c0_i32_0 = arith.constant 0 : i32
    %c0_i32_1 = arith.constant 0 : i32
    %c0_i32_2 = arith.constant 0 : i32
    return %c0_i32, %c0_i32_0, %c0_i32_1 : i32, i32, i32
  }
  func.func @transform_20(%arg0: i32) -> (i32, i32, i32) {
    %c0_i32 = arith.constant 0 : i32
    %c0_i32_0 = arith.constant 0 : i32
    %c0_i32_1 = arith.constant 0 : i32
    %c0_i32_2 = arith.constant 0 : i32
    return %c0_i32, %c0_i32_0, %c0_i32_1 : i32, i32, i32
  }
  func.func @transform_21(%arg0: i32) -> (i32, i32, i32) {
    %c0_i32 = arith.constant 0 : i32
    %c0_i32_0 = arith.constant 0 : i32
    %c0_i32_1 = arith.constant 0 : i32
    %c0_i32_2 = arith.constant 0 : i32
    return %c0_i32, %c0_i32_0, %c0_i32_1 : i32, i32, i32
  }
  func.func @transform_22(%arg0: i32) -> (i32, i32, i32) {
    %c0_i32 = arith.constant 0 : i32
    %c0_i32_0 = arith.constant 0 : i32
    %c0_i32_1 = arith.constant 0 : i32
    %c0_i32_2 = arith.constant 0 : i32
    return %c0_i32, %c0_i32_0, %c0_i32_1 : i32, i32, i32
  }
  func.func @transform_23(%arg0: i32) -> (i32, i32, i32) {
    %c0_i32 = arith.constant 0 : i32
    %c0_i32_0 = arith.constant 0 : i32
    %c0_i32_1 = arith.constant 0 : i32
    %c0_i32_2 = arith.constant 0 : i32
    return %c0_i32, %c0_i32_0, %c0_i32_1 : i32, i32, i32
  }
  func.func @transform_24(%arg0: i32) -> (i32, i32, i32) {
    %c0_i32 = arith.constant 0 : i32
    %c0_i32_0 = arith.constant 0 : i32
    %c0_i32_1 = arith.constant 0 : i32
    %c0_i32_2 = arith.constant 0 : i32
    return %c0_i32, %c0_i32_0, %c0_i32_1 : i32, i32, i32
  }
  func.func @transform_25(%arg0: i32) -> (i32, i32, i32) {
    %c0_i32 = arith.constant 0 : i32
    %c0_i32_0 = arith.constant 0 : i32
    %c0_i32_1 = arith.constant 0 : i32
    %c0_i32_2 = arith.constant 0 : i32
    return %c0_i32, %c0_i32_0, %c0_i32_1 : i32, i32, i32
  }
  func.func @transform_26(%arg0: i32) -> (i32, i32, i32) {
    %c0_i32 = arith.constant 0 : i32
    %c0_i32_0 = arith.constant 0 : i32
    %c0_i32_1 = arith.constant 0 : i32
    %c0_i32_2 = arith.constant 0 : i32
    return %c0_i32, %c0_i32_0, %c0_i32_1 : i32, i32, i32
  }
  func.func @transform_27(%arg0: i32) -> (i32, i32, i32) {
    %c0_i32 = arith.constant 0 : i32
    %c0_i32_0 = arith.constant 0 : i32
    %c0_i32_1 = arith.constant 0 : i32
    %c0_i32_2 = arith.constant 0 : i32
    return %c0_i32, %c0_i32_0, %c0_i32_1 : i32, i32, i32
  }
  func.func @transform_28(%arg0: i32) -> (i32, i32) {
    %c0_i32 = arith.constant 0 : i32
    %c0_i32_0 = arith.constant 0 : i32
    %c0_i32_1 = arith.constant 0 : i32
    return %c0_i32, %c0_i32_0 : i32, i32
  }
  func.func @transform_29(%arg0: i32) -> (i32, i32) {
    %c0_i32 = arith.constant 0 : i32
    %c0_i32_0 = arith.constant 0 : i32
    %c0_i32_1 = arith.constant 0 : i32
    return %c0_i32, %c0_i32_0 : i32, i32
  }
  func.func @transform_30(%arg0: i32) -> (i32, i32) {
    %c0_i32 = arith.constant 0 : i32
    %c0_i32_0 = arith.constant 0 : i32
    %c0_i32_1 = arith.constant 0 : i32
    return %c0_i32, %c0_i32_0 : i32, i32
  }
  func.func @transform_31(%arg0: i32) -> (i32, i32) {
    %c0_i32 = arith.constant 0 : i32
    %c0_i32_0 = arith.constant 0 : i32
    %c0_i32_1 = arith.constant 0 : i32
    return %c0_i32, %c0_i32_0 : i32, i32
  }
  func.func @transform_32(%arg0: i32) -> (i32, i32) {
    %c0_i32 = arith.constant 0 : i32
    %c0_i32_0 = arith.constant 0 : i32
    %c0_i32_1 = arith.constant 0 : i32
    return %c0_i32, %c0_i32_0 : i32, i32
  }
  func.func @transform_33(%arg0: i32) -> (i32, i32) {
    %c0_i32 = arith.constant 0 : i32
    %c0_i32_0 = arith.constant 0 : i32
    %c0_i32_1 = arith.constant 0 : i32
    return %c0_i32, %c0_i32_0 : i32, i32
  }
  func.func @transform_34(%arg0: i32) -> (i32, i32) {
    %c0_i32 = arith.constant 0 : i32
    %c0_i32_0 = arith.constant 0 : i32
    %c0_i32_1 = arith.constant 0 : i32
    return %c0_i32, %c0_i32_0 : i32, i32
  }
  func.func @transform_35(%arg0: i32) -> (i32, i32) {
    %c0_i32 = arith.constant 0 : i32
    %c0_i32_0 = arith.constant 0 : i32
    %c0_i32_1 = arith.constant 0 : i32
    return %c0_i32, %c0_i32_0 : i32, i32
  }
  func.func @transform_36(%arg0: i32) -> (i32, i32, i32) {
    %c0_i32 = arith.constant 0 : i32
    %c0_i32_0 = arith.constant 0 : i32
    %c0_i32_1 = arith.constant 0 : i32
    return %arg0, %c0_i32, %c0_i32_0 : i32, i32, i32
  }
  func.func @transform_37(%arg0: i32) -> (i32, i32, i32) {
    %c0_i32 = arith.constant 0 : i32
    %c0_i32_0 = arith.constant 0 : i32
    %c0_i32_1 = arith.constant 0 : i32
    return %arg0, %c0_i32, %c0_i32_0 : i32, i32, i32
  }
}

</mosaic_0001>

<bundles_post_ra>
// kernel: two_stream_forward.1
= control target key start
LH: loop header
LB: loop body
LE: loop exit
PB: predicated region body
PF: predicated region fallthrough
CT: control target
= control target key end

     0   :  { %s7385_s6 = smov 1   ;;  %s7386_s10 = smov 2   ;;  %s9077_s0 = inlined_call_operand.smem [shape: u32[38], index: -1, kind: input, shape index: {}] }
   0x1   :  { %s7447_s5 = sld [smem:[%s9077_s0]]   ;;  %s7387_s14 = smov 3  }
   0x2   :  { %s7452_s9 = sld [smem:[%s9077_s0 + %s7385_s6]]   ;;  %s7388_s18 = smov 4  }
   0x3   :  { %s7457_s13 = sld [smem:[%s9077_s0 + %s7386_s10]]   ;;  %s7389_s22 = smov 5  }
   0x4   :  { %s7462_s17 = sld [smem:[%s9077_s0 + %s7387_s14]]   ;;  %s7390_s26 = smov 6  }
   0x5   :  { %s7467_s21 = sld [smem:[%s9077_s0 + %s7388_s18]]   ;;  %s7391_s30 = smov 7  }
   0x6   :  { %s7472_s25 = sld [smem:[%s9077_s0 + %s7389_s22]]   ;;  %s7392_s4 = smov 8  }
   0x7   :  { %9130 = sst [smem:[#allocation23_spill]] %s7447_s5  ;;  %s7393_s10 = smov 9  }
   0x8   :  { %9131 = sst [smem:[#allocation24_spill]] %s7452_s9  ;;  %s7394_s15 = smov 10  }
   0x9   :  { %9132 = sst [smem:[#allocation25_spill]] %s7457_s13  ;;  %s7395_s20 = smov 11  }
   0xa   :  { %9133 = sst [smem:[#allocation26_spill]] %s7462_s17  ;;  %s7397_s1 = smov 13  }
   0xb   :  { %s7477_s29 = sld [smem:[%s9077_s0 + %s7390_s26]]   ;;  %s7396_s26 = smov 12  }
   0xc   :  { %s7482_s3 = sld [smem:[%s9077_s0 + %s7391_s30]]   ;;  %s7398_s7 = smov 14  }
   0xd   :  { %s7487_s8 = sld [smem:[%s9077_s0 + %s7392_s4]]   ;;  %s7400_s22 = smov 16  }
   0xe   :  { %s7492_s14 = sld [smem:[%s9077_s0 + %s7393_s10]]   ;;  %s7401_s28 = smov 17  }
   0xf   :  { %s7497_s19 = sld [smem:[%s9077_s0 + %s7394_s15]]   ;;  %s7399_s15 = smov 15  }
  0x10   :  { %s7502_s24 = sld [smem:[%s9077_s0 + %s7395_s20]]  }
  0x11   :  { %9134 = sst [smem:[#allocation27_spill]] %s7477_s29 }
  0x12   :  { %9135 = sst [smem:[#allocation28_spill]] %s7482_s3 }
  0x13   :  { %9136 = sst [smem:[#allocation29_spill]] %s7487_s8 }
  0x14   :  { %9137 = sst [smem:[#allocation30_spill]] %s7492_s14 }
  0x15   :  { %s7507_s30 = sld [smem:[%s9077_s0 + %s7396_s26]]  }
  0x16   :  { %9138 = sst [smem:[#allocation31_spill]] %s7502_s24 }
  0x17   :  { %s7512_s6 = sld [smem:[%s9077_s0 + %s7397_s1]]  }
  0x18   :  { %s7517_s12 = sld [smem:[%s9077_s0 + %s7398_s7]]   ;;  %s7402_s7 = smov 18  }
  0x19   :  { %s7522_s20 = sld [smem:[%s9077_s0 + %s7399_s15]]   ;;  %s7403_s15 = smov 19  }
  0x1a   :  { %s7527_s27 = sld [smem:[%s9077_s0 + %s7400_s22]]   ;;  %s7404_s22 = smov 20  }
  0x1b   :  { %s7532_s4 = sld [smem:[%s9077_s0 + %s7401_s28]]   ;;  %s7405_s28 = smov 21  }
  0x1d   :  { %9139 = sst [smem:[#allocation32_spill]] %s7512_s6 }
  0x1e   :  { %9140 = sst [smem:[#allocation33_spill]] %s7517_s12 }
  0x1f   :  { %9141 = sst [smem:[#allocation34_spill]] %s7522_s20 }
  0x20   :  { %9142 = sst [smem:[#allocation35_spill]] %s7527_s27 }
  0x21   :  { %9143 = sst [smem:[#allocation36_spill]] %s7532_s4 }
  0x22   :  { %s7537_s6 = sld [smem:[%s9077_s0 + %s7402_s7]]   ;;  %s7406_s7 = smov 22  }
  0x23   :  { %s7542_s20 = sld [smem:[%s9077_s0 + %s7403_s15]]   ;;  %s7407_s15 = smov 23  }
  0x24   :  { %s7547_s27 = sld [smem:[%s9077_s0 + %s7404_s22]]   ;;  %s7408_s22 = smov 24  }
  0x25   :  { %s7552_s4 = sld [smem:[%s9077_s0 + %s7405_s28]]   ;;  %s7409_s28 = smov 25  }
  0x26   :  { %s7557_s24 = sld [smem:[%s9077_s0 + %s7406_s7]]   ;;  %s7410_s7 = smov 26  }
  0x27   :  { %s7567_s14 = sld [smem:[%s9077_s0 + %s7408_s22]]   ;;  %s7412_s22 = smov 28  }
  0x28   :  { %9144 = sst [smem:[#allocation37_spill]] %s7537_s6 }
  0x29   :  { %9145 = sst [smem:[#allocation38_spill]] %s7542_s20 }
  0x2a   :  { %s7562_s20 = sld [smem:[%s9077_s0 + %s7407_s15]]   ;;  %s7411_s15 = smov 27  }
  0x2b   :  { %9146 = sst [smem:[#allocation39_spill]] %s7552_s4 }
  0x2c   :  { %9147 = sst [smem:[#allocation40_spill]] %s7557_s24 }
  0x2d   :  { %9149 = sst [smem:[#allocation42_spill]] %s7567_s14 }
  0x2e   :  { %s7572_s4 = sld [smem:[%s9077_s0 + %s7409_s28]]   ;;  %s7413_s28 = smov 29  }
  0x2f   :  { %s7577_s24 = sld [smem:[%s9077_s0 + %s7410_s7]]   ;;  %s7414_s7 = smov 30  }
  0x30   :  { %9148 = sst [smem:[#allocation41_spill]] %s7562_s20 }
  0x31   :  { %s7582_s20 = sld [smem:[%s9077_s0 + %s7411_s15]]   ;;  %s7415_s15 = smov 31  }
  0x32   :  { %s7587_s8 = sld [smem:[%s9077_s0 + %s7412_s22]]   ;;  %s7416_s22 = smov 32  }
  0x33   :  { %s7597_s3 = sld [smem:[%s9077_s0 + %s7414_s7]]   ;;  %s7418_s7 = smov 34  }
  0x34   :  { %9150 = sst [smem:[#allocation43_spill]] %s7572_s4 }
  0x35   :  { %s7592_s4 = sld [smem:[%s9077_s0 + %s7413_s28]]   ;;  %s7417_s28 = smov 33  }
  0x37   :  { %9151 = sst [smem:[#allocation44_spill]] %s7582_s20 }
  0x38   :  { %9152 = sst [smem:[#allocation45_spill]] %s7587_s8 }
  0x39   :  { %9154 = sst [smem:[#allocation47_spill]] %s7597_s3 }
  0x3a   :  { %s7602_s20 = sld [smem:[%s9077_s0 + %s7415_s15]]   ;;  %s7419_s15 = smov 35  }
  0x3b   :  { %9153 = sst [smem:[#allocation46_spill]] %s7592_s4 }
  0x3c   :  { %s7607_s8 = sld [smem:[%s9077_s0 + %s7416_s22]]   ;;  %s7420_s22 = smov 36  }
  0x3d   :  { %s7612_s4 = sld [smem:[%s9077_s0 + %s7417_s28]]   ;;  %s7421_s28 = smov 37  }
  0x3e   :  { %s7617_s3 = sld [smem:[%s9077_s0 + %s7418_s7]]  }
  0x3f   :  { %s7627_s29 = sld [smem:[%s9077_s0 + %s7420_s22]]  }
  0x40   :  { %9155 = sst [smem:[#allocation48_spill]] %s7602_s20 }
  0x41   :  { %s7622_s20 = sld [smem:[%s9077_s0 + %s7419_s15]]  }
  0x42   :  { %9156 = sst [smem:[#allocation49_spill]] %s7607_s8 }
  0x43   :  { %9157 = sst [smem:[#allocation50_spill]] %s7612_s4 }
  0x44   :  { %9158 = sst [smem:[#allocation51_spill]] %s7617_s3 }
  0x45   :  { %9159 = sst [smem:[#allocation52_spill]] %s7627_s29 }
  0x46   :  { %s7632_s4 = sld [smem:[%s9077_s0 + %s7421_s28]]  }
  0x4c   :  { %9160 = sst [smem:[#allocation53_spill]] %s7632_s4 }
  0x4d   :  { %81 = vsyncpa [#allocation3], 0 }
  0x4e   :  { %82 = vsyncpa [#allocation6], 0 }
  0x4f   :  { %83 = vsyncpa [#allocation9], 0 }
  0x50   :  { %84 = vsyncpa [#allocation12], 0 }
  0x51   :  { %85 = vsyncpa [#allocation4], 0 }
  0x52   :  { %87 = vsyncpa [#allocation4 + $0x1], 0 }
  0x53   :  { %88 = vsyncpa [#allocation16], 0 }
  0x54   :  { %90 = vsyncpa [#allocation16 + $0x1], 0  ;;  %s7634_s7 = smov 0   ;;  %s7636_s10 = smov 0  }
  0x55   :  { %9161 = sst [smem:[#allocation54_spill]] %s7634_s7  ;;  %s7638_s11 = smov 0  }
  0x56   :  { %s7640_s15 = smov 0  }
  0x57 LB: > { %s9163_s17 = sld [smem:[#allocation26_spill]]  ;;  %s7655_s0 = sadd.s32 4294967295, %s7383_s15   ;;  %s7379_s11 = sphi %s7638_s11, %s9225_s11   ;;  %s7375_s10 = sphi %s7636_s10, %s9227_s10   ;;  %s7383_s15 = sphi %s7640_s15, %s9223_s15  }
  0x58   : > { %s9164_s13 = sld [smem:[#allocation25_spill]]  ;;  %s5723_s16 = sadd.s32 4294967294, %s7383_s15  }
  0x59   : > { %s9165_s3 = sld [smem:[#allocation51_spill]]  ;;  %s7659_s18 = sadd.s32 1, %s7383_s15  }
  0x5a   : > { %s9166_s14 = sld [smem:[#allocation42_spill]]  ;;  %s869_s22 = sadd.s32 1, %s7379_s11 }
  0x5b   : > { %s9167_s8 = sld [smem:[#allocation49_spill]]  ;;  %s866_s23 = ssub.s32 %s7383_s15, %s7659_s18 }
  0x5c   : > { %s9168_s6 = sld [smem:[#allocation37_spill]]  ;;  %p879_p0 = scmp.ne.s32.totalorder %s7379_s11, %s7375_s10 }
  0x5d   : > { %s9169_s12 = sld [smem:[#allocation33_spill]]  ;;  %p867_p1 = scmp.eq.s32.totalorder %s866_s23, 0 }
  0x5e   : > { %s9170_s7 = sld [smem:[#allocation54_spill]]  ;;  %p880_p2 = scmp.eq.s32.totalorder %s7655_s0, 1 }
  0x5f   : > { %9172 = sst [smem:[#allocation55_spill]] %s7379_s11  ;;  %p886_p4 = scmp.eq.s32.totalorder %s5723_s16, 1 }
  0x60   : > { %9173 = sst [smem:[#allocation56_spill]] %s7383_s15  ;;  %p7672_p5 = por %p880_p2, %p879_p0 }
  0x61   : > { %9174 = sst [smem:[#allocation57_spill]] %s7659_s18  ;;  %p5724_p7 = scmp.ge.s32.totalorder %s7383_s15, 1 }
  0x62   : > { %s7670_s26 = scalar_select %p867_p1, %s7379_s11, %s869_s22  }
  0x63   : > { %s9176_s28 = scalar_select %p7672_p5, 1, 0 }
  0x64   : > { %9171 = sst [smem:[#allocation54_spill]] %s9170_s7  ;;  %p885_p3 = scmp.ne.s32.totalorder %s7375_s10, %s9170_s7 }
  0x65   : > { %9175 = sst [smem:[#allocation58_spill]] %s7670_s26  ;;  %p919_p8 = scmp.lt.s32.totalorder %s7383_s15, 3 }
  0x66   : > { %9177 = sst [smem:[#allocation59_spill]] %s9176_s28  ;;  %p7676_p6 = por %p886_p4, %p885_p3 }
  0x67   : > { %p6544_p9 = scmp.eq.s32.totalorder %s7655_s0, 0  ;;  %p7683_p10 = pnand %p5724_p7, %p919_p8 }
  0x68   : > { %s9178_s1 = scalar_select %p7676_p6, 1, 0 }
  0x69   : > { %s977_s23 = sshll.u32 %s9169_s12, 4  ;;  %p6515_p11 = pneg %p7683_p10  ;;  %s978_s23 = int_to_ptr.hbm [resolvable:$true] %s977_s23 }
  0x6a   : > { %9179 = sst [smem:[#allocation60_spill]] %s9178_s1  ;;  %s1017_s16 = sshll.u32 %s7547_s27, 4  ;;  %s7697_s16 = int_to_ptr.hbm [resolvable:$true] %s1017_s16 }
  0x6b   : > { %p7693_p12 = pnand %p6544_p9, %p6515_p11  ;;  %s7422_s26 = smov [#allocation5]  }
  0x6c   : > { %s979_s11 = sshll.u32 %s7422_s26, 4  ;;  %s7063_s18 = sshra.s32 %s978_s23, 4  ;;  %s980_s11 = int_to_ptr.vmem [resolvable:$true] %s979_s11  ;;  %s7064_s18 = int_to_ptr.hbm [resolvable:$true] %s7063_s18 }
  0x6d   : > { %s7065_s1 = scalar_lea.hbm %s7064_s18, 64  ;;  %p7701_p0 = pneg %p7693_p12 }
  0x6e   : > { %p7066_p13 = scmp.ne.s32.totalorder %s7064_s18, %s7065_s1  ;;  %s7070_s15 = scalar_lea.hbm %s9169_s12, 64 }
  0x6f   : > { %p7071_p3 = scmp.lt.s32.totalorder %s7064_s18, %s9169_s12  ;;  %p7072_p4 = scmp.lt.s32.totalorder %s7070_s15, %s7065_s1 }
  0x70   : > { %p7068_p1 = pnand %p7701_p0, %p7066_p13 }
  0x71   : > { %p7073_p7 = por %p7072_p4, %p7071_p3 }
  0x72   : > { %p7069_p2 = pneg %p7068_p1 }
  0x74   : > { %p7074_p8 = pnand %p7073_p7, %p7069_p2 }
  0x76   : > { %7077 = shalt.err (!%p7074_p8)
}
  0x77   : > { %s7423_s26 = smov 64   ;;  %s7424_s28 = smov 4  }
  0x78   : > { %6521 = dma.hbm_to_vmem [thread:$0]  (!%p7693_p12), %s978_s23, 1024, %s980_s11, [#allocation6], %s7423_s26, %s7423_s26, %s7424_s28  }
  0x79   : > { %s7425_s29 = smov [#allocation8]   ;;  %s1057_s18 = sshll.u32 %s7577_s24, 4  ;;  %s7715_s18 = int_to_ptr.hbm [resolvable:$true] %s1057_s18 }
  0x7a   : > { %s1019_s4 = sshll.u32 %s7425_s29, 4  ;;  %s7093_s15 = sshra.s32 %s7697_s16, 4  ;;  %s1020_s4 = int_to_ptr.vmem [resolvable:$true] %s1019_s4  ;;  %s7094_s15 = int_to_ptr.hbm [resolvable:$true] %s7093_s15 }
  0x7b   : > { %s7095_s1 = scalar_lea.hbm %s7094_s15, 256  ;;  %s7100_s12 = scalar_lea.hbm %s7547_s27, 256 }
  0x7c   : > { %p7096_p11 = scmp.ne.s32.totalorder %s7094_s15, %s7095_s1  ;;  %p7101_p2 = scmp.lt.s32.totalorder %s7094_s15, %s7547_s27 }
  0x7d   : > { %p7102_p3 = scmp.lt.s32.totalorder %s7100_s12, %s7095_s1 }
  0x7e   : > { %p7098_p13 = pnand %p7096_p11, %p7701_p0 }
  0x7f   : > { %p7103_p4 = por %p7102_p3, %p7101_p2 }
  0x80   : > { %p7099_p1 = pneg %p7098_p13 }
  0x82   : > { %p7104_p7 = pnand %p7103_p4, %p7099_p1 }
  0x84   : > { %7107 = shalt.err (!%p7104_p7)
}
  0x85   : > { %6527 = dma.hbm_to_vmem [thread:$0]  (!%p7693_p12), %s7697_s16, 4096, %s1020_s4, [#allocation9], %s7423_s26, %s7423_s26, %s7424_s28  }
  0x86   : > { %s960_s29 = sshll.u32 %s7507_s30, 4  ;;  %s7426_s11 = smov [#allocation11]   ;;  %s7729_s29 = int_to_ptr.hbm [resolvable:$true] %s960_s29 }
  0x87   : > { %s1059_s23 = sshll.u32 %s7426_s11, 4  ;;  %s7123_s12 = sshra.s32 %s7715_s18, 4  ;;  %s1060_s23 = int_to_ptr.vmem [resolvable:$true] %s1059_s23  ;;  %s7124_s12 = int_to_ptr.hbm [resolvable:$true] %s7123_s12 }
  0x88   : > { %s7125_s15 = scalar_lea.hbm %s7124_s12, 256  ;;  %s7130_s1 = scalar_lea.hbm %s7577_s24, 256 }
  0x89   : > { %p7126_p8 = scmp.ne.s32.totalorder %s7124_s12, %s7125_s15  ;;  %p7131_p1 = scmp.lt.s32.totalorder %s7124_s12, %s7577_s24 }
  0x8a   : > { %p7132_p2 = scmp.lt.s32.totalorder %s7130_s1, %s7125_s15 }
  0x8b   : > { %p7128_p11 = pnand %p7126_p8, %p7701_p0 }
  0x8c   : > { %p7133_p3 = por %p7132_p2, %p7131_p1 }
  0x8d   : > { %p7129_p13 = pneg %p7128_p11 }
  0x8f   : > { %p7134_p4 = pnand %p7133_p3, %p7129_p13 }
  0x91   : > { %7137 = shalt.err (!%p7134_p4)
}
  0x92   : > { %6533 = dma.hbm_to_vmem [thread:$0]  (!%p7693_p12), %s7715_s18, 4096, %s1060_s23, [#allocation12], %s7423_s26, %s7423_s26, %s7424_s28  }
  0x93   : > { %s7427_s4 = smov [#allocation2]   ;;  %s1000_s11 = sshll.u32 %s9168_s6, 4  ;;  %s7743_s11 = int_to_ptr.hbm [resolvable:$true] %s1000_s11 }
  0x94   : > { %s962_s16 = sshll.u32 %s7427_s4, 4  ;;  %s7153_s12 = sshra.s32 %s7729_s29, 4  ;;  %s963_s16 = int_to_ptr.vmem [resolvable:$true] %s962_s16  ;;  %s7154_s12 = int_to_ptr.hbm [resolvable:$true] %s7153_s12 }
  0x95   : > { %s7155_s15 = scalar_lea.hbm %s7154_s12, 64  ;;  %s7160_s1 = scalar_lea.hbm %s7507_s30, 64 }
  0x96   : > { %p7156_p7 = scmp.ne.s32.totalorder %s7154_s12, %s7155_s15  ;;  %p7161_p13 = scmp.lt.s32.totalorder %s7154_s12, %s7507_s30 }
  0x97   : > { %p7162_p1 = scmp.lt.s32.totalorder %s7160_s1, %s7155_s15 }
  0x98   : > { %p7158_p8 = pnand %p7156_p7, %p7701_p0 }
  0x99   : > { %p7163_p2 = por %p7162_p1, %p7161_p13 }
  0x9a   : > { %p7159_p11 = pneg %p7158_p8 }
  0x9c   : > { %p7164_p3 = pnand %p7163_p2, %p7159_p11 }
  0x9e   : > { %7167 = shalt.err (!%p7164_p3)
}
  0x9f   : > { %6518 = dma.hbm_to_vmem [thread:$0]  (!%p7693_p12), %s7729_s29, 1024, %s963_s16, [#allocation3], %s7423_s26, %s7423_s26, %s7424_s28  }
  0xa0   : > { %s1040_s18 = sshll.u32 %s9166_s14, 4  ;;  %s7428_s23 = smov [#allocation7]   ;;  %s7757_s18 = int_to_ptr.hbm [resolvable:$true] %s1040_s18 }
  0xa1   : > { %s1002_s4 = sshll.u32 %s7428_s23, 4  ;;  %s7183_s12 = sshra.s32 %s7743_s11, 4  ;;  %s1003_s4 = int_to_ptr.vmem [resolvable:$true] %s1002_s4  ;;  %s7184_s12 = int_to_ptr.hbm [resolvable:$true] %s7183_s12 }
  0xa2   : > { %s7185_s15 = scalar_lea.hbm %s7184_s12, 64  ;;  %s7190_s1 = scalar_lea.hbm %s9168_s6, 64 }
  0xa3   : > { %p7186_p4 = scmp.ne.s32.totalorder %s7184_s12, %s7185_s15  ;;  %p7191_p11 = scmp.lt.s32.totalorder %s7184_s12, %s9168_s6 }
  0xa4   : > { %p7192_p13 = scmp.lt.s32.totalorder %s7190_s1, %s7185_s15 }
  0xa5   : > { %p7188_p7 = pnand %p7186_p4, %p7701_p0 }
  0xa6   : > { %p7193_p1 = por %p7192_p13, %p7191_p11 }
  0xa7   : > { %p7189_p8 = pneg %p7188_p7 }
  0xa9   : > { %p7194_p2 = pnand %p7193_p1, %p7189_p8 }
  0xab   : > { %7197 = shalt.err (!%p7194_p2)
}
  0xac   : > { %6524 = dma.hbm_to_vmem [thread:$0]  (!%p7693_p12), %s7743_s11, 1024, %s1003_s4, [#allocation6], %s7423_s26, %s7423_s26, %s7424_s28  }
  0xad   : > { %s7429_s29 = smov [#allocation10]   ;;  %s1086_s23 = sshll.u32 %s9167_s8, 4  ;;  %s7771_s23 = int_to_ptr.hbm [resolvable:$true] %s1086_s23 }
  0xae   : > { %s1042_s16 = sshll.u32 %s7429_s29, 4  ;;  %s7213_s12 = sshra.s32 %s7757_s18, 4  ;;  %s1043_s16 = int_to_ptr.vmem [resolvable:$true] %s1042_s16  ;;  %s7214_s12 = int_to_ptr.hbm [resolvable:$true] %s7213_s12 }
  0xaf   : > { %s7215_s15 = scalar_lea.hbm %s7214_s12, 64  ;;  %s7220_s1 = scalar_lea.hbm %s9166_s14, 64 }
  0xb0   : > { %p7216_p3 = scmp.ne.s32.totalorder %s7214_s12, %s7215_s15  ;;  %p7221_p8 = scmp.lt.s32.totalorder %s7214_s12, %s9166_s14 }
  0xb1   : > { %p7222_p11 = scmp.lt.s32.totalorder %s7220_s1, %s7215_s15 }
  0xb2   : > { %p7218_p4 = pnand %p7216_p3, %p7701_p0 }
  0xb3   : > { %p7223_p13 = por %p7222_p11, %p7221_p8 }
  0xb4   : > { %p7219_p7 = pneg %p7218_p4 }
  0xb6   : > { %p7224_p1 = pnand %p7223_p13, %p7219_p7 }
  0xb8   : > { %7227 = shalt.err (!%p7224_p1)
}
  0xb9   : > { %6530 = dma.hbm_to_vmem [thread:$0]  (!%p7693_p12), %s7757_s18, 1024, %s1043_s16, [#allocation9], %s7423_s26, %s7423_s26, %s7424_s28  }
  0xba   : > { %s7430_s11 = smov [#allocation13]   ;;  %s7243_s29 = sshra.s32 %s7771_s23, 4  ;;  %s7244_s29 = int_to_ptr.hbm [resolvable:$true] %s7243_s29 }
  0xbb   : > { %s1088_s4 = sshll.u32 %s7430_s11, 4  ;;  %s7245_s12 = scalar_lea.hbm %s7244_s29, 32  ;;  %s1089_s4 = int_to_ptr.vmem [resolvable:$true] %s1088_s4 }
  0xbc   : > { %p7246_p2 = scmp.ne.s32.totalorder %s7244_s29, %s7245_s12  ;;  %s7250_s15 = scalar_lea.hbm %s9167_s8, 32 }
  0xbd   : > { %p7251_p7 = scmp.lt.s32.totalorder %s7244_s29, %s9167_s8  ;;  %p7252_p8 = scmp.lt.s32.totalorder %s7250_s15, %s7245_s12 }
  0xbe   : > { %p7248_p3 = pnand %p7246_p2, %p7701_p0 }
  0xbf   : > { %p7253_p11 = por %p7252_p8, %p7251_p7 }
  0xc0   : > { %p7249_p4 = pneg %p7248_p3 }
  0xc2   : > { %p7254_p13 = pnand %p7253_p11, %p7249_p4 }
  0xc4   : > { %7257 = shalt.err (!%p7254_p13)
}
  0xc5   : > { %s7431_s1 = smov 128   ;;  %s7432_s28 = smov 8  }
  0xc6   : > { %6536 = dma.hbm_to_vmem [thread:$0]  (!%p7693_p12), %s7771_s23, 512, %s1089_s4, [#allocation12], %s7431_s1, %s7431_s1, %s7432_s28  }
  0xc7   : > { %1128 = sbr.rel (%p7683_p10) target bundleno = 8344 (0x2098), region = 164 }
  0xcc   : > { %7346 = dma.done.wait (%p6544_p9), [#allocation3], 1024  }
  0xcd   : > { %7348 = vsyncadd (%p6544_p9), [#allocation3], 4294966272 }
  0xce   : > { %7350 = dma.done.wait (%p6544_p9), [#allocation6], 2048  }
  0xcf   : > { %7352 = vsyncadd (%p6544_p9), [#allocation6], 4294965248 }
  0xd0   : > { %7354 = dma.done.wait (%p6544_p9), [#allocation9], 5120  }
  0xd1   : > { %7356 = vsyncadd (%p6544_p9), [#allocation9], 4294962176 }
  0xd2   : > { %7358 = dma.done.wait (%p6544_p9), [#allocation12], 4608  }
  0xd3   : > { %7360 = vsyncadd (%p6544_p9), [#allocation12], 4294962688  ;;  %s9183_s5 = sld [smem:[#allocation23_spill]]  ;;  %p1260_p10 = scmp.lt.s32.totalorder %s7655_s0, 1  ;;  %vm1297_vm0 = vcmask 261120   ;;  %v7433_v6 = vmov 32.0  }
  0xd4   : > { %s9184_s9 = sld [smem:[#allocation24_spill]]  ;;  %6720 = vrcp.f32 %v7433_v6  ;;  %v5756_v28 = vld [vmem:[%s7497_s19 + $0x10] sm:$0xf]  ;;  %v6371_v29 = vld [vmem:[%s7497_s19 + $0x14] sm:$0xf0]  ;;  %s9108_s29 = smov 96  }
  0xd5   : > { %s1261_s7 = scalar_select %p1260_p10, %s7655_s0, 1  ;;  %v6370_v30 = vld [vmem:[%s7497_s19 + $0x14] sm:$0xf]  ;;  %v5757_v31 = vor.u32 %v6371_v29, %v5756_v28  ;;  %v5758_v32 = vld [vmem:[%s7497_s19 + $0x18] sm:$0xf0]  ;;  %vm1551_vm11 = vcmask 195584  }
  0xd6   : > { %v5761_v33 = vor.u32 %v6370_v30, %v5758_v32  ;;  %v5748_v36 = vld [vmem:[%s7497_s19] sm:$0xf]  ;;  %v6369_v37 = vld [vmem:[%s7497_s19 + $0x4] sm:$0xf0]  ;;  %v6368_v38 = vld [vmem:[%s7497_s19 + $0x4] sm:$0xf] }
  0xd7   : > { %s5743_s2 = sshll.u32 %s1261_s7, 3  ;;  %s6367_s22 = sshll.u32 %s1261_s7, 4  ;;  %1463 = vmatpush.bf16.msra.mxu0 %v5757_v31  ;;  %v5749_v39 = vor.u32 %v6369_v37, %v5748_v36  ;;  %v5750_v40 = vld [vmem:[%s7497_s19 + $0x8] sm:$0xf0]  ;;  %v6645_v63 = vld [vmem:[%s9164_s13] ss:$0 sm:$0xff] }
  0xd8   : > { %1486 = vmatpush.bf16.msra.mxu1 %v5761_v33  ;;  %v5753_v42 = vor.u32 %v6368_v38, %v5750_v40  ;;  %s9185_s16 = sld [smem:[#allocation50_spill]]  ;;  %s9110_s7 = smov 32   ;;  %vm1609_vm12 = vcmask 1043456  }
  0xd9   : > { %s7813_s26 = scalar_lea.vmem %s9183_s5, %s5743_s2  ;;  %s9186_s23 = sld [smem:[#allocation27_spill]] }
  0xda   : > { %s7816_s18 = scalar_lea.vmem %s9184_s9, %s6367_s22  ;;  %v1294_v0 = vld [vmem:[%s7813_s26] sm:$0xff]  ;;  %v6721_v7 = vpop.eup %6720  ;;  %s9187_s11 = sld [smem:[#allocation28_spill]] }
  0xdb   : > { %v1295_v1 = vld [vmem:[%s7816_s18] sm:$0xff]  ;;  %v1296_v2 = vld [vmem:[%s7816_s18 + $0x8] sm:$0xff]  ;;  %v1298_v3 = vsel %vm1297_vm0, %v1294_v0, 0.0  ;;  %v1302_v8 = vmul.f32 32.0, %v6721_v7  ;;  %vm1306_vm1 = vweird.f32 %v6721_v7  ;;  %1464 = vmatpush.bf16.msra.mxu0 %v5749_v39  ;;  %s9189_s12 = sld [smem:[#allocation29_spill]]  ;;  %s9106_s2 = smov 64  }
  0xdc   : > { %v1330_v4 = vsel %vm1297_vm0, %v1296_v2, 0.0  ;;  %1299 = vadd.xlane.f32.xlu0 %v1298_v3  ;;  %v1327_v5 = vsel %vm1297_vm0, %v1295_v1, 0.0  ;;  %1487 = vmatpush.bf16.msra.mxu1 %v5753_v42  ;;  %s9190_s15 = sld [smem:[#allocation30_spill]]  ;;  %s9211_s14 = smov 64  }
  0xdd   : > { %1331 = vadd.xlane.f32.xlu1 %v1330_v4  ;;  %v1303_v9 = vsub.f32 1.0, %v1302_v8  ;;  %v6648_v8 = vld [vmem:[%s7472_s25] ss:$0 sm:$0xff]  ;;  %s9192_s28 = sld [smem:[#allocation31_spill]] }
  0xde   : > { %v7877_v30 = vld [vmem:[%s9185_s16 + $0x28] sm:$0xff]  ;;  %v7885_v33 = vld [vmem:[%s9185_s16 + $0x38] sm:$0xff]  ;;  %s9193_s22 = sld [smem:[#allocation34_spill]] }
  0xdf   : > { %v1304_v10 = vmul.f32 %v6721_v7, %v1303_v9  ;;  %s9202_s5 = sld [smem:[#allocation38_spill]] }
  0xe0   : > { %s9188_s4 = smov %s9187_s11 }
  0xe1   : > { %v1305_v11 = vadd.f32 %v6721_v7, %v1304_v10  ;;  %v6651_v31 = vld [vmem:[%s9189_s12] ss:$0 sm:$0xff] }
  0xe2   : > { %s9191_s1 = smov %s9190_s15 }
  0xe3   : > { %v7824_v12 = vsel %vm1306_vm1, %v6721_v7, %v1305_v11  ;;  %v6646_v7 = vld [vmem:[%s9163_s17] ss:$0 sm:$0xff] }
  0xe4   : > { %1328 = vadd.xlane.f32.xlu0 %v1327_v5 }
 0x14f   : > { %v1300_v13 = vpop.xlane.xlu0 %1299 }
 0x150   : > { %v1308_v14 = vmul.f32 %v7824_v12, %v1300_v13  ;;  %v1332_v17 = vpop.xlane.xlu1 %1331 }
 0x151   : > { %v1334_v21 = vmul.f32 %v1332_v17, %v7824_v12 }
 0x152   : > { %v1309_v15 = vsub.f32 %v1294_v0, %v1308_v14 }
 0x153   : > { %v7830_v23 = vsub.f32 %v1296_v2, %v1334_v21  ;;  %v6647_v2 = vld [vmem:[%s7467_s21] ss:$0 sm:$0xff] }
 0x154   : > { %v1310_v16 = vmul.f32 %v1309_v15, %v1309_v15  ;;  %v6649_v21 = vld [vmem:[%s9186_s23] ss:$0 sm:$0xff] }
 0x155   : > { %v1338_v26 = vmul.f32 %v7830_v23, %v7830_v23 }
 0x156   : > { %v1311_v18 = vsel %vm1297_vm0, %v1310_v16, 0.0 }
 0x157   : > { %1312 = vadd.xlane.f32.xlu1 %v1311_v18  ;;  %v1329_v19 = vpop.xlane.xlu0 %1328  ;;  %v1342_v27 = vsel %vm1297_vm0, %v1338_v26, 0.0  ;;  %v7854_v18 = vld [vmem:[%s9185_s16] sm:$0xff] }
 0x158   : > { %v1333_v20 = vmul.f32 %v1329_v19, %v7824_v12  ;;  %v7857_v19 = vld [vmem:[%s9185_s16 + $0x8] sm:$0xff] }
 0x15a   : > { %v1335_v22 = vsub.f32 %v1295_v1, %v1333_v20 }
 0x15c   : > { %v1337_v24 = vmul.f32 %v1335_v22, %v1335_v22 }
 0x15e   : > { %v1339_v25 = vsel %vm1297_vm0, %v1337_v24, 0.0  ;;  %v7866_v24 = vld [vmem:[%s9185_s16 + $0x18] sm:$0xff] }
 0x15f   : > { %1340 = vadd.xlane.f32.xlu2 %v1339_v25  ;;  %v7869_v25 = vld [vmem:[%s9185_s16 + $0x10] sm:$0xff] }
 0x167   : > { %1343 = vadd.xlane.f32.xlu2 %v1342_v27  ;;  %v6650_v27 = vld [vmem:[%s9187_s11] ss:$0 sm:$0xff]  ;;  %s9194_s11 = sld [smem:[#allocation32_spill]] }
 0x170   : > { %1686 = vrot.lane.b32.xlu1 %v7854_v18, %s9108_s29 }
 0x178   : > { %1692 = vrot.lane.b32.xlu1 %v7866_v24, %s9108_s29 }
 0x17f   : > { %1688 = vrot.lane.b32.xlu2 %v7857_v19, %s9108_s29 }
 0x187   : > { %1690 = vrot.lane.b32.xlu2 %v7869_v25, %s9108_s29 }
 0x18f   : > { %1696 = vrot.lane.b32.xlu2 %v7877_v30, %s9108_s29 }
 0x197   : > { %1700 = vrot.lane.b32.xlu2 %v7885_v33, %s9108_s29 }
 0x1ca   : > { %v1313_v34 = vpop.xlane.xlu1 %1312 }
 0x1cb   : > { %v1314_v35 = vmul.f32 %v1313_v34, %v7824_v12 }
 0x1cd   : > { %v1315_v41 = vadd.f32 1e-06, %v1314_v35  ;;  %v6652_v35 = vld [vmem:[%s9190_s15] ss:$0 sm:$0xff]  ;;  %s9198_s15 = sld [smem:[#allocation40_spill]] }
 0x1cf   : > { %6722 = vrsqrt.f32 %v1315_v41  ;;  %vm1322_vm3 = vweird.f32 %v1315_v41 }
 0x1d2   : > { %v1341_v43 = vpop.xlane.xlu2 %1340 }
 0x1d3   : > { %v1345_v44 = vmul.f32 %v1341_v43, %v7824_v12  ;;  %v1422_v43 = vld [vmem:[%s9192_s28] sm:$0x3] }
 0x1d5   : > { %v6723_v45 = vpop.eup %6722  ;;  %v1347_v46 = vadd.f32 1e-06, %v1345_v44  ;;  %v1424_v44 = vperm.slane %v1422_v43, 0 }
 0x1d6   : > { %v1317_v47 = vmul.f32 %v6723_v45, %v1315_v41  ;;  %vm1323_vm2 = vweird.f32 %v6723_v45 }
 0x1d7   : > { %6724 = vrsqrt.f32 %v1347_v46  ;;  %vm1324_vm4 = vmor %vm1322_vm3, %vm1323_vm2  ;;  %vm1355_vm6 = vweird.f32 %v1347_v46 }
 0x1d8   : > { %v1318_v48 = vmul.f32 %v6723_v45, %v1317_v47 }
 0x1da   : > { %v1319_v49 = vmul.f32 0.5, %v1318_v48  ;;  %v1344_v50 = vpop.xlane.xlu2 %1343 }
 0x1db   : > { %v1346_v51 = vmul.f32 %v1344_v50, %v7824_v12 }
 0x1dc   : > { %v1320_v52 = vsub.f32 1.5, %v1319_v49 }
 0x1dd   : > { %v6725_v53 = vpop.eup %6724  ;;  %v1348_v54 = vadd.f32 1e-06, %v1346_v51 }
 0x1de   : > { %v1321_v55 = vmul.f32 %v6723_v45, %v1320_v52  ;;  %v1350_v56 = vmul.f32 %v6725_v53, %v1347_v46  ;;  %vm1356_vm5 = vweird.f32 %v6725_v53 }
 0x1df   : > { %6726 = vrsqrt.f32 %v1348_v54  ;;  %vm1357_vm7 = vmor %vm1355_vm6, %vm1356_vm5  ;;  %vm1365_vm8 = vweird.f32 %v1348_v54 }
 0x1e0   : > { %v1351_v57 = vmul.f32 %v6725_v53, %v1350_v56  ;;  %v1325_v58 = vsel %vm1324_vm4, %v6723_v45, %v1321_v55 }
 0x1e1   : > { %v1326_v62 = vmul.f32 %v1325_v58, %v1309_v15  ;;  %v7909_v58 = vld [vmem:[%s9185_s16 + $0x20] sm:$0xff] }
 0x1e2   : > { %v1352_v59 = vmul.f32 0.5, %v1351_v57  ;;  %v7906_v55 = vpop.permute.xlu2 %1688 }
 0x1e3   : > { %v1375_v6 = vmul.f32 %v6645_v63, %v1326_v62  ;;  %v1409_v34 = vmul.f32 %v6651_v31, %v1326_v62 }
 0x1e4   : > { %v1353_v60 = vsub.f32 1.5, %v1352_v59 }
 0x1e5   : > { %v6727_v61 = vpop.eup %6726  ;;  %v1380_v13 = vadd.f32 %v6646_v7, %v1375_v6  ;;  %v1414_v37 = vadd.f32 %v6652_v35, %v1409_v34 }
 0x1e6   : > { %v1354_v0 = vmul.f32 %v6725_v53, %v1353_v60  ;;  %v1360_v1 = vmul.f32 %v6727_v61, %v1348_v54  ;;  %vm1366_vm9 = vweird.f32 %v6727_v61 }
 0x1e7   : > { %vm1367_vm10 = vmor %vm1365_vm8, %vm1366_vm9 }
 0x1e8   : > { %v1358_v3 = vsel %vm1357_vm7, %v6725_v53, %v1354_v0  ;;  %v1361_v4 = vmul.f32 %v6727_v61, %v1360_v1  ;;  %v7902_v53 = vpop.permute.xlu1 %1686 }
 0x1e9   : > { %v1369_v5 = vmul.f32 %v1358_v3, %v1335_v22 }
 0x1ea   : > { %v1362_v9 = vmul.f32 0.5, %v1361_v4  ;;  %v7919_v1 = vpop.permute.xlu2 %1690 }
 0x1eb   : > { %v1385_v10 = vmul.f32 %v6647_v2, %v1369_v5  ;;  %v1397_v26 = vmul.f32 %v6649_v21, %v1369_v5 }
 0x1ec   : > { %v1363_v11 = vsub.f32 1.5, %v1362_v9 }
 0x1ed   : > { %v1391_v14 = vadd.f32 %v6648_v8, %v1385_v10  ;;  %v1403_v29 = vadd.f32 %v6650_v27, %v1397_v26 }
 0x1ee   : > { %v1364_v15 = vmul.f32 %v6727_v61, %v1363_v11 }
 0x1ef   : > { %v1415_v16 = vpack.c.bf16 %v1391_v14, %v1380_v13 }
 0x1f0   : > { %v1368_v17 = vsel %vm1367_vm10, %v6727_v61, %v1364_v15  ;;  %v7915_v62 = vpop.permute.xlu1 %1692  ;;  %v7931_v15 = vld [vmem:[#allocation13] sm:$0xff] }
 0x1f1   : > { %5762 = vmatmul.msk.bf16.vlgmr.msra.gmra.mxu0 %vm1297_vm0, %v1415_v16  ;;  %5765 = vmatmul.msk.bf16.vlgmr.msra.gmra.mxu1 %vm1297_vm0, %v1415_v16  ;;  %v1370_v20 = vmul.f32 %v1368_v17, %v7830_v23  ;;  %v7933_v16 = vld [vmem:[#allocation13 + $0x8] sm:$0xff] }
 0x1f3   : > { %v1386_v22 = vmul.f32 %v6647_v2, %v1370_v20  ;;  %v1398_v32 = vmul.f32 %v6649_v21, %v1370_v20  ;;  %v7922_v2 = vld [vmem:[%s9185_s16 + $0x30] sm:$0xff] }
 0x1f5   : > { %v1392_v28 = vadd.f32 %v6648_v8, %v1386_v22  ;;  %v1404_v36 = vadd.f32 %v6650_v27, %v1398_v32  ;;  %v1425_v8 = vperm.slane %v1422_v43, 1 }
 0x1f7   : > { %v1416_v23 = vpack.c.bf16 %v1403_v29, %v1392_v28  ;;  %v1417_v38 = vpack.c.bf16 %v1414_v37, %v1404_v36  ;;  %v7942_v28 = vpop.permute.xlu2 %1696 }
 0x1ff   : > { %v7954_v37 = vpop.permute.xlu2 %1700 }
 0x201   : > { %5763 = vmatmul.msk.bf16.gmra.mxu0 %vm1297_vm0, %v1416_v23  ;;  %5766 = vmatmul.msk.bf16.gmra.mxu1 %vm1297_vm0, %v1416_v23 }
 0x211   : > { %5764 = vmatmul.msk.bf16.gmra.mxu0 %vm1297_vm0, %v1417_v38  ;;  %5767 = vmatmul.msk.bf16.gmra.mxu1 %vm1297_vm0, %v1417_v38 }
 0x26e   : > { %v1466_v39 = vpop.f32.mrf.mxu0  ;;  %v1489_v40 = vpop.f32.mrf.mxu1 }
 0x26f   : > { %v7897_v51 = vadd.f32 %v1466_v39, %v1424_v44  ;;  %v7958_v39 = vld [vmem:[#allocation13 + $0x10] sm:$0xff]  ;;  %v7960_v40 = vld [vmem:[#allocation13 + $0x18] sm:$0xff] }
 0x271   : > { %v1506_v22 = vmul.f32 %v7897_v51, %v7931_v15  ;;  %v1507_v26 = vmul.f32 %v7897_v51, %v7933_v16 }
 0x273   : > { %v1510_v23 = vpack.c.bf16 %v1507_v26, %v1506_v22 }
 0x276   : > { %v1468_v41 = vpop.f32.mrf.mxu0  ;;  %v1490_v42 = vpop.f32.mrf.mxu1 }
 0x277   : > { %v1469_v49 = vadd.f32 %v1468_v41, %v1424_v44 }
 0x279   : > { %v7900_v52 = vpack.c.bf16 %v1469_v49, %v7897_v51 }
 0x27e   : > { %v1471_v45 = vpop.f32.mrf.mxu0  ;;  %v1492_v46 = vpop.f32.mrf.mxu1 }
 0x27f   : > { %v1472_v47 = vadd.f32 %v1471_v45, %v1424_v44  ;;  %v1509_v45 = vmul.f32 %v7897_v51, %v7960_v40 }
 0x281   : > { %v7893_v48 = vpack.c.bf16 %v1472_v47, %v1472_v47 }
 0x283   : > { %1518 = vrot.lane.b32.xlu0 %v7893_v48, %s9108_s29 }
 0x286   : > { %v1473_v50 = vpop.f32.mrf.mxu0  ;;  %v1493_v5 = vpop.f32.mrf.mxu1 }
 0x287   : > { %v1474_v54 = vadd.f32 %v1473_v50, %v1424_v44  ;;  %v1494_v27 = vadd.f32 %v1493_v5, %v1425_v8 }
 0x289   : > { %v1710_v59 = vmul.f32 %v7902_v53, %v1474_v54  ;;  %v1712_v3 = vmul.f32 %v7919_v1, %v1474_v54 }
 0x28b   : > { %1516 = vrot.lane.b32.xlu0 %v7900_v52, %s9108_s29 }
 0x28e   : > { %v1476_v56 = vpop.f32.mrf.mxu0  ;;  %v1496_v6 = vpop.f32.mrf.mxu1 }
 0x28f   : > { %v1477_v57 = vadd.f32 %v1476_v56, %v1424_v44  ;;  %v1497_v20 = vadd.f32 %v1496_v6, %v1425_v8  ;;  %v1508_v44 = vmul.f32 %v7897_v51, %v7958_v39 }
 0x291   : > { %v1711_v60 = vmul.f32 %v7906_v55, %v1477_v57  ;;  %v1713_v0 = vmul.f32 %v7915_v62, %v1477_v57  ;;  %v7944_v29 = vpack.c.bf16 %v1497_v20, %v1494_v27  ;;  %v1715_v34 = vmul.f32 %v7942_v28, %v1477_v57 }
 0x292   : > { %v1717_v42 = vmul.f32 %v7954_v37, %v1477_v57  ;;  %v1511_v46 = vpack.c.bf16 %v1509_v45, %v1508_v44  ;;  %v1290_v44 = vld [vmem:[%s7622_s20 + $0x20] sm:$0xff] }
 0x293   : > { %1694 = vrot.lane.b32.xlu0 %v7909_v58, %s9108_s29  ;;  %v1718_v61 = vpack.c.bf16 %v1711_v60, %v1710_v59  ;;  %v1719_v4 = vpack.c.bf16 %v1713_v0, %v1712_v3  ;;  %v1749_v35 = vsel %vm1297_vm0, %v7944_v29, 0  ;;  %v1283_v60 = vld [vmem:[%s9165_s3 + $0x8] sm:$0xff]  ;;  %v1284_v3 = vld [vmem:[%s9165_s3 + $0x10] sm:$0xff] }
 0x295   : > { %1728 = vrot.lane.b32.xlu1 %v1718_v61, %s9110_s7 }
 0x296   : > { %v1478_v63 = vpop.f32.mrf.mxu0  ;;  %v1498_v7 = vpop.f32.mrf.mxu1 }
 0x297   : > { %v1499_v11 = vadd.f32 %v1498_v7, %v1425_v8  ;;  %v1285_v7 = vld [vmem:[%s9165_s3 + $0x18] sm:$0xff] }
 0x299   : > { %v7929_v13 = vpack.c.bf16 %v1499_v11, %v1499_v11  ;;  %v1286_v11 = vld [vmem:[%s7622_s20] sm:$0xff] }
 0x29b   : > { %1698 = vrot.lane.b32.xlu0 %v7922_v2, %s9108_s29  ;;  %v1752_v21 = vsel %vm1297_vm0, %v7929_v13, 0 }
 0x29d   : > { %1730 = vrot.lane.b32.xlu1 %v1719_v4, %s9110_s7 }
 0x2f5   : > { %v1519_v9 = vpop.permute.xlu0 %1518 }
 0x2f6   : > { %v1530_v10 = vsel %vm1297_vm0, %v1519_v9, 0 }
 0x2f7   : > { %1538 = vmatpush.bf16.xpose.msra.mxu2 %v1530_v10 }
 0x2fd   : > { %v1517_v14 = vpop.permute.xlu0 %1516 }
 0x2fe   : > { %v1527_v17 = vsel %vm1297_vm0, %v1517_v14, 0 }
 0x2ff   : > { %1539 = vmatpush.bf16.xpose.msra.mxu2 %v1527_v17 }
 0x305   : > { %v7946_v31 = vpop.permute.xlu0 %1694 }
 0x306   : > { %5768 = vmatmul.msk.bf16.vlgmr.msra.gmra.mxu2 %vm1297_vm0, %v1510_v23  ;;  %v1714_v32 = vmul.f32 %v7946_v31, %v1474_v54  ;;  %v1288_v23 = vld [vmem:[%s7622_s20 + $0x10] sm:$0xff] }
 0x307   : > { %1760 = vmatpush.bf16.xpose.msrb.mxu2 %v1752_v21  ;;  %v1729_v47 = vpop.permute.xlu1 %1728  ;;  %v1287_v21 = vld [vmem:[%s7622_s20 + $0x8] sm:$0xff] }
 0x308   : > { %v1720_v36 = vpack.c.bf16 %v1715_v34, %v1714_v32 }
 0x30a   : > { %1732 = vrot.lane.b32.xlu0 %v1720_v36, %s9110_s7  ;;  %v1289_v36 = vld [vmem:[%s7622_s20 + $0x18] sm:$0xff] }
 0x30d   : > { %v7956_v38 = vpop.permute.xlu0 %1698 }
 0x30e   : > { %v1716_v41 = vmul.f32 %v7956_v38, %v1474_v54  ;;  %v1282_v54 = vld [vmem:[%s9165_s3] sm:$0xff] }
 0x30f   : > { %1761 = vmatpush.bf16.xpose.msrb.mxu2 %v1749_v35  ;;  %v1731_v49 = vpop.permute.xlu1 %1730 }
 0x310   : > { %v1721_v43 = vpack.c.bf16 %v1717_v42, %v1716_v41 }
 0x312   : > { %1734 = vrot.lane.b32.xlu2 %v1721_v43, %s9110_s7 }
 0x316   : > { %5769 = vmatmul.msk.bf16.gmra.mxu2 %vm1297_vm0, %v1511_v46 }
 0x326   : > { %5781 = vmatmul.msk.bf16.vlgmr.msrb.gmra.mxu2 %vm1297_vm0, %v1729_v47 }
 0x336   : > { %5782 = vmatmul.msk.bf16.gmra.mxu2 %vm1297_vm0, %v1731_v49  ;;  %v1291_v49 = vld [vmem:[%s7622_s20 + $0x28] sm:$0xff] }
 0x36c   : > { %v1735_v57 = vpop.permute.xlu2 %1734 }
 0x37c   : > { %v1733_v50 = vpop.permute.xlu0 %1732 }
 0x37d   : > { %5783 = vmatmul.msk.bf16.gmra.mxu2 %vm1297_vm0, %v1733_v50 }
 0x389   : > { %v1541_v56 = vpop.f32.mrf.mxu2 }
 0x38a   : > { %v1542_v51 = vadd.f32 %v1541_v56, %v1282_v54 }
 0x38c   : > { %v1552_v59 = vsel %vm1551_vm11, %v1542_v51, -inf }
 0x38d   : > { %5784 = vmatmul.msk.bf16.gmra.mxu2 %vm1297_vm0, %v1735_v57  ;;  %1553 = vmax.xlane.f32.xlu2 %v1552_v59 }
 0x391   : > { %v1543_v61 = vpop.f32.mrf.mxu2 }
 0x392   : > { %v1544_v63 = vadd.f32 %v1543_v61, %v1283_v60 }
 0x394   : > { %v1555_v0 = vsel %vm1551_vm11, %v1544_v63, -inf }
 0x395   : > { %1556 = vmax.xlane.f32.xlu1 %v1555_v0  ;;  %v1292_v0 = vld [vmem:[%s7622_s20 + $0x30] sm:$0xff] }
 0x399   : > { %v1546_v4 = vpop.f32.mrf.mxu2 }
 0x39a   : > { %v7979_v5 = vadd.f32 %v1546_v4, %v1284_v3 }
 0x39c   : > { %v1558_v6 = vsel %vm1551_vm11, %v7979_v5, -inf }
 0x39d   : > { %1559 = vmax.xlane.f32.xlu1 %v1558_v6 }
 0x3a1   : > { %v1548_v8 = vpop.f32.mrf.mxu2 }
 0x3a2   : > { %v7984_v9 = vadd.f32 %v1548_v8, %v1285_v7 }
 0x3a4   : > { %v1561_v10 = vsel %vm1551_vm11, %v7984_v9, -inf }
 0x3a5   : > { %1562 = vmax.xlane.f32.xlu0 %v1561_v10  ;;  %v1293_v10 = vld [vmem:[%s7622_s20 + $0x38] sm:$0xff] }
 0x3a9   : > { %v1763_v14 = vpop.f32.mrf.mxu2 }
 0x3aa   : > { %v1764_v17 = vadd.f32 %v1763_v14, %v1286_v11 }
 0x3ac   : > { %v1783_v20 = vsel %vm1551_vm11, %v1764_v17, -inf }
 0x3ad   : > { %1784 = vmax.xlane.f32.xlu1 %v1783_v20 }
 0x3b1   : > { %v1765_v22 = vpop.f32.mrf.mxu2 }
 0x3b2   : > { %v7991_v26 = vadd.f32 %v1765_v22, %v1287_v21 }
 0x3b4   : > { %v1786_v27 = vsel %vm1551_vm11, %v7991_v26, -inf }
 0x3b5   : > { %1787 = vmax.xlane.f32.xlu0 %v1786_v27 }
 0x3b9   : > { %v1768_v32 = vpop.f32.mrf.mxu2 }
 0x3ba   : > { %v1769_v34 = vadd.f32 %v1768_v32, %v1288_v23 }
 0x3bc   : > { %v1789_v35 = vsel %vm1551_vm11, %v1769_v34, -inf }
 0x3bd   : > { %1790 = vmax.xlane.f32.xlu0 %v1789_v35 }
 0x3c1   : > { %v1770_v41 = vpop.f32.mrf.mxu2 }
 0x3c2   : > { %v7998_v42 = vadd.f32 %v1770_v41, %v1289_v36 }
 0x3c4   : > { %v1792_v43 = vsel %vm1551_vm11, %v7998_v42, -inf }
 0x3c5   : > { %1793 = vmax.xlane.f32.xlu2 %v1792_v43 }
 0x400   : > { %v1773_v45 = vpop.f32.mrf.mxu2  ;;  %v1554_v50 = vpop.xlane.xlu2 %1553 }
 0x401   : > { %v8003_v46 = vadd.f32 %v1773_v45, %v1290_v44  ;;  %v1564_v57 = vsub.f32 %v1542_v51, %v1554_v50 }
 0x403   : > { %v1795_v47 = vsel %vm1551_vm11, %v8003_v46, -inf  ;;  %v1568_v60 = vmul.f32 1.442695, %v1564_v57 }
 0x404   : > { %1796 = vmax.xlane.f32.xlu2 %v1795_v47 }
 0x405   : > { %6728 = vpow2.f32 %v1568_v60 }
 0x408   : > { %v1775_v54 = vpop.f32.mrf.mxu2  ;;  %v1557_v61 = vpop.xlane.xlu1 %1556 }
 0x409   : > { %v8008_v56 = vadd.f32 %v1775_v54, %v1291_v49  ;;  %v1565_v6 = vsub.f32 %v1544_v63, %v1557_v61 }
 0x40b   : > { %v1798_v59 = vsel %vm1551_vm11, %v8008_v56, -inf  ;;  %v1570_v8 = vmul.f32 1.442695, %v1565_v6  ;;  %v8018_v11 = vpop.eup %6728 }
 0x40c   : > { %1799 = vmax.xlane.f32.xlu1 %v1798_v59  ;;  %v1576_v63 = vsel %vm1551_vm11, %v8018_v11, 0.0 }
 0x40d   : > { %6730 = vpow2.f32 %v1570_v8 }
 0x410   : > { %v1778_v3 = vpop.f32.mrf.mxu2  ;;  %v8020_v51 = vpop.xlane.xlu1 %1559 }
 0x411   : > { %v8013_v4 = vadd.f32 %v1778_v3, %v1292_v0 }
 0x413   : > { %v1801_v7 = vsel %vm1551_vm11, %v8013_v4, -inf  ;;  %v8028_v22 = vpop.eup %6730 }
 0x414   : > { %1802 = vmax.xlane.f32.xlu0 %v1801_v7  ;;  %v1579_v35 = vsel %vm1551_vm11, %v8028_v22, 0.0 }
 0x418   : > { %v1780_v14 = vpop.f32.mrf.mxu2  ;;  %v1563_v43 = vpop.xlane.xlu0 %1562 }
 0x419   : > { %v8022_v20 = vadd.f32 %v1780_v14, %v1293_v10  ;;  %v1567_v50 = vsub.f32 %v7984_v9, %v1563_v43 }
 0x41b   : > { %v1804_v21 = vsel %vm1551_vm11, %v8022_v20, -inf  ;;  %v1574_v57 = vmul.f32 1.442695, %v1567_v50 }
 0x41c   : > { %1805 = vmax.xlane.f32.xlu2 %v1804_v21  ;;  %1577 = vadd.xlane.f32.xlu0 %v1576_v63 }
 0x420   : > { %v1785_v27 = vpop.xlane.xlu1 %1784 }
 0x421   : > { %v1807_v23 = vsub.f32 %v1764_v17, %v1785_v27 }
 0x423   : > { %v1815_v32 = vmul.f32 1.442695, %v1807_v23 }
 0x424   : > { %1580 = vadd.xlane.f32.xlu0 %v1579_v35 }
 0x425   : > { %6732 = vpow2.f32 %v1815_v32 }
 0x428   : > { %v1788_v17 = vpop.xlane.xlu0 %1787 }
 0x429   : > { %v1808_v49 = vsub.f32 %v7991_v26, %v1788_v17 }
 0x42b   : > { %v8032_v36 = vpop.eup %6732  ;;  %v1817_v54 = vmul.f32 1.442695, %v1808_v49 }
 0x42c   : > { %v1831_v41 = vsel %vm1551_vm11, %v8032_v36, 0.0 }
 0x42d   : > { %1832 = vadd.xlane.f32.xlu1 %v1831_v41 }
 0x430   : > { %v1791_v44 = vpop.xlane.xlu0 %1790 }
 0x431   : > { %v1809_v45 = vsub.f32 %v1769_v34, %v1791_v44 }
 0x433   : > { %v1819_v47 = vmul.f32 1.442695, %v1809_v45 }
 0x434   : > { %1879 = vrot.lane.b32.xlu2 %v7929_v13, %s9108_s29 }
 0x435   : > { %6734 = vpow2.f32 %v1819_v47 }
 0x436   : > { %6736 = vpow2.f32 %v1817_v54 }
 0x437   : > { %6738 = vpow2.f32 %v1574_v57 }
 0x438   : > { %1600 = vrot.lane.b32.xlu0 %v7893_v48, %s9106_s2  ;;  %v1794_v59 = vpop.xlane.xlu2 %1793 }
 0x439   : > { %v1810_v34 = vsub.f32 %v7998_v42, %v1794_v59 }
 0x43b   : > { %v8044_v13 = vpop.eup %6734  ;;  %v1821_v26 = vmul.f32 1.442695, %v1810_v34 }
 0x43c   : > { %v1837_v48 = vsel %vm1551_vm11, %v8044_v13, 0.0 }
 0x43d   : > { %6740 = vpow2.f32 %v1821_v26 }
 0x446   : > { %1877 = vrot.lane.b32.xlu1 %v7944_v29, %s9108_s29  ;;  %v8048_v29 = vpop.eup %6736  ;;  %s9199_s29 = smov %s9198_s15 }
 0x447   : > { %v8051_v60 = vpop.eup %6738  ;;  %v1834_v9 = vsel %vm1551_vm11, %v8048_v29, 0.0 }
 0x448   : > { %v1585_v61 = vsel %vm1551_vm11, %v8051_v60, 0.0  ;;  %v8057_v0 = vpop.eup %6740 }
 0x449   : > { %v1840_v3 = vsel %vm1551_vm11, %v8057_v0, 0.0 }
 0x45d   : > { %1838 = vadd.xlane.f32.xlu2 %v1837_v48 }
 0x462   : > { %1835 = vadd.xlane.f32.xlu0 %v1834_v9 }
 0x465   : > { %1586 = vadd.xlane.f32.xlu2 %v1585_v61 }
 0x470   : > { %1841 = vadd.xlane.f32.xlu1 %v1840_v3 }
 0x476   : > { %1598 = vrot.lane.b32.xlu0 %v7900_v52, %s9106_s2  ;;  %s9195_s2 = smov %s9194_s11 }
 0x477   : > { %v1797_v42 = vpop.xlane.xlu2 %1796 }
 0x478   : > { %v1811_v6 = vsub.f32 %v8003_v46, %v1797_v42 }
 0x47a   : > { %v1823_v7 = vmul.f32 1.442695, %v1811_v6 }
 0x47c   : > { %6742 = vpow2.f32 %v1823_v7 }
 0x47f   : > { %v1800_v8 = vpop.xlane.xlu1 %1799 }
 0x480   : > { %v1812_v10 = vsub.f32 %v8008_v56, %v1800_v8  ;;  %v1566_v56 = vsub.f32 %v7979_v5, %v8020_v51 }
 0x482   : > { %v8065_v14 = vpop.eup %6742  ;;  %v1825_v21 = vmul.f32 1.442695, %v1812_v10  ;;  %v1572_v17 = vmul.f32 1.442695, %v1566_v56 }
 0x483   : > { %v1843_v63 = vsel %vm1551_vm11, %v8065_v14, 0.0 }
 0x484   : > { %6744 = vpow2.f32 %v1825_v21  ;;  %1844 = vadd.xlane.f32.xlu1 %v1843_v63 }
 0x487   : > { %v1803_v27 = vpop.xlane.xlu0 %1802 }
 0x488   : > { %v1813_v23 = vsub.f32 %v8013_v4, %v1803_v27 }
 0x48a   : > { %v8070_v52 = vpop.eup %6744  ;;  %v1827_v32 = vmul.f32 1.442695, %v1813_v23 }
 0x48b   : > { %v1846_v46 = vsel %vm1551_vm11, %v8070_v52, 0.0 }
 0x48c   : > { %6746 = vpow2.f32 %v1827_v32  ;;  %1847 = vadd.xlane.f32.xlu2 %v1846_v46 }
 0x48f   : > { %v1806_v35 = vpop.xlane.xlu2 %1805  ;;  %v1578_v47 = vpop.xlane.xlu0 %1577 }
 0x490   : > { %v1814_v41 = vsub.f32 %v8022_v20, %v1806_v35 }
 0x492   : > { %v8077_v43 = vpop.eup %6746  ;;  %v1829_v44 = vmul.f32 1.442695, %v1814_v41 }
 0x493   : > { %v1849_v4 = vsel %vm1551_vm11, %v8077_v43, 0.0 }
 0x494   : > { %6748 = vpow2.f32 %v1829_v44  ;;  %1850 = vadd.xlane.f32.xlu1 %v1849_v4 }
 0x495   : > { %6750 = vpow2.f32 %v1572_v17 }
 0x497   : > { %v1880_v45 = vpop.permute.xlu2 %1879  ;;  %v1581_v54 = vpop.xlane.xlu0 %1580 }
 0x498   : > { %v1895_v49 = vsel %vm1609_vm12, %v1880_v45, 0 }
 0x499   : > { %1903 = vmatpush.bf16.msrb.mxu0 %v1895_v49 }
 0x49a   : > { %v8082_v5 = vpop.eup %6748 }
 0x49b   : > { %v1852_v51 = vsel %vm1551_vm11, %v8082_v5, 0.0  ;;  %v8086_v20 = vpop.eup %6750 }
 0x49c   : > { %1853 = vadd.xlane.f32.xlu2 %v1852_v51  ;;  %v1582_v50 = vsel %vm1551_vm11, %v8086_v20, 0.0 }
 0x4a0   : > { %1583 = vadd.xlane.f32.xlu0 %v1582_v50  ;;  %v1833_v48 = vpop.xlane.xlu1 %1832 }
 0x4a1   : > { %6752 = vrcp.f32 %v1833_v48 }
 0x4a7   : > { %v6753_v26 = vpop.eup %6752 }
 0x4a8   : > { %v1863_v3 = vmul.f32 %v6753_v26, %v8032_v36 }
 0x4aa   : > { %v1601_v57 = vpop.permute.xlu0 %1600 }
 0x4ab   : > { %v1611_v59 = vsel %vm1609_vm12, %v1601_v57, 0 }
 0x4ac   : > { %1619 = vmatpush.bf16.msra.mxu3 %v1611_v59 }
 0x4b8   : > { %v1878_v34 = vpop.permute.xlu1 %1877 }
 0x4b9   : > { %1904 = vmatpush.bf16.msrb.mxu0 %v1878_v34 }
 0x4d0   : > { %v1839_v7 = vpop.xlane.xlu2 %1838 }
 0x4d5   : > { %v1836_v9 = vpop.xlane.xlu0 %1835 }
 0x4d6   : > { %6754 = vrcp.f32 %v1836_v9 }
 0x4d7   : > { %6756 = vrcp.f32 %v1581_v54 }
 0x4d8   : > { %6758 = vrcp.f32 %v1578_v47  ;;  %v1587_v41 = vpop.xlane.xlu2 %1586 }
 0x4d9   : > { %6760 = vrcp.f32 %v1839_v7  ;;  %v6373_v7 = vld [vmem:[#allocation2 + $0x8] sm:$0xff] }
 0x4dc   : > { %v6755_v61 = vpop.eup %6754 }
 0x4dd   : > { %v1864_v42 = vmul.f32 %v6755_v61, %v8048_v29  ;;  %v6757_v8 = vpop.eup %6756 }
 0x4de   : > { %v6759_v21 = vpop.eup %6758  ;;  %v1593_v63 = vmul.f32 %v6757_v8, %v8028_v22  ;;  %v6372_v8 = vld [vmem:[#allocation2] sm:$0xff] }
 0x4df   : > { %v1871_v6 = vpack.c.bf16 %v1864_v42, %v1863_v3  ;;  %v1592_v23 = vmul.f32 %v6759_v21, %v8018_v11  ;;  %v6761_v32 = vpop.eup %6760  ;;  %v6375_v42 = vld [vmem:[#allocation5 + $0x8] sm:$0xff] }
 0x4e0   : > { %v1865_v56 = vmul.f32 %v6761_v32, %v8044_v13  ;;  %1962 = vmatpush.bf16.msrb.mxu1 %v6375_v42 }
 0x4e1   : > { %5785 = vmatmul.msk.bf16.vlgmr.msrb.gmra.mxu0 %vm1551_vm11, %v1871_v6  ;;  %v1596_v46 = vpack.c.bf16 %v1593_v63, %v1592_v23 }
 0x4e3   : > { %v1842_v10 = vpop.xlane.xlu1 %1841 }
 0x4e4   : > { %6762 = vrcp.f32 %v1842_v10 }
 0x4e8   : > { %v1599_v27 = vpop.permute.xlu0 %1598 }
 0x4e9   : > { %1620 = vmatpush.bf16.msra.mxu3 %v1599_v27 }
 0x4ea   : > { %v6763_v36 = vpop.eup %6762 }
 0x4eb   : > { %v1866_v29 = vmul.f32 %v6763_v36, %v8057_v0 }
 0x4ec   : > { %5770 = vmatmul.msk.bf16.vlgmr.msra.gmra.mxu3 %vm1551_vm11, %v1596_v46 }
 0x4ed   : > { %v1872_v35 = vpack.c.bf16 %v1866_v29, %v1865_v56  ;;  %1661 = vmatpush.bf16.msrb.mxu3 %v6373_v7 }
 0x4f1   : > { %5786 = vmatmul.msk.bf16.gmra.mxu0 %vm1551_vm11, %v1872_v35  ;;  %1662 = vmatpush.bf16.msrb.mxu3 %v6372_v8 }
 0x4f7   : > { %v1845_v17 = vpop.xlane.xlu1 %1844 }
 0x4f8   : > { %6764 = vrcp.f32 %v1845_v17 }
 0x4fe   : > { %v6765_v44 = vpop.eup %6764 }
 0x4ff   : > { %v1848_v22 = vpop.xlane.xlu2 %1847  ;;  %v1867_v4 = vmul.f32 %v6765_v44, %v8065_v14 }
 0x500   : > { %6766 = vrcp.f32 %v1848_v22 }
 0x506   : > { %v6767_v11 = vpop.eup %6766 }
 0x507   : > { %v1868_v45 = vmul.f32 %v6767_v11, %v8070_v52  ;;  %v1851_v0 = vpop.xlane.xlu1 %1850 }
 0x508   : > { %6768 = vrcp.f32 %v1851_v0 }
 0x509   : > { %v1873_v47 = vpack.c.bf16 %v1868_v45, %v1867_v4 }
 0x50b   : > { %5787 = vmatmul.msk.bf16.gmra.mxu0 %vm1551_vm11, %v1873_v47 }
 0x50e   : > { %v6769_v51 = vpop.eup %6768 }
 0x50f   : > { %v1854_v13 = vpop.xlane.xlu2 %1853  ;;  %v1869_v54 = vmul.f32 %v6769_v51, %v8077_v43  ;;  %v6374_v43 = vld [vmem:[#allocation5] sm:$0xff] }
 0x510   : > { %6770 = vrcp.f32 %v1854_v13  ;;  %1963 = vmatpush.bf16.msrb.mxu1 %v6374_v43 }
 0x511   : > { %6772 = vrcp.f32 %v1587_v41 }
 0x513   : > { %v1584_v49 = vpop.xlane.xlu0 %1583 }
 0x514   : > { %6774 = vrcp.f32 %v1584_v49  ;;  %v6988_v49 = vld [vmem:[%s7816_s18] sm:$0xff] }
 0x516   : > { %v6771_v50 = vpop.eup %6770 }
 0x517   : > { %v1870_v57 = vmul.f32 %v6771_v50, %v8082_v5  ;;  %v6773_v59 = vpop.eup %6772 }
 0x518   : > { %v1595_v34 = vmul.f32 %v6773_v59, %v8051_v60 }
 0x519   : > { %v1874_v14 = vpack.c.bf16 %v1870_v57, %v1869_v54  ;;  %v6989_v54 = vld [vmem:[%s7816_s18 + $0x8] sm:$0xff]  ;;  %s9197_s18 = sld [smem:[#allocation36_spill]] }
 0x51a   : > { %v6775_v48 = vpop.eup %6774 }
 0x51b   : > { %5788 = vmatmul.msk.bf16.gmra.mxu0 %vm1551_vm11, %v1874_v14  ;;  %v1594_v52 = vmul.f32 %v6775_v48, %v8086_v20  ;;  %v6654_v14 = vld [vmem:[%s9194_s11] ss:$0 sm:$0xff]  ;;  %s9200_s11 = sld [smem:[#allocation41_spill]] }
 0x51d   : > { %v1597_v9 = vpack.c.bf16 %v1595_v34, %v1594_v52  ;;  %v6990_v52 = vld [vmem:[%s7813_s26] sm:$0xff]  ;;  %s9196_s26 = sld [smem:[#allocation35_spill]] }
 0x51f   : > { %5771 = vmatmul.msk.bf16.gmra.mxu3 %vm1551_vm11, %v1597_v9 }
 0x521   : > { %s9201_s7 = smov %s9200_s11 }
 0x55e   : > { %v1906_v26 = vpop.f32.mrf.mxu0 }
 0x55f   : > { %v1926_v23 = vmul.f32 %v1906_v26, %v7854_v18 }
 0x566   : > { %v1908_v61 = vpop.f32.mrf.mxu0 }
 0x567   : > { %v1927_v32 = vmul.f32 %v1908_v61, %v7857_v19 }
 0x56e   : > { %v1911_v3 = vpop.f32.mrf.mxu0 }
 0x56f   : > { %v1622_v10 = vpop.f32.mrf.mxu3  ;;  %v1928_v63 = vmul.f32 %v1911_v3, %v7869_v25 }
 0x571   : > { %v1934_v29 = vadd.f32 %v1928_v63, %v1926_v23 }
 0x576   : > { %v1913_v6 = vpop.f32.mrf.mxu0 }
 0x577   : > { %v1624_v60 = vpop.f32.mrf.mxu3  ;;  %v1929_v27 = vmul.f32 %v1913_v6, %v7866_v24 }
 0x578   : > { %v1633_v19 = vmul.f32 %v1624_v60, %v7933_v16  ;;  %v6653_v16 = vld [vmem:[%s9193_s22] ss:$0 sm:$0xff] }
 0x579   : > { %v1935_v56 = vadd.f32 %v1929_v27, %v1927_v32 }
 0x588   : > { %v1916_v5 = vpop.f32.mrf.mxu0 }
 0x589   : > { %v1930_v36 = vmul.f32 %v1916_v5, %v7909_v58  ;;  %v1632_v58 = vmul.f32 %v1622_v10, %v7931_v15 }
 0x58b   : > { %v1936_v17 = vadd.f32 %v1934_v29, %v1930_v36  ;;  %v6377_v36 = vld [vmem:[#allocation7 + $0x8] sm:$0xff] }
 0x58c   : > { %2056 = vmatpush.bf16.msra.mxu3 %v6377_v36  ;;  %v6384_v36 = vld [vmem:[#allocation8 + $0x30] sm:$0xff] }
 0x590   : > { %v1918_v20 = vpop.f32.mrf.mxu0 }
 0x591   : > { %v1931_v46 = vmul.f32 %v1918_v20, %v7877_v30 }
 0x593   : > { %v1937_v22 = vadd.f32 %v1935_v56, %v1931_v46 }
 0x598   : > { %v1921_v21 = vpop.f32.mrf.mxu0 }
 0x599   : > { %v1932_v35 = vmul.f32 %v1921_v21, %v7922_v2  ;;  %v1636_v2 = vadd.f32 %v1633_v19, %v1632_v58 }
 0x59b   : > { %v1938_v24 = vadd.f32 %v1936_v17, %v1932_v35  ;;  %v6376_v35 = vld [vmem:[#allocation7] sm:$0xff] }
 0x59c   : > { %2057 = vmatpush.bf16.msra.mxu3 %v6376_v35  ;;  %v6395_v35 = vld [vmem:[#allocation11 + $0x38] sm:$0xff] }
 0x5a0   : > { %v1923_v41 = vpop.f32.mrf.mxu0 }
 0x5a1   : > { %v1933_v44 = vmul.f32 %v1923_v41, %v7885_v33 }
 0x5a2   : > { %v1627_v25 = vpop.f32.mrf.mxu3 }
 0x5a3   : > { %v1939_v18 = vadd.f32 %v1937_v22, %v1933_v44  ;;  %v1634_v30 = vmul.f32 %v1627_v25, %v7958_v39  ;;  %v6387_v44 = vld [vmem:[#allocation10 + $0x8] sm:$0xff] }
 0x5a5   : > { %v1940_v11 = vpack.c.bf16 %v1939_v18, %v1938_v24  ;;  %v1637_v45 = vadd.f32 %v1636_v2, %v1634_v30  ;;  %v6386_v18 = vld [vmem:[#allocation10] sm:$0xff] }
 0x5a7   : > { %5797 = vmatmul.msk.bf16.vlgmr.msrb.gmra.mxu1 %vm1297_vm0, %v1940_v11 }
 0x5aa   : > { %v1629_v4 = vpop.f32.mrf.mxu3 }
 0x5ab   : > { %v1635_v33 = vmul.f32 %v1629_v4, %v7960_v40 }
 0x5ad   : > { %v1638_v47 = vadd.f32 %v1637_v45, %v1635_v33 }
 0x5af   : > { %v1639_v0 = vpack.c.bf16 %v1638_v47, %v1638_v47 }
 0x5b1   : > { %5780 = vmatmul.msk.bf16.vlgmr.msrb.gmra.mxu3 %vm1297_vm0, %v1639_v0  ;;  %v6385_v0 = vld [vmem:[#allocation8 + $0x38] sm:$0xff] }
 0x5b2   : > { %2241 = vmatpush.bf16.msrb.mxu3 %v6387_v44  ;;  %2124 = vmatpush.bf16.msra.mxu1 %v6385_v0  ;;  %v6659_v44 = vld [vmem:[%s9202_s5] ss:$0 sm:$0xff] }
 0x5b6   : > { %2242 = vmatpush.bf16.msrb.mxu3 %v6386_v18  ;;  %2125 = vmatpush.bf16.msra.mxu1 %v6384_v36 }
 0x624   : > { %v1965_v13 = vpop.f32.mrf.mxu1 }
 0x625   : > { %v1970_v15 = vadd.f32 %v6988_v49, %v1965_v13 }
 0x627   : > { %v8125_v51 = vadd.f32 %v6653_v16, %v1970_v15 }
 0x629   : > { %v2162_v39 = vsel %vm1297_vm0, %v8125_v51, 0.0 }
 0x62a   : > { %2163 = vadd.xlane.f32.xlu2 %v2162_v39 }
 0x62c   : > { %v1967_v50 = vpop.f32.mrf.mxu1 }
 0x62d   : > { %v1971_v57 = vadd.f32 %v6989_v54, %v1967_v50  ;;  %v6657_v54 = vld [vmem:[%s9196_s26] ss:$0 sm:$0xff] }
 0x62f   : > { %v8130_v40 = vadd.f32 %v6653_v16, %v1971_v57 }
 0x631   : > { %v2165_v59 = vsel %vm1297_vm0, %v8130_v40, 0.0 }
 0x632   : > { %2166 = vadd.xlane.f32.xlu0 %v2165_v59 }
 0x634   : > { %v1664_v48 = vpop.f32.mrf.mxu3 }
 0x635   : > { %v1668_v34 = vadd.f32 %v6990_v52, %v1664_v48  ;;  %v6658_v48 = vld [vmem:[%s9197_s18] ss:$0 sm:$0xff] }
 0x637   : > { %v8136_v9 = vadd.f32 %v6654_v14, %v1668_v34 }
 0x639   : > { %v2001_v26 = vsel %vm1297_vm0, %v8136_v9, 0.0 }
 0x63a   : > { %2002 = vadd.xlane.f32.xlu1 %v2001_v26 }
 0x63c   : > { %v1666_v61 = vpop.f32.mrf.mxu3 }
 0x69d   : > { %v2164_v3 = vpop.xlane.xlu2 %2163 }
 0x69e   : > { %v2168_v42 = vmul.f32 %v2164_v3, %v7824_v12 }
 0x6a0   : > { %v8142_v6 = vsub.f32 %v8125_v51, %v2168_v42 }
 0x6a2   : > { %v2172_v43 = vmul.f32 %v8142_v6, %v8142_v6 }
 0x6a4   : > { %v2174_v5 = vsel %vm1297_vm0, %v2172_v43, 0.0 }
 0x6a5   : > { %2175 = vadd.xlane.f32.xlu2 %v2174_v5  ;;  %v2167_v7 = vpop.xlane.xlu0 %2166 }
 0x6a6   : > { %v2169_v8 = vmul.f32 %v2167_v7, %v7824_v12 }
 0x6a8   : > { %v8149_v10 = vsub.f32 %v8130_v40, %v2169_v8  ;;  %v6655_v8 = vld [vmem:[%s9198_s15] ss:$0 sm:$0xff]  ;;  %s9203_s15 = sld [smem:[#allocation43_spill]] }
 0x6aa   : > { %v2173_v20 = vmul.f32 %v8149_v10, %v8149_v10 }
 0x6ac   : > { %v2177_v21 = vsel %vm1297_vm0, %v2173_v20, 0.0 }
 0x6ad   : > { %v2003_v60 = vpop.xlane.xlu1 %2002  ;;  %2178 = vadd.xlane.f32.xlu0 %v2177_v21 }
 0x6ae   : > { %v2004_v63 = vmul.f32 %v2003_v60, %v7824_v12  ;;  %v6656_v60 = vld [vmem:[%s9200_s11] ss:$0 sm:$0xff]  ;;  %s9204_s6 = smov %s9203_s15  ;;  %s9205_s11 = sld [smem:[#allocation39_spill]] }
 0x6af   : > { %v6660_v0 = vld [vmem:[%s9203_s15] ss:$0 sm:$0xff]  ;;  %s9207_s15 = sld [smem:[#allocation44_spill]] }
 0x6b0   : > { %v2005_v27 = vsub.f32 %v8136_v9, %v2004_v63 }
 0x6b2   : > { %v2006_v23 = vmul.f32 %v2005_v27, %v2005_v27 }
 0x6b4   : > { %v2007_v32 = vsel %vm1297_vm0, %v2006_v23, 0.0  ;;  %s9206_s8 = smov %s9205_s11 }
 0x6b5   : > { %2008 = vadd.xlane.f32.xlu1 %v2007_v32  ;;  %s9208_s9 = smov %s9207_s15 }
 0x718   : > { %v2176_v46 = vpop.xlane.xlu2 %2175 }
 0x719   : > { %v2180_v41 = vmul.f32 %v2176_v46, %v7824_v12  ;;  %v6383_v46 = vld [vmem:[#allocation8 + $0x28] sm:$0xff] }
 0x71a   : > { %2126 = vmatpush.bf16.msra.mxu1 %v6383_v46  ;;  %v6661_v46 = vld [vmem:[%s9205_s11] ss:$0 sm:$0xff]  ;;  %s9209_s11 = smov 96  }
 0x71b   : > { %v2182_v22 = vadd.f32 1e-06, %v2180_v41  ;;  %v6378_v41 = vld [vmem:[#allocation8] sm:$0xff] }
 0x71d   : > { %vm2190_vm5 = vweird.f32 %v2182_v22 }
 0x720   : > { %v2179_v29 = vpop.xlane.xlu0 %2178 }
 0x721   : > { %v2181_v56 = vmul.f32 %v2179_v29, %v7824_v12  ;;  %v6382_v29 = vld [vmem:[#allocation8 + $0x20] sm:$0xff] }
 0x722   : > { %2127 = vmatpush.bf16.msra.mxu1 %v6382_v29 }
 0x723   : > { %v2183_v17 = vadd.f32 1e-06, %v2181_v56  ;;  %v6381_v56 = vld [vmem:[#allocation8 + $0x18] sm:$0xff] }
 0x725   : > { %6776 = vrsqrt.f32 %v2183_v17  ;;  %vm2200_vm3 = vweird.f32 %v2183_v17 }
 0x726   : > { %6778 = vrsqrt.f32 %v2182_v22  ;;  %2128 = vmatpush.bf16.msra.mxu1 %v6381_v56 }
 0x728   : > { %v2009_v25 = vpop.xlane.xlu1 %2008 }
 0x729   : > { %v2010_v24 = vmul.f32 %v2009_v25, %v7824_v12 }
 0x72b   : > { %v2011_v19 = vadd.f32 1e-06, %v2010_v24  ;;  %v6777_v11 = vpop.eup %6776  ;;  %v6392_v24 = vld [vmem:[#allocation11 + $0x20] sm:$0xff] }
 0x72c   : > { %v6779_v58 = vpop.eup %6778  ;;  %v2195_v30 = vmul.f32 %v6777_v11, %v2183_v17  ;;  %vm2201_vm1 = vweird.f32 %v6777_v11  ;;  %v6394_v17 = vld [vmem:[#allocation11 + $0x30] sm:$0xff] }
 0x72d   : > { %6780 = vrsqrt.f32 %v2011_v19  ;;  %v2185_v4 = vmul.f32 %v6779_v58, %v2182_v22  ;;  %vm2018_vm14 = vweird.f32 %v2011_v19  ;;  %vm2191_vm2 = vweird.f32 %v6779_v58  ;;  %vm2202_vm4 = vmor %vm2200_vm3, %vm2201_vm1  ;;  %v6393_v22 = vld [vmem:[#allocation11 + $0x28] sm:$0xff] }
 0x72e   : > { %v2196_v33 = vmul.f32 %v6777_v11, %v2195_v30  ;;  %vm2192_vm6 = vmor %vm2190_vm5, %vm2191_vm2 }
 0x72f   : > { %v2186_v16 = vmul.f32 %v6779_v58, %v2185_v4  ;;  %v6390_v4 = vld [vmem:[#allocation11 + $0x10] sm:$0xff] }
 0x730   : > { %v2197_v49 = vmul.f32 0.5, %v2196_v33  ;;  %v6389_v33 = vld [vmem:[#allocation11 + $0x8] sm:$0xff] }
 0x731   : > { %v2187_v39 = vmul.f32 0.5, %v2186_v16  ;;  %v6388_v16 = vld [vmem:[#allocation11] sm:$0xff] }
 0x732   : > { %v2198_v57 = vsub.f32 1.5, %v2197_v49 }
 0x733   : > { %v6781_v2 = vpop.eup %6780  ;;  %v2188_v52 = vsub.f32 1.5, %v2187_v39 }
 0x734   : > { %v2013_v45 = vmul.f32 %v6781_v2, %v2011_v19  ;;  %vm2019_vm13 = vweird.f32 %v6781_v2  ;;  %v2199_v26 = vmul.f32 %v6777_v11, %v2198_v57 }
 0x735   : > { %vm2020_vm15 = vmor %vm2018_vm14, %vm2019_vm13  ;;  %v2189_v3 = vmul.f32 %v6779_v58, %v2188_v52 }
 0x736   : > { %v2014_v47 = vmul.f32 %v6781_v2, %v2013_v45  ;;  %v2203_v43 = vsel %vm2202_vm4, %v6777_v11, %v2199_v26  ;;  %v6391_v11 = vld [vmem:[#allocation11 + $0x18] sm:$0xff] }
 0x737   : > { %v2193_v5 = vsel %vm2192_vm6, %v6779_v58, %v2189_v3  ;;  %v2205_v7 = vmul.f32 %v2203_v43, %v8149_v10  ;;  %v6380_v10 = vld [vmem:[#allocation8 + $0x10] sm:$0xff] }
 0x738   : > { %v2015_v13 = vmul.f32 0.5, %v2014_v47  ;;  %v2204_v20 = vmul.f32 %v2193_v5, %v8142_v6  ;;  %2129 = vmatpush.bf16.msra.mxu1 %v6380_v10  ;;  %v6379_v6 = vld [vmem:[#allocation8 + $0x8] sm:$0xff] }
 0x739   : > { %v2210_v21 = vmul.f32 %v6655_v8, %v2205_v7 }
 0x73a   : > { %v2016_v15 = vsub.f32 1.5, %v2015_v13  ;;  %v2209_v63 = vmul.f32 %v6655_v8, %v2204_v20 }
 0x73c   : > { %v2017_v50 = vmul.f32 %v6781_v2, %v2016_v15  ;;  %v2214_v23 = vadd.f32 %v6656_v60, %v2209_v63  ;;  %2130 = vmatpush.bf16.msra.mxu1 %v6379_v6 }
 0x73e   : > { %v2021_v59 = vsel %vm2020_vm15, %v6781_v2, %v2017_v50 }
 0x73f   : > { %v2022_v14 = vmul.f32 %v2021_v59, %v2005_v27  ;;  %v2215_v27 = vadd.f32 %v6656_v60, %v2210_v21 }
 0x740   : > { %2131 = vmatpush.bf16.msra.mxu1 %v6378_v41  ;;  %v6662_v41 = vld [vmem:[%s9207_s15] ss:$0 sm:$0xff]  ;;  %s9210_s15 = smov 32  }
 0x741   : > { %v2026_v34 = vmul.f32 %v6657_v54, %v2022_v14  ;;  %v2216_v32 = vpack.c.bf16 %v2215_v27, %v2214_v23 }
 0x743   : > { %v2030_v61 = vadd.f32 %v6658_v48, %v2026_v34 }
 0x745   : > { %v2031_v42 = vpack.c.bf16 %v2030_v61, %v2030_v61 }
 0x747   : > { %5806 = vmatmul.msk.bf16.vlgmr.msra.gmra.mxu3 %vm1297_vm0, %v2031_v42 }
 0x748   : > { %2319 = vmatpush.bf16.msra.mxu3 %v6395_v35 }
 0x74c   : > { %2320 = vmatpush.bf16.msra.mxu3 %v6394_v17 }
 0x750   : > { %2321 = vmatpush.bf16.msra.mxu3 %v6393_v22 }
 0x754   : > { %2322 = vmatpush.bf16.msra.mxu3 %v6392_v24 }
 0x757   : > { %5847 = vmatmul.msk.bf16.vlgmr.msrb.gmra.mxu3 %vm1297_vm0, %v2216_v32 }
 0x758   : > { %2323 = vmatpush.bf16.msra.mxu3 %v6391_v11 }
 0x75c   : > { %2324 = vmatpush.bf16.msra.mxu3 %v6390_v4 }
 0x760   : > { %2325 = vmatpush.bf16.msra.mxu3 %v6389_v33 }
 0x764   : > { %2326 = vmatpush.bf16.msra.mxu3 %v6388_v16 }
 0x7ca   : > { %v2059_v25 = vpop.f32.mrf.mxu3 }
 0x7cb   : > { %v2060_v18 = vadd.f32 %v6659_v44, %v2059_v25 }
 0x7cd   : > { %v2063_v19 = vmul.f32 %v2060_v18, %v2060_v18 }
 0x7cf   : > { %v2064_v58 = vmul.f32 %v2063_v19, %v2060_v18 }
 0x7d1   : > { %v2065_v30 = vmul.f32 0.044715, %v2064_v58 }
 0x7d2   : > { %v2061_v2 = vpop.f32.mrf.mxu3 }
 0x7d3   : > { %v2066_v45 = vadd.f32 %v2065_v30, %v2060_v18 }
 0x7d5   : > { %v2067_v47 = vmul.f32 0.7978846, %v2066_v45 }
 0x7d7   : > { %6782 = vtanh.f32 %v2067_v47 }
 0x7da   : > { %v2244_v13 = vpop.f32.mrf.mxu3 }
 0x7db   : > { %v2245_v49 = vadd.f32 %v6660_v0, %v2244_v13 }
 0x7dd   : > { %v6783_v15 = vpop.eup %6782  ;;  %v2249_v39 = vmul.f32 %v2245_v49, %v2245_v49 }
 0x7de   : > { %v2069_v50 = vadd.f32 1.0, %v6783_v15 }
 0x7df   : > { %v2251_v54 = vmul.f32 %v2249_v39, %v2245_v49 }
 0x7e0   : > { %v2070_v57 = vmul.f32 0.5, %v2069_v50 }
 0x7e1   : > { %v2253_v59 = vmul.f32 0.044715, %v2251_v54 }
 0x7e2   : > { %v2246_v14 = vpop.f32.mrf.mxu3  ;;  %v2071_v48 = vmul.f32 %v2070_v57, %v2060_v18  ;;  %v5903_v57 = vld [vmem:[%s7497_s19 + $0x30] sm:$0xf] }
 0x7e3   : > { %v2255_v52 = vadd.f32 %v2253_v59, %v2245_v49  ;;  %v2247_v34 = vadd.f32 %v6660_v0, %v2246_v14  ;;  %v6399_v59 = vld [vmem:[%s7497_s19 + $0x34] sm:$0xf0]  ;;  %v6398_v14 = vld [vmem:[%s7497_s19 + $0x34] sm:$0xf] }
 0x7e4   : > { %v2072_v26 = vpack.c.bf16 %v2071_v48, %v2071_v48  ;;  %v5904_v48 = vor.u32 %v6399_v59, %v5903_v57  ;;  %v6667_v57 = vld [vmem:[%s9186_s23 + $0x1] ss:$0 sm:$0xff] }
 0x7e5   : > { %v2257_v61 = vmul.f32 0.7978846, %v2255_v52  ;;  %v2250_v3 = vmul.f32 %v2247_v34, %v2247_v34  ;;  %v5905_v52 = vld [vmem:[%s7497_s19 + $0x38] sm:$0xf0] }
 0x7e6   : > { %2132 = vmatmul.bf16.vlgmr.msra.gmra.mxu1 %v2072_v26 }
 0x7e7   : > { %v2252_v42 = vmul.f32 %v2250_v3, %v2247_v34  ;;  %6784 = vtanh.f32 %v2257_v61  ;;  %2503 = vmatpush.bf16.msrb.mxu1 %v5904_v48  ;;  %v5895_v61 = vld [vmem:[%s7497_s19 + $0x20] sm:$0xf]  ;;  %v6397_v3 = vld [vmem:[%s7497_s19 + $0x24] sm:$0xf0] }
 0x7e8   : > { %v6668_v48 = vld [vmem:[%s9188_s4 + $0x1] ss:$0 sm:$0xff] }
 0x7e9   : > { %v2254_v43 = vmul.f32 0.044715, %v2252_v42  ;;  %v6396_v42 = vld [vmem:[%s7497_s19 + $0x24] sm:$0xf] }
 0x7eb   : > { %v2256_v5 = vadd.f32 %v2254_v43, %v2247_v34  ;;  %v5896_v43 = vor.u32 %v6397_v3, %v5895_v61  ;;  %v6669_v61 = vld [vmem:[%s9189_s12 + $0x1] ss:$0 sm:$0xff] }
 0x7ed   : > { %v2258_v7 = vmul.f32 0.7978846, %v2256_v5  ;;  %v6785_v8 = vpop.eup %6784  ;;  %v5897_v5 = vld [vmem:[%s7497_s19 + $0x28] sm:$0xf0]  ;;  %2504 = vmatpush.bf16.msrb.mxu1 %v5896_v43  ;;  %v6670_v43 = vld [vmem:[%s9191_s1 + $0x1] ss:$0 sm:$0xff] }
 0x7ee   : > { %v2261_v20 = vadd.f32 1.0, %v6785_v8  ;;  %v5900_v8 = vor.u32 %v6396_v42, %v5897_v5 }
 0x7ef   : > { %6786 = vtanh.f32 %v2258_v7 }
 0x7f0   : > { %v2263_v60 = vmul.f32 0.5, %v2261_v20 }
 0x7f2   : > { %v2265_v23 = vmul.f32 %v2263_v60, %v2245_v49 }
 0x7f5   : > { %v6787_v21 = vpop.eup %6786 }
 0x7f6   : > { %v2262_v63 = vadd.f32 1.0, %v6787_v21 }
 0x7f8   : > { %v2264_v27 = vmul.f32 0.5, %v2262_v63 }
 0x7fa   : > { %v2266_v32 = vmul.f32 %v2264_v27, %v2247_v34  ;;  %v5908_v34 = vor.u32 %v6398_v14, %v5905_v52 }
 0x7fc   : > { %v2267_v36 = vpack.c.bf16 %v2266_v32, %v2265_v23  ;;  %2526 = vmatpush.bf16.msra.mxu2 %v5908_v34 }
 0x7fe   : > { %2327 = vmatmul.bf16.vlgmr.msra.gmra.mxu3 %v2267_v36 }
 0x800   : > { %2527 = vmatpush.bf16.msra.mxu2 %v5900_v8 }
 0x863   : > { %v2133_v29 = vpop.f32.mrf.mxu1 }
 0x864   : > { %v2134_v56 = vadd.f32 %v6661_v46, %v2133_v29 }
 0x866   : > { %v8172_v10 = vadd.f32 %v2134_v56, %v8136_v9 }
 0x868   : > { %v2335_v6 = vsel %vm1297_vm0, %v8172_v10, 0.0 }
 0x869   : > { %2336 = vadd.xlane.f32.xlu1 %v2335_v6 }
 0x86b   : > { %v2135_v35 = vpop.f32.mrf.mxu1 }
 0x881   : > { %v2328_v17 = vpop.f32.mrf.mxu3 }
 0x882   : > { %v2329_v22 = vadd.f32 %v6662_v41, %v2328_v17 }
 0x884   : > { %v8178_v44 = vadd.f32 %v2329_v22, %v8125_v51 }
 0x886   : > { %v2357_v25 = vsel %vm1297_vm0, %v8178_v44, 0.0 }
 0x887   : > { %2358 = vadd.xlane.f32.xlu2 %v2357_v25 }
 0x889   : > { %v2330_v24 = vpop.f32.mrf.mxu3 }
 0x88a   : > { %v2331_v18 = vadd.f32 %v6662_v41, %v2330_v24  ;;  %v6663_v24 = vld [vmem:[%s9164_s13 + $0x1] ss:$0 sm:$0xff] }
 0x88c   : > { %v8183_v9 = vadd.f32 %v2331_v18, %v8130_v40 }
 0x88e   : > { %v2360_v19 = vsel %vm1297_vm0, %v8183_v9, 0.0 }
 0x88f   : > { %2361 = vadd.xlane.f32.xlu0 %v2360_v19 }
 0x8dc   : > { %v2337_v11 = vpop.xlane.xlu1 %2336 }
 0x8dd   : > { %v2338_v58 = vmul.f32 %v2337_v11, %v7824_v12 }
 0x8df   : > { %v2339_v30 = vsub.f32 %v8172_v10, %v2338_v58  ;;  %v6664_v58 = vld [vmem:[%s7467_s21 + $0x1] ss:$0 sm:$0xff] }
 0x8e1   : > { %v2340_v51 = vmul.f32 %v2339_v30, %v2339_v30 }
 0x8e3   : > { %v2341_v2 = vsel %vm1297_vm0, %v2340_v51, 0.0 }
 0x8e4   : > { %2342 = vadd.xlane.f32.xlu1 %v2341_v2 }
 0x8fa   : > { %v2359_v4 = vpop.xlane.xlu2 %2358 }
 0x8fb   : > { %v2363_v45 = vmul.f32 %v2359_v4, %v7824_v12 }
 0x8fd   : > { %v8192_v40 = vsub.f32 %v8178_v44, %v2363_v45  ;;  %v6665_v45 = vld [vmem:[%s7472_s25 + $0x1] ss:$0 sm:$0xff] }
 0x8ff   : > { %v2367_v33 = vmul.f32 %v8192_v40, %v8192_v40 }
 0x901   : > { %v2369_v47 = vsel %vm1297_vm0, %v2367_v33, 0.0 }
 0x902   : > { %v2362_v0 = vpop.xlane.xlu0 %2361  ;;  %2370 = vadd.xlane.f32.xlu2 %v2369_v47  ;;  %v6666_v47 = vld [vmem:[%s9163_s17 + $0x1] ss:$0 sm:$0xff] }
 0x903   : > { %v2364_v16 = vmul.f32 %v2362_v0, %v7824_v12 }
 0x905   : > { %v8199_v13 = vsub.f32 %v8183_v9, %v2364_v16 }
 0x907   : > { %v2368_v49 = vmul.f32 %v8199_v13, %v8199_v13 }
 0x909   : > { %v2372_v15 = vsel %vm1297_vm0, %v2368_v49, 0.0 }
 0x90a   : > { %2373 = vadd.xlane.f32.xlu0 %v2372_v15 }
 0x957   : > { %v2343_v39 = vpop.xlane.xlu1 %2342 }
 0x958   : > { %v2344_v50 = vmul.f32 %v2343_v39, %v7824_v12 }
 0x95a   : > { %v2345_v54 = vadd.f32 1e-06, %v2344_v50 }
 0x95c   : > { %6788 = vrsqrt.f32 %v2345_v54  ;;  %vm2352_vm8 = vweird.f32 %v2345_v54 }
 0x962   : > { %v6789_v26 = vpop.eup %6788 }
 0x963   : > { %v2347_v7 = vmul.f32 %v6789_v26, %v2345_v54  ;;  %vm2353_vm7 = vweird.f32 %v6789_v26 }
 0x964   : > { %vm2354_vm9 = vmor %vm2352_vm8, %vm2353_vm7 }
 0x965   : > { %v2348_v20 = vmul.f32 %v6789_v26, %v2347_v7 }
 0x967   : > { %v2349_v27 = vmul.f32 0.5, %v2348_v20  ;;  %v5892_v20 = vld [vmem:[%s9192_s28 + $0x2] sm:$0x3] }
 0x969   : > { %v2350_v23 = vsub.f32 1.5, %v2349_v27 }
 0x96b   : > { %v2351_v56 = vmul.f32 %v6789_v26, %v2350_v23 }
 0x96d   : > { %v2355_v41 = vsel %vm2354_vm9, %v6789_v26, %v2351_v56 }
 0x96e   : > { %v2356_v18 = vmul.f32 %v2355_v41, %v2339_v30 }
 0x970   : > { %v2406_v4 = vmul.f32 %v6663_v24, %v2356_v18  ;;  %v2446_v42 = vmul.f32 %v6669_v61, %v2356_v18  ;;  %v8262_v61 = vld [vmem:[#allocation13] sm:$0xff] }
 0x972   : > { %v2412_v30 = vadd.f32 %v6666_v47, %v2406_v4  ;;  %v2452_v7 = vadd.f32 %v6670_v43, %v2446_v42  ;;  %v8265_v42 = vld [vmem:[#allocation13 + $0x8] sm:$0xff] }
 0x975   : > { %v2371_v21 = vpop.xlane.xlu2 %2370 }
 0x976   : > { %v2375_v60 = vmul.f32 %v2371_v21, %v7824_v12  ;;  %v2464_v21 = vperm.slane %v5892_v20, 0 }
 0x978   : > { %v2377_v63 = vadd.f32 1e-06, %v2375_v60 }
 0x97a   : > { %6790 = vrsqrt.f32 %v2377_v63  ;;  %vm2385_vm13 = vweird.f32 %v2377_v63 }
 0x97d   : > { %v2374_v32 = vpop.xlane.xlu0 %2373 }
 0x97e   : > { %v2376_v36 = vmul.f32 %v2374_v32, %v7824_v12 }
 0x980   : > { %v6791_v46 = vpop.eup %6790  ;;  %v2378_v29 = vadd.f32 1e-06, %v2376_v36 }
 0x981   : > { %v2380_v6 = vmul.f32 %v6791_v46, %v2377_v63  ;;  %vm2386_vm10 = vweird.f32 %v6791_v46 }
 0x982   : > { %6792 = vrsqrt.f32 %v2378_v29  ;;  %vm2387_vm14 = vmor %vm2385_vm13, %vm2386_vm10  ;;  %vm2395_vm1 = vweird.f32 %v2378_v29 }
 0x983   : > { %v2381_v35 = vmul.f32 %v6791_v46, %v2380_v6 }
 0x985   : > { %v2382_v17 = vmul.f32 0.5, %v2381_v35 }
 0x987   : > { %v2383_v22 = vsub.f32 1.5, %v2382_v17 }
 0x988   : > { %v6793_v25 = vpop.eup %6792 }
 0x989   : > { %v2384_v19 = vmul.f32 %v6791_v46, %v2383_v22  ;;  %v2390_v11 = vmul.f32 %v6793_v25, %v2378_v29  ;;  %vm2396_vm15 = vweird.f32 %v6793_v25 }
 0x98a   : > { %vm2397_vm2 = vmor %vm2395_vm1, %vm2396_vm15 }
 0x98b   : > { %v2388_v51 = vsel %vm2387_vm14, %v6791_v46, %v2384_v19  ;;  %v2391_v2 = vmul.f32 %v6793_v25, %v2390_v11 }
 0x98c   : > { %v2399_v33 = vmul.f32 %v2388_v51, %v8192_v40 }
 0x98d   : > { %v2392_v0 = vmul.f32 0.5, %v2391_v2 }
 0x98e   : > { %v2418_v16 = vmul.f32 %v6664_v58, %v2399_v33  ;;  %v2432_v14 = vmul.f32 %v6667_v57, %v2399_v33 }
 0x98f   : > { %v2393_v49 = vsub.f32 1.5, %v2392_v0 }
 0x990   : > { %v2425_v15 = vadd.f32 %v6665_v45, %v2418_v16  ;;  %v2439_v34 = vadd.f32 %v6668_v48, %v2432_v14 }
 0x991   : > { %v2394_v39 = vmul.f32 %v6793_v25, %v2393_v49  ;;  %v2465_v49 = vperm.slane %v5892_v20, 1  ;;  %v8273_v20 = vld [vmem:[#allocation13 + $0x18] sm:$0xff] }
 0x992   : > { %v2453_v50 = vpack.c.bf16 %v2425_v15, %v2412_v30 }
 0x993   : > { %v2398_v54 = vsel %vm2397_vm2, %v6793_v25, %v2394_v39 }
 0x994   : > { %5909 = vmatmul.msk.bf16.vlgmr.msrb.gmra.mxu1 %vm1297_vm0, %v2453_v50  ;;  %5912 = vmatmul.msk.bf16.vlgmr.msra.gmra.mxu2 %vm1297_vm0, %v2453_v50  ;;  %v2400_v40 = vmul.f32 %v2398_v54, %v8199_v13 }
 0x996   : > { %v2419_v59 = vmul.f32 %v6664_v58, %v2400_v40  ;;  %v2433_v3 = vmul.f32 %v6667_v57, %v2400_v40 }
 0x998   : > { %v2426_v52 = vadd.f32 %v6665_v45, %v2419_v59  ;;  %v2440_v5 = vadd.f32 %v6668_v48, %v2433_v3 }
 0x99a   : > { %v2454_v26 = vpack.c.bf16 %v2439_v34, %v2426_v52  ;;  %v2455_v8 = vpack.c.bf16 %v2452_v7, %v2440_v5 }
 0x9a4   : > { %5910 = vmatmul.msk.bf16.gmra.mxu1 %vm1297_vm0, %v2454_v26  ;;  %5913 = vmatmul.msk.bf16.gmra.mxu2 %vm1297_vm0, %v2454_v26 }
 0x9b4   : > { %5911 = vmatmul.msk.bf16.gmra.mxu1 %vm1297_vm0, %v2455_v8  ;;  %5914 = vmatmul.msk.bf16.gmra.mxu2 %vm1297_vm0, %v2455_v8  ;;  %v8270_v8 = vld [vmem:[#allocation13 + $0x10] sm:$0xff] }
 0xa11   : > { %v2506_v13 = vpop.f32.mrf.mxu1 }
 0xa12   : > { %v2507_v27 = vadd.f32 %v2506_v13, %v2464_v21 }
 0xa14   : > { %v2548_v3 = vmul.f32 %v8262_v61, %v2507_v27  ;;  %v2549_v43 = vmul.f32 %v8265_v42, %v2507_v27  ;;  %v2550_v13 = vmul.f32 %v8270_v8, %v2507_v27 }
 0xa16   : > { %v2552_v5 = vpack.c.bf16 %v2549_v43, %v2548_v3  ;;  %v7003_v3 = vld [vmem:[%s7622_s20 + $0x28] sm:$0xff] }
 0xa17   : > { %v2529_v60 = vpop.f32.mrf.mxu2 }
 0xa19   : > { %v2508_v63 = vpop.f32.mrf.mxu1 }
 0xa1a   : > { %v2509_v23 = vadd.f32 %v2508_v63, %v2464_v21 }
 0xa1c   : > { %v8232_v32 = vpack.c.bf16 %v2509_v23, %v2507_v27 }
 0xa1e   : > { %2558 = vrot.lane.b32.xlu2 %v8232_v32, %s9209_s11 }
 0xa1f   : > { %v2530_v36 = vpop.f32.mrf.mxu2 }
 0xa21   : > { %v2511_v46 = vpop.f32.mrf.mxu1 }
 0xa22   : > { %v2512_v29 = vadd.f32 %v2511_v46, %v2464_v21 }
 0xa24   : > { %v8236_v56 = vpack.c.bf16 %v2512_v29, %v2512_v29  ;;  %v6995_v29 = vld [vmem:[%s9165_s3] sm:$0xff] }
 0xa26   : > { %2560 = vrot.lane.b32.xlu1 %v8236_v56, %s9209_s11 }
 0xa27   : > { %v2532_v6 = vpop.f32.mrf.mxu2 }
 0xa29   : > { %v2513_v35 = vpop.f32.mrf.mxu1 }
 0xa2a   : > { %v2514_v41 = vadd.f32 %v2513_v35, %v2464_v21 }
 0xa2c   : > { %v2720_v24 = vmul.f32 %v2514_v41, %v7902_v53  ;;  %v2722_v18 = vmul.f32 %v2514_v41, %v7919_v1  ;;  %v2726_v58 = vmul.f32 %v2514_v41, %v7956_v38  ;;  %v2724_v16 = vmul.f32 %v2514_v41, %v7946_v31  ;;  %v6996_v41 = vld [vmem:[%s7622_s20] sm:$0xff] }
 0xa2f   : > { %v2533_v17 = vpop.f32.mrf.mxu2 }
 0xa30   : > { %v2534_v57 = vadd.f32 %v2533_v17, %v2465_v49 }
 0xa31   : > { %v2516_v22 = vpop.f32.mrf.mxu1 }
 0xa32   : > { %v2517_v25 = vadd.f32 %v2516_v22, %v2464_v21  ;;  %v2551_v21 = vmul.f32 %v8273_v20, %v2507_v27 }
 0xa34   : > { %v2721_v19 = vmul.f32 %v2517_v25, %v7906_v55  ;;  %v2723_v11 = vmul.f32 %v2517_v25, %v7915_v62  ;;  %v2727_v51 = vmul.f32 %v2517_v25, %v7954_v37  ;;  %v2725_v0 = vmul.f32 %v2517_v25, %v7942_v28 }
 0xa35   : > { %v2553_v60 = vpack.c.bf16 %v2551_v21, %v2550_v13 }
 0xa36   : > { %v2728_v2 = vpack.c.bf16 %v2721_v19, %v2720_v24  ;;  %v2729_v4 = vpack.c.bf16 %v2723_v11, %v2722_v18  ;;  %v2731_v45 = vpack.c.bf16 %v2727_v51, %v2726_v58  ;;  %v2730_v15 = vpack.c.bf16 %v2725_v0, %v2724_v16  ;;  %v6997_v24 = vld [vmem:[%s9165_s3 + $0x8] sm:$0xff]  ;;  %v7000_v0 = vld [vmem:[%s7622_s20 + $0x10] sm:$0xff] }
 0xa37   : > { %v2536_v33 = vpop.f32.mrf.mxu2  ;;  %v6998_v11 = vld [vmem:[%s7622_s20 + $0x8] sm:$0xff] }
 0xa38   : > { %2738 = vrot.lane.b32.xlu0 %v2728_v2, %s9210_s15  ;;  %2740 = vrot.lane.b32.xlu1 %v2729_v4, %s9210_s15  ;;  %v2537_v54 = vadd.f32 %v2536_v33, %v2465_v49 }
 0xa39   : > { %2744 = vrot.lane.b32.xlu2 %v2731_v45, %s9210_s15  ;;  %v2518_v47 = vpop.f32.mrf.mxu1  ;;  %v6999_v45 = vld [vmem:[%s9165_s3 + $0x10] sm:$0xff] }
 0xa3a   : > { %v8256_v59 = vpack.c.bf16 %v2537_v54, %v2534_v57 }
 0xa3c   : > { %v2759_v14 = vsel %vm1297_vm0, %v8256_v59, 0 }
 0xa3f   : > { %v2538_v30 = vpop.f32.mrf.mxu2 }
 0xa40   : > { %v2539_v39 = vadd.f32 %v2538_v30, %v2465_v49  ;;  %2742 = vrot.lane.b32.xlu0 %v2730_v15, %s9210_s15 }
 0xa42   : > { %v8252_v50 = vpack.c.bf16 %v2539_v39, %v2539_v39  ;;  %v7001_v39 = vld [vmem:[%s9165_s3 + $0x18] sm:$0xff] }
 0xa44   : > { %v2762_v40 = vsel %vm1297_vm0, %v8252_v50, 0 }
 0xa45   : > { %2770 = vmatpush.bf16.xpose.msra.mxu1 %v2762_v40 }
 0xa4d   : > { %2771 = vmatpush.bf16.xpose.msra.mxu1 %v2759_v14 }
 0xa78   : > { %v2559_v34 = vpop.permute.xlu2 %2558 }
 0xa79   : > { %v2569_v26 = vsel %vm1297_vm0, %v2559_v34, 0 }
 0xa93   : > { %v2745_v36 = vpop.permute.xlu2 %2744 }
 0xa98   : > { %v2561_v48 = vpop.permute.xlu1 %2560 }
 0xa99   : > { %v2572_v52 = vsel %vm1297_vm0, %v2561_v48, 0  ;;  %v7002_v48 = vld [vmem:[%s7622_s20 + $0x20] sm:$0xff] }
 0xa9a   : > { %2580 = vmatpush.bf16.xpose.msra.mxu0 %v2572_v52 }
 0xaa2   : > { %2581 = vmatpush.bf16.xpose.msra.mxu0 %v2569_v26 }
 0xaa9   : > { %5916 = vmatmul.msk.bf16.vlgmr.msra.gmra.mxu0 %vm1297_vm0, %v2552_v5 }
 0xaaa   : > { %v2739_v7 = vpop.permute.xlu0 %2738  ;;  %v2741_v63 = vpop.permute.xlu1 %2740 }
 0xaab   : > { %5930 = vmatmul.msk.bf16.vlgmr.msra.gmra.mxu1 %vm1297_vm0, %v2739_v7 }
 0xab2   : > { %v2743_v23 = vpop.permute.xlu0 %2742 }
 0xab9   : > { %5917 = vmatmul.msk.bf16.gmra.mxu0 %vm1297_vm0, %v2553_v60 }
 0xabb   : > { %5931 = vmatmul.msk.bf16.gmra.mxu1 %vm1297_vm0, %v2741_v63  ;;  %v7005_v63 = vld [vmem:[%s7622_s20 + $0x18] sm:$0xff] }
 0xacb   : > { %5932 = vmatmul.msk.bf16.gmra.mxu1 %vm1297_vm0, %v2743_v23 }
 0xadb   : > { %5933 = vmatmul.msk.bf16.gmra.mxu1 %vm1297_vm0, %v2745_v36 }
 0xb26   : > { %v2583_v46 = vpop.f32.mrf.mxu0 }
 0xb27   : > { %v2584_v6 = vadd.f32 %v6995_v29, %v2583_v46 }
 0xb28   : > { %v2773_v35 = vpop.f32.mrf.mxu1 }
 0xb29   : > { %v2774_v27 = vadd.f32 %v6996_v41, %v2773_v35  ;;  %v2593_v17 = vsel %vm1551_vm11, %v2584_v6, -inf }
 0xb2a   : > { %2594 = vmax.xlane.f32.xlu1 %v2593_v17 }
 0xb2b   : > { %v2793_v22 = vsel %vm1551_vm11, %v2774_v27, -inf }
 0xb2c   : > { %2794 = vmax.xlane.f32.xlu0 %v2793_v22 }
 0xb2e   : > { %v2585_v25 = vpop.f32.mrf.mxu0 }
 0xb2f   : > { %v2586_v18 = vadd.f32 %v6997_v24, %v2585_v25 }
 0xb30   : > { %v2775_v19 = vpop.f32.mrf.mxu1 }
 0xb31   : > { %v2776_v58 = vadd.f32 %v6998_v11, %v2775_v19  ;;  %v2596_v2 = vsel %vm1551_vm11, %v2586_v18, -inf }
 0xb33   : > { %v2796_v51 = vsel %vm1551_vm11, %v2776_v58, -inf }
 0xb34   : > { %2797 = vmax.xlane.f32.xlu2 %v2796_v51  ;;  %2597 = vmax.xlane.f32.xlu0 %v2596_v2 }
 0xb36   : > { %v2588_v4 = vpop.f32.mrf.mxu0 }
 0xb37   : > { %v2589_v33 = vadd.f32 %v6999_v45, %v2588_v4 }
 0xb38   : > { %v2778_v47 = vpop.f32.mrf.mxu1 }
 0xb39   : > { %v8290_v16 = vadd.f32 %v7000_v0, %v2778_v47  ;;  %v2599_v49 = vsel %vm1551_vm11, %v2589_v33, -inf }
 0xb3b   : > { %v2799_v15 = vsel %vm1551_vm11, %v8290_v16, -inf }
 0xb3c   : > { %2600 = vmax.xlane.f32.xlu2 %v2599_v49  ;;  %2800 = vmax.xlane.f32.xlu1 %v2799_v15 }
 0xb3e   : > { %v2590_v30 = vpop.f32.mrf.mxu0 }
 0xb3f   : > { %v2591_v54 = vadd.f32 %v7001_v39, %v2590_v30 }
 0xb40   : > { %v2780_v40 = vpop.f32.mrf.mxu1 }
 0xb41   : > { %v2602_v57 = vsel %vm1551_vm11, %v2591_v54, -inf  ;;  %v8317_v23 = vadd.f32 %v7005_v63, %v2780_v40  ;;  %v7006_v63 = vld [vmem:[%s7622_s20 + $0x30] sm:$0xff] }
 0xb43   : > { %v2802_v36 = vsel %vm1551_vm11, %v8317_v23, -inf }
 0xb44   : > { %2603 = vmax.xlane.f32.xlu1 %v2602_v57 }
 0xb48   : > { %v2783_v14 = vpop.f32.mrf.mxu1  ;;  %2641 = vrot.lane.b32.xlu0 %v8236_v56, %s9211_s14  ;;  %v7004_v56 = vld [vmem:[%s7622_s20 + $0x38] sm:$0xff] }
 0xb49   : > { %v8300_v52 = vadd.f32 %v7002_v48, %v2783_v14 }
 0xb4b   : > { %v2805_v34 = vsel %vm1551_vm11, %v8300_v52, -inf }
 0xb4c   : > { %2806 = vmax.xlane.f32.xlu1 %v2805_v34 }
 0xb50   : > { %v2785_v26 = vpop.f32.mrf.mxu1 }
 0xb51   : > { %v8305_v43 = vadd.f32 %v7003_v3, %v2785_v26 }
 0xb53   : > { %v2808_v5 = vsel %vm1551_vm11, %v8305_v43, -inf }
 0xb54   : > { %2809 = vmax.xlane.f32.xlu1 %v2808_v5 }
 0xb58   : > { %v8309_v7 = vpop.f32.mrf.mxu1 }
 0xb60   : > { %v2790_v13 = vpop.f32.mrf.mxu1 }
 0xb61   : > { %v8312_v21 = vadd.f32 %v7004_v56, %v2790_v13 }
 0xb63   : > { %v2814_v60 = vsel %vm1551_vm11, %v8312_v21, -inf }
 0xb64   : > { %2815 = vmax.xlane.f32.xlu1 %v2814_v60 }
 0xb72   : > { %2803 = vmax.xlane.f32.xlu0 %v2802_v36  ;;  %v8352_v36 = vadd.f32 %v7006_v63, %v8309_v7 }
 0xb9d   : > { %v2595_v46 = vpop.xlane.xlu1 %2594 }
 0xb9e   : > { %v2605_v29 = vsub.f32 %v2584_v6, %v2595_v46 }
 0xb9f   : > { %v2795_v35 = vpop.xlane.xlu0 %2794 }
 0xba0   : > { %v2609_v41 = vmul.f32 1.442695, %v2605_v29  ;;  %v2817_v17 = vsub.f32 %v2774_v27, %v2795_v35 }
 0xba2   : > { %6794 = vpow2.f32 %v2609_v41  ;;  %v2825_v22 = vmul.f32 1.442695, %v2817_v17 }
 0xba4   : > { %6796 = vpow2.f32 %v2825_v22 }
 0xba7   : > { %v2798_v25 = vpop.xlane.xlu2 %2797  ;;  %v2598_v24 = vpop.xlane.xlu0 %2597 }
 0xba8   : > { %v8321_v19 = vpop.eup %6794  ;;  %v2606_v11 = vsub.f32 %v2586_v18, %v2598_v24  ;;  %v2818_v45 = vsub.f32 %v2776_v58, %v2798_v25 }
 0xba9   : > { %v2617_v51 = vsel %vm1551_vm11, %v8321_v19, 0.0 }
 0xbaa   : > { %v8325_v2 = vpop.eup %6796  ;;  %v2611_v4 = vmul.f32 1.442695, %v2606_v11  ;;  %2618 = vadd.xlane.f32.xlu2 %v2617_v51  ;;  %v2827_v27 = vmul.f32 1.442695, %v2818_v45 }
 0xbab   : > { %v2841_v6 = vsel %vm1551_vm11, %v8325_v2, 0.0 }
 0xbac   : > { %2842 = vadd.xlane.f32.xlu1 %v2841_v6  ;;  %6798 = vpow2.f32 %v2611_v4 }
 0xbad   : > { %6800 = vpow2.f32 %v2827_v27 }
 0xbaf   : > { %v2601_v47 = vpop.xlane.xlu2 %2600  ;;  %v2801_v0 = vpop.xlane.xlu1 %2800 }
 0xbb0   : > { %v2607_v49 = vsub.f32 %v2589_v33, %v2601_v47  ;;  %v2819_v13 = vsub.f32 %v8290_v16, %v2801_v0 }
 0xbb2   : > { %v2613_v15 = vmul.f32 1.442695, %v2607_v49  ;;  %v8329_v30 = vpop.eup %6798  ;;  %v2829_v56 = vmul.f32 1.442695, %v2819_v13 }
 0xbb3   : > { %v2620_v18 = vsel %vm1551_vm11, %v8329_v30, 0.0  ;;  %v8333_v40 = vpop.eup %6800 }
 0xbb4   : > { %6802 = vpow2.f32 %v2613_v15  ;;  %2621 = vadd.xlane.f32.xlu1 %v2620_v18  ;;  %v2844_v26 = vsel %vm1551_vm11, %v8333_v40, 0.0 }
 0xbb7   : > { %v2604_v39 = vpop.xlane.xlu1 %2603 }
 0xbb8   : > { %v2608_v58 = vsub.f32 %v2591_v54, %v2604_v39 }
 0xbba   : > { %v8335_v57 = vpop.eup %6802  ;;  %v2615_v14 = vmul.f32 1.442695, %v2608_v58  ;;  %v2642_v48 = vpop.permute.xlu0 %2641 }
 0xbbb   : > { %v2651_v34 = vsel %vm1609_vm12, %v2642_v48, 0  ;;  %v2623_v33 = vsel %vm1551_vm11, %v8335_v57, 0.0 }
 0xbbc   : > { %6804 = vpow2.f32 %v2615_v14  ;;  %2624 = vadd.xlane.f32.xlu0 %v2623_v33  ;;  %2659 = vmatpush.bf16.msrb.mxu3 %v2651_v34 }
 0xbbd   : > { %2845 = vadd.xlane.f32.xlu1 %v2844_v26  ;;  %6806 = vpow2.f32 %v2829_v56 }
 0xbbf   : > { %v2807_v5 = vpop.xlane.xlu1 %2806 }
 0xbc2   : > { %v6805_v54 = vpop.eup %6804  ;;  %2639 = vrot.lane.b32.xlu2 %v8232_v32, %s9211_s14 }
 0xbc3   : > { %v2626_v3 = vsel %vm1551_vm11, %v6805_v54, 0.0  ;;  %v8358_v41 = vpop.eup %6806 }
 0xbc4   : > { %v2847_v16 = vsel %vm1551_vm11, %v8358_v41, 0.0 }
 0xbc5   : > { %2627 = vadd.xlane.f32.xlu1 %v2626_v3 }
 0xbc7   : > { %v2810_v60 = vpop.xlane.xlu1 %2809 }
 0xbc8   : > { %v2822_v32 = vsub.f32 %v8305_v43, %v2810_v60  ;;  %v2821_v43 = vsub.f32 %v8300_v52, %v2807_v5 }
 0xbca   : > { %v2835_v35 = vmul.f32 1.442695, %v2822_v32  ;;  %v2833_v22 = vmul.f32 1.442695, %v2821_v43 }
 0xbcc   : > { %6808 = vpow2.f32 %v2835_v35 }
 0xbd0   : > { %2887 = vrot.lane.b32.xlu0 %v8256_v59, %s9209_s11  ;;  %v2811_v59 = vsel %vm1551_vm11, %v8352_v36, -inf }
 0xbd2   : > { %v8362_v7 = vpop.eup %6808 }
 0xbd7   : > { %v2816_v51 = vpop.xlane.xlu1 %2815 }
 0xbde   : > { %2889 = vrot.lane.b32.xlu1 %v8252_v50, %s9209_s11 }
 0xbe5   : > { %v2804_v46 = vpop.xlane.xlu0 %2803 }
 0xbe6   : > { %v2820_v29 = vsub.f32 %v8317_v23, %v2804_v46  ;;  %v2856_v23 = vsel %vm1551_vm11, %v8362_v7, 0.0  ;;  %v2824_v46 = vsub.f32 %v8312_v21, %v2816_v51 }
 0xbe8   : > { %v2831_v50 = vmul.f32 1.442695, %v2820_v29  ;;  %v2839_v29 = vmul.f32 1.442695, %v2824_v46  ;;  %v6403_v46 = vld [vmem:[#allocation5 + $0x18] sm:$0xff] }
 0xbe9   : > { %2972 = vmatpush.bf16.msrb.mxu2 %v6403_v46  ;;  %v6673_v46 = vld [vmem:[%s9196_s26 + $0x1] ss:$0 sm:$0xff] }
 0xbea   : > { %6810 = vpow2.f32 %v2831_v50 }
 0xbeb   : > { %2812 = vmax.xlane.f32.xlu2 %v2811_v59  ;;  %6812 = vpow2.f32 %v2833_v22 }
 0xbf0   : > { %v8365_v17 = vpop.eup %6810 }
 0xbf1   : > { %v2850_v25 = vsel %vm1551_vm11, %v8365_v17, 0.0  ;;  %v8371_v24 = vpop.eup %6812 }
 0xbf2   : > { %v2853_v11 = vsel %vm1551_vm11, %v8371_v24, 0.0 }
 0xbf3   : > { %2848 = vadd.xlane.f32.xlu2 %v2847_v16 }
 0xbfa   : > { %2857 = vadd.xlane.f32.xlu0 %v2856_v23 }
 0xbfb   : > { %2851 = vadd.xlane.f32.xlu2 %v2850_v25 }
 0xc08   : > { %2854 = vadd.xlane.f32.xlu1 %v2853_v11 }
 0xc1d   : > { %v2619_v52 = vpop.xlane.xlu2 %2618 }
 0xc1e   : > { %6814 = vrcp.f32 %v2619_v52 }
 0xc1f   : > { %v2843_v4 = vpop.xlane.xlu1 %2842 }
 0xc24   : > { %v6815_v27 = vpop.eup %6814 }
 0xc25   : > { %v2640_v45 = vpop.permute.xlu2 %2639  ;;  %v2633_v0 = vmul.f32 %v6815_v27, %v8321_v19  ;;  %v6401_v27 = vld [vmem:[#allocation2 + $0x18] sm:$0xff] }
 0xc26   : > { %2660 = vmatpush.bf16.msrb.mxu3 %v2640_v45  ;;  %2701 = vmatpush.bf16.msrb.mxu0 %v6401_v27 }
 0xc27   : > { %v2622_v6 = vpop.xlane.xlu1 %2621 }
 0xc28   : > { %6816 = vrcp.f32 %v2622_v6 }
 0xc2e   : > { %v6817_v47 = vpop.eup %6816 }
 0xc2f   : > { %v2634_v49 = vmul.f32 %v6817_v47, %v8329_v30  ;;  %v2625_v39 = vpop.xlane.xlu0 %2624 }
 0xc30   : > { %v2846_v15 = vpop.xlane.xlu1 %2845  ;;  %6818 = vrcp.f32 %v2625_v39 }
 0xc31   : > { %v2637_v18 = vpack.c.bf16 %v2634_v49, %v2633_v0 }
 0xc33   : > { %5918 = vmatmul.msk.bf16.vlgmr.msrb.gmra.mxu3 %vm1551_vm11, %v2637_v18 }
 0xc36   : > { %v6819_v14 = vpop.eup %6818 }
 0xc37   : > { %v2635_v34 = vmul.f32 %v6819_v14, %v8335_v57 }
 0xc38   : > { %v2628_v58 = vpop.xlane.xlu1 %2627 }
 0xc39   : > { %6820 = vrcp.f32 %v2628_v58 }
 0xc3a   : > { %6822 = vrcp.f32 %v2846_v15 }
 0xc3b   : > { %6824 = vrcp.f32 %v2843_v4 }
 0xc3f   : > { %v6821_v48 = vpop.eup %6820 }
 0xc40   : > { %v2636_v33 = vmul.f32 %v6821_v48, %v6805_v54  ;;  %v6823_v19 = vpop.eup %6822 }
 0xc41   : > { %v6825_v5 = vpop.eup %6824  ;;  %v2874_v13 = vmul.f32 %v6823_v19, %v8333_v40 }
 0xc42   : > { %v2638_v26 = vpack.c.bf16 %v2636_v33, %v2635_v34  ;;  %v2873_v56 = vmul.f32 %v6825_v5, %v8325_v2  ;;  %v2888_v60 = vpop.permute.xlu0 %2887 }
 0xc44   : > { %5919 = vmatmul.msk.bf16.gmra.mxu3 %vm1551_vm11, %v2638_v26  ;;  %v2881_v63 = vpack.c.bf16 %v2874_v13, %v2873_v56 }
 0xc50   : > { %v2890_v30 = vpop.permute.xlu1 %2889 }
 0xc51   : > { %v2905_v3 = vsel %vm1609_vm12, %v2890_v30, 0 }
 0xc52   : > { %2913 = vmatpush.bf16.msra.mxu3 %v2905_v3 }
 0xc56   : > { %2914 = vmatpush.bf16.msra.mxu3 %v2888_v60 }
 0xc59   : > { %5934 = vmatmul.msk.bf16.vlgmr.msra.gmra.mxu3 %vm1551_vm11, %v2881_v63 }
 0xc5e   : > { %v2813_v57 = vpop.xlane.xlu2 %2812 }
 0xc5f   : > { %v2823_v54 = vsub.f32 %v8352_v36, %v2813_v57 }
 0xc61   : > { %v2837_v32 = vmul.f32 1.442695, %v2823_v54 }
 0xc63   : > { %6826 = vpow2.f32 %v2837_v32  ;;  %v6402_v32 = vld [vmem:[#allocation5 + $0x10] sm:$0xff] }
 0xc64   : > { %6828 = vpow2.f32 %v2839_v29  ;;  %2973 = vmatpush.bf16.msrb.mxu2 %v6402_v32 }
 0xc66   : > { %v2849_v59 = vpop.xlane.xlu2 %2848 }
 0xc67   : > { %6830 = vrcp.f32 %v2849_v59 }
 0xc69   : > { %v6827_v35 = vpop.eup %6826 }
 0xc6a   : > { %v2859_v40 = vsel %vm1551_vm11, %v6827_v35, 0.0  ;;  %v6829_v50 = vpop.eup %6828 }
 0xc6b   : > { %2860 = vadd.xlane.f32.xlu2 %v2859_v40  ;;  %v2862_v16 = vsel %vm1551_vm11, %v6829_v50, 0.0 }
 0xc6d   : > { %v6831_v43 = vpop.eup %6830  ;;  %v2858_v25 = vpop.xlane.xlu0 %2857 }
 0xc6e   : > { %v2852_v2 = vpop.xlane.xlu2 %2851  ;;  %v2875_v21 = vmul.f32 %v6831_v43, %v8358_v41  ;;  %v6400_v41 = vld [vmem:[#allocation2 + $0x10] sm:$0xff] }
 0xc6f   : > { %6832 = vrcp.f32 %v2852_v2  ;;  %2702 = vmatpush.bf16.msrb.mxu0 %v6400_v41  ;;  %v7008_v2 = vld [vmem:[%s9185_s16 + $0x18] sm:$0xff] }
 0xc73   : > { %2863 = vadd.xlane.f32.xlu2 %v2862_v16  ;;  %v7009_v16 = vld [vmem:[%s9185_s16] sm:$0xff] }
 0xc75   : > { %v6833_v36 = vpop.eup %6832 }
 0xc76   : > { %v2876_v23 = vmul.f32 %v6833_v36, %v8365_v17  ;;  %v7010_v36 = vld [vmem:[%s9185_s16 + $0x8] sm:$0xff] }
 0xc78   : > { %v2882_v22 = vpack.c.bf16 %v2876_v23, %v2875_v21  ;;  %v7011_v23 = vld [vmem:[%s9185_s16 + $0x20] sm:$0xff] }
 0xc7a   : > { %5935 = vmatmul.msk.bf16.gmra.mxu3 %vm1551_vm11, %v2882_v22 }
 0xc7b   : > { %v2855_v11 = vpop.xlane.xlu1 %2854 }
 0xc7c   : > { %6834 = vrcp.f32 %v2855_v11 }
 0xc7d   : > { %6836 = vrcp.f32 %v2858_v25  ;;  %v7012_v25 = vld [vmem:[%s9185_s16 + $0x28] sm:$0xff] }
 0xc82   : > { %v6835_v51 = vpop.eup %6834 }
 0xc83   : > { %v6837_v52 = vpop.eup %6836  ;;  %v2877_v4 = vmul.f32 %v6835_v51, %v8371_v24 }
 0xc84   : > { %v2878_v45 = vmul.f32 %v6837_v52, %v8362_v7 }
 0xc86   : > { %v2883_v6 = vpack.c.bf16 %v2878_v45, %v2877_v4  ;;  %v7013_v4 = vld [vmem:[%s9185_s16 + $0x30] sm:$0xff] }
 0xc8a   : > { %5936 = vmatmul.msk.bf16.gmra.mxu3 %vm1551_vm11, %v2883_v6 }
 0xcb6   : > { %v2662_v17 = vpop.f32.mrf.mxu3 }
 0xcb7   : > { %v2672_v15 = vmul.f32 %v8262_v61, %v2662_v17  ;;  %v7014_v17 = vld [vmem:[%s9185_s16 + $0x38] sm:$0xff] }
 0xcbe   : > { %v2664_v47 = vpop.f32.mrf.mxu3 }
 0xcbf   : > { %v2673_v49 = vmul.f32 %v8265_v42, %v2664_v47 }
 0xcc1   : > { %v2676_v39 = vadd.f32 %v2673_v49, %v2672_v15 }
 0xcc7   : > { %v2667_v0 = vpop.f32.mrf.mxu3 }
 0xcc8   : > { %v2674_v18 = vmul.f32 %v8270_v8, %v2667_v0 }
 0xcca   : > { %v2677_v58 = vadd.f32 %v2676_v39, %v2674_v18 }
 0xccf   : > { %v2669_v24 = vpop.f32.mrf.mxu3 }
 0xcd0   : > { %v2675_v7 = vmul.f32 %v8273_v20, %v2669_v24  ;;  %v6671_v20 = vld [vmem:[%s9195_s2 + $0x1] ss:$0 sm:$0xff] }
 0xcd2   : > { %v2678_v14 = vadd.f32 %v2677_v58, %v2675_v7 }
 0xcd4   : > { %v2679_v48 = vpack.c.bf16 %v2678_v14, %v2678_v14  ;;  %v6672_v14 = vld [vmem:[%s9193_s22 + $0x1] ss:$0 sm:$0xff] }
 0xcd6   : > { %5928 = vmatmul.msk.bf16.vlgmr.msrb.gmra.mxu0 %vm1297_vm0, %v2679_v48 }
 0xcdc   : > { %v2916_v8 = vpop.f32.mrf.mxu3 }
 0xcdd   : > { %v2936_v43 = vmul.f32 %v7009_v16, %v2916_v8  ;;  %v6405_v8 = vld [vmem:[#allocation7 + $0x18] sm:$0xff] }
 0xcde   : > { %v2861_v34 = vpop.xlane.xlu2 %2860  ;;  %3072 = vmatpush.bf16.msra.mxu0 %v6405_v8 }
 0xcdf   : > { %6838 = vrcp.f32 %v2861_v34 }
 0xce4   : > { %v2918_v3 = vpop.f32.mrf.mxu3 }
 0xce5   : > { %v6839_v26 = vpop.eup %6838  ;;  %v2937_v21 = vmul.f32 %v7010_v36, %v2918_v3  ;;  %v6404_v3 = vld [vmem:[#allocation7 + $0x10] sm:$0xff] }
 0xce6   : > { %v2864_v33 = vpop.xlane.xlu2 %2863  ;;  %v2879_v19 = vmul.f32 %v6839_v26, %v6827_v35  ;;  %v7007_v35 = vld [vmem:[%s9185_s16 + $0x10] sm:$0xff]  ;;  %3073 = vmatpush.bf16.msra.mxu0 %v6404_v3 }
 0xce7   : > { %6840 = vrcp.f32 %v2864_v33 }
 0xced   : > { %v6841_v42 = vpop.eup %6840 }
 0xcee   : > { %v2880_v61 = vmul.f32 %v6841_v42, %v6829_v50 }
 0xcf0   : > { %v2884_v30 = vpack.c.bf16 %v2880_v61, %v2879_v19 }
 0xcf2   : > { %5937 = vmatmul.msk.bf16.gmra.mxu3 %vm1551_vm11, %v2884_v30 }
 0xcfd   : > { %v2921_v5 = vpop.f32.mrf.mxu3 }
 0xcfe   : > { %v2938_v40 = vmul.f32 %v7007_v35, %v2921_v5 }
 0xd00   : > { %v2944_v51 = vadd.f32 %v2938_v40, %v2936_v43 }
 0xd05   : > { %v2923_v57 = vpop.f32.mrf.mxu3 }
 0xd06   : > { %v2939_v50 = vmul.f32 %v7008_v2, %v2923_v57  ;;  %v6413_v2 = vld [vmem:[#allocation8 + $0x78] sm:$0xff] }
 0xd07   : > { %3140 = vmatpush.bf16.msra.mxu2 %v6413_v2  ;;  %v6676_v2 = vld [vmem:[%s9199_s29 + $0x1] ss:$0 sm:$0xff] }
 0xd08   : > { %v2945_v52 = vadd.f32 %v2939_v50, %v2937_v21 }
 0xd0d   : > { %v2926_v29 = vpop.f32.mrf.mxu3 }
 0xd0e   : > { %v2940_v22 = vmul.f32 %v7011_v23, %v2926_v29 }
 0xd10   : > { %v2946_v27 = vadd.f32 %v2944_v51, %v2940_v22 }
 0xd15   : > { %v2928_v59 = vpop.f32.mrf.mxu3 }
 0xd16   : > { %v2941_v11 = vmul.f32 %v7012_v25, %v2928_v59  ;;  %v6674_v59 = vld [vmem:[%s9197_s18 + $0x1] ss:$0 sm:$0xff] }
 0xd18   : > { %v2947_v41 = vadd.f32 %v2945_v52, %v2941_v11  ;;  %v6412_v52 = vld [vmem:[#allocation8 + $0x70] sm:$0xff] }
 0xd19   : > { %3141 = vmatpush.bf16.msra.mxu2 %v6412_v52 }
 0xd53   : > { %v2704_v13 = vpop.f32.mrf.mxu0 }
 0xd54   : > { %v2708_v56 = vadd.f32 %v2704_v13, %v8172_v10 }
 0xd56   : > { %v8402_v60 = vadd.f32 %v6671_v20, %v2708_v56 }
 0xd58   : > { %v3017_v63 = vsel %vm1297_vm0, %v8402_v60, 0.0 }
 0xd59   : > { %3018 = vadd.xlane.f32.xlu2 %v3017_v63 }
 0xd5b   : > { %v2706_v54 = vpop.f32.mrf.mxu0 }
 0xd75   : > { %v2931_v10 = vpop.f32.mrf.mxu3 }
 0xd76   : > { %v2942_v45 = vmul.f32 %v7013_v4, %v2931_v10  ;;  %v6411_v4 = vld [vmem:[#allocation8 + $0x68] sm:$0xff] }
 0xd77   : > { %3142 = vmatpush.bf16.msra.mxu2 %v6411_v4 }
 0xd78   : > { %v2948_v0 = vadd.f32 %v2946_v27, %v2942_v45  ;;  %v6410_v45 = vld [vmem:[#allocation8 + $0x60] sm:$0xff]  ;;  %v6408_v27 = vld [vmem:[#allocation8 + $0x50] sm:$0xff] }
 0xd7b   : > { %3143 = vmatpush.bf16.msra.mxu2 %v6410_v45  ;;  %v6678_v45 = vld [vmem:[%s9206_s8 + $0x1] ss:$0 sm:$0xff] }
 0xd7d   : > { %v2933_v6 = vpop.f32.mrf.mxu3 }
 0xd7e   : > { %v2943_v47 = vmul.f32 %v7014_v17, %v2933_v6  ;;  %v6409_v6 = vld [vmem:[#allocation8 + $0x58] sm:$0xff]  ;;  %v6406_v17 = vld [vmem:[#allocation8 + $0x40] sm:$0xff] }
 0xd7f   : > { %3144 = vmatpush.bf16.msra.mxu2 %v6409_v6 }
 0xd80   : > { %v2949_v49 = vadd.f32 %v2947_v41, %v2943_v47  ;;  %v6407_v41 = vld [vmem:[#allocation8 + $0x48] sm:$0xff]  ;;  %v6675_v47 = vld [vmem:[%s9202_s5 + $0x1] ss:$0 sm:$0xff] }
 0xd82   : > { %v2950_v15 = vpack.c.bf16 %v2949_v49, %v2948_v0 }
 0xd83   : > { %3145 = vmatpush.bf16.msra.mxu2 %v6408_v27 }
 0xd84   : > { %5946 = vmatmul.msk.bf16.vlgmr.msrb.gmra.mxu2 %vm1297_vm0, %v2950_v15 }
 0xd87   : > { %3146 = vmatpush.bf16.msra.mxu2 %v6407_v41  ;;  %v6423_v41 = vld [vmem:[#allocation11 + $0x78] sm:$0xff] }
 0xd8b   : > { %3147 = vmatpush.bf16.msra.mxu2 %v6406_v17 }
 0xdcc   : > { %v3019_v18 = vpop.xlane.xlu2 %3018 }
 0xdcd   : > { %v3020_v39 = vmul.f32 %v3019_v18, %v7824_v12 }
 0xdcf   : > { %v3021_v24 = vsub.f32 %v8402_v60, %v3020_v39 }
 0xdd1   : > { %v3022_v58 = vmul.f32 %v3021_v24, %v3021_v24 }
 0xdd3   : > { %v3023_v7 = vsel %vm1297_vm0, %v3022_v58, 0.0 }
 0xdd4   : > { %3024 = vadd.xlane.f32.xlu1 %v3023_v7 }
 0xe07   : > { %v2975_v48 = vpop.f32.mrf.mxu2 }
 0xe08   : > { %v2980_v34 = vadd.f32 %v2975_v48, %v8178_v44 }
 0xe0a   : > { %v8420_v33 = vadd.f32 %v6672_v14, %v2980_v34 }
 0xe0c   : > { %v3184_v26 = vsel %vm1297_vm0, %v8420_v33, 0.0 }
 0xe0d   : > { %3185 = vadd.xlane.f32.xlu2 %v3184_v26  ;;  %v6415_v26 = vld [vmem:[#allocation10 + $0x18] sm:$0xff] }
 0xe0e   : > { %3263 = vmatpush.bf16.msrb.mxu0 %v6415_v26 }
 0xe0f   : > { %v2977_v42 = vpop.f32.mrf.mxu2 }
 0xe10   : > { %v2981_v19 = vadd.f32 %v2977_v42, %v8183_v9 }
 0xe12   : > { %v8425_v61 = vadd.f32 %v6672_v14, %v2981_v19 }
 0xe14   : > { %v3187_v30 = vsel %vm1297_vm0, %v8425_v61, 0.0 }
 0xe15   : > { %3188 = vadd.xlane.f32.xlu2 %v3187_v30 }
 0xe47   : > { %v3025_v44 = vpop.xlane.xlu1 %3024 }
 0xe48   : > { %v3026_v5 = vmul.f32 %v3025_v44, %v7824_v12  ;;  %v6414_v44 = vld [vmem:[#allocation10 + $0x10] sm:$0xff] }
 0xe49   : > { %3264 = vmatpush.bf16.msrb.mxu0 %v6414_v44 }
 0xe4a   : > { %v3027_v20 = vadd.f32 1e-06, %v3026_v5 }
 0xe4c   : > { %6842 = vrsqrt.f32 %v3027_v20  ;;  %vm3034_vm4 = vweird.f32 %v3027_v20 }
 0xe52   : > { %v6843_v13 = vpop.eup %6842 }
 0xe53   : > { %v3029_v56 = vmul.f32 %v6843_v13, %v3027_v20  ;;  %vm3035_vm3 = vweird.f32 %v6843_v13 }
 0xe54   : > { %vm3036_vm5 = vmor %vm3034_vm4, %vm3035_vm3 }
 0xe55   : > { %v3030_v9 = vmul.f32 %v6843_v13, %v3029_v56 }
 0xe57   : > { %v3031_v63 = vmul.f32 0.5, %v3030_v9 }
 0xe59   : > { %v3032_v57 = vsub.f32 1.5, %v3031_v63 }
 0xe5b   : > { %v3033_v54 = vmul.f32 %v6843_v13, %v3032_v57 }
 0xe5d   : > { %v3037_v32 = vsel %vm3036_vm5, %v6843_v13, %v3033_v54 }
 0xe5e   : > { %v3038_v29 = vmul.f32 %v3037_v32, %v3021_v24 }
 0xe60   : > { %v3042_v10 = vmul.f32 %v6673_v46, %v3038_v29 }
 0xe62   : > { %v3046_v35 = vadd.f32 %v6674_v59, %v3042_v10 }
 0xe64   : > { %v3047_v40 = vpack.c.bf16 %v3046_v35, %v3046_v35 }
 0xe66   : > { %5959 = vmatmul.msk.bf16.vlgmr.msra.gmra.mxu0 %vm1297_vm0, %v3047_v40 }
 0xe67   : > { %3341 = vmatpush.bf16.msra.mxu0 %v6423_v41 }
 0xe80   : > { %v3186_v50 = vpop.xlane.xlu2 %3185 }
 0xe81   : > { %v3190_v16 = vmul.f32 %v3186_v50, %v7824_v12 }
 0xe83   : > { %v8435_v43 = vsub.f32 %v8420_v33, %v3190_v16 }
 0xe85   : > { %v3194_v36 = vmul.f32 %v8435_v43, %v8435_v43 }
 0xe87   : > { %v3196_v21 = vsel %vm1297_vm0, %v3194_v36, 0.0 }
 0xe88   : > { %3197 = vadd.xlane.f32.xlu2 %v3196_v21  ;;  %v3189_v23 = vpop.xlane.xlu2 %3188  ;;  %v6677_v21 = vld [vmem:[%s9201_s7 + $0x1] ss:$0 sm:$0xff] }
 0xe89   : > { %v3191_v22 = vmul.f32 %v3189_v23, %v7824_v12 }
 0xe8b   : > { %v8442_v25 = vsub.f32 %v8425_v61, %v3191_v22 }
 0xe8d   : > { %v3195_v11 = vmul.f32 %v8442_v25, %v8442_v25 }
 0xe8f   : > { %v3199_v51 = vsel %vm1297_vm0, %v3195_v11, 0.0 }
 0xe90   : > { %3200 = vadd.xlane.f32.xlu0 %v3199_v51 }
 0xee3   : > { %v3075_v0 = vpop.f32.mrf.mxu0 }
 0xee4   : > { %v3076_v49 = vadd.f32 %v6675_v47, %v3075_v0  ;;  %v6422_v47 = vld [vmem:[#allocation11 + $0x70] sm:$0xff]  ;;  %v6421_v0 = vld [vmem:[#allocation11 + $0x68] sm:$0xff] }
 0xee5   : > { %3342 = vmatpush.bf16.msra.mxu0 %v6422_v47 }
 0xee6   : > { %v3079_v15 = vmul.f32 %v3076_v49, %v3076_v49 }
 0xee8   : > { %v3080_v18 = vmul.f32 %v3079_v15, %v3076_v49  ;;  %v6419_v15 = vld [vmem:[#allocation11 + $0x58] sm:$0xff] }
 0xee9   : > { %3343 = vmatpush.bf16.msra.mxu0 %v6421_v0 }
 0xeea   : > { %v3081_v39 = vmul.f32 0.044715, %v3080_v18  ;;  %v6418_v18 = vld [vmem:[#allocation11 + $0x50] sm:$0xff] }
 0xeeb   : > { %v3077_v24 = vpop.f32.mrf.mxu0 }
 0xeec   : > { %v3082_v58 = vadd.f32 %v3081_v39, %v3076_v49  ;;  %v6417_v39 = vld [vmem:[#allocation11 + $0x48] sm:$0xff] }
 0xeee   : > { %v3083_v7 = vmul.f32 0.7978846, %v3082_v58  ;;  %v6416_v58 = vld [vmem:[#allocation11 + $0x40] sm:$0xff] }
 0xef0   : > { %6844 = vtanh.f32 %v3083_v7 }
 0xef6   : > { %v6845_v14 = vpop.eup %6844 }
 0xef7   : > { %v3085_v48 = vadd.f32 1.0, %v6845_v14 }
 0xef9   : > { %v3086_v34 = vmul.f32 0.5, %v3085_v48 }
 0xefb   : > { %v3198_v42 = vpop.xlane.xlu2 %3197  ;;  %v3087_v19 = vmul.f32 %v3086_v34, %v3076_v49  ;;  %v6420_v49 = vld [vmem:[#allocation11 + $0x60] sm:$0xff] }
 0xefc   : > { %v3202_v30 = vmul.f32 %v3198_v42, %v7824_v12  ;;  %3344 = vmatpush.bf16.msra.mxu0 %v6420_v49 }
 0xefd   : > { %v3088_v8 = vpack.c.bf16 %v3087_v19, %v3087_v19 }
 0xefe   : > { %v3204_v3 = vadd.f32 1e-06, %v3202_v30 }
 0xeff   : > { %3148 = vmatmul.bf16.vlgmr.msra.gmra.mxu2 %v3088_v8 }
 0xf00   : > { %6846 = vrsqrt.f32 %v3204_v3  ;;  %vm3212_vm7 = vweird.f32 %v3204_v3  ;;  %3345 = vmatpush.bf16.msra.mxu0 %v6419_v15 }
 0xf03   : > { %v3201_v5 = vpop.xlane.xlu0 %3200 }
 0xf04   : > { %v3203_v20 = vmul.f32 %v3201_v5, %v7824_v12  ;;  %3346 = vmatpush.bf16.msra.mxu0 %v6418_v18  ;;  %v6060_v18 = vld [vmem:[%s7497_s19 + $0x50] sm:$0xf] }
 0xf06   : > { %v6847_v13 = vpop.eup %6846  ;;  %v3205_v56 = vadd.f32 1e-06, %v3203_v20 }
 0xf07   : > { %v3207_v9 = vmul.f32 %v6847_v13, %v3204_v3  ;;  %vm3213_vm6 = vweird.f32 %v6847_v13 }
 0xf08   : > { %6848 = vrsqrt.f32 %v3205_v56  ;;  %vm3214_vm8 = vmor %vm3212_vm7, %vm3213_vm6  ;;  %vm3222_vm10 = vweird.f32 %v3205_v56  ;;  %3347 = vmatpush.bf16.msra.mxu0 %v6417_v39  ;;  %v6427_v39 = vld [vmem:[%s7497_s19 + $0x54] sm:$0xf0] }
 0xf09   : > { %v3208_v63 = vmul.f32 %v6847_v13, %v3207_v9 }
 0xf0b   : > { %v3209_v57 = vmul.f32 0.5, %v3208_v63 }
 0xf0c   : > { %3348 = vmatpush.bf16.msra.mxu0 %v6416_v58  ;;  %v6062_v58 = vld [vmem:[%s7497_s19 + $0x58] sm:$0xf0] }
 0xf0d   : > { %v3210_v54 = vsub.f32 1.5, %v3209_v57 }
 0xf0e   : > { %v6849_v46 = vpop.eup %6848 }
 0xf0f   : > { %v3211_v32 = vmul.f32 %v6847_v13, %v3210_v54  ;;  %v3217_v29 = vmul.f32 %v6849_v46, %v3205_v56  ;;  %vm3223_vm9 = vweird.f32 %v6849_v46 }
 0xf10   : > { %vm3224_vm13 = vmor %vm3222_vm10, %vm3223_vm9 }
 0xf11   : > { %v3218_v59 = vmul.f32 %v6849_v46, %v3217_v29  ;;  %v3215_v10 = vsel %vm3214_vm8, %v6847_v13, %v3211_v32 }
 0xf12   : > { %v3226_v50 = vmul.f32 %v3215_v10, %v8435_v43 }
 0xf13   : > { %v3219_v35 = vmul.f32 0.5, %v3218_v59 }
 0xf14   : > { %v3231_v23 = vmul.f32 %v6676_v2, %v3226_v50  ;;  %v6680_v50 = vld [vmem:[%s9208_s9 + $0x1] ss:$0 sm:$0xff] }
 0xf15   : > { %v3220_v40 = vsub.f32 1.5, %v3219_v35 }
 0xf16   : > { %v3236_v51 = vadd.f32 %v6677_v21, %v3231_v23 }
 0xf17   : > { %v3221_v16 = vmul.f32 %v6849_v46, %v3220_v40 }
 0xf19   : > { %v3225_v36 = vsel %vm3224_vm13, %v6849_v46, %v3221_v16 }
 0xf1a   : > { %v3227_v22 = vmul.f32 %v3225_v36, %v8442_v25 }
 0xf1c   : > { %v3232_v11 = vmul.f32 %v6676_v2, %v3227_v22 }
 0xf1e   : > { %v3237_v52 = vadd.f32 %v6677_v21, %v3232_v11 }
 0xf20   : > { %v3238_v4 = vpack.c.bf16 %v3237_v52, %v3236_v51 }
 0xf22   : > { %6004 = vmatmul.msk.bf16.vlgmr.msrb.gmra.mxu0 %vm1297_vm0, %v3238_v4 }
 0xf82   : > { %v3149_v6 = vpop.f32.mrf.mxu2 }
 0xf83   : > { %v3150_v27 = vadd.f32 %v6678_v45, %v3149_v6 }
 0xf85   : > { %v8457_v43 = vadd.f32 %v3150_v27, %v8402_v60  ;;  %v6679_v60 = vld [vmem:[%s9204_s6 + $0x1] ss:$0 sm:$0xff] }
 0xf87   : > { %v3357_v17 = vsel %vm1297_vm0, %v8457_v43, 0.0 }
 0xf88   : > { %3358 = vadd.xlane.f32.xlu1 %v3357_v17 }
 0xf8a   : > { %v3151_v25 = vpop.f32.mrf.mxu2 }
 0xf9f   : > { %v3266_v24 = vpop.f32.mrf.mxu0 }
 0xfa0   : > { %v3267_v7 = vadd.f32 %v6679_v60, %v3266_v24  ;;  %v6061_v24 = vor.u32 %v6427_v39, %v6060_v18  ;;  %v6685_v18 = vld [vmem:[%s9186_s23 + $0x2] ss:$0 sm:$0xff] }
 0xfa2   : > { %v3271_v14 = vmul.f32 %v3267_v7, %v3267_v7  ;;  %3525 = vmatpush.bf16.msrb.mxu2 %v6061_v24  ;;  %v6686_v24 = vld [vmem:[%s9188_s4 + $0x2] ss:$0 sm:$0xff] }
 0xfa4   : > { %v3273_v48 = vmul.f32 %v3271_v14, %v3267_v7 }
 0xfa6   : > { %v3275_v34 = vmul.f32 0.044715, %v3273_v48  ;;  %v6052_v48 = vld [vmem:[%s7497_s19 + $0x40] sm:$0xf] }
 0xfa7   : > { %v3268_v26 = vpop.f32.mrf.mxu0 }
 0xfa8   : > { %v3277_v42 = vadd.f32 %v3275_v34, %v3267_v7  ;;  %v3269_v19 = vadd.f32 %v6679_v60, %v3268_v26  ;;  %v6426_v60 = vld [vmem:[%s7497_s19 + $0x54] sm:$0xf]  ;;  %v6425_v34 = vld [vmem:[%s7497_s19 + $0x44] sm:$0xf0]  ;;  %v6424_v26 = vld [vmem:[%s7497_s19 + $0x44] sm:$0xf] }
 0xfaa   : > { %v3279_v30 = vmul.f32 0.7978846, %v3277_v42  ;;  %v3272_v8 = vmul.f32 %v3269_v19, %v3269_v19  ;;  %v6053_v42 = vor.u32 %v6425_v34, %v6052_v48  ;;  %v6687_v48 = vld [vmem:[%s9189_s12 + $0x2] ss:$0 sm:$0xff] }
 0xfac   : > { %v3274_v3 = vmul.f32 %v3272_v8, %v3269_v19  ;;  %6850 = vtanh.f32 %v3279_v30  ;;  %3526 = vmatpush.bf16.msrb.mxu2 %v6053_v42  ;;  %v6688_v42 = vld [vmem:[%s9191_s1 + $0x2] ss:$0 sm:$0xff] }
 0xfae   : > { %v3276_v44 = vmul.f32 0.044715, %v3274_v3 }
 0xfb0   : > { %v3278_v5 = vadd.f32 %v3276_v44, %v3269_v19 }
 0xfb2   : > { %v3280_v20 = vmul.f32 0.7978846, %v3278_v5  ;;  %v6851_v13 = vpop.eup %6850 }
 0xfb3   : > { %v3283_v56 = vadd.f32 1.0, %v6851_v13 }
 0xfb4   : > { %6852 = vtanh.f32 %v3280_v20 }
 0xfb5   : > { %v3285_v63 = vmul.f32 0.5, %v3283_v56 }
 0xfb7   : > { %v3287_v46 = vmul.f32 %v3285_v63, %v3267_v7  ;;  %v6065_v7 = vor.u32 %v6426_v60, %v6062_v58 }
 0xfb9   : > { %3548 = vmatpush.bf16.msrb.mxu1 %v6065_v7 }
 0xfba   : > { %v6853_v9 = vpop.eup %6852 }
 0xfbb   : > { %v3284_v57 = vadd.f32 1.0, %v6853_v9 }
 0xfbd   : > { %v3286_v54 = vmul.f32 0.5, %v3284_v57 }
 0xfbf   : > { %v3288_v32 = vmul.f32 %v3286_v54, %v3269_v19  ;;  %v6054_v19 = vld [vmem:[%s7497_s19 + $0x48] sm:$0xf0] }
 0xfc0   : > { %v6057_v8 = vor.u32 %v6424_v26, %v6054_v19 }
 0xfc1   : > { %v3289_v29 = vpack.c.bf16 %v3288_v32, %v3287_v46 }
 0xfc2   : > { %3549 = vmatpush.bf16.msrb.mxu1 %v6057_v8 }
 0xfc3   : > { %3349 = vmatmul.bf16.vlgmr.msra.gmra.mxu0 %v3289_v29 }
 0xffb   : > { %v3359_v59 = vpop.xlane.xlu1 %3358 }
 0xffc   : > { %v3360_v10 = vmul.f32 %v3359_v59, %v7824_v12 }
 0xffe   : > { %v8464_v35 = vsub.f32 %v8457_v43, %v3360_v10 }
0x1000   : > { %v3362_v40 = vmul.f32 %v8464_v35, %v8464_v35 }
0x1002   : > { %v3363_v2 = vsel %vm1297_vm0, %v3362_v40, 0.0 }
0x1003   : > { %3364 = vadd.xlane.f32.xlu1 %v3363_v2 }
0x1040   : > { %v3350_v16 = vpop.f32.mrf.mxu0 }
0x1041   : > { %v3351_v36 = vadd.f32 %v6680_v50, %v3350_v16 }
0x1043   : > { %v8471_v21 = vadd.f32 %v3351_v36, %v8420_v33 }
0x1045   : > { %v3379_v23 = vsel %vm1297_vm0, %v8471_v21, 0.0 }
0x1046   : > { %3380 = vadd.xlane.f32.xlu2 %v3379_v23 }
0x1048   : > { %v3352_v22 = vpop.f32.mrf.mxu0 }
0x1049   : > { %v3353_v11 = vadd.f32 %v6680_v50, %v3352_v22  ;;  %v6681_v50 = vld [vmem:[%s9164_s13 + $0x2] ss:$0 sm:$0xff] }
0x104a   : > { %v6683_v22 = vld [vmem:[%s7467_s21 + $0x2] ss:$0 sm:$0xff] }
0x104b   : > { %v8476_v51 = vadd.f32 %v3353_v11, %v8425_v61 }
0x104d   : > { %v3382_v52 = vsel %vm1297_vm0, %v8476_v51, 0.0 }
0x104e   : > { %3383 = vadd.xlane.f32.xlu0 %v3382_v52 }
0x1076   : > { %v3365_v0 = vpop.xlane.xlu1 %3364 }
0x1077   : > { %v3366_v49 = vmul.f32 %v3365_v0, %v7824_v12 }
0x1079   : > { %v3367_v15 = vadd.f32 1e-06, %v3366_v49 }
0x107b   : > { %6854 = vrsqrt.f32 %v3367_v15  ;;  %vm3374_vm15 = vweird.f32 %v3367_v15 }
0x1081   : > { %v6855_v14 = vpop.eup %6854 }
0x1082   : > { %v3369_v30 = vmul.f32 %v6855_v14, %v3367_v15  ;;  %vm3375_vm14 = vweird.f32 %v6855_v14 }
0x1083   : > { %vm3376_vm1 = vmor %vm3374_vm15, %vm3375_vm14 }
0x1084   : > { %v3370_v3 = vmul.f32 %v6855_v14, %v3369_v30 }
0x1086   : > { %v3371_v13 = vmul.f32 0.5, %v3370_v3 }
0x1088   : > { %v3372_v56 = vsub.f32 1.5, %v3371_v13 }
0x108a   : > { %v3373_v46 = vmul.f32 %v6855_v14, %v3372_v56 }
0x108c   : > { %v3377_v59 = vsel %vm3376_vm1, %v6855_v14, %v3373_v46 }
0x108d   : > { %v3378_v16 = vmul.f32 %v3377_v59, %v8464_v35 }
0x108f   : > { %v3468_v26 = vmul.f32 %v6687_v48, %v3378_v16  ;;  %v8553_v48 = vld [vmem:[#allocation13] sm:$0xff] }
0x1091   : > { %v3474_v30 = vadd.f32 %v6688_v42, %v3468_v26  ;;  %v8556_v26 = vld [vmem:[#allocation13 + $0x8] sm:$0xff] }
0x10b9   : > { %v3381_v4 = vpop.xlane.xlu2 %3380 }
0x10ba   : > { %v3385_v45 = vmul.f32 %v3381_v4, %v7824_v12  ;;  %v6682_v4 = vld [vmem:[%s9163_s17 + $0x2] ss:$0 sm:$0xff] }
0x10bc   : > { %v8482_v33 = vsub.f32 %v8471_v21, %v3385_v45  ;;  %v3428_v45 = vmul.f32 %v6681_v50, %v3378_v16 }
0x10be   : > { %v3389_v6 = vmul.f32 %v8482_v33, %v8482_v33 }
0x10c0   : > { %v3391_v27 = vsel %vm1297_vm0, %v3389_v6, 0.0  ;;  %v6684_v6 = vld [vmem:[%s7472_s25 + $0x2] ss:$0 sm:$0xff] }
0x10c1   : > { %v3384_v61 = vpop.xlane.xlu0 %3383  ;;  %3392 = vadd.xlane.f32.xlu2 %v3391_v27 }
0x10c2   : > { %v3386_v41 = vmul.f32 %v3384_v61, %v7824_v12 }
0x10c4   : > { %v8489_v17 = vsub.f32 %v8476_v51, %v3386_v41 }
0x10c6   : > { %v3390_v47 = vmul.f32 %v8489_v17, %v8489_v17 }
0x10c8   : > { %v3394_v25 = vsel %vm1297_vm0, %v3390_v47, 0.0 }
0x10c9   : > { %3395 = vadd.xlane.f32.xlu0 %v3394_v25  ;;  %v3434_v25 = vadd.f32 %v6682_v4, %v3428_v45 }
0x1134   : > { %v3393_v44 = vpop.xlane.xlu2 %3392 }
0x1135   : > { %v3397_v5 = vmul.f32 %v3393_v44, %v7824_v12  ;;  %v6049_v44 = vld [vmem:[%s9192_s28 + $0x4] sm:$0x3] }
0x1136   : > { %v3487_v50 = vperm.slane %v6049_v44, 1 }
0x1137   : > { %v3399_v20 = vadd.f32 1e-06, %v3397_v5 }
0x1139   : > { %6856 = vrsqrt.f32 %v3399_v20  ;;  %vm3407_vm3 = vweird.f32 %v3399_v20 }
0x113c   : > { %v3396_v9 = vpop.xlane.xlu0 %3395 }
0x113d   : > { %v3398_v63 = vmul.f32 %v3396_v9, %v7824_v12 }
0x113f   : > { %v6857_v57 = vpop.eup %6856  ;;  %v3400_v54 = vadd.f32 1e-06, %v3398_v63 }
0x1140   : > { %v3402_v32 = vmul.f32 %v6857_v57, %v3399_v20  ;;  %vm3408_vm2 = vweird.f32 %v6857_v57  ;;  %v3486_v20 = vperm.slane %v6049_v44, 0 }
0x1141   : > { %6858 = vrsqrt.f32 %v3400_v54  ;;  %vm3409_vm4 = vmor %vm3407_vm3, %vm3408_vm2  ;;  %vm3417_vm6 = vweird.f32 %v3400_v54 }
0x1142   : > { %v3403_v29 = vmul.f32 %v6857_v57, %v3402_v32 }
0x1144   : > { %v3404_v10 = vmul.f32 0.5, %v3403_v29 }
0x1146   : > { %v3405_v40 = vsub.f32 1.5, %v3404_v10 }
0x1147   : > { %v6859_v2 = vpop.eup %6858 }
0x1148   : > { %v3406_v36 = vmul.f32 %v6857_v57, %v3405_v40  ;;  %v3412_v23 = vmul.f32 %v6859_v2, %v3400_v54  ;;  %vm3418_vm5 = vweird.f32 %v6859_v2 }
0x1149   : > { %vm3419_vm7 = vmor %vm3417_vm6, %vm3418_vm5 }
0x114a   : > { %v3410_v11 = vsel %vm3409_vm4, %v6857_v57, %v3406_v36  ;;  %v3413_v52 = vmul.f32 %v6859_v2, %v3412_v23 }
0x114b   : > { %v3421_v27 = vmul.f32 %v3410_v11, %v8482_v33 }
0x114c   : > { %v3414_v61 = vmul.f32 0.5, %v3413_v52 }
0x114d   : > { %v3440_v41 = vmul.f32 %v6683_v22, %v3421_v27  ;;  %v3454_v60 = vmul.f32 %v6685_v18, %v3421_v27 }
0x114e   : > { %v3415_v47 = vsub.f32 1.5, %v3414_v61 }
0x114f   : > { %v3447_v35 = vadd.f32 %v6684_v6, %v3440_v41  ;;  %v3461_v7 = vadd.f32 %v6686_v24, %v3454_v60 }
0x1150   : > { %v3416_v0 = vmul.f32 %v6859_v2, %v3415_v47 }
0x1151   : > { %v3475_v49 = vpack.c.bf16 %v3447_v35, %v3434_v25 }
0x1152   : > { %v3420_v15 = vsel %vm3419_vm7, %v6859_v2, %v3416_v0 }
0x1153   : > { %6066 = vmatmul.msk.bf16.vlgmr.msrb.gmra.mxu2 %vm1297_vm0, %v3475_v49  ;;  %6069 = vmatmul.msk.bf16.vlgmr.msrb.gmra.mxu1 %vm1297_vm0, %v3475_v49  ;;  %v3422_v33 = vmul.f32 %v3420_v15, %v8489_v17 }
0x1155   : > { %v3441_v39 = vmul.f32 %v6683_v22, %v3422_v33  ;;  %v3455_v34 = vmul.f32 %v6685_v18, %v3422_v33 }
0x1157   : > { %v3448_v58 = vadd.f32 %v6684_v6, %v3441_v39  ;;  %v3462_v19 = vadd.f32 %v6686_v24, %v3455_v34 }
0x1159   : > { %v3476_v14 = vpack.c.bf16 %v3461_v7, %v3448_v58  ;;  %v3477_v8 = vpack.c.bf16 %v3474_v30, %v3462_v19 }
0x1163   : > { %6067 = vmatmul.msk.bf16.gmra.mxu2 %vm1297_vm0, %v3476_v14  ;;  %6070 = vmatmul.msk.bf16.gmra.mxu1 %vm1297_vm0, %v3476_v14 }
0x1173   : > { %6068 = vmatmul.msk.bf16.gmra.mxu2 %vm1297_vm0, %v3477_v8  ;;  %6071 = vmatmul.msk.bf16.gmra.mxu1 %vm1297_vm0, %v3477_v8  ;;  %v8561_v8 = vld [vmem:[#allocation13 + $0x10] sm:$0xff] }
0x11d0   : > { %v3551_v17 = vpop.f32.mrf.mxu1 }
0x11d6   : > { %v3528_v3 = vpop.f32.mrf.mxu2 }
0x11d7   : > { %v3529_v56 = vadd.f32 %v3528_v3, %v3486_v20  ;;  %v8564_v3 = vld [vmem:[#allocation13 + $0x18] sm:$0xff] }
0x11d8   : > { %v3552_v5 = vpop.f32.mrf.mxu1 }
0x11d9   : > { %v3570_v34 = vmul.f32 %v8553_v48, %v3529_v56  ;;  %v3571_v42 = vmul.f32 %v8556_v26, %v3529_v56  ;;  %v3572_v17 = vmul.f32 %v8561_v8, %v3529_v56  ;;  %v3573_v44 = vmul.f32 %v8564_v3, %v3529_v56 }
0x11db   : > { %v3574_v19 = vpack.c.bf16 %v3571_v42, %v3570_v34  ;;  %v3575_v5 = vpack.c.bf16 %v3573_v44, %v3572_v17  ;;  %v7027_v34 = vld [vmem:[%s7622_s20 + $0x28] sm:$0xff]  ;;  %v7028_v44 = vld [vmem:[%s7622_s20 + $0x38] sm:$0xff] }
0x11de   : > { %v3530_v13 = vpop.f32.mrf.mxu2 }
0x11df   : > { %v3531_v9 = vadd.f32 %v3530_v13, %v3486_v20 }
0x11e0   : > { %v3554_v63 = vpop.f32.mrf.mxu1 }
0x11e1   : > { %v8523_v57 = vpack.c.bf16 %v3531_v9, %v3529_v56 }
0x11e3   : > { %3580 = vrot.lane.b32.xlu2 %v8523_v57, %s9209_s11 }
0x11e6   : > { %v3533_v54 = vpop.f32.mrf.mxu2 }
0x11e7   : > { %v3534_v46 = vadd.f32 %v3533_v54, %v3486_v20  ;;  %v7019_v54 = vld [vmem:[%s9165_s3] sm:$0xff] }
0x11e8   : > { %v3555_v32 = vpop.f32.mrf.mxu1 }
0x11e9   : > { %v8527_v29 = vpack.c.bf16 %v3534_v46, %v3534_v46  ;;  %v3556_v49 = vadd.f32 %v3555_v32, %v3487_v50 }
0x11eb   : > { %3582 = vrot.lane.b32.xlu1 %v8527_v29, %s9209_s11 }
0x11ee   : > { %v3535_v59 = vpop.f32.mrf.mxu2 }
0x11ef   : > { %v3536_v40 = vadd.f32 %v3535_v59, %v3486_v20  ;;  %v7020_v59 = vld [vmem:[%s7622_s20] sm:$0xff] }
0x11f0   : > { %v3558_v10 = vpop.f32.mrf.mxu1 }
0x11f1   : > { %v3742_v23 = vmul.f32 %v3536_v40, %v7902_v53  ;;  %v3748_v22 = vmul.f32 %v3536_v40, %v7956_v38  ;;  %v3746_v11 = vmul.f32 %v3536_v40, %v7946_v31  ;;  %v3559_v25 = vadd.f32 %v3558_v10, %v3487_v50 }
0x11f2   : > { %v3744_v18 = vmul.f32 %v3536_v40, %v7919_v1 }
0x11f3   : > { %v8545_v33 = vpack.c.bf16 %v3559_v25, %v3556_v49  ;;  %v7025_v49 = vld [vmem:[%s9165_s3 + $0x18] sm:$0xff] }
0x11f5   : > { %v3781_v60 = vsel %vm1297_vm0, %v8545_v33, 0 }
0x11f6   : > { %v3538_v2 = vpop.f32.mrf.mxu2 }
0x11f7   : > { %v3539_v16 = vadd.f32 %v3538_v2, %v3486_v20 }
0x11f8   : > { %v3560_v36 = vpop.f32.mrf.mxu1 }
0x11f9   : > { %v3561_v52 = vadd.f32 %v3560_v36, %v3487_v50  ;;  %v3743_v4 = vmul.f32 %v3539_v16, %v7906_v55  ;;  %v3749_v45 = vmul.f32 %v3539_v16, %v7954_v37  ;;  %v3747_v6 = vmul.f32 %v3539_v16, %v7942_v28  ;;  %v7021_v50 = vld [vmem:[%s9165_s3 + $0x8] sm:$0xff] }
0x11fa   : > { %v3745_v15 = vmul.f32 %v3539_v16, %v7915_v62 }
0x11fb   : > { %v8537_v27 = vpack.c.bf16 %v3561_v52, %v3561_v52  ;;  %v3750_v61 = vpack.c.bf16 %v3743_v4, %v3742_v23  ;;  %v3753_v41 = vpack.c.bf16 %v3749_v45, %v3748_v22  ;;  %v3752_v47 = vpack.c.bf16 %v3747_v6, %v3746_v11  ;;  %v7022_v23 = vld [vmem:[%s7622_s20 + $0x8] sm:$0xff]  ;;  %v7023_v45 = vld [vmem:[%s9165_s3 + $0x10] sm:$0xff] }
0x11fc   : > { %v3751_v39 = vpack.c.bf16 %v3745_v15, %v3744_v18 }
0x11fd   : > { %v3784_v35 = vsel %vm1297_vm0, %v8537_v27, 0  ;;  %3760 = vrot.lane.b32.xlu0 %v3750_v61, %s9210_s15  ;;  %3766 = vrot.lane.b32.xlu1 %v3753_v41, %s9210_s15  ;;  %v7024_v41 = vld [vmem:[%s7622_s20 + $0x10] sm:$0xff] }
0x11fe   : > { %3764 = vrot.lane.b32.xlu2 %v3752_v47, %s9210_s15  ;;  %v3540_v0 = vpop.f32.mrf.mxu2  ;;  %3792 = vmatpush.bf16.xpose.msra.mxu2 %v3784_v35 }
0x1205   : > { %3762 = vrot.lane.b32.xlu0 %v3751_v39, %s9210_s15 }
0x1206   : > { %3793 = vmatpush.bf16.xpose.msra.mxu2 %v3781_v60 }
0x123d   : > { %v3581_v7 = vpop.permute.xlu2 %3580 }
0x123e   : > { %v3591_v14 = vsel %vm1297_vm0, %v3581_v7, 0 }
0x1258   : > { %v3765_v13 = vpop.permute.xlu2 %3764 }
0x125d   : > { %v3583_v24 = vpop.permute.xlu1 %3582 }
0x125e   : > { %v3594_v58 = vsel %vm1297_vm0, %v3583_v24, 0  ;;  %v7026_v24 = vld [vmem:[%s7622_s20 + $0x20] sm:$0xff] }
0x125f   : > { %3602 = vmatpush.bf16.xpose.msrb.mxu3 %v3594_v58 }
0x1267   : > { %3603 = vmatpush.bf16.xpose.msrb.mxu3 %v3591_v14 }
0x126e   : > { %6073 = vmatmul.msk.bf16.vlgmr.msrb.gmra.mxu3 %vm1297_vm0, %v3574_v19 }
0x126f   : > { %v3761_v30 = vpop.permute.xlu0 %3760  ;;  %v3767_v9 = vpop.permute.xlu1 %3766 }
0x1270   : > { %6087 = vmatmul.msk.bf16.vlgmr.msra.gmra.mxu2 %vm1297_vm0, %v3761_v30 }
0x1277   : > { %v3763_v20 = vpop.permute.xlu0 %3762 }
0x127e   : > { %6074 = vmatmul.msk.bf16.gmra.mxu3 %vm1297_vm0, %v3575_v5 }
0x1280   : > { %6088 = vmatmul.msk.bf16.gmra.mxu2 %vm1297_vm0, %v3763_v20 }
0x1290   : > { %6089 = vmatmul.msk.bf16.gmra.mxu2 %vm1297_vm0, %v3765_v13 }
0x12a0   : > { %6090 = vmatmul.msk.bf16.gmra.mxu2 %vm1297_vm0, %v3767_v9 }
0x12f1   : > { %v3605_v63 = vpop.f32.mrf.mxu3 }
0x12f2   : > { %v3606_v46 = vadd.f32 %v7019_v54, %v3605_v63 }
0x12f3   : > { %v3795_v32 = vpop.f32.mrf.mxu2 }
0x12f4   : > { %v3796_v56 = vadd.f32 %v7020_v59, %v3795_v32  ;;  %v3615_v10 = vsel %vm1551_vm11, %v3606_v46, -inf }
0x12f5   : > { %3616 = vmax.xlane.f32.xlu0 %v3615_v10 }
0x12f6   : > { %v3815_v40 = vsel %vm1551_vm11, %v3796_v56, -inf }
0x12f7   : > { %3816 = vmax.xlane.f32.xlu2 %v3815_v40 }
0x12f9   : > { %v3607_v2 = vpop.f32.mrf.mxu3 }
0x12fa   : > { %v3608_v16 = vadd.f32 %v7021_v50, %v3607_v2 }
0x12fb   : > { %v3797_v36 = vpop.f32.mrf.mxu2 }
0x12fc   : > { %v3798_v22 = vadd.f32 %v7022_v23, %v3797_v36  ;;  %v3618_v52 = vsel %vm1551_vm11, %v3608_v16, -inf }
0x12fe   : > { %v3818_v11 = vsel %vm1551_vm11, %v3798_v22, -inf }
0x12ff   : > { %3819 = vmax.xlane.f32.xlu1 %v3818_v11  ;;  %3619 = vmax.xlane.f32.xlu2 %v3618_v52 }
0x1301   : > { %v3610_v4 = vpop.f32.mrf.mxu3 }
0x1302   : > { %v8580_v6 = vadd.f32 %v7023_v45, %v3610_v4 }
0x1303   : > { %v3800_v61 = vpop.f32.mrf.mxu2 }
0x1304   : > { %v8583_v47 = vadd.f32 %v7024_v41, %v3800_v61  ;;  %v3621_v25 = vsel %vm1551_vm11, %v8580_v6, -inf }
0x1306   : > { %v3821_v35 = vsel %vm1551_vm11, %v8583_v47, -inf }
0x1307   : > { %3622 = vmax.xlane.f32.xlu1 %v3621_v25  ;;  %3822 = vmax.xlane.f32.xlu0 %v3821_v35 }
0x1309   : > { %v3612_v0 = vpop.f32.mrf.mxu3 }
0x130a   : > { %v3613_v15 = vadd.f32 %v7025_v49, %v3612_v0 }
0x130b   : > { %v3802_v18 = vpop.f32.mrf.mxu2 }
0x130c   : > { %v3624_v39 = vsel %vm1551_vm11, %v3613_v15, -inf }
0x130f   : > { %3625 = vmax.xlane.f32.xlu0 %v3624_v39 }
0x1313   : > { %v3805_v60 = vpop.f32.mrf.mxu2 }
0x1314   : > { %v8592_v58 = vadd.f32 %v7026_v24, %v3805_v60 }
0x1316   : > { %v3827_v7 = vsel %vm1551_vm11, %v8592_v58, -inf }
0x1317   : > { %3663 = vrot.lane.b32.xlu2 %v8527_v29, %s9211_s14  ;;  %3828 = vmax.xlane.f32.xlu0 %v3827_v7  ;;  %v7029_v29 = vld [vmem:[%s7622_s20 + $0x18] sm:$0xff] }
0x1318   : > { %v8611_v13 = vadd.f32 %v7029_v29, %v3802_v18 }
0x131a   : > { %v3824_v9 = vsel %vm1551_vm11, %v8611_v13, -inf }
0x131b   : > { %v3807_v14 = vpop.f32.mrf.mxu2 }
0x131c   : > { %v8599_v42 = vadd.f32 %v7027_v34, %v3807_v14 }
0x131e   : > { %v3830_v19 = vsel %vm1551_vm11, %v8599_v42, -inf }
0x131f   : > { %3831 = vmax.xlane.f32.xlu0 %v3830_v19 }
0x1323   : > { %v8603_v30 = vpop.f32.mrf.mxu2 }
0x132b   : > { %v3812_v17 = vpop.f32.mrf.mxu2 }
0x132c   : > { %v8606_v5 = vadd.f32 %v7028_v44, %v3812_v17 }
0x132e   : > { %v3836_v20 = vsel %vm1551_vm11, %v8606_v5, -inf }
0x132f   : > { %3837 = vmax.xlane.f32.xlu0 %v3836_v20  ;;  %v7030_v20 = vld [vmem:[%s7622_s20 + $0x30] sm:$0xff] }
0x1340   : > { %3825 = vmax.xlane.f32.xlu2 %v3824_v9 }
0x1368   : > { %v3617_v63 = vpop.xlane.xlu0 %3616 }
0x1369   : > { %v3627_v54 = vsub.f32 %v3606_v46, %v3617_v63 }
0x136a   : > { %v3817_v32 = vpop.xlane.xlu2 %3816 }
0x136b   : > { %v3631_v59 = vmul.f32 1.442695, %v3627_v54  ;;  %v3839_v10 = vsub.f32 %v3796_v56, %v3817_v32 }
0x136d   : > { %6860 = vpow2.f32 %v3631_v59  ;;  %v3847_v40 = vmul.f32 1.442695, %v3839_v10 }
0x136f   : > { %6862 = vpow2.f32 %v3847_v40 }
0x1372   : > { %v3820_v2 = vpop.xlane.xlu1 %3819  ;;  %v3620_v50 = vpop.xlane.xlu2 %3619 }
0x1373   : > { %v8615_v36 = vpop.eup %6860  ;;  %v3628_v23 = vsub.f32 %v3608_v16, %v3620_v50  ;;  %v3840_v45 = vsub.f32 %v3798_v22, %v3820_v2 }
0x1374   : > { %v3639_v11 = vsel %vm1551_vm11, %v8615_v36, 0.0 }
0x1375   : > { %v8619_v52 = vpop.eup %6862  ;;  %v3633_v4 = vmul.f32 1.442695, %v3628_v23  ;;  %3640 = vadd.xlane.f32.xlu1 %v3639_v11  ;;  %v3849_v56 = vmul.f32 1.442695, %v3840_v45 }
0x1376   : > { %v3863_v46 = vsel %vm1551_vm11, %v8619_v52, 0.0 }
0x1377   : > { %3864 = vadd.xlane.f32.xlu0 %v3863_v46  ;;  %6864 = vpow2.f32 %v3633_v4 }
0x1378   : > { %6866 = vpow2.f32 %v3849_v56 }
0x137a   : > { %v3664_v61 = vpop.permute.xlu2 %3663  ;;  %v3623_v41 = vpop.xlane.xlu1 %3622 }
0x137b   : > { %v3673_v25 = vsel %vm1609_vm12, %v3664_v61, 0  ;;  %v3823_v35 = vpop.xlane.xlu0 %3822  ;;  %v3629_v0 = vsub.f32 %v8580_v6, %v3623_v41 }
0x137c   : > { %3681 = vmatpush.bf16.msrb.mxu0 %v3673_v25  ;;  %v3841_v19 = vsub.f32 %v8583_v47, %v3823_v35 }
0x137d   : > { %v8624_v16 = vpop.eup %6864  ;;  %v3635_v49 = vmul.f32 1.442695, %v3629_v0 }
0x137e   : > { %v3642_v22 = vsel %vm1551_vm11, %v8624_v16, 0.0  ;;  %v8629_v39 = vpop.eup %6866  ;;  %v3851_v44 = vmul.f32 1.442695, %v3841_v19 }
0x137f   : > { %3643 = vadd.xlane.f32.xlu0 %v3642_v22  ;;  %6868 = vpow2.f32 %v3635_v49  ;;  %v3866_v7 = vsel %vm1551_vm11, %v8629_v39, 0.0 }
0x1383   : > { %v3626_v18 = vpop.xlane.xlu0 %3625 }
0x1384   : > { %v3630_v60 = vsub.f32 %v3613_v15, %v3626_v18 }
0x1385   : > { %v8633_v14 = vpop.eup %6868 }
0x1386   : > { %v3637_v24 = vmul.f32 1.442695, %v3630_v60  ;;  %v3645_v34 = vsel %vm1551_vm11, %v8633_v14, 0.0 }
0x1387   : > { %3867 = vadd.xlane.f32.xlu0 %v3866_v7 }
0x1388   : > { %6870 = vpow2.f32 %v3637_v24 }
0x1389   : > { %6872 = vpow2.f32 %v3851_v44 }
0x138b   : > { %v3829_v17 = vpop.xlane.xlu0 %3828 }
0x138c   : > { %v3843_v29 = vsub.f32 %v8592_v58, %v3829_v17 }
0x138e   : > { %v8635_v6 = vpop.eup %6870  ;;  %3661 = vrot.lane.b32.xlu1 %v8523_v57, %s9211_s14  ;;  %v8650_v57 = vadd.f32 %v7030_v20, %v8603_v30 }
0x138f   : > { %v3648_v15 = vsel %vm1551_vm11, %v8635_v6, 0.0  ;;  %3646 = vadd.xlane.f32.xlu0 %v3645_v34  ;;  %v8655_v32 = vpop.eup %6872 }
0x1390   : > { %3649 = vadd.xlane.f32.xlu2 %v3648_v15  ;;  %v3833_v9 = vsel %vm1551_vm11, %v8650_v57, -inf  ;;  %v3869_v30 = vsel %vm1551_vm11, %v8655_v32, 0.0 }
0x1393   : > { %v3832_v54 = vpop.xlane.xlu0 %3831 }
0x1394   : > { %v3844_v47 = vsub.f32 %v8599_v42, %v3832_v54 }
0x1396   : > { %v3857_v58 = vmul.f32 1.442695, %v3844_v47 }
0x13a2   : > { %v3838_v10 = vpop.xlane.xlu0 %3837 }
0x13a3   : > { %3911 = vrot.lane.b32.xlu0 %v8537_v27, %s9209_s11  ;;  %v3855_v27 = vmul.f32 1.442695, %v3843_v29  ;;  %v3846_v2 = vsub.f32 %v8606_v5, %v3838_v10 }
0x13a5   : > { %6874 = vpow2.f32 %v3855_v27  ;;  %v3861_v42 = vmul.f32 1.442695, %v3846_v2 }
0x13a8   : > { %3909 = vrot.lane.b32.xlu2 %v8545_v33, %s9209_s11 }
0x13ab   : > { %v8661_v40 = vpop.eup %6874 }
0x13ac   : > { %v3875_v50 = vsel %vm1551_vm11, %v8661_v40, 0.0 }
0x13b3   : > { %v3826_v63 = vpop.xlane.xlu2 %3825 }
0x13b4   : > { %v3842_v33 = vsub.f32 %v8611_v13, %v3826_v63 }
0x13b6   : > { %v3853_v59 = vmul.f32 1.442695, %v3842_v33 }
0x13b8   : > { %3834 = vmax.xlane.f32.xlu1 %v3833_v9  ;;  %6876 = vpow2.f32 %v3853_v59 }
0x13b9   : > { %6878 = vpow2.f32 %v3857_v58 }
0x13ba   : > { %6880 = vpow2.f32 %v3861_v42 }
0x13be   : > { %v8666_v13 = vpop.eup %6876 }
0x13bf   : > { %v8668_v23 = vpop.eup %6878  ;;  %v3872_v11 = vsel %vm1551_vm11, %v8666_v13, 0.0 }
0x13c0   : > { %3870 = vadd.xlane.f32.xlu1 %v3869_v30  ;;  %v3878_v4 = vsel %vm1551_vm11, %v8668_v23, 0.0  ;;  %v8674_v45 = vpop.eup %6880 }
0x13c1   : > { %v3884_v5 = vsel %vm1551_vm11, %v8674_v45, 0.0 }
0x13c8   : > { %3876 = vadd.xlane.f32.xlu1 %v3875_v50 }
0x13cd   : > { %3873 = vadd.xlane.f32.xlu0 %v3872_v11 }
0x13d0   : > { %3879 = vadd.xlane.f32.xlu1 %v3878_v4 }
0x13d8   : > { %3885 = vadd.xlane.f32.xlu1 %v3884_v5 }
0x13e8   : > { %v3641_v61 = vpop.xlane.xlu1 %3640 }
0x13ea   : > { %v3865_v46 = vpop.xlane.xlu0 %3864 }
0x13f2   : > { %v3644_v56 = vpop.xlane.xlu0 %3643 }
0x13f3   : > { %6882 = vrcp.f32 %v3644_v56  ;;  %v6429_v56 = vld [vmem:[#allocation2 + $0x28] sm:$0xff] }
0x13f4   : > { %6884 = vrcp.f32 %v3641_v61  ;;  %3723 = vmatpush.bf16.msra.mxu3 %v6429_v56 }
0x13f9   : > { %v6883_v41 = vpop.eup %6882 }
0x13fa   : > { %v3868_v25 = vpop.xlane.xlu0 %3867  ;;  %v6885_v35 = vpop.eup %6884  ;;  %v3656_v0 = vmul.f32 %v6883_v41, %v8624_v16 }
0x13fb   : > { %v3655_v22 = vmul.f32 %v6885_v35, %v8615_v36 }
0x13fd   : > { %v3659_v18 = vpack.c.bf16 %v3656_v0, %v3655_v22 }
0x1400   : > { %v3662_v49 = vpop.permute.xlu1 %3661 }
0x1401   : > { %3682 = vmatpush.bf16.msrb.mxu0 %v3662_v49 }
0x1402   : > { %v3647_v24 = vpop.xlane.xlu0 %3646 }
0x1403   : > { %v3650_v60 = vpop.xlane.xlu2 %3649 }
0x1404   : > { %6886 = vrcp.f32 %v3650_v60  ;;  %6075 = vmatmul.msk.bf16.vlgmr.msrb.gmra.mxu0 %vm1551_vm11, %v3659_v18 }
0x1405   : > { %6888 = vrcp.f32 %v3647_v24 }
0x1406   : > { %6890 = vrcp.f32 %v3868_v25 }
0x1407   : > { %6892 = vrcp.f32 %v3865_v46 }
0x140a   : > { %v6887_v7 = vpop.eup %6886 }
0x140b   : > { %v6889_v34 = vpop.eup %6888  ;;  %v3658_v15 = vmul.f32 %v6887_v7, %v8635_v6  ;;  %v3910_v20 = vpop.permute.xlu2 %3909 }
0x140c   : > { %v3657_v19 = vmul.f32 %v6889_v34, %v8633_v14  ;;  %v6891_v44 = vpop.eup %6890 }
0x140d   : > { %v6893_v29 = vpop.eup %6892  ;;  %v3896_v9 = vmul.f32 %v6891_v44, %v8629_v39  ;;  %v6430_v44 = vld [vmem:[#allocation5 + $0x20] sm:$0xff] }
0x140e   : > { %v3660_v17 = vpack.c.bf16 %v3658_v15, %v3657_v19  ;;  %v3895_v63 = vmul.f32 %v6893_v29, %v8619_v52  ;;  %v6689_v29 = vld [vmem:[%s9195_s2 + $0x2] ss:$0 sm:$0xff] }
0x1410   : > { %v3903_v6 = vpack.c.bf16 %v3896_v9, %v3895_v63 }
0x1414   : > { %6076 = vmatmul.msk.bf16.gmra.mxu0 %vm1551_vm11, %v3660_v17 }
0x1415   : > { %v3912_v36 = vpop.permute.xlu0 %3911 }
0x1416   : > { %v3927_v16 = vsel %vm1609_vm12, %v3912_v36, 0 }
0x1417   : > { %3935 = vmatpush.bf16.msra.mxu0 %v3927_v16  ;;  %v6431_v16 = vld [vmem:[#allocation5 + $0x28] sm:$0xff] }
0x1418   : > { %3994 = vmatpush.bf16.msra.mxu1 %v6431_v16 }
0x141b   : > { %3936 = vmatpush.bf16.msra.mxu0 %v3910_v20 }
0x141c   : > { %3995 = vmatpush.bf16.msra.mxu1 %v6430_v44 }
0x1424   : > { %6091 = vmatmul.msk.bf16.vlgmr.msra.gmra.mxu0 %vm1551_vm11, %v3903_v6 }
0x142b   : > { %v3835_v14 = vpop.xlane.xlu1 %3834 }
0x142c   : > { %v3845_v27 = vsub.f32 %v8650_v57, %v3835_v14 }
0x142e   : > { %v3859_v54 = vmul.f32 1.442695, %v3845_v27 }
0x1430   : > { %6894 = vpow2.f32 %v3859_v54 }
0x1433   : > { %v3871_v47 = vpop.xlane.xlu1 %3870 }
0x1434   : > { %6896 = vrcp.f32 %v3871_v47 }
0x1436   : > { %v6895_v33 = vpop.eup %6894 }
0x1437   : > { %v3881_v30 = vsel %vm1551_vm11, %v6895_v33, 0.0 }
0x1438   : > { %3882 = vadd.xlane.f32.xlu2 %v3881_v30  ;;  %v7032_v30 = vld [vmem:[%s9185_s16 + $0x18] sm:$0xff] }
0x143a   : > { %v6897_v39 = vpop.eup %6896 }
0x143b   : > { %v3877_v59 = vpop.xlane.xlu1 %3876  ;;  %v3897_v52 = vmul.f32 %v6897_v39, %v8655_v32  ;;  %v6428_v32 = vld [vmem:[#allocation2 + $0x20] sm:$0xff] }
0x143c   : > { %3724 = vmatpush.bf16.msra.mxu3 %v6428_v32 }
0x1440   : > { %v3874_v58 = vpop.xlane.xlu0 %3873 }
0x1441   : > { %6898 = vrcp.f32 %v3874_v58  ;;  %v7033_v58 = vld [vmem:[%s9185_s16] sm:$0xff] }
0x1443   : > { %v3880_v50 = vpop.xlane.xlu1 %3879 }
0x1444   : > { %6900 = vrcp.f32 %v3880_v50  ;;  %v7036_v50 = vld [vmem:[%s9185_s16 + $0x28] sm:$0xff] }
0x1445   : > { %6902 = vrcp.f32 %v3877_v59 }
0x1447   : > { %v6899_v10 = vpop.eup %6898 }
0x1448   : > { %v3898_v2 = vmul.f32 %v6899_v10, %v8666_v13  ;;  %v7034_v10 = vld [vmem:[%s9185_s16 + $0x8] sm:$0xff] }
0x144a   : > { %v3904_v42 = vpack.c.bf16 %v3898_v2, %v3897_v52  ;;  %v6901_v57 = vpop.eup %6900  ;;  %v7035_v52 = vld [vmem:[%s9185_s16 + $0x20] sm:$0xff] }
0x144b   : > { %v6903_v11 = vpop.eup %6902  ;;  %v3900_v4 = vmul.f32 %v6901_v57, %v8668_v23  ;;  %v3886_v24 = vpop.xlane.xlu1 %3885 }
0x144c   : > { %6092 = vmatmul.msk.bf16.gmra.mxu0 %vm1551_vm11, %v3904_v42  ;;  %v3899_v5 = vmul.f32 %v6903_v11, %v8661_v40  ;;  %6904 = vrcp.f32 %v3886_v24 }
0x144e   : > { %v3905_v46 = vpack.c.bf16 %v3900_v4, %v3899_v5  ;;  %v7037_v4 = vld [vmem:[%s9185_s16 + $0x30] sm:$0xff] }
0x1452   : > { %v6905_v34 = vpop.eup %6904 }
0x145c   : > { %6093 = vmatmul.msk.bf16.gmra.mxu0 %vm1551_vm11, %v3905_v46 }
0x1481   : > { %v3684_v13 = vpop.f32.mrf.mxu0 }
0x1482   : > { %v3694_v35 = vmul.f32 %v8553_v48, %v3684_v13  ;;  %v3902_v48 = vmul.f32 %v6905_v34, %v8674_v45  ;;  %v7038_v13 = vld [vmem:[%s9185_s16 + $0x38] sm:$0xff] }
0x1489   : > { %v3686_v61 = vpop.f32.mrf.mxu0 }
0x148a   : > { %v3695_v25 = vmul.f32 %v8556_v26, %v3686_v61 }
0x148c   : > { %v3698_v22 = vadd.f32 %v3695_v25, %v3694_v35 }
0x1491   : > { %v3689_v41 = vpop.f32.mrf.mxu0 }
0x1492   : > { %v3696_v0 = vmul.f32 %v8561_v8, %v3689_v41 }
0x1494   : > { %v3699_v49 = vadd.f32 %v3698_v22, %v3696_v0  ;;  %v6690_v22 = vld [vmem:[%s9193_s22 + $0x2] ss:$0 sm:$0xff] }
0x1499   : > { %v3691_v23 = vpop.f32.mrf.mxu0 }
0x149a   : > { %v3697_v40 = vmul.f32 %v8564_v3, %v3691_v23 }
0x149c   : > { %v3700_v18 = vadd.f32 %v3699_v49, %v3697_v40 }
0x149e   : > { %v3701_v60 = vpack.c.bf16 %v3700_v18, %v3700_v18 }
0x14a0   : > { %6085 = vmatmul.msk.bf16.vlgmr.msra.gmra.mxu3 %vm1297_vm0, %v3701_v60 }
0x14a1   : > { %v3938_v19 = vpop.f32.mrf.mxu0 }
0x14a2   : > { %v3958_v39 = vmul.f32 %v7033_v58, %v3938_v19  ;;  %v6433_v19 = vld [vmem:[#allocation7 + $0x28] sm:$0xff] }
0x14a3   : > { %4094 = vmatpush.bf16.msrb.mxu3 %v6433_v19 }
0x14a9   : > { %v3940_v17 = vpop.f32.mrf.mxu0 }
0x14ab   : > { %v3883_v7 = vpop.xlane.xlu2 %3882 }
0x14ac   : > { %6906 = vrcp.f32 %v3883_v7 }
0x14b2   : > { %v6907_v26 = vpop.eup %6906 }
0x14b3   : > { %v3901_v15 = vmul.f32 %v6907_v26, %v6895_v33  ;;  %v7031_v33 = vld [vmem:[%s9185_s16 + $0x10] sm:$0xff] }
0x14b5   : > { %v3906_v8 = vpack.c.bf16 %v3902_v48, %v3901_v15 }
0x14b7   : > { %6094 = vmatmul.msk.bf16.gmra.mxu0 %vm1551_vm11, %v3906_v8 }
0x14c9   : > { %v3943_v3 = vpop.f32.mrf.mxu0 }
0x14ca   : > { %v3960_v47 = vmul.f32 %v7031_v33, %v3943_v3 }
0x14cc   : > { %v3966_v57 = vadd.f32 %v3960_v47, %v3958_v39  ;;  %v6691_v39 = vld [vmem:[%s9196_s26 + $0x2] ss:$0 sm:$0xff] }
0x14d1   : > { %v3945_v36 = vpop.f32.mrf.mxu0 }
0x14d2   : > { %v3961_v59 = vmul.f32 %v7032_v30, %v3945_v36  ;;  %v6432_v36 = vld [vmem:[#allocation7 + $0x20] sm:$0xff] }
0x14d3   : > { %4095 = vmatpush.bf16.msrb.mxu3 %v6432_v36  ;;  %v6437_v36 = vld [vmem:[#allocation8 + $0x98] sm:$0xff] }
0x14d9   : > { %v3948_v20 = vpop.f32.mrf.mxu0 }
0x14da   : > { %v3962_v2 = vmul.f32 %v7035_v52, %v3948_v20 }
0x14dc   : > { %v3968_v56 = vadd.f32 %v3966_v57, %v3962_v2 }
0x14e1   : > { %v3950_v27 = vpop.f32.mrf.mxu0 }
0x14e2   : > { %v3963_v42 = vmul.f32 %v7036_v50, %v3950_v27 }
0x1523   : > { %v3726_v9 = vpop.f32.mrf.mxu3 }
0x1524   : > { %v3730_v45 = vadd.f32 %v3726_v9, %v8457_v43  ;;  %v3959_v43 = vmul.f32 %v7034_v10, %v3940_v17 }
0x1526   : > { %v8705_v63 = vadd.f32 %v6689_v29, %v3730_v45  ;;  %v3967_v11 = vadd.f32 %v3961_v59, %v3959_v43  ;;  %v6692_v43 = vld [vmem:[%s9197_s18 + $0x2] ss:$0 sm:$0xff] }
0x1528   : > { %v4039_v6 = vsel %vm1297_vm0, %v8705_v63, 0.0  ;;  %v3969_v32 = vadd.f32 %v3967_v11, %v3963_v42  ;;  %v6443_v11 = vld [vmem:[#allocation10 + $0x28] sm:$0xff] }
0x1529   : > { %4040 = vadd.xlane.f32.xlu1 %v4039_v6  ;;  %4285 = vmatpush.bf16.msra.mxu3 %v6443_v11  ;;  %v6451_v11 = vld [vmem:[#allocation11 + $0xb8] sm:$0xff] }
0x152b   : > { %v3728_v14 = vpop.f32.mrf.mxu3 }
0x1534   : > { %v3953_v54 = vpop.f32.mrf.mxu0 }
0x1535   : > { %v3964_v5 = vmul.f32 %v7037_v4, %v3953_v54 }
0x1537   : > { %v3970_v41 = vadd.f32 %v3968_v56, %v3964_v5  ;;  %v6441_v56 = vld [vmem:[#allocation8 + $0xb8] sm:$0xff] }
0x1538   : > { %4162 = vmatpush.bf16.msrb.mxu1 %v6441_v56  ;;  %v6447_v56 = vld [vmem:[#allocation11 + $0x98] sm:$0xff] }
0x153c   : > { %v3955_v46 = vpop.f32.mrf.mxu0 }
0x153d   : > { %v3965_v61 = vmul.f32 %v7038_v13, %v3955_v46  ;;  %v6442_v46 = vld [vmem:[#allocation10 + $0x20] sm:$0xff] }
0x153e   : > { %4286 = vmatpush.bf16.msra.mxu3 %v6442_v46  ;;  %v6448_v46 = vld [vmem:[#allocation11 + $0xa0] sm:$0xff] }
0x153f   : > { %v3971_v25 = vadd.f32 %v3969_v32, %v3965_v61 }
0x1541   : > { %v3972_v35 = vpack.c.bf16 %v3971_v25, %v3970_v41 }
0x1543   : > { %6103 = vmatmul.msk.bf16.vlgmr.msra.gmra.mxu1 %vm1297_vm0, %v3972_v35 }
0x159c   : > { %v4041_v0 = vpop.xlane.xlu1 %4040 }
0x159d   : > { %v4042_v49 = vmul.f32 %v4041_v0, %v7824_v12 }
0x159f   : > { %v4043_v60 = vsub.f32 %v8705_v63, %v4042_v49 }
0x15a1   : > { %v4044_v26 = vmul.f32 %v4043_v60, %v4043_v60 }
0x15a3   : > { %v4045_v15 = vsel %vm1297_vm0, %v4044_v26, 0.0 }
0x15c0   : > { %v3997_v23 = vpop.f32.mrf.mxu1 }
0x15c1   : > { %v4002_v40 = vadd.f32 %v3997_v23, %v8471_v21 }
0x15c3   : > { %v8721_v18 = vadd.f32 %v6690_v22, %v4002_v40 }
0x15c5   : > { %v4206_v24 = vsel %vm1297_vm0, %v8721_v18, 0.0 }
0x15c6   : > { %4207 = vadd.xlane.f32.xlu1 %v4206_v24  ;;  %v6439_v24 = vld [vmem:[#allocation8 + $0xa8] sm:$0xff] }
0x15c8   : > { %v3999_v7 = vpop.f32.mrf.mxu1 }
0x15c9   : > { %v4003_v34 = vadd.f32 %v3999_v7, %v8476_v51 }
0x15cb   : > { %v8727_v48 = vadd.f32 %v6690_v22, %v4003_v34  ;;  %v6440_v22 = vld [vmem:[#allocation8 + $0xb0] sm:$0xff] }
0x15cc   : > { %4163 = vmatpush.bf16.msrb.mxu1 %v6440_v22 }
0x15cd   : > { %v4209_v8 = vsel %vm1297_vm0, %v8727_v48, 0.0 }
0x15ce   : > { %4046 = vadd.xlane.f32.xlu1 %v4045_v15  ;;  %4210 = vadd.xlane.f32.xlu0 %v4209_v8  ;;  %v6438_v15 = vld [vmem:[#allocation8 + $0xa0] sm:$0xff] }
0x15d0   : > { %4164 = vmatpush.bf16.msrb.mxu1 %v6439_v24 }
0x15d4   : > { %4165 = vmatpush.bf16.msrb.mxu1 %v6438_v15 }
0x15d8   : > { %4166 = vmatpush.bf16.msrb.mxu1 %v6437_v36  ;;  %v6697_v36 = vld [vmem:[%s9206_s8 + $0x2] ss:$0 sm:$0xff] }
0x1639   : > { %v4208_v21 = vpop.xlane.xlu1 %4207 }
0x163a   : > { %v4212_v17 = vmul.f32 %v4208_v21, %v7824_v12  ;;  %v6693_v21 = vld [vmem:[%s9199_s29 + $0x2] ss:$0 sm:$0xff] }
0x163c   : > { %v8734_v3 = vsub.f32 %v8721_v18, %v4212_v17 }
0x163e   : > { %v4216_v51 = vmul.f32 %v8734_v3, %v8734_v3 }
0x1640   : > { %v4218_v16 = vsel %vm1297_vm0, %v4216_v51, 0.0 }
0x1641   : > { %v4047_v44 = vpop.xlane.xlu1 %4046  ;;  %4219 = vadd.xlane.f32.xlu0 %v4218_v16  ;;  %v4211_v20 = vpop.xlane.xlu0 %4210  ;;  %v6694_v16 = vld [vmem:[%s9201_s7 + $0x2] ss:$0 sm:$0xff] }
0x1642   : > { %v4048_v29 = vmul.f32 %v4047_v44, %v7824_v12  ;;  %v4213_v9 = vmul.f32 %v4211_v20, %v7824_v12 }
0x1644   : > { %v4049_v45 = vadd.f32 1e-06, %v4048_v29  ;;  %v8742_v6 = vsub.f32 %v8727_v48, %v4213_v9  ;;  %v6436_v29 = vld [vmem:[#allocation8 + $0x90] sm:$0xff] }
0x1645   : > { %4167 = vmatpush.bf16.msrb.mxu1 %v6436_v29 }
0x1646   : > { %6908 = vrsqrt.f32 %v4049_v45  ;;  %v4217_v14 = vmul.f32 %v8742_v6, %v8742_v6  ;;  %vm4056_vm9 = vweird.f32 %v4049_v45 }
0x1648   : > { %v4221_v27 = vsel %vm1297_vm0, %v4217_v14, 0.0 }
0x1649   : > { %4222 = vadd.xlane.f32.xlu1 %v4221_v27  ;;  %v6435_v27 = vld [vmem:[#allocation8 + $0x88] sm:$0xff] }
0x164a   : > { %4168 = vmatpush.bf16.msrb.mxu1 %v6435_v27 }
0x164c   : > { %v6909_v54 = vpop.eup %6908 }
0x164d   : > { %v4051_v33 = vmul.f32 %v6909_v54, %v4049_v45  ;;  %vm4057_vm8 = vweird.f32 %v6909_v54 }
0x164e   : > { %vm4058_vm10 = vmor %vm4056_vm9, %vm4057_vm8 }
0x164f   : > { %v4052_v47 = vmul.f32 %v6909_v54, %v4051_v33  ;;  %v6695_v33 = vld [vmem:[%s9202_s5 + $0x2] ss:$0 sm:$0xff] }
0x1651   : > { %v4053_v30 = vmul.f32 0.5, %v4052_v47 }
0x1653   : > { %v4054_v59 = vsub.f32 1.5, %v4053_v30 }
0x1655   : > { %v4055_v58 = vmul.f32 %v6909_v54, %v4054_v59 }
0x1657   : > { %v4059_v10 = vsel %vm4058_vm10, %v6909_v54, %v4055_v58 }
0x1658   : > { %v4060_v52 = vmul.f32 %v4059_v10, %v4043_v60 }
0x165a   : > { %v4064_v2 = vmul.f32 %v6691_v39, %v4060_v52 }
0x165c   : > { %v4068_v50 = vadd.f32 %v6692_v43, %v4064_v2 }
0x165e   : > { %v4069_v42 = vpack.c.bf16 %v4068_v50, %v4068_v50 }
0x1660   : > { %6116 = vmatmul.msk.bf16.vlgmr.msrb.gmra.mxu3 %vm1297_vm0, %v4069_v42 }
0x1661   : > { %4363 = vmatpush.bf16.msrb.mxu3 %v6451_v11 }
0x16b4   : > { %v4220_v57 = vpop.xlane.xlu0 %4219 }
0x16b5   : > { %v4224_v4 = vmul.f32 %v4220_v57, %v7824_v12 }
0x16b7   : > { %v4226_v5 = vadd.f32 1e-06, %v4224_v4  ;;  %v6450_v4 = vld [vmem:[#allocation11 + $0xb0] sm:$0xff] }
0x16b8   : > { %4364 = vmatpush.bf16.msrb.mxu3 %v6450_v4 }
0x16b9   : > { %6910 = vrsqrt.f32 %v4226_v5  ;;  %vm4234_vm14 = vweird.f32 %v4226_v5 }
0x16bc   : > { %v4223_v32 = vpop.xlane.xlu1 %4222 }
0x16bd   : > { %v4225_v13 = vmul.f32 %v4223_v32, %v7824_v12  ;;  %v6446_v32 = vld [vmem:[#allocation11 + $0x90] sm:$0xff] }
0x16bf   : > { %v6911_v61 = vpop.eup %6910  ;;  %v4227_v41 = vadd.f32 1e-06, %v4225_v13  ;;  %v6696_v13 = vld [vmem:[%s9204_s6 + $0x2] ss:$0 sm:$0xff] }
0x16c0   : > { %v4229_v25 = vmul.f32 %v6911_v61, %v4226_v5  ;;  %vm4235_vm13 = vweird.f32 %v6911_v61  ;;  %v6449_v5 = vld [vmem:[#allocation11 + $0xa8] sm:$0xff] }
0x16c1   : > { %6912 = vrsqrt.f32 %v4227_v41  ;;  %vm4236_vm15 = vmor %vm4234_vm14, %vm4235_vm13  ;;  %vm4244_vm2 = vweird.f32 %v4227_v41  ;;  %4365 = vmatpush.bf16.msrb.mxu3 %v6449_v5 }
0x16c2   : > { %v4230_v35 = vmul.f32 %v6911_v61, %v4229_v25 }
0x16c4   : > { %v4231_v0 = vmul.f32 0.5, %v4230_v35  ;;  %v6444_v35 = vld [vmem:[#allocation11 + $0x80] sm:$0xff] }
0x16c5   : > { %4366 = vmatpush.bf16.msrb.mxu3 %v6448_v46 }
0x16c6   : > { %v4232_v23 = vsub.f32 1.5, %v4231_v0 }
0x16c7   : > { %v6913_v49 = vpop.eup %6912 }
0x16c8   : > { %v4233_v40 = vmul.f32 %v6911_v61, %v4232_v23  ;;  %v4239_v60 = vmul.f32 %v6913_v49, %v4227_v41  ;;  %vm4245_vm1 = vweird.f32 %v6913_v49 }
0x16c9   : > { %vm4246_vm3 = vmor %vm4244_vm2, %vm4245_vm1  ;;  %4367 = vmatpush.bf16.msrb.mxu3 %v6447_v56 }
0x16ca   : > { %v4240_v7 = vmul.f32 %v6913_v49, %v4239_v60  ;;  %v4237_v34 = vsel %vm4236_vm15, %v6911_v61, %v4233_v40  ;;  %v6445_v61 = vld [vmem:[#allocation11 + $0x88] sm:$0xff] }
0x16cb   : > { %v4248_v19 = vmul.f32 %v4237_v34, %v8734_v3  ;;  %v6434_v3 = vld [vmem:[#allocation8 + $0x80] sm:$0xff] }
0x16cc   : > { %v4241_v26 = vmul.f32 0.5, %v4240_v7  ;;  %4169 = vmatpush.bf16.msrb.mxu1 %v6434_v3 }
0x16cd   : > { %v4253_v44 = vmul.f32 %v6693_v21, %v4248_v19  ;;  %4368 = vmatpush.bf16.msrb.mxu3 %v6446_v32 }
0x16ce   : > { %v4242_v8 = vsub.f32 1.5, %v4241_v26 }
0x16cf   : > { %v4258_v45 = vadd.f32 %v6694_v16, %v4253_v44 }
0x16d0   : > { %v4243_v17 = vmul.f32 %v6913_v49, %v4242_v8 }
0x16d1   : > { %4369 = vmatpush.bf16.msrb.mxu3 %v6445_v61 }
0x16d2   : > { %v4247_v51 = vsel %vm4246_vm3, %v6913_v49, %v4243_v17 }
0x16d3   : > { %v4249_v20 = vmul.f32 %v4247_v51, %v8742_v6 }
0x16d5   : > { %v4254_v9 = vmul.f32 %v6693_v21, %v4249_v20  ;;  %4370 = vmatpush.bf16.msrb.mxu3 %v6444_v35  ;;  %v6217_v35 = vld [vmem:[%s7497_s19 + $0x70] sm:$0xf] }
0x16d7   : > { %v4259_v14 = vadd.f32 %v6694_v16, %v4254_v9 }
0x16d9   : > { %v4260_v54 = vpack.c.bf16 %v4259_v14, %v4258_v45 }
0x16db   : > { %6161 = vmatmul.msk.bf16.vlgmr.msra.gmra.mxu3 %vm1297_vm0, %v4260_v54 }
0x16e3   : > { %v4097_v47 = vpop.f32.mrf.mxu3 }
0x16e4   : > { %v4098_v30 = vadd.f32 %v6695_v33, %v4097_v47 }
0x16e6   : > { %v4101_v59 = vmul.f32 %v4098_v30, %v4098_v30 }
0x16e8   : > { %v4102_v58 = vmul.f32 %v4101_v59, %v4098_v30 }
0x16ea   : > { %v4103_v39 = vmul.f32 0.044715, %v4102_v58 }
0x16eb   : > { %v4099_v10 = vpop.f32.mrf.mxu3 }
0x16ec   : > { %v4104_v6 = vadd.f32 %v4103_v39, %v4098_v30 }
0x16ee   : > { %v4105_v43 = vmul.f32 0.7978846, %v4104_v6 }
0x16f0   : > { %6914 = vtanh.f32 %v4105_v43 }
0x16f6   : > { %v6915_v52 = vpop.eup %6914 }
0x16f7   : > { %v4107_v2 = vadd.f32 1.0, %v6915_v52 }
0x16f9   : > { %v4108_v50 = vmul.f32 0.5, %v4107_v2 }
0x16fb   : > { %v4109_v42 = vmul.f32 %v4108_v50, %v4098_v30 }
0x16fd   : > { %v4110_v57 = vpack.c.bf16 %v4109_v42, %v4109_v42 }
0x16ff   : > { %4170 = vmatmul.bf16.vlgmr.msrb.gmra.mxu1 %v4110_v57 }
0x175e   : > { %v4288_v41 = vpop.f32.mrf.mxu3 }
0x175f   : > { %v4289_v25 = vadd.f32 %v6696_v13, %v4288_v41 }
0x1761   : > { %v4293_v0 = vmul.f32 %v4289_v25, %v4289_v25 }
0x1763   : > { %v4295_v22 = vmul.f32 %v4293_v0, %v4289_v25  ;;  %v6455_v0 = vld [vmem:[%s7497_s19 + $0x74] sm:$0xf0] }
0x1765   : > { %v4297_v23 = vmul.f32 0.044715, %v4295_v22  ;;  %v6454_v22 = vld [vmem:[%s7497_s19 + $0x74] sm:$0xf] }
0x1766   : > { %v4290_v49 = vpop.f32.mrf.mxu3 }
0x1767   : > { %v4299_v40 = vadd.f32 %v4297_v23, %v4289_v25  ;;  %v4291_v60 = vadd.f32 %v6696_v13, %v4290_v49  ;;  %v6218_v23 = vor.u32 %v6455_v0, %v6217_v35  ;;  %v6219_v49 = vld [vmem:[%s7497_s19 + $0x78] sm:$0xf0]  ;;  %v6703_v35 = vld [vmem:[%s9186_s23 + $0x3] ss:$0 sm:$0xff] }
0x1769   : > { %v4301_v24 = vmul.f32 0.7978846, %v4299_v40  ;;  %v4294_v7 = vmul.f32 %v4291_v60, %v4291_v60  ;;  %4547 = vmatpush.bf16.msra.mxu1 %v6218_v23  ;;  %v6704_v23 = vld [vmem:[%s9188_s4 + $0x3] ss:$0 sm:$0xff] }
0x176b   : > { %v4296_v34 = vmul.f32 %v4294_v7, %v4291_v60  ;;  %6916 = vtanh.f32 %v4301_v24  ;;  %v6209_v24 = vld [vmem:[%s7497_s19 + $0x60] sm:$0xf]  ;;  %v6453_v7 = vld [vmem:[%s7497_s19 + $0x64] sm:$0xf0] }
0x176d   : > { %v4298_v26 = vmul.f32 0.044715, %v4296_v34  ;;  %v6452_v34 = vld [vmem:[%s7497_s19 + $0x64] sm:$0xf] }
0x176f   : > { %v4300_v15 = vadd.f32 %v4298_v26, %v4291_v60 }
0x1771   : > { %v4302_v8 = vmul.f32 0.7978846, %v4300_v15  ;;  %v6917_v21 = vpop.eup %6916  ;;  %v6210_v15 = vor.u32 %v6453_v7, %v6209_v24  ;;  %v6705_v24 = vld [vmem:[%s9189_s12 + $0x3] ss:$0 sm:$0xff] }
0x1772   : > { %v4305_v19 = vadd.f32 1.0, %v6917_v21 }
0x1773   : > { %6918 = vtanh.f32 %v4302_v8  ;;  %v6211_v8 = vld [vmem:[%s7497_s19 + $0x68] sm:$0xf0]  ;;  %4548 = vmatpush.bf16.msra.mxu1 %v6210_v15 }
0x1774   : > { %v4307_v51 = vmul.f32 0.5, %v4305_v19  ;;  %v6214_v21 = vor.u32 %v6452_v34, %v6211_v8 }
0x1776   : > { %v4309_v9 = vmul.f32 %v4307_v51, %v4289_v25 }
0x1779   : > { %v6919_v17 = vpop.eup %6918 }
0x177a   : > { %v4306_v16 = vadd.f32 1.0, %v6919_v17 }
0x177c   : > { %v4308_v44 = vmul.f32 0.5, %v4306_v16  ;;  %v4171_v20 = vpop.f32.mrf.mxu1 }
0x177d   : > { %v4172_v29 = vadd.f32 %v6697_v36, %v4171_v20 }
0x177e   : > { %v4310_v45 = vmul.f32 %v4308_v44, %v4291_v60  ;;  %v6222_v60 = vor.u32 %v6454_v22, %v6219_v49 }
0x177f   : > { %v8761_v14 = vadd.f32 %v4172_v29, %v8705_v63  ;;  %v6698_v63 = vld [vmem:[%s9208_s9 + $0x2] ss:$0 sm:$0xff] }
0x1780   : > { %v4311_v27 = vpack.c.bf16 %v4310_v45, %v4309_v9  ;;  %4570 = vmatpush.bf16.msrb.mxu2 %v6222_v60 }
0x1781   : > { %v4379_v54 = vsel %vm1297_vm0, %v8761_v14, 0.0 }
0x1782   : > { %4380 = vadd.xlane.f32.xlu2 %v4379_v54  ;;  %4371 = vmatmul.bf16.vlgmr.msrb.gmra.mxu3 %v4311_v27 }
0x1784   : > { %v4173_v3 = vpop.f32.mrf.mxu1  ;;  %4571 = vmatpush.bf16.msrb.mxu2 %v6214_v21 }
0x17f5   : > { %v4381_v33 = vpop.xlane.xlu2 %4380 }
0x17f6   : > { %v4382_v47 = vmul.f32 %v4381_v33, %v7824_v12 }
0x17f8   : > { %v8767_v30 = vsub.f32 %v8761_v14, %v4382_v47 }
0x17fa   : > { %v4384_v59 = vmul.f32 %v8767_v30, %v8767_v30 }
0x17fc   : > { %v4385_v58 = vsel %vm1297_vm0, %v4384_v59, 0.0 }
0x17fd   : > { %4386 = vadd.xlane.f32.xlu2 %v4385_v58 }
0x1805   : > { %v4372_v39 = vpop.f32.mrf.mxu3 }
0x1806   : > { %v4373_v10 = vadd.f32 %v6698_v63, %v4372_v39 }
0x1808   : > { %v8774_v6 = vadd.f32 %v4373_v10, %v8721_v18 }
0x180a   : > { %v4401_v43 = vsel %vm1297_vm0, %v8774_v6, 0.0 }
0x180b   : > { %4402 = vadd.xlane.f32.xlu0 %v4401_v43 }
0x180d   : > { %v4374_v52 = vpop.f32.mrf.mxu3 }
0x180e   : > { %v4375_v2 = vadd.f32 %v6698_v63, %v4374_v52  ;;  %v6699_v63 = vld [vmem:[%s9164_s13 + $0x3] ss:$0 sm:$0xff] }
0x180f   : > { %v6701_v52 = vld [vmem:[%s7467_s21 + $0x3] ss:$0 sm:$0xff] }
0x1810   : > { %v8779_v50 = vadd.f32 %v4375_v2, %v8727_v48 }
0x1812   : > { %v4404_v42 = vsel %vm1297_vm0, %v8779_v50, 0.0 }
0x1813   : > { %4405 = vadd.xlane.f32.xlu1 %v4404_v42 }
0x1870   : > { %v4387_v61 = vpop.xlane.xlu2 %4386 }
0x1871   : > { %v4388_v41 = vmul.f32 %v4387_v61, %v7824_v12 }
0x1873   : > { %v4389_v25 = vadd.f32 1e-06, %v4388_v41 }
0x1875   : > { %6920 = vrsqrt.f32 %v4389_v25  ;;  %vm4396_vm5 = vweird.f32 %v4389_v25 }
0x187b   : > { %v6921_v40 = vpop.eup %6920 }
0x187c   : > { %v4391_v26 = vmul.f32 %v6921_v40, %v4389_v25  ;;  %vm4397_vm4 = vweird.f32 %v6921_v40 }
0x187d   : > { %vm4398_vm6 = vmor %vm4396_vm5, %vm4397_vm4 }
0x187e   : > { %v4403_v57 = vpop.xlane.xlu0 %4402  ;;  %v4392_v19 = vmul.f32 %v6921_v40, %v4391_v26  ;;  %v6706_v26 = vld [vmem:[%s9191_s1 + $0x3] ss:$0 sm:$0xff]  ;;  %s9215_s1 = sld [smem:[#allocation53_spill]] }
0x187f   : > { %v4407_v11 = vmul.f32 %v4403_v57, %v7824_v12  ;;  %v6700_v57 = vld [vmem:[%s9163_s17 + $0x3] ss:$0 sm:$0xff] }
0x1880   : > { %v4393_v16 = vmul.f32 0.5, %v4392_v19  ;;  %v6206_v19 = vld [vmem:[%s9192_s28 + $0x6] sm:$0x3] }
0x1881   : > { %v8785_v18 = vsub.f32 %v8774_v6, %v4407_v11 }
0x1882   : > { %v4394_v44 = vsub.f32 1.5, %v4393_v16 }
0x1883   : > { %v4411_v4 = vmul.f32 %v8785_v18, %v8785_v18 }
0x1884   : > { %v4395_v27 = vmul.f32 %v6921_v40, %v4394_v44 }
0x1885   : > { %v4413_v5 = vsel %vm1297_vm0, %v4411_v4, 0.0  ;;  %v6702_v4 = vld [vmem:[%s7472_s25 + $0x3] ss:$0 sm:$0xff] }
0x1886   : > { %v4406_v48 = vpop.xlane.xlu1 %4405  ;;  %4414 = vadd.xlane.f32.xlu0 %v4413_v5  ;;  %v4399_v33 = vsel %vm4398_vm6, %v6921_v40, %v4395_v27 }
0x1887   : > { %v4408_v46 = vmul.f32 %v4406_v48, %v7824_v12  ;;  %v4400_v39 = vmul.f32 %v4399_v33, %v8767_v30 }
0x1889   : > { %v8792_v56 = vsub.f32 %v8779_v50, %v4408_v46  ;;  %v4450_v11 = vmul.f32 %v6699_v63, %v4400_v39  ;;  %v4490_v34 = vmul.f32 %v6705_v24, %v4400_v39  ;;  %v8876_v24 = vld [vmem:[#allocation13 + $0x18] sm:$0xff] }
0x188b   : > { %v4412_v32 = vmul.f32 %v8792_v56, %v8792_v56  ;;  %v4496_v8 = vadd.f32 %v6706_v26, %v4490_v34 }
0x188d   : > { %v4416_v13 = vsel %vm1297_vm0, %v4412_v32, 0.0 }
0x188e   : > { %4417 = vadd.xlane.f32.xlu1 %v4416_v13  ;;  %v4456_v13 = vadd.f32 %v6700_v57, %v4450_v11 }
0x18f9   : > { %v4415_v17 = vpop.xlane.xlu0 %4414 }
0x18fa   : > { %v4419_v36 = vmul.f32 %v4415_v17, %v7824_v12  ;;  %v4508_v17 = vperm.slane %v6206_v19, 0 }
0x18fc   : > { %v4421_v51 = vadd.f32 1e-06, %v4419_v36 }
0x18fe   : > { %6922 = vrsqrt.f32 %v4421_v51  ;;  %vm4429_vm8 = vweird.f32 %v4421_v51 }
0x1901   : > { %v4418_v20 = vpop.xlane.xlu1 %4417 }
0x1902   : > { %v4420_v29 = vmul.f32 %v4418_v20, %v7824_v12 }
0x1904   : > { %v6923_v9 = vpop.eup %6922  ;;  %v4422_v45 = vadd.f32 1e-06, %v4420_v29 }
0x1905   : > { %v4424_v54 = vmul.f32 %v6923_v9, %v4421_v51  ;;  %vm4430_vm7 = vweird.f32 %v6923_v9 }
0x1906   : > { %6924 = vrsqrt.f32 %v4422_v45  ;;  %vm4431_vm9 = vmor %vm4429_vm8, %vm4430_vm7  ;;  %vm4439_vm13 = vweird.f32 %v4422_v45 }
0x1907   : > { %v4425_v3 = vmul.f32 %v6923_v9, %v4424_v54 }
0x1909   : > { %v4426_v47 = vmul.f32 0.5, %v4425_v3 }
0x190b   : > { %v4427_v59 = vsub.f32 1.5, %v4426_v47 }
0x190c   : > { %v6925_v58 = vpop.eup %6924 }
0x190d   : > { %v4428_v10 = vmul.f32 %v6923_v9, %v4427_v59  ;;  %v4434_v43 = vmul.f32 %v6925_v58, %v4422_v45  ;;  %vm4440_vm10 = vweird.f32 %v6925_v58 }
0x190e   : > { %vm4441_vm14 = vmor %vm4439_vm13, %vm4440_vm10 }
0x190f   : > { %v4432_v2 = vsel %vm4431_vm9, %v6923_v9, %v4428_v10  ;;  %v4435_v42 = vmul.f32 %v6925_v58, %v4434_v43 }
0x1910   : > { %v4443_v5 = vmul.f32 %v4432_v2, %v8785_v18 }
0x1911   : > { %v4436_v48 = vmul.f32 0.5, %v4435_v42 }
0x1912   : > { %v4462_v46 = vmul.f32 %v6701_v52, %v4443_v5  ;;  %v4476_v22 = vmul.f32 %v6703_v35, %v4443_v5 }
0x1913   : > { %v4437_v32 = vsub.f32 1.5, %v4436_v48 }
0x1914   : > { %v4469_v30 = vadd.f32 %v6702_v4, %v4462_v46  ;;  %v4483_v40 = vadd.f32 %v6704_v23, %v4476_v22  ;;  %v8868_v22 = vld [vmem:[#allocation13 + $0x8] sm:$0xff] }
0x1915   : > { %v4438_v61 = vmul.f32 %v6925_v58, %v4437_v32 }
0x1916   : > { %v4497_v41 = vpack.c.bf16 %v4469_v30, %v4456_v13 }
0x1917   : > { %v4442_v25 = vsel %vm4441_vm14, %v6925_v58, %v4438_v61 }
0x1918   : > { %6223 = vmatmul.msk.bf16.vlgmr.msra.gmra.mxu1 %vm1297_vm0, %v4497_v41  ;;  %6226 = vmatmul.msk.bf16.vlgmr.msrb.gmra.mxu2 %vm1297_vm0, %v4497_v41  ;;  %v4444_v18 = vmul.f32 %v4442_v25, %v8792_v56 }
0x191a   : > { %v4463_v0 = vmul.f32 %v6701_v52, %v4444_v18  ;;  %v4477_v7 = vmul.f32 %v6703_v35, %v4444_v18  ;;  %v8865_v35 = vld [vmem:[#allocation13] sm:$0xff] }
0x191c   : > { %v4470_v49 = vadd.f32 %v6702_v4, %v4463_v0  ;;  %v4484_v15 = vadd.f32 %v6704_v23, %v4477_v7 }
0x191e   : > { %v4498_v60 = vpack.c.bf16 %v4483_v40, %v4470_v49  ;;  %v4499_v21 = vpack.c.bf16 %v4496_v8, %v4484_v15  ;;  %v8873_v40 = vld [vmem:[#allocation13 + $0x10] sm:$0xff]  ;;  %v7043_v15 = vld [vmem:[%s9165_s3] sm:$0xff] }
0x1928   : > { %6224 = vmatmul.msk.bf16.gmra.mxu1 %vm1297_vm0, %v4498_v60  ;;  %6227 = vmatmul.msk.bf16.gmra.mxu2 %vm1297_vm0, %v4498_v60 }
0x1938   : > { %6225 = vmatmul.msk.bf16.gmra.mxu1 %vm1297_vm0, %v4499_v21  ;;  %6228 = vmatmul.msk.bf16.gmra.mxu2 %vm1297_vm0, %v4499_v21 }
0x1995   : > { %v4550_v56 = vpop.f32.mrf.mxu1 }
0x1996   : > { %v4551_v16 = vadd.f32 %v4550_v56, %v4508_v17 }
0x1998   : > { %v4592_v0 = vmul.f32 %v8865_v35, %v4551_v16  ;;  %v4593_v23 = vmul.f32 %v8868_v22, %v4551_v16  ;;  %v4594_v60 = vmul.f32 %v8873_v40, %v4551_v16  ;;  %v4595_v7 = vmul.f32 %v8876_v24, %v4551_v16 }
0x199a   : > { %v4596_v49 = vpack.c.bf16 %v4593_v23, %v4592_v0  ;;  %v4597_v34 = vpack.c.bf16 %v4595_v7, %v4594_v60 }
0x199b   : > { %v4573_v36 = vpop.f32.mrf.mxu2 }
0x199d   : > { %v4552_v51 = vpop.f32.mrf.mxu1 }
0x199e   : > { %v4553_v44 = vadd.f32 %v4552_v51, %v4508_v17 }
0x19a0   : > { %v8826_v20 = vpack.c.bf16 %v4553_v44, %v4551_v16  ;;  %v7045_v44 = vld [vmem:[%s9165_s3 + $0x10] sm:$0xff] }
0x19a2   : > { %4602 = vrot.lane.b32.xlu0 %v8826_v20, %s9209_s11 }
0x19a3   : > { %v4574_v29 = vpop.f32.mrf.mxu2 }
0x19a5   : > { %v4555_v9 = vpop.f32.mrf.mxu1 }
0x19a6   : > { %v4556_v45 = vadd.f32 %v4555_v9, %v4508_v17 }
0x19a8   : > { %v8830_v27 = vpack.c.bf16 %v4556_v45, %v4556_v45  ;;  %v7046_v45 = vld [vmem:[%s9165_s3 + $0x18] sm:$0xff] }
0x19aa   : > { %4604 = vrot.lane.b32.xlu2 %v8830_v27, %s9209_s11 }
0x19ab   : > { %v4576_v54 = vpop.f32.mrf.mxu2 }
0x19ad   : > { %v4557_v3 = vpop.f32.mrf.mxu1 }
0x19ae   : > { %v4558_v33 = vadd.f32 %v4557_v3, %v4508_v17 }
0x19b0   : > { %v4764_v63 = vmul.f32 %v4558_v33, %v7902_v53  ;;  %v8836_v39 = vmul.f32 %v4558_v33, %v7919_v1  ;;  %v8839_v10 = vmul.f32 %v4558_v33, %v7946_v31  ;;  %v8842_v43 = vmul.f32 %v4558_v33, %v7956_v38 }
0x19b3   : > { %v4577_v47 = vpop.f32.mrf.mxu2 }
0x19b5   : > { %v4560_v59 = vpop.f32.mrf.mxu1 }
0x19b6   : > { %v4561_v58 = vadd.f32 %v4560_v59, %v4508_v17 }
0x19b8   : > { %v4765_v52 = vmul.f32 %v4561_v58, %v7906_v55  ;;  %v4767_v2 = vmul.f32 %v4561_v58, %v7915_v62  ;;  %v4769_v42 = vmul.f32 %v4561_v58, %v7942_v28  ;;  %v8848_v57 = vmul.f32 %v4561_v58, %v7954_v37 }
0x19b9   : > { %v4509_v55 = vperm.slane %v6206_v19, 1  ;;  %v7044_v19 = vld [vmem:[%s9165_s3 + $0x8] sm:$0xff] }
0x19ba   : > { %v4772_v11 = vpack.c.bf16 %v4765_v52, %v4764_v63  ;;  %v4773_v53 = vpack.c.bf16 %v4767_v2, %v8836_v39  ;;  %v4774_v1 = vpack.c.bf16 %v4769_v42, %v8839_v10  ;;  %v4775_v31 = vpack.c.bf16 %v8848_v57, %v8842_v43 }
0x19bb   : > { %v4580_v4 = vpop.f32.mrf.mxu2  ;;  %v4578_v46 = vadd.f32 %v4577_v47, %v4509_v55 }
0x19bc   : > { %4782 = vrot.lane.b32.xlu2 %v4772_v11, %s9210_s15  ;;  %v4581_v28 = vadd.f32 %v4580_v4, %v4509_v55 }
0x19bd   : > { %v4562_v38 = vpop.f32.mrf.mxu1 }
0x19be   : > { %v8859_v32 = vpack.c.bf16 %v4581_v28, %v4578_v46  ;;  %v7047_v46 = vld [vmem:[%s7622_s20] sm:$0xff] }
0x19c0   : > { %v4803_v13 = vsel %vm1297_vm0, %v8859_v32, 0 }
0x19c3   : > { %v4582_v5 = vpop.f32.mrf.mxu2 }
0x19c4   : > { %v4583_v62 = vadd.f32 %v4582_v5, %v4509_v55 }
0x19c6   : > { %v8855_v48 = vpack.c.bf16 %v4583_v62, %v4583_v62 }
0x19c8   : > { %v4806_v37 = vsel %vm1297_vm0, %v8855_v48, 0 }
0x19c9   : > { %4814 = vmatpush.bf16.xpose.msrb.mxu1 %v4806_v37 }
0x19d1   : > { %4815 = vmatpush.bf16.xpose.msrb.mxu1 %v4803_v13 }
0x1a04   : > { %v4605_v30 = vpop.permute.xlu2 %4604 }
0x1a05   : > { %v4616_v61 = vsel %vm1297_vm0, %v4605_v30, 0 }
0x1a06   : > { %4624 = vmatpush.bf16.xpose.msrb.mxu0 %v4616_v61 }
0x1a14   : > { %v4603_v41 = vpop.permute.xlu0 %4602 }
0x1a15   : > { %v4613_v25 = vsel %vm1297_vm0, %v4603_v41, 0 }
0x1a16   : > { %v4783_v18 = vpop.permute.xlu2 %4782  ;;  %4625 = vmatpush.bf16.xpose.msrb.mxu0 %v4613_v25  ;;  %v7048_v25 = vld [vmem:[%s7622_s20 + $0x8] sm:$0xff] }
0x1a17   : > { %6244 = vmatmul.msk.bf16.vlgmr.msrb.gmra.mxu1 %vm1297_vm0, %v4783_v18 }
0x1a1d   : > { %6230 = vmatmul.msk.bf16.vlgmr.msrb.gmra.mxu0 %vm1297_vm0, %v4596_v49 }
0x1a2d   : > { %6231 = vmatmul.msk.bf16.gmra.mxu0 %vm1297_vm0, %v4597_v34 }
0x1a94   : > { %v4817_v37 = vpop.f32.mrf.mxu1 }
0x1a95   : > { %v8899_v13 = vadd.f32 %v7047_v46, %v4817_v37  ;;  %v6457_v46 = vld [vmem:[#allocation2 + $0x38] sm:$0xff] }
0x1a96   : > { %4745 = vmatpush.bf16.msra.mxu0 %v6457_v46 }
0x1a97   : > { %v4837_v61 = vsel %vm1551_vm11, %v8899_v13, -inf }
0x1a9a   : > { %v4627_v26 = vpop.f32.mrf.mxu0 }
0x1a9b   : > { %v4628_v8 = vadd.f32 %v7043_v15, %v4627_v26 }
0x1a9d   : > { %v4637_v21 = vsel %vm1551_vm11, %v4628_v8, -inf }
0x1a9e   : > { %4638 = vmax.xlane.f32.xlu1 %v4637_v21 }
0x1aa2   : > { %v4629_v56 = vpop.f32.mrf.mxu0 }
0x1aa3   : > { %v4630_v17 = vadd.f32 %v7044_v19, %v4629_v56 }
0x1aa5   : > { %v4640_v36 = vsel %vm1551_vm11, %v4630_v17, -inf }
0x1aa6   : > { %4641 = vmax.xlane.f32.xlu1 %v4640_v36 }
0x1aaa   : > { %v4632_v51 = vpop.f32.mrf.mxu0 }
0x1aab   : > { %v4633_v29 = vadd.f32 %v7045_v44, %v4632_v51 }
0x1aad   : > { %v4643_v16 = vsel %vm1551_vm11, %v4633_v29, -inf }
0x1aae   : > { %4644 = vmax.xlane.f32.xlu1 %v4643_v16  ;;  %v7049_v16 = vld [vmem:[%s7622_s20 + $0x10] sm:$0xff] }
0x1ab2   : > { %v4634_v9 = vpop.f32.mrf.mxu0 }
0x1ab3   : > { %v4635_v54 = vadd.f32 %v7046_v45, %v4634_v9 }
0x1ab5   : > { %v4646_v3 = vsel %vm1551_vm11, %v4635_v54, -inf }
0x1ab6   : > { %4647 = vmax.xlane.f32.xlu0 %v4646_v3  ;;  %v7050_v3 = vld [vmem:[%s7622_s20 + $0x18] sm:$0xff] }
0x1ac7   : > { %4784 = vrot.lane.b32.xlu1 %v4773_v53, %s9210_s15 }
0x1aca   : > { %4786 = vrot.lane.b32.xlu0 %v4774_v1, %s9210_s15 }
0x1ad2   : > { %4683 = vrot.lane.b32.xlu0 %v8826_v20, %s9211_s14 }
0x1b11   : > { %v4639_v33 = vpop.xlane.xlu1 %4638 }
0x1b12   : > { %v4649_v47 = vsub.f32 %v4628_v8, %v4639_v33 }
0x1b14   : > { %v4653_v59 = vmul.f32 1.442695, %v4649_v47 }
0x1b16   : > { %6926 = vpow2.f32 %v4653_v59 }
0x1b19   : > { %v4642_v58 = vpop.xlane.xlu1 %4641 }
0x1b1a   : > { %v4650_v63 = vsub.f32 %v4630_v17, %v4642_v58  ;;  %v7051_v58 = vld [vmem:[%s7622_s20 + $0x20] sm:$0xff] }
0x1b1c   : > { %v6927_v39 = vpop.eup %6926  ;;  %v4655_v10 = vmul.f32 1.442695, %v4650_v63 }
0x1b1d   : > { %v4661_v52 = vsel %vm1551_vm11, %v6927_v39, 0.0 }
0x1b1e   : > { %6928 = vpow2.f32 %v4655_v10  ;;  %4662 = vadd.xlane.f32.xlu2 %v4661_v52  ;;  %v7052_v52 = vld [vmem:[%s7622_s20 + $0x28] sm:$0xff] }
0x1b21   : > { %v4645_v2 = vpop.xlane.xlu1 %4644 }
0x1b22   : > { %v4651_v42 = vsub.f32 %v4633_v29, %v4645_v2 }
0x1b24   : > { %v6929_v11 = vpop.eup %6928  ;;  %v4657_v53 = vmul.f32 1.442695, %v4651_v42 }
0x1b25   : > { %v4664_v1 = vsel %vm1551_vm11, %v6929_v11, 0.0 }
0x1b26   : > { %6930 = vpow2.f32 %v4657_v53  ;;  %4665 = vadd.xlane.f32.xlu1 %v4664_v1 }
0x1b29   : > { %v4648_v20 = vpop.xlane.xlu0 %4647 }
0x1b2a   : > { %v4652_v4 = vsub.f32 %v4635_v54, %v4648_v20 }
0x1b2c   : > { %v6931_v38 = vpop.eup %6930  ;;  %v4659_v55 = vmul.f32 1.442695, %v4652_v4 }
0x1b2d   : > { %v4667_v5 = vsel %vm1551_vm11, %v6931_v38, 0.0 }
0x1b2e   : > { %6932 = vpow2.f32 %v4659_v55  ;;  %4668 = vadd.xlane.f32.xlu0 %v4667_v5 }
0x1b34   : > { %v6933_v62 = vpop.eup %6932 }
0x1b35   : > { %v4670_v28 = vsel %vm1551_vm11, %v6933_v62, 0.0 }
0x1b36   : > { %4685 = vrot.lane.b32.xlu2 %v8830_v27, %s9211_s14  ;;  %4671 = vadd.xlane.f32.xlu1 %v4670_v28  ;;  %v4819_v27 = vpop.f32.mrf.mxu1  ;;  %v7053_v28 = vld [vmem:[%s7622_s20 + $0x30] sm:$0xff]  ;;  %s9212_s14 = sld [smem:[#allocation47_spill]] }
0x1b37   : > { %v4820_v18 = vadd.f32 %v7048_v25, %v4819_v27  ;;  %v7054_v25 = vld [vmem:[%s7622_s20 + $0x38] sm:$0xff] }
0x1b39   : > { %v4785_v30 = vpop.permute.xlu1 %4784  ;;  %v4840_v0 = vsel %vm1551_vm11, %v4820_v18, -inf }
0x1b3a   : > { %6245 = vmatmul.msk.bf16.gmra.mxu1 %vm1297_vm0, %v4785_v30 }
0x1b3c   : > { %v4787_v41 = vpop.permute.xlu0 %4786 }
0x1b3e   : > { %4788 = vrot.lane.b32.xlu2 %v4775_v31, %s9210_s15  ;;  %4838 = vmax.xlane.f32.xlu1 %v4837_v61  ;;  %v6456_v61 = vld [vmem:[#allocation2 + $0x30] sm:$0xff]  ;;  %s9214_s15 = sld [smem:[#allocation46_spill]] }
0x1b3f   : > { %4746 = vmatpush.bf16.msra.mxu0 %v6456_v61 }
0x1b44   : > { %v4684_v43 = vpop.permute.xlu0 %4683 }
0x1b4a   : > { %6246 = vmatmul.msk.bf16.gmra.mxu1 %vm1297_vm0, %v4787_v41 }
0x1b67   : > { %4841 = vmax.xlane.f32.xlu2 %v4840_v0 }
0x1b91   : > { %v4663_v23 = vpop.xlane.xlu2 %4662 }
0x1b92   : > { %6934 = vrcp.f32 %v4663_v23 }
0x1b98   : > { %v6935_v57 = vpop.eup %6934 }
0x1b99   : > { %v4686_v49 = vpop.permute.xlu2 %4685  ;;  %v4666_v60 = vpop.xlane.xlu1 %4665  ;;  %v4677_v34 = vmul.f32 %v6935_v57, %v6927_v39 }
0x1b9a   : > { %v4695_v7 = vsel %vm1609_vm12, %v4686_v49, 0  ;;  %6936 = vrcp.f32 %v4666_v60 }
0x1b9b   : > { %4703 = vmatpush.bf16.msra.mxu3 %v4695_v7 }
0x1b9f   : > { %4704 = vmatpush.bf16.msra.mxu3 %v4684_v43 }
0x1ba0   : > { %v6937_v31 = vpop.eup %6936 }
0x1ba1   : > { %v4678_v26 = vmul.f32 %v6937_v31, %v6929_v11  ;;  %v4789_v15 = vpop.permute.xlu2 %4788  ;;  %v4669_v21 = vpop.xlane.xlu0 %4668 }
0x1ba2   : > { %6247 = vmatmul.msk.bf16.gmra.mxu1 %vm1297_vm0, %v4789_v15  ;;  %6938 = vrcp.f32 %v4669_v21 }
0x1ba3   : > { %v4681_v8 = vpack.c.bf16 %v4678_v26, %v4677_v34 }
0x1ba5   : > { %6232 = vmatmul.msk.bf16.vlgmr.msra.gmra.mxu3 %vm1551_vm11, %v4681_v8 }
0x1ba8   : > { %v6939_v19 = vpop.eup %6938 }
0x1ba9   : > { %v4672_v56 = vpop.xlane.xlu1 %4671  ;;  %v4679_v36 = vmul.f32 %v6939_v19, %v6931_v38 }
0x1baa   : > { %6940 = vrcp.f32 %v4672_v56 }
0x1bb0   : > { %v6941_v17 = vpop.eup %6940 }
0x1bb1   : > { %v4680_v51 = vmul.f32 %v6941_v17, %v6933_v62  ;;  %v4839_v38 = vpop.xlane.xlu1 %4838 }
0x1bb2   : > { %v4861_v55 = vsub.f32 %v8899_v13, %v4839_v38 }
0x1bb3   : > { %v4682_v44 = vpack.c.bf16 %v4680_v51, %v4679_v36 }
0x1bb4   : > { %v4869_v5 = vmul.f32 1.442695, %v4861_v55 }
0x1bb5   : > { %6233 = vmatmul.msk.bf16.gmra.mxu3 %vm1551_vm11, %v4682_v44 }
0x1bb7   : > { %v4822_v29 = vpop.f32.mrf.mxu1 }
0x1bb8   : > { %v4823_v9 = vadd.f32 %v7049_v16, %v4822_v29 }
0x1bba   : > { %v4843_v45 = vsel %vm1551_vm11, %v4823_v9, -inf }
0x1bbb   : > { %4844 = vmax.xlane.f32.xlu1 %v4843_v45 }
0x1bbf   : > { %v4824_v54 = vpop.f32.mrf.mxu1 }
0x1bc0   : > { %v4825_v33 = vadd.f32 %v7050_v3, %v4824_v54 }
0x1bc2   : > { %v4846_v47 = vsel %vm1551_vm11, %v4825_v33, -inf }
0x1bc3   : > { %4847 = vmax.xlane.f32.xlu1 %v4846_v47 }
0x1bc7   : > { %v4827_v59 = vpop.f32.mrf.mxu1 }
0x1bc8   : > { %v4828_v63 = vadd.f32 %v7051_v58, %v4827_v59 }
0x1bca   : > { %v4849_v39 = vsel %vm1551_vm11, %v4828_v63, -inf }
0x1bcb   : > { %4850 = vmax.xlane.f32.xlu1 %v4849_v39 }
0x1bcf   : > { %v4829_v10 = vpop.f32.mrf.mxu1 }
0x1bd0   : > { %v8922_v2 = vadd.f32 %v7052_v52, %v4829_v10 }
0x1bd2   : > { %v4852_v42 = vsel %vm1551_vm11, %v8922_v2, -inf }
0x1bd3   : > { %4853 = vmax.xlane.f32.xlu1 %v4852_v42 }
0x1bda   : > { %v4842_v11 = vpop.xlane.xlu2 %4841 }
0x1bdb   : > { %v4862_v53 = vsub.f32 %v4820_v18, %v4842_v11 }
0x1bdd   : > { %v4871_v1 = vmul.f32 1.442695, %v4862_v53 }
0x1bdf   : > { %6942 = vpow2.f32 %v4871_v1 }
0x1be0   : > { %6944 = vpow2.f32 %v4869_v5 }
0x1be5   : > { %v8926_v20 = vpop.eup %6942 }
0x1be6   : > { %v4888_v4 = vsel %vm1551_vm11, %v8926_v20, 0.0  ;;  %v8933_v41 = vpop.eup %6944 }
0x1be7   : > { %4889 = vadd.xlane.f32.xlu2 %v4888_v4  ;;  %v4885_v23 = vsel %vm1551_vm11, %v8933_v41, 0.0 }
0x1c1f   : > { %v4832_v62 = vpop.f32.mrf.mxu1 }
0x1c20   : > { %v4833_v37 = vadd.f32 %v7053_v28, %v4832_v62 }
0x1c22   : > { %v4855_v30 = vsel %vm1551_vm11, %v4833_v37, -inf }
0x1c23   : > { %4856 = vmax.xlane.f32.xlu0 %v4855_v30 }
0x1c27   : > { %v4834_v27 = vpop.f32.mrf.mxu1 }
0x1c28   : > { %v4835_v18 = vadd.f32 %v7054_v25, %v4834_v27  ;;  %v4706_v0 = vpop.f32.mrf.mxu3  ;;  %v6707_v25 = vld [vmem:[%s9195_s2 + $0x3] ss:$0 sm:$0xff]  ;;  %s9029_s2 = sand.u32 1, %s7375_s10  }
0x1c29   : > { %v4716_v56 = vmul.f32 %v8865_v35, %v4706_v0  ;;  %s5742_s3 = sshll.u32 %s9029_s2, 4  ;;  %s5741_s13 = sshll.u32 %s9029_s2, 3 }
0x1c2a   : > { %v4858_v13 = vsel %vm1551_vm11, %v4835_v18, -inf }
0x1c2b   : > { %4859 = vmax.xlane.f32.xlu1 %v4858_v13  ;;  %4886 = vadd.xlane.f32.xlu0 %v4885_v23 }
0x1c2e   : > { %v4845_v49 = vpop.xlane.xlu1 %4844 }
0x1c2f   : > { %v4863_v60 = vsub.f32 %v4823_v9, %v4845_v49 }
0x1c30   : > { %v4708_v7 = vpop.f32.mrf.mxu3 }
0x1c31   : > { %v4873_v43 = vmul.f32 1.442695, %v4863_v60  ;;  %v4717_v21 = vmul.f32 %v8868_v22, %v4708_v7 }
0x1c33   : > { %6946 = vpow2.f32 %v4873_v43  ;;  %v4720_v36 = vadd.f32 %v4717_v21, %v4716_v56 }
0x1c36   : > { %v4848_v57 = vpop.xlane.xlu1 %4847 }
0x1c37   : > { %v4864_v31 = vsub.f32 %v4825_v33, %v4848_v57 }
0x1c38   : > { %v4711_v34 = vpop.f32.mrf.mxu3 }
0x1c39   : > { %v8939_v26 = vpop.eup %6946  ;;  %v4875_v15 = vmul.f32 1.442695, %v4864_v31  ;;  %v4718_v19 = vmul.f32 %v8873_v40, %v4711_v34 }
0x1c3a   : > { %v4891_v8 = vsel %vm1551_vm11, %v8939_v26, 0.0 }
0x1c3b   : > { %6948 = vpow2.f32 %v4875_v15  ;;  %4892 = vadd.xlane.f32.xlu2 %v4891_v8  ;;  %v4721_v16 = vadd.f32 %v4720_v36, %v4718_v19 }
0x1c3e   : > { %v4851_v17 = vpop.xlane.xlu1 %4850 }
0x1c3f   : > { %v4865_v51 = vsub.f32 %v4828_v63, %v4851_v17  ;;  %4931 = vrot.lane.b32.xlu0 %v8859_v32, %s9209_s11 }
0x1c40   : > { %v4713_v44 = vpop.f32.mrf.mxu3 }
0x1c41   : > { %v6949_v29 = vpop.eup %6948  ;;  %v4877_v9 = vmul.f32 1.442695, %v4865_v51  ;;  %v4719_v45 = vmul.f32 %v8876_v24, %v4713_v44 }
0x1c42   : > { %v4894_v22 = vsel %vm1551_vm11, %v6949_v29, 0.0 }
0x1c43   : > { %6950 = vpow2.f32 %v4877_v9  ;;  %v4722_v54 = vadd.f32 %v4721_v16, %v4719_v45  ;;  %4895 = vadd.xlane.f32.xlu2 %v4894_v22 }
0x1c44   : > { %4933 = vrot.lane.b32.xlu1 %v8855_v48, %s9209_s11  ;;  %s9213_s11 = sld [smem:[#allocation45_spill]] }
0x1c45   : > { %v4723_v35 = vpack.c.bf16 %v4722_v54, %v4722_v54 }
0x1c46   : > { %v4854_v3 = vpop.xlane.xlu1 %4853 }
0x1c47   : > { %6242 = vmatmul.msk.bf16.vlgmr.msra.gmra.mxu0 %vm1297_vm0, %v4723_v35  ;;  %v4866_v33 = vsub.f32 %v8922_v2, %v4854_v3  ;;  %v6459_v3 = vld [vmem:[#allocation5 + $0x38] sm:$0xff] }
0x1c48   : > { %5016 = vmatpush.bf16.msra.mxu2 %v6459_v3  ;;  %v6463_v3 = vld [vmem:[#allocation8 + $0xc8] sm:$0xff] }
0x1c49   : > { %v6951_v40 = vpop.eup %6950  ;;  %v4879_v47 = vmul.f32 1.442695, %v4866_v33  ;;  %v6458_v33 = vld [vmem:[#allocation5 + $0x30] sm:$0xff] }
0x1c4a   : > { %v4897_v32 = vsel %vm1551_vm11, %v6951_v40, 0.0 }
0x1c4b   : > { %4898 = vadd.xlane.f32.xlu2 %v4897_v32  ;;  %6952 = vpow2.f32 %v4879_v47 }
0x1c4c   : > { %5017 = vmatpush.bf16.msra.mxu2 %v6458_v33 }
0x1c51   : > { %v6953_v24 = vpop.eup %6952 }
0x1c52   : > { %v4900_v59 = vsel %vm1551_vm11, %v6953_v24, 0.0 }
0x1c5a   : > { %v4890_v1 = vpop.xlane.xlu2 %4889 }
0x1c69   : > { %4901 = vadd.xlane.f32.xlu0 %v4900_v59 }
0x1c96   : > { %v4857_v58 = vpop.xlane.xlu0 %4856 }
0x1c97   : > { %v4867_v63 = vsub.f32 %v4833_v37, %v4857_v58  ;;  %v7055_v58 = vld [vmem:[%s9185_s16 + $0x10] sm:$0xff] }
0x1c99   : > { %v4881_v39 = vmul.f32 1.442695, %v4867_v63 }
0x1c9b   : > { %6954 = vpow2.f32 %v4881_v39  ;;  %v7056_v39 = vld [vmem:[%s9185_s16 + $0x18] sm:$0xff] }
0x1c9e   : > { %v4860_v48 = vpop.xlane.xlu1 %4859  ;;  %v4887_v4 = vpop.xlane.xlu0 %4886 }
0x1c9f   : > { %v4868_v10 = vsub.f32 %v4835_v18, %v4860_v48 }
0x1ca1   : > { %v6955_v52 = vpop.eup %6954  ;;  %v4883_v42 = vmul.f32 1.442695, %v4868_v10  ;;  %v6461_v10 = vld [vmem:[#allocation7 + $0x38] sm:$0xff] }
0x1ca2   : > { %v4903_v11 = vsel %vm1551_vm11, %v6955_v52, 0.0  ;;  %5116 = vmatpush.bf16.msrb.mxu0 %v6461_v10 }
0x1ca3   : > { %6956 = vpow2.f32 %v4883_v42  ;;  %4904 = vadd.xlane.f32.xlu1 %v4903_v11  ;;  %v7058_v11 = vld [vmem:[%s9185_s16 + $0x8] sm:$0xff] }
0x1ca4   : > { %6958 = vrcp.f32 %v4887_v4  ;;  %v7060_v4 = vld [vmem:[%s9185_s16 + $0x28] sm:$0xff] }
0x1ca5   : > { %6960 = vrcp.f32 %v4890_v1 }
0x1ca9   : > { %v6957_v53 = vpop.eup %6956 }
0x1caa   : > { %v4906_v2 = vsel %vm1551_vm11, %v6957_v53, 0.0  ;;  %v6959_v55 = vpop.eup %6958 }
0x1cab   : > { %4907 = vadd.xlane.f32.xlu2 %v4906_v2  ;;  %v6961_v28 = vpop.eup %6960  ;;  %v4917_v37 = vmul.f32 %v6959_v55, %v8933_v41  ;;  %v7059_v2 = vld [vmem:[%s9185_s16 + $0x20] sm:$0xff] }
0x1cac   : > { %v4918_v46 = vmul.f32 %v6961_v28, %v8926_v20 }
0x1cae   : > { %v4893_v38 = vpop.xlane.xlu2 %4892  ;;  %v4925_v61 = vpack.c.bf16 %v4918_v46, %v4917_v37  ;;  %v6460_v37 = vld [vmem:[#allocation7 + $0x30] sm:$0xff] }
0x1caf   : > { %5117 = vmatpush.bf16.msrb.mxu0 %v6460_v37 }
0x1cb1   : > { %v4932_v30 = vpop.permute.xlu0 %4931 }
0x1cb6   : > { %v4934_v5 = vpop.permute.xlu1 %4933  ;;  %v4896_v27 = vpop.xlane.xlu2 %4895 }
0x1cb7   : > { %v4949_v62 = vsel %vm1609_vm12, %v4934_v5, 0  ;;  %6962 = vrcp.f32 %v4896_v27  ;;  %v7062_v27 = vld [vmem:[%s9185_s16 + $0x38] sm:$0xff] }
0x1cb8   : > { %4957 = vmatpush.bf16.msrb.mxu3 %v4949_v62  ;;  %6964 = vrcp.f32 %v4893_v38  ;;  %v7061_v62 = vld [vmem:[%s9185_s16 + $0x30] sm:$0xff] }
0x1cbc   : > { %4958 = vmatpush.bf16.msrb.mxu3 %v4932_v30 }
0x1cbd   : > { %v6963_v13 = vpop.eup %6962 }
0x1cbe   : > { %v6965_v49 = vpop.eup %6964  ;;  %v4920_v60 = vmul.f32 %v6963_v13, %v6949_v29  ;;  %v4899_v57 = vpop.xlane.xlu2 %4898 }
0x1cbf   : > { %6248 = vmatmul.msk.bf16.vlgmr.msrb.gmra.mxu3 %vm1551_vm11, %v4925_v61  ;;  %v4919_v41 = vmul.f32 %v6965_v49, %v8939_v26  ;;  %6966 = vrcp.f32 %v4899_v57 }
0x1cc1   : > { %v4926_v43 = vpack.c.bf16 %v4920_v60, %v4919_v41 }
0x1cc4   : > { %v4748_v18 = vpop.f32.mrf.mxu0 }
0x1cc5   : > { %v4752_v0 = vadd.f32 %v4748_v18, %v8761_v14  ;;  %v6967_v14 = vpop.eup %6966 }
0x1cc6   : > { %v4921_v15 = vmul.f32 %v6967_v14, %v6951_v40 }
0x1cc7   : > { %v8964_v23 = vadd.f32 %v6707_v25, %v4752_v0 }
0x1cc9   : > { %v5061_v20 = vsel %vm1297_vm0, %v8964_v23, 0.0 }
0x1cca   : > { %5062 = vadd.xlane.f32.xlu2 %v5061_v20 }
0x1ccc   : > { %v4750_v7 = vpop.f32.mrf.mxu0 }
0x1ccf   : > { %6249 = vmatmul.msk.bf16.gmra.mxu3 %vm1551_vm11, %v4926_v43 }
0x1cdc   : > { %v4902_v31 = vpop.xlane.xlu0 %4901 }
0x1cdd   : > { %6968 = vrcp.f32 %v4902_v31 }
0x1ce3   : > { %v6969_v34 = vpop.eup %6968 }
0x1ce4   : > { %v4922_v8 = vmul.f32 %v6969_v34, %v6953_v24  ;;  %v6708_v34 = vld [vmem:[%s9196_s26 + $0x3] ss:$0 sm:$0xff] }
0x1ce6   : > { %v4927_v21 = vpack.c.bf16 %v4922_v8, %v4921_v15  ;;  %v6709_v8 = vld [vmem:[%s9197_s18 + $0x3] ss:$0 sm:$0xff] }
0x1ce8   : > { %6250 = vmatmul.msk.bf16.gmra.mxu3 %vm1551_vm11, %v4927_v21 }
0x1d16   : > { %v4905_v56 = vpop.xlane.xlu1 %4904 }
0x1d17   : > { %6970 = vrcp.f32 %v4905_v56 }
0x1d1d   : > { %v6971_v26 = vpop.eup %6970 }
0x1d1e   : > { %v4908_v19 = vpop.xlane.xlu2 %4907  ;;  %v4923_v36 = vmul.f32 %v6971_v26, %v6955_v52  ;;  %v7057_v52 = vld [vmem:[%s9185_s16] sm:$0xff]  ;;  %s5481_s16 = scalar_lea.sflag [#allocation16], %s9029_s2 }
0x1d1f   : > { %6972 = vrcp.f32 %v4908_v19 }
0x1d25   : > { %v6973_v17 = vpop.eup %6972 }
0x1d26   : > { %v4924_v51 = vmul.f32 %v6973_v17, %v6957_v53  ;;  %v6469_v17 = vld [vmem:[#allocation8 + $0xf8] sm:$0xff] }
0x1d27   : > { %5184 = vmatpush.bf16.msrb.mxu2 %v6469_v17 }
0x1d28   : > { %v4928_v44 = vpack.c.bf16 %v4924_v51, %v4923_v36  ;;  %v6468_v36 = vld [vmem:[#allocation8 + $0xf0] sm:$0xff]  ;;  %v6467_v51 = vld [vmem:[#allocation8 + $0xe8] sm:$0xff] }
0x1d2a   : > { %6251 = vmatmul.msk.bf16.gmra.mxu3 %vm1551_vm11, %v4928_v44  ;;  %v6466_v44 = vld [vmem:[#allocation8 + $0xe0] sm:$0xff] }
0x1d2b   : > { %5185 = vmatpush.bf16.msrb.mxu2 %v6468_v36 }
0x1d2f   : > { %5186 = vmatpush.bf16.msrb.mxu2 %v6467_v51 }
0x1d33   : > { %5187 = vmatpush.bf16.msrb.mxu2 %v6466_v44 }
0x1d3d   : > { %v5063_v29 = vpop.xlane.xlu2 %5062 }
0x1d3e   : > { %v5064_v16 = vmul.f32 %v5063_v29, %v7824_v12  ;;  %v6710_v29 = vld [vmem:[%s9193_s22 + $0x3] ss:$0 sm:$0xff] }
0x1d40   : > { %v5065_v9 = vsub.f32 %v8964_v23, %v5064_v16 }
0x1d42   : > { %v5066_v45 = vmul.f32 %v5065_v9, %v5065_v9  ;;  %v4960_v54 = vpop.f32.mrf.mxu3 }
0x1d43   : > { %v4980_v42 = vmul.f32 %v7057_v52, %v4960_v54 }
0x1d44   : > { %v5067_v22 = vsel %vm1297_vm0, %v5066_v45, 0.0 }
0x1d45   : > { %5068 = vadd.xlane.f32.xlu2 %v5067_v22  ;;  %v6465_v22 = vld [vmem:[#allocation8 + $0xd8] sm:$0xff] }
0x1d46   : > { %5188 = vmatpush.bf16.msrb.mxu2 %v6465_v22 }
0x1d4a   : > { %v4962_v35 = vpop.f32.mrf.mxu3 }
0x1d4b   : > { %v4981_v53 = vmul.f32 %v7058_v11, %v4962_v35  ;;  %v6464_v35 = vld [vmem:[#allocation8 + $0xd0] sm:$0xff] }
0x1d4c   : > { %5189 = vmatpush.bf16.msrb.mxu2 %v6464_v35 }
0x1d50   : > { %5190 = vmatpush.bf16.msrb.mxu2 %v6463_v3 }
0x1d52   : > { %v4965_v40 = vpop.f32.mrf.mxu3 }
0x1d53   : > { %v4982_v63 = vmul.f32 %v7055_v58, %v4965_v40 }
0x1d55   : > { %v4988_v55 = vadd.f32 %v4982_v63, %v4980_v42 }
0x1d5a   : > { %v4967_v32 = vpop.f32.mrf.mxu3 }
0x1d5b   : > { %v4983_v48 = vmul.f32 %v7056_v39, %v4967_v32 }
0x1d5d   : > { %v4989_v5 = vadd.f32 %v4983_v48, %v4981_v53 }
0x1d6b   : > { %v4970_v47 = vpop.f32.mrf.mxu3 }
0x1d6c   : > { %v4984_v1 = vmul.f32 %v7059_v2, %v4970_v47  ;;  %v6462_v47 = vld [vmem:[#allocation8 + $0xc0] sm:$0xff] }
0x1d6d   : > { %5191 = vmatpush.bf16.msrb.mxu2 %v6462_v47 }
0x1d6e   : > { %v4990_v30 = vadd.f32 %v4988_v55, %v4984_v1 }
0x1d73   : > { %v4972_v24 = vpop.f32.mrf.mxu3 }
0x1d74   : > { %v4985_v38 = vmul.f32 %v7060_v4, %v4972_v24  ;;  %v6711_v24 = vld [vmem:[%s9202_s5 + $0x3] ss:$0 sm:$0xff]  ;;  %s9218_s5 = sld [smem:[#allocation48_spill]] }
0x1d76   : > { %v4991_v61 = vadd.f32 %v4989_v5, %v4985_v38 }
0x1dad   : > { %v4975_v59 = vpop.f32.mrf.mxu3 }
0x1dae   : > { %v4986_v28 = vmul.f32 %v7061_v62, %v4975_v59 }
0x1db0   : > { %v4992_v18 = vadd.f32 %v4990_v30, %v4986_v28 }
0x1db5   : > { %v4977_v46 = vpop.f32.mrf.mxu3 }
0x1db6   : > { %v4987_v25 = vmul.f32 %v7062_v27, %v4977_v46  ;;  %v6712_v27 = vld [vmem:[%s9206_s8 + $0x3] ss:$0 sm:$0xff] }
0x1db8   : > { %v4993_v0 = vadd.f32 %v4991_v61, %v4987_v25  ;;  %v5069_v13 = vpop.xlane.xlu2 %5068 }
0x1db9   : > { %v5070_v49 = vmul.f32 %v5069_v13, %v7824_v12 }
0x1dba   : > { %v4994_v60 = vpack.c.bf16 %v4993_v0, %v4992_v18 }
0x1dbb   : > { %v5071_v20 = vadd.f32 1e-06, %v5070_v49 }
0x1dbc   : > { %6260 = vmatmul.msk.bf16.vlgmr.msra.gmra.mxu2 %vm1297_vm0, %v4994_v60 }
0x1dbd   : > { %6974 = vrsqrt.f32 %v5071_v20  ;;  %vm5078_vm12 = vweird.f32 %v5071_v20 }
0x1dc3   : > { %v6975_v41 = vpop.eup %6974 }
0x1dc4   : > { %v5073_v7 = vmul.f32 %v6975_v41, %v5071_v20  ;;  %vm5079_vm11 = vweird.f32 %v6975_v41  ;;  %v6471_v20 = vld [vmem:[#allocation10 + $0x38] sm:$0xff] }
0x1dc5   : > { %vm5080_vm15 = vmor %vm5078_vm12, %vm5079_vm11  ;;  %5307 = vmatpush.bf16.msra.mxu0 %v6471_v20 }
0x1dc6   : > { %v5074_v43 = vmul.f32 %v6975_v41, %v5073_v7 }
0x1dc8   : > { %v5075_v57 = vmul.f32 0.5, %v5074_v43  ;;  %v6470_v43 = vld [vmem:[#allocation10 + $0x30] sm:$0xff] }
0x1dc9   : > { %5308 = vmatpush.bf16.msra.mxu0 %v6470_v43 }
0x1dca   : > { %v5076_v31 = vsub.f32 1.5, %v5075_v57 }
0x1dcc   : > { %v5077_v14 = vmul.f32 %v6975_v41, %v5076_v31 }
0x1dce   : > { %v5081_v15 = vsel %vm5080_vm15, %v6975_v41, %v5077_v14 }
0x1dcf   : > { %v5082_v21 = vmul.f32 %v5081_v15, %v5065_v9 }
0x1dd1   : > { %v5086_v56 = vmul.f32 %v6708_v34, %v5082_v21 }
0x1dd3   : > { %v5090_v19 = vadd.f32 %v6709_v8, %v5086_v56 }
0x1dd5   : > { %v5091_v26 = vpack.c.bf16 %v5090_v19, %v5090_v19 }
0x1dd7   : > { %6273 = vmatmul.msk.bf16.vlgmr.msrb.gmra.mxu0 %vm1297_vm0, %v5091_v26 }
0x1e3f   : > { %v5019_v16 = vpop.f32.mrf.mxu2 }
0x1e40   : > { %v5024_v45 = vadd.f32 %v5019_v16, %v8774_v6 }
0x1e42   : > { %v8990_v9 = vadd.f32 %v6710_v29, %v5024_v45 }
0x1e44   : > { %v5228_v54 = vsel %vm1297_vm0, %v8990_v9, 0.0 }
0x1e45   : > { %5229 = vadd.xlane.f32.xlu2 %v5228_v54  ;;  %v6714_v54 = vld [vmem:[%s9201_s7 + $0x3] ss:$0 sm:$0xff] }
0x1e47   : > { %v5021_v40 = vpop.f32.mrf.mxu2 }
0x1e48   : > { %v5025_v32 = vadd.f32 %v5021_v40, %v8779_v50 }
0x1e4a   : > { %v8995_v33 = vadd.f32 %v6710_v29, %v5025_v32  ;;  %v6713_v29 = vld [vmem:[%s9199_s29 + $0x3] ss:$0 sm:$0xff] }
0x1e4c   : > { %v5231_v6 = vsel %vm1297_vm0, %v8995_v33, 0.0 }
0x1e4d   : > { %5232 = vadd.xlane.f32.xlu2 %v5231_v6 }
0x1e54   : > { %v5119_v59 = vpop.f32.mrf.mxu0 }
0x1e55   : > { %v5120_v58 = vadd.f32 %v6711_v24, %v5119_v59 }
0x1e57   : > { %v5123_v63 = vmul.f32 %v5120_v58, %v5120_v58 }
0x1e59   : > { %v5124_v39 = vmul.f32 %v5123_v63, %v5120_v58 }
0x1e5b   : > { %v5125_v48 = vmul.f32 0.044715, %v5124_v39 }
0x1e5c   : > { %v5121_v10 = vpop.f32.mrf.mxu0 }
0x1e5d   : > { %v5126_v52 = vadd.f32 %v5125_v48, %v5120_v58  ;;  %v6479_v48 = vld [vmem:[#allocation11 + $0xf8] sm:$0xff]  ;;  %v6478_v10 = vld [vmem:[#allocation11 + $0xf0] sm:$0xff] }
0x1e5e   : > { %5385 = vmatpush.bf16.msrb.mxu0 %v6479_v48 }
0x1e5f   : > { %v5127_v42 = vmul.f32 0.7978846, %v5126_v52  ;;  %v6477_v52 = vld [vmem:[#allocation11 + $0xe8] sm:$0xff] }
0x1e61   : > { %6976 = vtanh.f32 %v5127_v42  ;;  %v6476_v42 = vld [vmem:[#allocation11 + $0xe0] sm:$0xff] }
0x1e62   : > { %5386 = vmatpush.bf16.msrb.mxu0 %v6478_v10 }
0x1e66   : > { %5387 = vmatpush.bf16.msrb.mxu0 %v6477_v52 }
0x1e67   : > { %v6977_v50 = vpop.eup %6976 }
0x1e68   : > { %v5129_v11 = vadd.f32 1.0, %v6977_v50  ;;  %v6475_v50 = vld [vmem:[#allocation11 + $0xd8] sm:$0xff] }
0x1e6a   : > { %v5130_v53 = vmul.f32 0.5, %v5129_v11  ;;  %5388 = vmatpush.bf16.msrb.mxu0 %v6476_v42  ;;  %v6474_v11 = vld [vmem:[#allocation11 + $0xd0] sm:$0xff] }
0x1e6c   : > { %v5131_v2 = vmul.f32 %v5130_v53, %v5120_v58  ;;  %v6715_v53 = vld [vmem:[%s9204_s6 + $0x3] ss:$0 sm:$0xff]  ;;  %s1259_s6 = scalar_lea.vmem [#allocation15], %s5742_s3 }
0x1e6d   : > { %s5507_s7 = sshll.u32 %s1259_s6, 4  ;;  %s9037_s7 = int_to_ptr.vmem [resolvable:$true] %s5507_s7 }
0x1e6e   : > { %v5132_v1 = vpack.c.bf16 %v5131_v2, %v5131_v2  ;;  %5389 = vmatpush.bf16.msrb.mxu0 %v6475_v50  ;;  %v6473_v2 = vld [vmem:[#allocation11 + $0xc8] sm:$0xff] }
0x1e70   : > { %5192 = vmatmul.bf16.vlgmr.msrb.gmra.mxu2 %v5132_v1 }
0x1e72   : > { %5390 = vmatpush.bf16.msrb.mxu0 %v6474_v11 }
0x1e76   : > { %5391 = vmatpush.bf16.msrb.mxu0 %v6473_v2 }
0x1eb8   : > { %v5230_v4 = vpop.xlane.xlu2 %5229 }
0x1eb9   : > { %v5234_v38 = vmul.f32 %v5230_v4, %v7824_v12 }
0x1ebb   : > { %v5236_v55 = vsub.f32 %v8990_v9, %v5234_v38  ;;  %v6472_v38 = vld [vmem:[#allocation11 + $0xc0] sm:$0xff] }
0x1ebc   : > { %5392 = vmatpush.bf16.msrb.mxu0 %v6472_v38 }
0x1ebd   : > { %v5238_v5 = vmul.f32 %v5236_v55, %v5236_v55 }
0x1ebf   : > { %v5240_v62 = vsel %vm1297_vm0, %v5238_v5, 0.0 }
0x1ec0   : > { %5241 = vadd.xlane.f32.xlu0 %v5240_v62  ;;  %v5233_v28 = vpop.xlane.xlu2 %5232 }
0x1ec1   : > { %v5235_v37 = vmul.f32 %v5233_v28, %v7824_v12 }
0x1ec3   : > { %v5237_v46 = vsub.f32 %v8995_v33, %v5235_v37  ;;  %v6481_v37 = vld [vmem:[%s9212_s14 + $0x8] sm:$0xff] }
0x1ec4   : > { %5463 = vmatpush.bf16.msra.mxu2 %v6481_v37 }
0x1ec5   : > { %v5239_v30 = vmul.f32 %v5237_v46, %v5237_v46 }
0x1ec7   : > { %v5243_v61 = vsel %vm1297_vm0, %v5239_v30, 0.0 }
0x1ec8   : > { %5244 = vadd.xlane.f32.xlu1 %v5243_v61 }
0x1ef3   : > { %v5193_v25 = vpop.f32.mrf.mxu2 }
0x1ef4   : > { %v5194_v18 = vadd.f32 %v6712_v27, %v5193_v25  ;;  %v6480_v25 = vld [vmem:[%s9212_s14] sm:$0xff]  ;;  %s6362_s14 = sshll.u32 %s7655_s0, 3 }
0x1ef5   : > { %5464 = vmatpush.bf16.msra.mxu2 %v6480_v25 }
0x1ef6   : > { %v5197_v0 = vadd.f32 %v5194_v18, %v8964_v23 }
0x1ef8   : > { %v5401_v13 = vsel %vm1297_vm0, %v5197_v0, 0.0 }
0x1ef9   : > { %5402 = vadd.xlane.f32.xlu2 %v5401_v13 }
0x1efb   : > { %v5195_v49 = vpop.f32.mrf.mxu2 }
0x1f33   : > { %v5242_v60 = vpop.xlane.xlu0 %5241 }
0x1f34   : > { %v5246_v41 = vmul.f32 %v5242_v60, %v7824_v12 }
0x1f36   : > { %v5248_v7 = vadd.f32 1e-06, %v5246_v41 }
0x1f38   : > { %6978 = vrsqrt.f32 %v5248_v7  ;;  %vm5256_vm2 = vweird.f32 %v5248_v7 }
0x1f3b   : > { %v5245_v57 = vpop.xlane.xlu1 %5244 }
0x1f3c   : > { %v5247_v31 = vmul.f32 %v5245_v57, %v7824_v12 }
0x1f3e   : > { %v6979_v14 = vpop.eup %6978  ;;  %v5249_v34 = vadd.f32 1e-06, %v5247_v31 }
0x1f3f   : > { %v5251_v15 = vmul.f32 %v6979_v14, %v5248_v7  ;;  %vm5257_vm1 = vweird.f32 %v6979_v14 }
0x1f40   : > { %6980 = vrsqrt.f32 %v5249_v34  ;;  %vm5258_vm3 = vmor %vm5256_vm2, %vm5257_vm1  ;;  %vm5266_vm5 = vweird.f32 %v5249_v34 }
0x1f41   : > { %v5252_v23 = vmul.f32 %v6979_v14, %v5251_v15 }
0x1f43   : > { %v5253_v8 = vmul.f32 0.5, %v5252_v23 }
0x1f45   : > { %v5254_v21 = vsub.f32 1.5, %v5253_v8 }
0x1f46   : > { %v6981_v56 = vpop.eup %6980 }
0x1f47   : > { %v5255_v19 = vmul.f32 %v6979_v14, %v5254_v21  ;;  %v5261_v26 = vmul.f32 %v6981_v56, %v5249_v34  ;;  %vm5267_vm4 = vweird.f32 %v6981_v56 }
0x1f48   : > { %vm5268_vm6 = vmor %vm5266_vm5, %vm5267_vm4 }
0x1f49   : > { %v5262_v17 = vmul.f32 %v6981_v56, %v5261_v26  ;;  %v5259_v36 = vsel %vm5258_vm3, %v6979_v14, %v5255_v19 }
0x1f4a   : > { %v5270_v16 = vmul.f32 %v5259_v36, %v5236_v55  ;;  %v6716_v36 = vld [vmem:[%s9213_s11] ss:$0 sm:$0xff]  ;;  %s9216_s11 = sld [smem:[#allocation52_spill]] }
0x1f4b   : > { %v5263_v51 = vmul.f32 0.5, %v5262_v17 }
0x1f4c   : > { %v5275_v35 = vmul.f32 %v6713_v29, %v5270_v16 }
0x1f4d   : > { %v5264_v44 = vsub.f32 1.5, %v5263_v51 }
0x1f4e   : > { %v5280_v3 = vadd.f32 %v6714_v54, %v5275_v35 }
0x1f4f   : > { %v5265_v45 = vmul.f32 %v6981_v56, %v5264_v44  ;;  %v6717_v44 = vld [vmem:[%s9214_s15] ss:$0 sm:$0xff]  ;;  %s6482_s15 = sshll.u32 %s7655_s0, 4 }
0x1f50   : > { %s9217_s4 = smov %s9216_s11  ;;  %s5506_s8 = scalar_lea.hbm %s9215_s1, %s6482_s15 }
0x1f51   : > { %v5269_v22 = vsel %vm5268_vm6, %v6981_v56, %v5265_v45  ;;  %s5509_s12 = sshll.u32 %s5506_s8, 4  ;;  %s5491_s3 = scalar_lea.hbm %s9216_s11, %s6362_s14  ;;  %s5510_s12 = int_to_ptr.hbm [resolvable:$true] %s5509_s12 }
0x1f52   : > { %v5271_v40 = vmul.f32 %v5269_v22, %v5237_v46  ;;  %s7287_s15 = sshra.s32 %s5510_s12, 4  ;;  %s7293_s8 = scalar_lea.hbm %s9215_s1, 32  ;;  %s7288_s15 = int_to_ptr.hbm [resolvable:$true] %s7287_s15 }
0x1f53   : > { %s7289_s17 = scalar_lea.hbm %s7288_s15, 16  ;;  %p7294_p1 = scmp.lt.s32.totalorder %s7288_s15, %s9215_s1 }
0x1f54   : > { %v5276_v32 = vmul.f32 %v6713_v29, %v5271_v40  ;;  %p7290_p9 = scmp.ne.s32.totalorder %s7288_s15, %s7289_s17  ;;  %p7295_p2 = scmp.lt.s32.totalorder %s7293_s8, %s7289_s17 }
0x1f56   : > { %v5281_v6 = vadd.f32 %v6714_v54, %v5276_v32  ;;  %v6718_v54 = vld [vmem:[%s9208_s9 + $0x3] ss:$0 sm:$0xff]  ;;  %p7291_p12 = pnand %p7290_p9, %p7672_p5  ;;  %p7296_p3 = por %p7295_p2, %p7294_p1 }
0x1f58   : > { %v5282_v47 = vpack.c.bf16 %v5281_v6, %v5280_v3  ;;  %p7292_p0 = pneg %p7291_p12 }
0x1f5a   : > { %6318 = vmatmul.msk.bf16.vlgmr.msra.gmra.mxu0 %vm1297_vm0, %v5282_v47  ;;  %p7297_p4 = pnand %p7296_p3, %p7292_p0 }
0x1f6c   : > { %v5403_v24 = vpop.xlane.xlu2 %5402 }
0x1f6d   : > { %v5404_v59 = vmul.f32 %v5403_v24, %v7824_v12 }
0x1f6f   : > { %v9015_v58 = vsub.f32 %v5197_v0, %v5404_v59  ;;  %v6719_v59 = vld [vmem:[%s9218_s5] ss:$0 sm:$0xff] }
0x1f71   : > { %v5406_v63 = vmul.f32 %v9015_v58, %v9015_v58 }
0x1f73   : > { %v5407_v39 = vsel %vm1297_vm0, %v5406_v63, 0.0 }
0x1f74   : > { %5408 = vadd.xlane.f32.xlu0 %v5407_v39 }
0x1fd7   : > { %v5310_v1 = vpop.f32.mrf.mxu0 }
0x1fd8   : > { %v5311_v4 = vadd.f32 %v6715_v53, %v5310_v1 }
0x1fda   : > { %v5315_v55 = vmul.f32 %v5311_v4, %v5311_v4 }
0x1fdc   : > { %v5317_v5 = vmul.f32 %v5315_v55, %v5311_v4 }
0x1fde   : > { %v5319_v62 = vmul.f32 0.044715, %v5317_v5 }
0x1fdf   : > { %v5312_v28 = vpop.f32.mrf.mxu0 }
0x1fe0   : > { %v5321_v46 = vadd.f32 %v5319_v62, %v5311_v4  ;;  %v5313_v30 = vadd.f32 %v6715_v53, %v5312_v28 }
0x1fe2   : > { %v5323_v61 = vmul.f32 0.7978846, %v5321_v46  ;;  %v5316_v27 = vmul.f32 %v5313_v30, %v5313_v30 }
0x1fe4   : > { %v5318_v18 = vmul.f32 %v5316_v27, %v5313_v30  ;;  %6982 = vtanh.f32 %v5323_v61 }
0x1fe6   : > { %v5320_v0 = vmul.f32 0.044715, %v5318_v18 }
0x1fe7   : > { %v5409_v13 = vpop.xlane.xlu0 %5408 }
0x1fe8   : > { %v5322_v49 = vadd.f32 %v5320_v0, %v5313_v30  ;;  %v5410_v60 = vmul.f32 %v5409_v13, %v7824_v12 }
0x1fea   : > { %v5324_v20 = vmul.f32 0.7978846, %v5322_v49  ;;  %v5411_v41 = vadd.f32 1e-06, %v5410_v60  ;;  %v6983_v7 = vpop.eup %6982 }
0x1feb   : > { %v5327_v43 = vadd.f32 1.0, %v6983_v7 }
0x1fec   : > { %6984 = vtanh.f32 %v5324_v20  ;;  %vm5418_vm8 = vweird.f32 %v5411_v41 }
0x1fed   : > { %6986 = vrsqrt.f32 %v5411_v41  ;;  %v5329_v14 = vmul.f32 0.5, %v5327_v43 }
0x1fef   : > { %v5331_v21 = vmul.f32 %v5329_v14, %v5311_v4 }
0x1ff2   : > { %v6985_v57 = vpop.eup %6984 }
0x1ff3   : > { %v6987_v31 = vpop.eup %6986  ;;  %v5328_v34 = vadd.f32 1.0, %v6985_v57 }
0x1ff4   : > { %v5413_v15 = vmul.f32 %v6987_v31, %v5411_v41  ;;  %vm5419_vm7 = vweird.f32 %v6987_v31 }
0x1ff5   : > { %v5330_v23 = vmul.f32 0.5, %v5328_v34  ;;  %vm5420_vm9 = vmor %vm5418_vm8, %vm5419_vm7 }
0x1ff6   : > { %v5414_v8 = vmul.f32 %v6987_v31, %v5413_v15 }
0x1ff7   : > { %v5332_v56 = vmul.f32 %v5330_v23, %v5313_v30 }
0x1ff8   : > { %v5415_v19 = vmul.f32 0.5, %v5414_v8 }
0x1ff9   : > { %v5333_v12 = vpack.c.bf16 %v5332_v56, %v5331_v21 }
0x1ffa   : > { %v5416_v26 = vsub.f32 1.5, %v5415_v19 }
0x1ffb   : > { %5393 = vmatmul.bf16.vlgmr.msrb.gmra.mxu0 %v5333_v12 }
0x1ffc   : > { %v5417_v17 = vmul.f32 %v6987_v31, %v5416_v26 }
0x1ffe   : > { %v5421_v51 = vsel %vm5420_vm9, %v6987_v31, %v5417_v17 }
0x1fff   : > { %v5422_v29 = vmul.f32 %v5421_v51, %v9015_v58 }
0x2001   : > { %v5427_v16 = vmul.f32 %v6716_v36, %v5422_v29 }
0x2003   : > { %v5432_v45 = vadd.f32 %v6717_v44, %v5427_v16 }
0x2005   : > { %v5433_v22 = vpack.c.bf16 %v5432_v45, %v5432_v45 }
0x2007   : > { %6359 = vmatmul.msk.bf16.vlgmr.msra.gmra.mxu2 %vm1297_vm0, %v5433_v22 }
0x2078   : > { %v5394_v35 = vpop.f32.mrf.mxu0 }
0x2079   : > { %v5395_v40 = vadd.f32 %v6718_v54, %v5394_v35 }
0x207b   : > { %v5399_v32 = vadd.f32 %v5395_v40, %v8990_v9 }
0x207d   : > { %v5471_v3 = vsel %vm1297_vm0, %v5399_v32, 0.0 }
0x207e   : > { %5473 = vst [vmem:[%s1259_s6] sm:$0xff] %v5471_v3 }
0x2080   : > { %v5396_v6 = vpop.f32.mrf.mxu0 }
0x2081   : > { %v5397_v47 = vadd.f32 %v6718_v54, %v5396_v6 }
0x2083   : > { %v5400_v9 = vadd.f32 %v5397_v47, %v8995_v33 }
0x2085   : > { %v5472_v24 = vsel %vm1297_vm0, %v5400_v9, 0.0 }
0x2086   : > { %5474 = vst [vmem:[%s1259_s6 + $0x8] sm:$0xff] %v5472_v24 }
0x2087   : > { %7300 = shalt.err (!%p7297_p4)
}
0x2088   : > { %s7437_s0 = smov 128   ;;  %s7438_s5 = smov 8  }
0x2089   : > { %6512 = dma.vmem_to_hbm [thread:$0]  (%p7672_p5), %s9037_s7, 256, %s5510_s12, %s5481_s16, %s7437_s0, %s7437_s0, %s7438_s5  }
0x208a   : > { %s1252_s6 = scalar_lea.vmem [#allocation14], %s5741_s13  ;;  %s5495_s11 = sshll.u32 %s5491_s3, 4  ;;  %v5466_v33 = vpop.f32.mrf.mxu2  ;;  %s5496_s11 = int_to_ptr.hbm [resolvable:$true] %s5495_s11 }
0x208b   : > { %s5493_s14 = sshll.u32 %s1252_s6, 4  ;;  %v5467_v58 = vadd.f32 %v6719_v59, %v5466_v33  ;;  %s5476_s17 = scalar_lea.sflag [#allocation4], %s9029_s2  ;;  %s5494_s14 = int_to_ptr.vmem [resolvable:$true] %s5493_s14 }
0x208c   : > { %s7315_s15 = sshra.s32 %s5496_s11, 4  ;;  %s7321_s1 = scalar_lea.hbm %s9217_s4, 16  ;;  %s7316_s15 = int_to_ptr.hbm [resolvable:$true] %s7315_s15 }
0x208d   : > { %5470 = vst [vmem:[%s1252_s6] sm:$0xff] %v5467_v58  ;;  %s7317_s8 = scalar_lea.hbm %s7316_s15, 8  ;;  %p7322_p13 = scmp.lt.s32.totalorder %s7316_s15, %s9217_s4 }
0x208e   : > { %p7318_p7 = scmp.ne.s32.totalorder %s7316_s15, %s7317_s8  ;;  %p7323_p10 = scmp.lt.s32.totalorder %s7321_s1, %s7317_s8 }
0x2090   : > { %p7319_p8 = pnand %p7318_p7, %p7672_p5  ;;  %p7324_p9 = por %p7323_p10, %p7322_p13 }
0x2092   : > { %p7320_p11 = pneg %p7319_p8 }
0x2094   : > { %p7325_p12 = pnand %p7324_p9, %p7320_p11 }
0x2096   : > { %7328 = shalt.err (!%p7325_p12)
}
0x2097   : > { %6511 = dma.vmem_to_hbm [thread:$0]  (%p7672_p5), %s5494_s14, 128, %s5496_s11, %s5476_s17   ;;  %v5468_v63 = vpop.f32.mrf.mxu2 }
0x2098 PF: > { %s9220_s13 = sld [smem:[#allocation56_spill]] }
0x2099   : > { %s9221_s16 = sld [smem:[#allocation54_spill]] }
0x209e   : > { %p6558_p0 = scmp.ge.s32.totalorder %s9220_s13, 2 }
0x209f   : > { %s5524_s7 = sand.u32 1, %s9221_s16  }
0x20a0   : > { %p6538_p1 = pnand %p6558_p0, %p7676_p6  ;;  %s5525_s2 = scalar_lea.sflag [#allocation4], %s5524_s7 }
0x20a2   : > { %p6539_p2 = pneg %p6538_p1 }
0x20a4   : > { %7362 = dma.done.wait (%p6539_p2), %s5525_s2, 128  }
0x20a5   : > { %7364 = vsyncadd (%p6539_p2), %s5525_s2, 4294967168  ;;  %s5535_s1 = scalar_lea.sflag [#allocation16], %s5524_s7 }
0x20a6   : > { %7366 = dma.done.wait (%p6539_p2), %s5535_s1, 256  }
0x20a7   : > { %7368 = vsyncadd (%p6539_p2), %s5535_s1, 4294967040  ;;  %s9223_s15 = sld [smem:[#allocation57_spill]] }
0x20a8   : > { %s9224_s9 = sld [smem:[#allocation55_spill]] }
0x20a9   : > { %s9225_s11 = sld [smem:[#allocation58_spill]] }
0x20aa   : > { %9226 = sst [smem:[#allocation54_spill]] %s7375_s10 }
0x20ad   : > { %p93_p5 = scmp.ge.s32.totalorder %s9223_s15, 4  }
0x20ae   : > { %s9227_s10 = smov %s9224_s9 }
0x20af   :  { %95 = sbr.rel (!%p93_p5) target bundleno = 87 (0x57), region = 363 }
0x20b4   :  { %5541 = vsyncpa [#allocation3], 1 }
0x20b5   :  { %5543 = vsyncpa [#allocation3 + $0x1], 1 }
0x20b6   :  { %5544 = vsyncpa [#allocation6], 1 }
0x20b7   :  { %5545 = vsyncpa [#allocation9], 1 }
0x20b8   :  { %5546 = vsyncpa [#allocation12], 1 }
0x20b9   :  { %5547 = vsyncpa [#allocation4], 1 }
0x20ba   :  { %5549 = vsyncpa [#allocation4 + $0x1], 1 }
0x20bb   :  { %5550 = vsyncpa [#allocation16], 1 }
0x20bc   :  { %5552 = vsyncpa [#allocation16 + $0x1], 1 }

</bundles_post_ra>
